<compile_context>
chip_gen: v7x
topology: tpu7x:2x2x1
jax: 0.10.0
libtpu: 0.0.40
codegen_flags: <defaults>
</compile_context>

<pallas_src>
import functools

import jax
import jax.numpy as jnp
from jax.experimental import pallas as pl
from jax.experimental.pallas import tpu as pltpu


def _round_up(x, m):
    return (x + m - 1) // m * m


_VMEM_LIMIT = 48 * 1024 * 1024     # scoped-VMEM cap (valid on v5e/v6e/v7x)
_VMEM_BUDGET = 32 * 1024 * 1024    # working-set target used for tile sizing


# ---------------------------------------------------------------------------
# Pallas kernels (1-D grid over M; weight, bias and full K resident in VMEM)
# ---------------------------------------------------------------------------
def _mm_act_kernel(a_ref, w_ref, b_ref, o_ref, *, act):
    """GEMM against a resident (K, Cout_pad) weight; bias + activation fused."""
    y = jnp.dot(a_ref[...], w_ref[...],
                preferred_element_type=jnp.float32) + b_ref[...]
    if act == "leaky":
        y = jnp.where(y > 0, y, 0.2 * y)
    elif act == "sigmoid":
        y = jax.nn.sigmoid(y)          # f32 epilogue (safe on v5e as well)
    o_ref[...] = y.astype(o_ref.dtype)


def _mm_stats_kernel(a_ref, w_ref, b_ref, o_ref, stats_ref):
    """GEMM + bias; also emits per-tile pre-bias sum / sum-of-squares.

    Stats are taken on the pre-bias product so zero (M-padding) rows of A
    contribute exactly zero -> no row masking / program_id needed.  The host
    shifts the mean by the bias afterwards (variance is shift-invariant).
    """
    z = jnp.dot(a_ref[...], w_ref[...], preferred_element_type=jnp.float32)
    o_ref[...] = (z + b_ref[...]).astype(o_ref.dtype)
    s = jnp.sum(z, axis=0, keepdims=True)
    sq = jnp.sum(z * z, axis=0, keepdims=True)
    stats_ref[...] = jnp.concatenate([s, sq], axis=0)[None]


# ---------------------------------------------------------------------------
# Tiling
# ---------------------------------------------------------------------------
def _choose_tile_m(M, K, cout_pad):
    """Largest M tile that fits the VMEM budget; >= 2 m-tiles when M allows."""
    # resident weight + bias (double-buffered by the pipeline)
    fixed = 2 * K * cout_pad * 2 + 2 * cout_pad * 4
    tile_m = 1024
    while tile_m > 128:
        need = fixed + 2 * tile_m * K * 2 + 2 * tile_m * cout_pad * 4
        if need <= _VMEM_BUDGET:
            break
        tile_m //= 2
    # keep at least two m tiles so both v7x TensorCores get work
    while tile_m > 128 and M > 128 and M <= tile_m:
        tile_m //= 2
    if M <= tile_m:
        tile_m = max(_round_up(M, 16), 16)   # bf16-native sublane multiple
    return tile_m, _round_up(M, tile_m)


# ---------------------------------------------------------------------------
# One conv block: Conv2d(k=4, pad=1, stride) [+ activation] [+ BN batch stats]
# ---------------------------------------------------------------------------
def conv_block(x, Wm, b_row, *, stride, cin, cout, act="none",
               emit_stats=False, out_dtype=jnp.bfloat16):
    # x: (N, H, W, cin) NHWC; Wm: (K, cout_pad) bf16; b_row: (1, cout_pad) f32
    N, H, Wd, _ = x.shape
    KH = KW = 4
    cin_pad = _round_up(cin, 8)
    cout_pad = Wm.shape[1]
    OH = (H + 2 - KH) // stride + 1
    OW = (Wd + 2 - KW) // stride + 1

    # --- im2col glue (plain JAX, fused by XLA); feature order (ki, kj, cin)
    #     matches Wm's row order ---
    x = x.astype(jnp.bfloat16)
    x_pad = jnp.pad(x, ((0, 0), (1, 1), (1, 1), (0, cin_pad - cin)))
    cols = []
    for ki in range(KH):
        for kj in range(KW):
            cols.append(
                x_pad[:, ki:ki + stride * (OH - 1) + 1:stride,
                      kj:kj + stride * (OW - 1) + 1:stride, :])
    M = N * OH * OW
    K = KH * KW * cin_pad
    A = jnp.stack(cols, axis=3).reshape(M, K)

    tile_m, M_pad = _choose_tile_m(M, K, cout_pad)
    if M_pad != M:
        A = jnp.pad(A, ((0, M_pad - M), (0, 0)))
    m_tiles = M_pad // tile_m

    a_spec = pl.BlockSpec((tile_m, K), lambda i: (i, 0))
    w_spec = pl.BlockSpec((K, cout_pad), lambda i: (0, 0))       # resident
    b_spec = pl.BlockSpec((1, cout_pad), lambda i: (0, 0))       # resident
    y_spec = pl.BlockSpec((tile_m, cout_pad), lambda i: (i, 0))

    params = pltpu.CompilerParams(
        dimension_semantics=("parallel",),
        vmem_limit_bytes=_VMEM_LIMIT,
    )

    if not emit_stats:
        y = pl.pallas_call(
            functools.partial(_mm_act_kernel, act=act),
            out_shape=jax.ShapeDtypeStruct((M_pad, cout_pad), out_dtype),
            grid=(m_tiles,),
            in_specs=[a_spec, w_spec, b_spec],
            out_specs=y_spec,
            compiler_params=params,
        )(A, Wm, b_row)
        return y[:M, :cout].reshape(N, OH, OW, cout)

    y, stats = pl.pallas_call(
        _mm_stats_kernel,
        out_shape=(
            jax.ShapeDtypeStruct((M_pad, cout_pad), jnp.bfloat16),
            jax.ShapeDtypeStruct((m_tiles, 2, cout_pad), jnp.float32),
        ),
        grid=(m_tiles,),
        in_specs=[a_spec, w_spec, b_spec],
        out_specs=(
            y_spec,
            pl.BlockSpec((1, 2, cout_pad), lambda i: (i, 0, 0)),
        ),
        compiler_params=params,
    )(A, Wm, b_row)

    # training-mode BatchNorm batch statistics (biased, eps applied later)
    ssum = jnp.sum(stats[:, 0, :cout], axis=0)        # sum of pre-bias output
    ssq = jnp.sum(stats[:, 1, :cout], axis=0)
    mean_z = ssum / M
    var = jnp.maximum(ssq / M - mean_z * mean_z, 0.0)
    mean_y = mean_z + b_row[0, :cout]                 # shift by the conv bias
    return y[:M, :cout].reshape(N, OH, OW, cout), (mean_y, var)


def _bn_lrelu(y, mean, var, gamma, beta):
    """Folded BatchNorm affine + LeakyReLU(0.2), fused by XLA into the next
    layer's im2col gather (no extra Pallas/HBM pass)."""
    inv = gamma * jax.lax.rsqrt(var + 1e-5)
    t = y.astype(jnp.float32) * inv + (beta - mean * inv)
    return jnp.where(t > 0, t, 0.2 * t).astype(jnp.bfloat16)


# ---------------------------------------------------------------------------
# Parameters (same shapes/semantics as the PyTorch module __init__)
# ---------------------------------------------------------------------------
_LAYERS = [(6, 64), (64, 128), (128, 256), (256, 512), (512, 1)]


def init_params(key):
    params = {}
    for i, (cin, cout) in enumerate(_LAYERS):
        key, kw, kb = jax.random.split(key, 3)
        params[f"w{i}"] = 0.02 * jax.random.normal(kw, (4, 4, cin, cout), jnp.float32)
        params[f"b{i}"] = 0.02 * jax.random.normal(kb, (cout,), jnp.float32)
        if i in (1, 2, 3):  # layers with BatchNorm2d (default gamma=1, beta=0)
            params[f"gamma{i}"] = jnp.ones((cout,), jnp.float32)
            params[f"beta{i}"] = jnp.zeros((cout,), jnp.float32)
    return params


def prepare_params(params):
    """One-time pad / reshape / cast of weights into GEMM-ready form."""
    prepared = {}
    for i, (cin, cout) in enumerate(_LAYERS):
        cin_pad = _round_up(cin, 8)
        cout_pad = _round_up(cout, 128)
        W = jnp.pad(params[f"w{i}"],
                    ((0, 0), (0, 0), (0, cin_pad - cin), (0, cout_pad - cout)))
        prepared[f"w{i}"] = W.reshape(4 * 4 * cin_pad, cout_pad).astype(jnp.bfloat16)
        prepared[f"b{i}"] = jnp.pad(params[f"b{i}"], (0, cout_pad - cout)
                                    ).reshape(1, cout_pad).astype(jnp.float32)
        if f"gamma{i}" in params:
            prepared[f"gamma{i}"] = params[f"gamma{i}"].astype(jnp.float32)
            prepared[f"beta{i}"] = params[f"beta{i}"].astype(jnp.float32)
    return prepared


# ---------------------------------------------------------------------------
# Forward pass (matches Discriminator.forward)
# ---------------------------------------------------------------------------
def discriminator_forward(p, pred, real):
    # pred, real: (N, 3, H, W) NCHW, as in PyTorch
    x = jnp.concatenate([pred, real], axis=1)                 # (N, 6, H, W)
    x = jnp.transpose(x, (0, 2, 3, 1)).astype(jnp.float32)    # NHWC

    x = conv_block(x, p["w0"], p["b0"], stride=2, cin=6, cout=64, act="leaky")

    y, (m1, v1) = conv_block(x, p["w1"], p["b1"], stride=2, cin=64, cout=128,
                             emit_stats=True)
    x = _bn_lrelu(y, m1, v1, p["gamma1"], p["beta1"])

    y, (m2, v2) = conv_block(x, p["w2"], p["b2"], stride=2, cin=128, cout=256,
                             emit_stats=True)
    x = _bn_lrelu(y, m2, v2, p["gamma2"], p["beta2"])

    y, (m3, v3) = conv_block(x, p["w3"], p["b3"], stride=2, cin=256, cout=512,
                             emit_stats=True)
    x = _bn_lrelu(y, m3, v3, p["gamma3"], p["beta3"])

    x = conv_block(x, p["w4"], p["b4"], stride=1, cin=512, cout=1,
                   act="sigmoid", out_dtype=jnp.float32)

    return jnp.transpose(x, (0, 3, 1, 2))                     # back to NCHW


if __name__ == "__main__":
    key = jax.random.PRNGKey(0)
    kp, kr, kw = jax.random.split(key, 3)

    # Small but valid spatial size: 32 -> 16 -> 8 -> 4 -> 2 -> 1
    pred = jax.random.normal(kp, (2, 3, 32, 32), jnp.float32)
    real = jax.random.normal(kr, (2, 3, 32, 32), jnp.float32)
    params = init_params(kw)
    prepared = prepare_params(params)   # one-time weight prep, outside jit

    fwd = jax.jit(discriminator_forward)
    out = fwd(prepared, pred, real)
    out = jax.block_until_ready(out)

    assert out.shape == (2, 1, 1, 1), out.shape
    assert bool(jnp.all(jnp.isfinite(out)))
    assert bool(jnp.all((out >= 0.0) & (out <= 1.0)))  # sigmoid range
    print("KERNEL_OK")
</pallas_src>

<mosaic_0001>
module attributes {stable_mosaic.version = 11 : i64} {
  func.func @_mm_act_kernel(%arg0: i32, %arg1: memref<256x128xbf16, #tpu.memory_space<vmem>>, %arg2: memref<128x128xbf16, #tpu.memory_space<vmem>>, %arg3: memref<1x128xf32, #tpu.memory_space<vmem>>, %arg4: memref<256x128xbf16, #tpu.memory_space<vmem>>) attributes {dimension_semantics = [#tpu.dimension_semantics<parallel>], iteration_bounds = array<i64: 2>, scalar_prefetch = 0 : i64, scratch_operands = 0 : i64, tpu.core_type = #tpu.core_type<tc>, window_params = [{transform_indices = @transform_0, window_bounds = array<i64: 256, 128>}, {pipeline_mode = #tpu.pipeline_mode<synchronous>, transform_indices = @transform_1, window_bounds = array<i64: 128, 128>}, {pipeline_mode = #tpu.pipeline_mode<synchronous>, transform_indices = @transform_2, window_bounds = array<i64: 1, 128>}, {transform_indices = @transform_3, window_bounds = array<i64: 256, 128>}]} {
    %c0 = arith.constant 0 : index
    %c0_0 = arith.constant 0 : index
    %0 = vector.load %arg1[%c0, %c0_0] : memref<256x128xbf16, #tpu.memory_space<vmem>>, vector<256x128xbf16>
    %c0_1 = arith.constant 0 : index
    %c0_2 = arith.constant 0 : index
    %1 = vector.load %arg2[%c0_1, %c0_2] : memref<128x128xbf16, #tpu.memory_space<vmem>>, vector<128x128xbf16>
    %cst = arith.constant dense<0.000000e+00> : vector<256x128xf32>
    %2 = tpu.matmul %0, %1, %cst {dimension_numbers = #tpu.dot_dimension_numbers<[1], [0], [0], [1], [0, 0, 1, 1], [], []>} : vector<256x128xbf16>, vector<128x128xbf16>, vector<256x128xf32> -> vector<256x128xf32>
    %c0_3 = arith.constant 0 : index
    %c0_4 = arith.constant 0 : index
    %3 = vector.load %arg3[%c0_3, %c0_4] : memref<1x128xf32, #tpu.memory_space<vmem>>, vector<1x128xf32>
    %4 = vector.broadcast %3 : vector<1x128xf32> to vector<256x128xf32>
    %5 = arith.addf %2, %4 : vector<256x128xf32>
    %cst_5 = arith.constant 0.000000e+00 : f32
    %6 = vector.broadcast %cst_5 : f32 to vector<256x128xf32>
    %7 = arith.cmpf ogt, %5, %6 : vector<256x128xf32>
    %cst_6 = arith.constant 2.000000e-01 : f32
    %8 = vector.broadcast %cst_6 : f32 to vector<256x128xf32>
    %9 = arith.mulf %8, %5 : vector<256x128xf32>
    %10 = arith.select %7, %5, %9 : vector<256x128xi1>, vector<256x128xf32>
    %11 = arith.truncf %10 : vector<256x128xf32> to vector<256x128xbf16>
    %c0_7 = arith.constant 0 : index
    %c0_8 = arith.constant 0 : index
    %12 = vector.load %arg4[%c0_7, %c0_8] : memref<256x128xbf16, #tpu.memory_space<vmem>>, vector<256x128xbf16>
    tpu.vector_store %arg4[%c0_7, %c0_8], %11 {strides = array<i32>} : memref<256x128xbf16, #tpu.memory_space<vmem>>, vector<256x128xbf16>,
    return
  }
  func.func @transform_0(%arg0: i32) -> (i32, i32) {
    %c0_i32 = arith.constant 0 : i32
    %c0_i32_0 = arith.constant 0 : i32
    return %arg0, %c0_i32 : i32, i32
  }
  func.func @transform_1(%arg0: i32) -> (i32, i32) {
    %c0_i32 = arith.constant 0 : i32
    %c0_i32_0 = arith.constant 0 : i32
    %c0_i32_1 = arith.constant 0 : i32
    return %c0_i32, %c0_i32_0 : i32, i32
  }
  func.func @transform_2(%arg0: i32) -> (i32, i32) {
    %c0_i32 = arith.constant 0 : i32
    %c0_i32_0 = arith.constant 0 : i32
    %c0_i32_1 = arith.constant 0 : i32
    return %c0_i32, %c0_i32_0 : i32, i32
  }
  func.func @transform_3(%arg0: i32) -> (i32, i32) {
    %c0_i32 = arith.constant 0 : i32
    %c0_i32_0 = arith.constant 0 : i32
    return %arg0, %c0_i32 : i32, i32
  }
}

module attributes {stable_mosaic.version = 11 : i64} {
  func.func @_mm_stats_kernel(%arg0: i32, %arg1: memref<128x1024xbf16, #tpu.memory_space<vmem>>, %arg2: memref<1024x128xbf16, #tpu.memory_space<vmem>>, %arg3: memref<1x128xf32, #tpu.memory_space<vmem>>, %arg4: memref<128x128xbf16, #tpu.memory_space<vmem>>, %arg5: memref<1x2x128xf32, #tpu.memory_space<vmem>>) attributes {dimension_semantics = [#tpu.dimension_semantics<parallel>], iteration_bounds = array<i64: 1>, scalar_prefetch = 0 : i64, scratch_operands = 0 : i64, tpu.core_type = #tpu.core_type<tc>, window_params = [{transform_indices = @transform_0, window_bounds = array<i64: 128, 1024>}, {pipeline_mode = #tpu.pipeline_mode<synchronous>, transform_indices = @transform_1, window_bounds = array<i64: 1024, 128>}, {pipeline_mode = #tpu.pipeline_mode<synchronous>, transform_indices = @transform_2, window_bounds = array<i64: 1, 128>}, {transform_indices = @transform_3, window_bounds = array<i64: 128, 128>}, {transform_indices = @transform_4, window_bounds = array<i64: 1, 2, 128>}]} {
    %c0 = arith.constant 0 : index
    %c0_0 = arith.constant 0 : index
    %0 = vector.load %arg1[%c0, %c0_0] : memref<128x1024xbf16, #tpu.memory_space<vmem>>, vector<128x1024xbf16>
    %c0_1 = arith.constant 0 : index
    %c0_2 = arith.constant 0 : index
    %1 = vector.load %arg2[%c0_1, %c0_2] : memref<1024x128xbf16, #tpu.memory_space<vmem>>, vector<1024x128xbf16>
    %cst = arith.constant dense<0.000000e+00> : vector<128x128xf32>
    %2 = tpu.matmul %0, %1, %cst {dimension_numbers = #tpu.dot_dimension_numbers<[1], [0], [0], [1], [0, 0, 1, 1], [], []>} : vector<128x1024xbf16>, vector<1024x128xbf16>, vector<128x128xf32> -> vector<128x128xf32>
    %c0_3 = arith.constant 0 : index
    %c0_4 = arith.constant 0 : index
    %3 = vector.load %arg3[%c0_3, %c0_4] : memref<1x128xf32, #tpu.memory_space<vmem>>, vector<1x128xf32>
    %4 = vector.broadcast %3 : vector<1x128xf32> to vector<128x128xf32>
    %5 = arith.addf %2, %4 : vector<128x128xf32>
    %6 = arith.truncf %5 : vector<128x128xf32> to vector<128x128xbf16>
    %c0_5 = arith.constant 0 : index
    %c0_6 = arith.constant 0 : index
    %7 = vector.load %arg4[%c0_5, %c0_6] : memref<128x128xbf16, #tpu.memory_space<vmem>>, vector<128x128xbf16>
    tpu.vector_store %arg4[%c0_5, %c0_6], %6 {strides = array<i32>} : memref<128x128xbf16, #tpu.memory_space<vmem>>, vector<128x128xbf16>,
    %cst_7 = arith.constant dense<0.000000e+00> : vector<128xf32>
    %8 = vector.multi_reduction <add>, %2, %cst_7 [0] : vector<128x128xf32> to vector<128xf32>
    %9 = vector.shape_cast %8 : vector<128xf32> to vector<1x128xf32>
    %10 = arith.mulf %2, %2 : vector<128x128xf32>
    %cst_8 = arith.constant dense<0.000000e+00> : vector<128xf32>
    %11 = vector.multi_reduction <add>, %10, %cst_8 [0] : vector<128x128xf32> to vector<128xf32>
    %12 = vector.shape_cast %11 : vector<128xf32> to vector<1x128xf32>
    %13 = tpu.concatenate %9, %12 in 0 : vector<1x128xf32>, vector<1x128xf32> -> vector<2x128xf32>
    %14 = vector.shape_cast %13 : vector<2x128xf32> to vector<1x2x128xf32>
    %c0_9 = arith.constant 0 : index
    %c0_10 = arith.constant 0 : index
    %c0_11 = arith.constant 0 : index
    %15 = vector.load %arg5[%c0_9, %c0_10, %c0_11] : memref<1x2x128xf32, #tpu.memory_space<vmem>>, vector<1x2x128xf32>
    tpu.vector_store %arg5[%c0_9, %c0_10, %c0_11], %14 {strides = array<i32>} : memref<1x2x128xf32, #tpu.memory_space<vmem>>, vector<1x2x128xf32>,
    return
  }
  func.func @transform_0(%arg0: i32) -> (i32, i32) {
    %c0_i32 = arith.constant 0 : i32
    %c0_i32_0 = arith.constant 0 : i32
    return %arg0, %c0_i32 : i32, i32
  }
  func.func @transform_1(%arg0: i32) -> (i32, i32) {
    %c0_i32 = arith.constant 0 : i32
    %c0_i32_0 = arith.constant 0 : i32
    %c0_i32_1 = arith.constant 0 : i32
    return %c0_i32, %c0_i32_0 : i32, i32
  }
  func.func @transform_2(%arg0: i32) -> (i32, i32) {
    %c0_i32 = arith.constant 0 : i32
    %c0_i32_0 = arith.constant 0 : i32
    %c0_i32_1 = arith.constant 0 : i32
    return %c0_i32, %c0_i32_0 : i32, i32
  }
  func.func @transform_3(%arg0: i32) -> (i32, i32) {
    %c0_i32 = arith.constant 0 : i32
    %c0_i32_0 = arith.constant 0 : i32
    return %arg0, %c0_i32 : i32, i32
  }
  func.func @transform_4(%arg0: i32) -> (i32, i32, i32) {
    %c0_i32 = arith.constant 0 : i32
    %c0_i32_0 = arith.constant 0 : i32
    %c0_i32_1 = arith.constant 0 : i32
    return %arg0, %c0_i32, %c0_i32_0 : i32, i32, i32
  }
}

module attributes {stable_mosaic.version = 11 : i64} {
  func.func @_mm_stats_kernel(%arg0: i32, %arg1: memref<32x2048xbf16, #tpu.memory_space<vmem>>, %arg2: memref<2048x256xbf16, #tpu.memory_space<vmem>>, %arg3: memref<1x256xf32, #tpu.memory_space<vmem>>, %arg4: memref<32x256xbf16, #tpu.memory_space<vmem>>, %arg5: memref<1x2x256xf32, #tpu.memory_space<vmem>>) attributes {dimension_semantics = [#tpu.dimension_semantics<parallel>], iteration_bounds = array<i64: 1>, scalar_prefetch = 0 : i64, scratch_operands = 0 : i64, tpu.core_type = #tpu.core_type<tc>, window_params = [{transform_indices = @transform_0, window_bounds = array<i64: 32, 2048>}, {pipeline_mode = #tpu.pipeline_mode<synchronous>, transform_indices = @transform_1, window_bounds = array<i64: 2048, 256>}, {pipeline_mode = #tpu.pipeline_mode<synchronous>, transform_indices = @transform_2, window_bounds = array<i64: 1, 256>}, {transform_indices = @transform_3, window_bounds = array<i64: 32, 256>}, {transform_indices = @transform_4, window_bounds = array<i64: 1, 2, 256>}]} {
    %c0 = arith.constant 0 : index
    %c0_0 = arith.constant 0 : index
    %0 = vector.load %arg1[%c0, %c0_0] : memref<32x2048xbf16, #tpu.memory_space<vmem>>, vector<32x2048xbf16>
    %c0_1 = arith.constant 0 : index
    %c0_2 = arith.constant 0 : index
    %1 = vector.load %arg2[%c0_1, %c0_2] : memref<2048x256xbf16, #tpu.memory_space<vmem>>, vector<2048x256xbf16>
    %cst = arith.constant dense<0.000000e+00> : vector<32x256xf32>
    %2 = tpu.matmul %0, %1, %cst {dimension_numbers = #tpu.dot_dimension_numbers<[1], [0], [0], [1], [0, 0, 1, 1], [], []>} : vector<32x2048xbf16>, vector<2048x256xbf16>, vector<32x256xf32> -> vector<32x256xf32>
    %c0_3 = arith.constant 0 : index
    %c0_4 = arith.constant 0 : index
    %3 = vector.load %arg3[%c0_3, %c0_4] : memref<1x256xf32, #tpu.memory_space<vmem>>, vector<1x256xf32>
    %4 = vector.broadcast %3 : vector<1x256xf32> to vector<32x256xf32>
    %5 = arith.addf %2, %4 : vector<32x256xf32>
    %6 = arith.truncf %5 : vector<32x256xf32> to vector<32x256xbf16>
    %c0_5 = arith.constant 0 : index
    %c0_6 = arith.constant 0 : index
    %7 = vector.load %arg4[%c0_5, %c0_6] : memref<32x256xbf16, #tpu.memory_space<vmem>>, vector<32x256xbf16>
    tpu.vector_store %arg4[%c0_5, %c0_6], %6 {strides = array<i32>} : memref<32x256xbf16, #tpu.memory_space<vmem>>, vector<32x256xbf16>,
    %cst_7 = arith.constant dense<0.000000e+00> : vector<256xf32>
    %8 = vector.multi_reduction <add>, %2, %cst_7 [0] : vector<32x256xf32> to vector<256xf32>
    %9 = vector.shape_cast %8 : vector<256xf32> to vector<1x256xf32>
    %10 = arith.mulf %2, %2 : vector<32x256xf32>
    %cst_8 = arith.constant dense<0.000000e+00> : vector<256xf32>
    %11 = vector.multi_reduction <add>, %10, %cst_8 [0] : vector<32x256xf32> to vector<256xf32>
    %12 = vector.shape_cast %11 : vector<256xf32> to vector<1x256xf32>
    %13 = tpu.concatenate %9, %12 in 0 : vector<1x256xf32>, vector<1x256xf32> -> vector<2x256xf32>
    %14 = vector.shape_cast %13 : vector<2x256xf32> to vector<1x2x256xf32>
    %c0_9 = arith.constant 0 : index
    %c0_10 = arith.constant 0 : index
    %c0_11 = arith.constant 0 : index
    %15 = vector.load %arg5[%c0_9, %c0_10, %c0_11] : memref<1x2x256xf32, #tpu.memory_space<vmem>>, vector<1x2x256xf32>
    tpu.vector_store %arg5[%c0_9, %c0_10, %c0_11], %14 {strides = array<i32>} : memref<1x2x256xf32, #tpu.memory_space<vmem>>, vector<1x2x256xf32>,
    return
  }
  func.func @transform_0(%arg0: i32) -> (i32, i32) {
    %c0_i32 = arith.constant 0 : i32
    %c0_i32_0 = arith.constant 0 : i32
    return %arg0, %c0_i32 : i32, i32
  }
  func.func @transform_1(%arg0: i32) -> (i32, i32) {
    %c0_i32 = arith.constant 0 : i32
    %c0_i32_0 = arith.constant 0 : i32
    %c0_i32_1 = arith.constant 0 : i32
    return %c0_i32, %c0_i32_0 : i32, i32
  }
  func.func @transform_2(%arg0: i32) -> (i32, i32) {
    %c0_i32 = arith.constant 0 : i32
    %c0_i32_0 = arith.constant 0 : i32
    %c0_i32_1 = arith.constant 0 : i32
    return %c0_i32, %c0_i32_0 : i32, i32
  }
  func.func @transform_3(%arg0: i32) -> (i32, i32) {
    %c0_i32 = arith.constant 0 : i32
    %c0_i32_0 = arith.constant 0 : i32
    return %arg0, %c0_i32 : i32, i32
  }
  func.func @transform_4(%arg0: i32) -> (i32, i32, i32) {
    %c0_i32 = arith.constant 0 : i32
    %c0_i32_0 = arith.constant 0 : i32
    %c0_i32_1 = arith.constant 0 : i32
    return %arg0, %c0_i32, %c0_i32_0 : i32, i32, i32
  }
}

module attributes {stable_mosaic.version = 11 : i64} {
  func.func @_mm_stats_kernel(%arg0: i32, %arg1: memref<16x4096xbf16, #tpu.memory_space<vmem>>, %arg2: memref<4096x512xbf16, #tpu.memory_space<vmem>>, %arg3: memref<1x512xf32, #tpu.memory_space<vmem>>, %arg4: memref<16x512xbf16, #tpu.memory_space<vmem>>, %arg5: memref<1x2x512xf32, #tpu.memory_space<vmem>>) attributes {dimension_semantics = [#tpu.dimension_semantics<parallel>], iteration_bounds = array<i64: 1>, scalar_prefetch = 0 : i64, scratch_operands = 0 : i64, tpu.core_type = #tpu.core_type<tc>, window_params = [{transform_indices = @transform_0, window_bounds = array<i64: 16, 4096>}, {pipeline_mode = #tpu.pipeline_mode<synchronous>, transform_indices = @transform_1, window_bounds = array<i64: 4096, 512>}, {pipeline_mode = #tpu.pipeline_mode<synchronous>, transform_indices = @transform_2, window_bounds = array<i64: 1, 512>}, {transform_indices = @transform_3, window_bounds = array<i64: 16, 512>}, {transform_indices = @transform_4, window_bounds = array<i64: 1, 2, 512>}]} {
    %c0 = arith.constant 0 : index
    %c0_0 = arith.constant 0 : index
    %0 = vector.load %arg1[%c0, %c0_0] : memref<16x4096xbf16, #tpu.memory_space<vmem>>, vector<16x4096xbf16>
    %c0_1 = arith.constant 0 : index
    %c0_2 = arith.constant 0 : index
    %1 = vector.load %arg2[%c0_1, %c0_2] : memref<4096x512xbf16, #tpu.memory_space<vmem>>, vector<4096x512xbf16>
    %cst = arith.constant dense<0.000000e+00> : vector<16x512xf32>
    %2 = tpu.matmul %0, %1, %cst {dimension_numbers = #tpu.dot_dimension_numbers<[1], [0], [0], [1], [0, 0, 1, 1], [], []>} : vector<16x4096xbf16>, vector<4096x512xbf16>, vector<16x512xf32> -> vector<16x512xf32>
    %c0_3 = arith.constant 0 : index
    %c0_4 = arith.constant 0 : index
    %3 = vector.load %arg3[%c0_3, %c0_4] : memref<1x512xf32, #tpu.memory_space<vmem>>, vector<1x512xf32>
    %4 = vector.broadcast %3 : vector<1x512xf32> to vector<16x512xf32>
    %5 = arith.addf %2, %4 : vector<16x512xf32>
    %6 = arith.truncf %5 : vector<16x512xf32> to vector<16x512xbf16>
    %c0_5 = arith.constant 0 : index
    %c0_6 = arith.constant 0 : index
    %7 = vector.load %arg4[%c0_5, %c0_6] : memref<16x512xbf16, #tpu.memory_space<vmem>>, vector<16x512xbf16>
    tpu.vector_store %arg4[%c0_5, %c0_6], %6 {strides = array<i32>} : memref<16x512xbf16, #tpu.memory_space<vmem>>, vector<16x512xbf16>,
    %cst_7 = arith.constant dense<0.000000e+00> : vector<512xf32>
    %8 = vector.multi_reduction <add>, %2, %cst_7 [0] : vector<16x512xf32> to vector<512xf32>
    %9 = vector.shape_cast %8 : vector<512xf32> to vector<1x512xf32>
    %10 = arith.mulf %2, %2 : vector<16x512xf32>
    %cst_8 = arith.constant dense<0.000000e+00> : vector<512xf32>
    %11 = vector.multi_reduction <add>, %10, %cst_8 [0] : vector<16x512xf32> to vector<512xf32>
    %12 = vector.shape_cast %11 : vector<512xf32> to vector<1x512xf32>
    %13 = tpu.concatenate %9, %12 in 0 : vector<1x512xf32>, vector<1x512xf32> -> vector<2x512xf32>
    %14 = vector.shape_cast %13 : vector<2x512xf32> to vector<1x2x512xf32>
    %c0_9 = arith.constant 0 : index
    %c0_10 = arith.constant 0 : index
    %c0_11 = arith.constant 0 : index
    %15 = vector.load %arg5[%c0_9, %c0_10, %c0_11] : memref<1x2x512xf32, #tpu.memory_space<vmem>>, vector<1x2x512xf32>
    tpu.vector_store %arg5[%c0_9, %c0_10, %c0_11], %14 {strides = array<i32>} : memref<1x2x512xf32, #tpu.memory_space<vmem>>, vector<1x2x512xf32>,
    return
  }
  func.func @transform_0(%arg0: i32) -> (i32, i32) {
    %c0_i32 = arith.constant 0 : i32
    %c0_i32_0 = arith.constant 0 : i32
    return %arg0, %c0_i32 : i32, i32
  }
  func.func @transform_1(%arg0: i32) -> (i32, i32) {
    %c0_i32 = arith.constant 0 : i32
    %c0_i32_0 = arith.constant 0 : i32
    %c0_i32_1 = arith.constant 0 : i32
    return %c0_i32, %c0_i32_0 : i32, i32
  }
  func.func @transform_2(%arg0: i32) -> (i32, i32) {
    %c0_i32 = arith.constant 0 : i32
    %c0_i32_0 = arith.constant 0 : i32
    %c0_i32_1 = arith.constant 0 : i32
    return %c0_i32, %c0_i32_0 : i32, i32
  }
  func.func @transform_3(%arg0: i32) -> (i32, i32) {
    %c0_i32 = arith.constant 0 : i32
    %c0_i32_0 = arith.constant 0 : i32
    return %arg0, %c0_i32 : i32, i32
  }
  func.func @transform_4(%arg0: i32) -> (i32, i32, i32) {
    %c0_i32 = arith.constant 0 : i32
    %c0_i32_0 = arith.constant 0 : i32
    %c0_i32_1 = arith.constant 0 : i32
    return %arg0, %c0_i32, %c0_i32_0 : i32, i32, i32
  }
}

module attributes {stable_mosaic.version = 11 : i64} {
  func.func @_mm_act_kernel(%arg0: i32, %arg1: memref<16x8192xbf16, #tpu.memory_space<vmem>>, %arg2: memref<8192x128xbf16, #tpu.memory_space<vmem>>, %arg3: memref<1x128xf32, #tpu.memory_space<vmem>>, %arg4: memref<16x128xf32, #tpu.memory_space<vmem>>) attributes {dimension_semantics = [#tpu.dimension_semantics<parallel>], iteration_bounds = array<i64: 1>, scalar_prefetch = 0 : i64, scratch_operands = 0 : i64, tpu.core_type = #tpu.core_type<tc>, window_params = [{transform_indices = @transform_0, window_bounds = array<i64: 16, 8192>}, {pipeline_mode = #tpu.pipeline_mode<synchronous>, transform_indices = @transform_1, window_bounds = array<i64: 8192, 128>}, {pipeline_mode = #tpu.pipeline_mode<synchronous>, transform_indices = @transform_2, window_bounds = array<i64: 1, 128>}, {transform_indices = @transform_3, window_bounds = array<i64: 16, 128>}]} {
    %c0 = arith.constant 0 : index
    %c0_0 = arith.constant 0 : index
    %0 = vector.load %arg1[%c0, %c0_0] : memref<16x8192xbf16, #tpu.memory_space<vmem>>, vector<16x8192xbf16>
    %c0_1 = arith.constant 0 : index
    %c0_2 = arith.constant 0 : index
    %1 = vector.load %arg2[%c0_1, %c0_2] : memref<8192x128xbf16, #tpu.memory_space<vmem>>, vector<8192x128xbf16>
    %cst = arith.constant dense<0.000000e+00> : vector<16x128xf32>
    %2 = tpu.matmul %0, %1, %cst {dimension_numbers = #tpu.dot_dimension_numbers<[1], [0], [0], [1], [0, 0, 1, 1], [], []>} : vector<16x8192xbf16>, vector<8192x128xbf16>, vector<16x128xf32> -> vector<16x128xf32>
    %c0_3 = arith.constant 0 : index
    %c0_4 = arith.constant 0 : index
    %3 = vector.load %arg3[%c0_3, %c0_4] : memref<1x128xf32, #tpu.memory_space<vmem>>, vector<1x128xf32>
    %4 = vector.broadcast %3 : vector<1x128xf32> to vector<16x128xf32>
    %5 = arith.addf %2, %4 : vector<16x128xf32>
    %6 = arith.negf %5 : vector<16x128xf32>
    %7 = math.exp %6 : vector<16x128xf32>
    %cst_5 = arith.constant 1.000000e+00 : f32
    %8 = vector.broadcast %cst_5 : f32 to vector<16x128xf32>
    %9 = arith.addf %8, %7 : vector<16x128xf32>
    %10 = arith.divf %8, %9 : vector<16x128xf32>
    %c0_6 = arith.constant 0 : index
    %c0_7 = arith.constant 0 : index
    %11 = vector.load %arg4[%c0_6, %c0_7] : memref<16x128xf32, #tpu.memory_space<vmem>>, vector<16x128xf32>
    tpu.vector_store %arg4[%c0_6, %c0_7], %10 {strides = array<i32>} : memref<16x128xf32, #tpu.memory_space<vmem>>, vector<16x128xf32>,
    return
  }
  func.func @transform_0(%arg0: i32) -> (i32, i32) {
    %c0_i32 = arith.constant 0 : i32
    %c0_i32_0 = arith.constant 0 : i32
    return %arg0, %c0_i32 : i32, i32
  }
  func.func @transform_1(%arg0: i32) -> (i32, i32) {
    %c0_i32 = arith.constant 0 : i32
    %c0_i32_0 = arith.constant 0 : i32
    %c0_i32_1 = arith.constant 0 : i32
    return %c0_i32, %c0_i32_0 : i32, i32
  }
  func.func @transform_2(%arg0: i32) -> (i32, i32) {
    %c0_i32 = arith.constant 0 : i32
    %c0_i32_0 = arith.constant 0 : i32
    %c0_i32_1 = arith.constant 0 : i32
    return %c0_i32, %c0_i32_0 : i32, i32
  }
  func.func @transform_3(%arg0: i32) -> (i32, i32) {
    %c0_i32 = arith.constant 0 : i32
    %c0_i32_0 = arith.constant 0 : i32
    return %arg0, %c0_i32 : i32, i32
  }
}

</mosaic_0001>

<bundles_post_ra>
// kernel: discriminator_forward.5
= control target key start
LH: loop header
LB: loop body
LE: loop exit
PB: predicated region body
PF: predicated region fallthrough
CT: control target
= control target key end

     0   :  { %s1190_s12 = smov 0   ;;  %s1317_s0 = inlined_call_operand.vmem [shape: bf16[512,128], index: 0, kind: input, shape index: {}]   ;;  %s1318_s1 = inlined_call_operand.vmem [shape: bf16[128,128], index: 1, kind: input, shape index: {}]   ;;  %s1319_s2 = inlined_call_operand.vmem [shape: f32[1,128], index: 2, kind: input, shape index: {}]   ;;  %s1320_s3 = inlined_call_operand.vmem [shape: bf16[512,128], index: 3, kind: output, shape index: {}]  }
   0x1 LB: > { %s847_s13 = sadd.s32 4294967295, %s1168_s12   ;;  %p851_p0 = scmp.ge.s32.totalorder %s1168_s12, 1  ;;  %s1168_s12 = sphi %s1190_s12, %s13_s12  }
   0x2   : > { %p138_p1 = scmp.lt.s32.totalorder %s1168_s12, 3 }
   0x4   : > { %p139_p2 = pnand %p851_p0, %p138_p1 }
   0x5   : > { %v1138_v0 = vld [vmem:[%s1318_s1] sm:$0xff] (!%p139_p2)   ;;  %s852_s16 = sshll.u32 (!%p139_p2), %s847_s13, 5  ;;  %v1139_v1 = vld [vmem:[%s1318_s1 + $0x8] sm:$0xff] (!%p139_p2)   ;;  %v1140_v2 = vld [vmem:[%s1318_s1 + $0x10] sm:$0xff] (!%p139_p2)  }
   0x6   : > { %142 = sbr.rel (%p139_p2) target bundleno = 293 (0x125), region = 32  ;;  %p163_p3 = scmp.lt.s32.totalorder (!%p139_p2), %s852_s16, 63  ;;  %1066 = vmatprep.subr.bf16.mxu0 (!%p139_p2), %v1138_v0  ;;  %1114 = vmatprep.subr.bf16.mxu1 (!%p139_p2), %v1138_v0  ;;  %v1141_v3 = vld [vmem:[%s1318_s1 + $0x18] sm:$0xff] (!%p139_p2)   ;;  %v1142_v6 = vld [vmem:[%s1318_s1 + $0x20] sm:$0xff] (!%p139_p2)   ;;  %v1143_v7 = vld [vmem:[%s1318_s1 + $0x28] sm:$0xff] (!%p139_p2)  }
   0x7   : > { %1067 = vmatpush3.bf16.msra.mxu0 (!%p139_p2), %v1138_v0  ;;  %1122 = vmatpush3.bf16.msra.mxu1 (!%p139_p2), %v1138_v0  ;;  %v1144_v8 = vld [vmem:[%s1318_s1 + $0x30] sm:$0xff] (!%p139_p2)   ;;  %v1145_v9 = vld [vmem:[%s1318_s1 + $0x38] sm:$0xff] (!%p139_p2)   ;;  %v1251_v24 = vld [vmem:[%s1319_s2] ss:$0 sm:$0xff] (!%p139_p2) }
   0x8   : > { %1068 = vmatprep.subr.bf16.mxu0 (!%p139_p2), %v1139_v1  ;;  %1115 = vmatprep.subr.bf16.mxu1 (!%p139_p2), %v1139_v1 }
   0xb   : > { %1069 = vmatpush3.bf16.msra.mxu0 (!%p139_p2), %v1139_v1  ;;  %1123 = vmatpush3.bf16.msra.mxu1 (!%p139_p2), %v1139_v1 }
   0xc   : > { %1070 = vmatprep.subr.bf16.mxu0 (!%p139_p2), %v1140_v2  ;;  %1116 = vmatprep.subr.bf16.mxu1 (!%p139_p2), %v1140_v2 }
   0xd   : > { %s1322_s16 = smov (!%p163_p3, %s852_s16), 63 }
   0xe   : > { %s853_s21 = sshll.u32 %s1322_s16, 2 }
   0xf   : > { %s1215_s24 = scalar_lea.vmem %s1317_s0, %s853_s21  ;;  %1071 = vmatpush3.bf16.msra.mxu0 %v1140_v2  ;;  %1124 = vmatpush3.bf16.msra.mxu1 %v1140_v2  ;;  %s1268_s13 = scalar_lea.vmem %s1320_s3, %s853_s21 }
  0x10   : > { %v1146_v4 = vld [vmem:[%s1215_s24] sm:$0xff]   ;;  %1072 = vmatprep.subr.bf16.mxu0 %v1141_v3  ;;  %1117 = vmatprep.subr.bf16.mxu1 %v1141_v3  ;;  %v1148_v10 = vld [vmem:[%s1215_s24 + $0x8] sm:$0xff]   ;;  %v1150_v12 = vld [vmem:[%s1215_s24 + $0x10] sm:$0xff]  }
  0x11   : > { %v1147_v5 = vld [vmem:[%s1215_s24 + $0x40] sm:$0xff]   ;;  %1082 = vmatprep.mubr.bf16.mxu0 %v1146_v4  ;;  %v1149_v11 = vld [vmem:[%s1215_s24 + $0x48] sm:$0xff]   ;;  %v1151_v13 = vld [vmem:[%s1215_s24 + $0x50] sm:$0xff]  }
  0x12   : > { %1098 = vmatprep.mubr.bf16.mxu1 %v1147_v5  ;;  %v1152_v14 = vld [vmem:[%s1215_s24 + $0x18] sm:$0xff]   ;;  %v1154_v16 = vld [vmem:[%s1215_s24 + $0x20] sm:$0xff]   ;;  %v1156_v18 = vld [vmem:[%s1215_s24 + $0x28] sm:$0xff]  }
  0x13   : > { %1073 = vmatpush3.bf16.msra.mxu0 %v1141_v3  ;;  %1125 = vmatpush3.bf16.msra.mxu1 %v1141_v3  ;;  %v1153_v15 = vld [vmem:[%s1215_s24 + $0x58] sm:$0xff]   ;;  %v1155_v17 = vld [vmem:[%s1215_s24 + $0x60] sm:$0xff]   ;;  %v1157_v19 = vld [vmem:[%s1215_s24 + $0x68] sm:$0xff]  }
  0x14   : > { %1074 = vmatprep.subr.bf16.mxu0 %v1142_v6  ;;  %1118 = vmatprep.subr.bf16.mxu1 %v1142_v6  ;;  %v1158_v20 = vld [vmem:[%s1215_s24 + $0x30] sm:$0xff]   ;;  %v1160_v22 = vld [vmem:[%s1215_s24 + $0x38] sm:$0xff]  }
  0x15   : > { %v1159_v21 = vld [vmem:[%s1215_s24 + $0x70] sm:$0xff]   ;;  %v1161_v23 = vld [vmem:[%s1215_s24 + $0x78] sm:$0xff]  }
  0x17   : > { %1075 = vmatpush3.bf16.msra.mxu0 %v1142_v6  ;;  %1126 = vmatpush3.bf16.msra.mxu1 %v1142_v6 }
  0x18   : > { %1076 = vmatprep.subr.bf16.mxu0 %v1143_v7  ;;  %1119 = vmatprep.subr.bf16.mxu1 %v1143_v7 }
  0x1b   : > { %1077 = vmatpush3.bf16.msra.mxu0 %v1143_v7  ;;  %1127 = vmatpush3.bf16.msra.mxu1 %v1143_v7 }
  0x1c   : > { %1078 = vmatprep.subr.bf16.mxu0 %v1144_v8  ;;  %1120 = vmatprep.subr.bf16.mxu1 %v1144_v8 }
  0x1f   : > { %1079 = vmatpush3.bf16.msra.mxu0 %v1144_v8  ;;  %1128 = vmatpush3.bf16.msra.mxu1 %v1144_v8 }
  0x20   : > { %1080 = vmatprep.subr.bf16.mxu0 %v1145_v9  ;;  %1121 = vmatprep.subr.bf16.mxu1 %v1145_v9 }
  0x23   : > { %1081 = vmatpush3.bf16.msra.mxu0 %v1145_v9  ;;  %1129 = vmatpush3.bf16.msra.mxu1 %v1145_v9 }
  0x26   : > { %1083 = vmatmul.mubr.bf16.vlgmr.msra.gmra.mrb[0].mxu0 %v1148_v10  ;;  %1099 = vmatmul.mubr.bf16.vlgmr.msra.gmra.mrb[0].mxu1 %v1149_v11 }
  0x27   : > { %1086 = vmatprep.mubr.bf16.mxu0 %v1150_v12  ;;  %1102 = vmatprep.mubr.bf16.mxu1 %v1151_v13 }
  0x2e   : > { %1087 = vmatmul.mubr.bf16.gmra.mrb[4].mxu0 %v1152_v14  ;;  %1103 = vmatmul.mubr.bf16.gmra.mrb[4].mxu1 %v1153_v15 }
  0x2f   : > { %1090 = vmatprep.mubr.bf16.mxu0 %v1154_v16  ;;  %1106 = vmatprep.mubr.bf16.mxu1 %v1155_v17 }
  0x36   : > { %1091 = vmatmul.mubr.bf16.gmra.mrb[8].mxu0 %v1156_v18  ;;  %1107 = vmatmul.mubr.bf16.gmra.mrb[8].mxu1 %v1157_v19 }
  0x37   : > { %1094 = vmatprep.mubr.bf16.mxu0 %v1158_v20  ;;  %1110 = vmatprep.mubr.bf16.mxu1 %v1159_v21 }
  0x3e   : > { %1095 = vmatmul.mubr.bf16.gmra.mrb[12].mxu0 %v1160_v22  ;;  %1111 = vmatmul.mubr.bf16.gmra.mrb[12].mxu1 %v1161_v23 }
  0xf9   : > { %v1084_v25 = vpop.f32.mrb[0].mxu0  ;;  %v1100_v26 = vpop.f32.mrb[0].mxu1 }
  0xfa   : > { %v417_v27 = vadd.f32 %v1084_v25, %v1251_v24  ;;  %v481_v28 = vadd.f32 %v1100_v26, %v1251_v24  ;;  %v408_v29 = vpop.f32.mrb[1].mxu0  ;;  %v472_v30 = vpop.f32.mrb[1].mxu1 }
  0xfb   : > { %v409_v31 = vadd.f32 %v1251_v24, %v408_v29  ;;  %v473_v32 = vadd.f32 %v1251_v24, %v472_v30  ;;  %v1085_v33 = vpop.f32.mrb[2].mxu0  ;;  %v1101_v34 = vpop.f32.mrb[2].mxu1 }
  0xfc   : > { %vm537_vm0 = vcmp.gt.f32.partialorder %v417_v27, 0.0  ;;  %v569_v35 = vmul.f32 0.2, %v417_v27  ;;  %vm553_vm1 = vcmp.gt.f32.partialorder %v481_v28, 0.0  ;;  %v585_v36 = vmul.f32 0.2, %v481_v28 }
  0xfd   : > { %vm535_vm2 = vcmp.gt.f32.partialorder %v409_v31, 0.0  ;;  %v567_v37 = vmul.f32 0.2, %v409_v31  ;;  %vm551_vm3 = vcmp.gt.f32.partialorder %v473_v32, 0.0  ;;  %v583_v38 = vmul.f32 0.2, %v473_v32 }
  0xfe   : > { %v420_v39 = vadd.f32 %v1085_v33, %v1251_v24  ;;  %v484_v40 = vadd.f32 %v1101_v34, %v1251_v24  ;;  %v411_v41 = vpop.f32.mrb[3].mxu0  ;;  %v475_v42 = vpop.f32.mrb[3].mxu1  ;;  %v601_v43 = vsel %vm537_vm0, %v417_v27, %v569_v35  ;;  %v617_v44 = vsel %vm553_vm1, %v481_v28, %v585_v36 }
  0xff   : > { %v412_v45 = vadd.f32 %v1251_v24, %v411_v41  ;;  %v476_v46 = vadd.f32 %v1251_v24, %v475_v42  ;;  %v599_v51 = vsel %vm535_vm2, %v409_v31, %v567_v37  ;;  %v615_v52 = vsel %vm551_vm3, %v473_v32, %v583_v38 }
 0x100   : > { %vm538_vm4 = vcmp.gt.f32.partialorder %v420_v39, 0.0  ;;  %v570_v47 = vmul.f32 0.2, %v420_v39  ;;  %vm554_vm5 = vcmp.gt.f32.partialorder %v484_v40, 0.0  ;;  %v586_v48 = vmul.f32 0.2, %v484_v40 }
 0x101   : > { %vm536_vm6 = vcmp.gt.f32.partialorder %v412_v45, 0.0  ;;  %v568_v49 = vmul.f32 0.2, %v412_v45  ;;  %vm552_vm7 = vcmp.gt.f32.partialorder %v476_v46, 0.0  ;;  %v584_v50 = vmul.f32 0.2, %v476_v46 }
 0x102   : > { %v602_v53 = vsel %vm538_vm4, %v420_v39, %v570_v47  ;;  %v618_v54 = vsel %vm554_vm5, %v484_v40, %v586_v48  ;;  %v1088_v55 = vpop.f32.mrb[4].mxu0  ;;  %v1104_v56 = vpop.f32.mrb[4].mxu1 }
 0x103   : > { %v955_v57 = vpack.c.bf16 %v602_v53, %v601_v43  ;;  %v995_v58 = vpack.c.bf16 %v618_v54, %v617_v44  ;;  %v600_v59 = vsel %vm536_vm6, %v412_v45, %v568_v49  ;;  %v616_v60 = vsel %vm552_vm7, %v476_v46, %v584_v50  ;;  %v424_v61 = vpop.f32.mrb[5].mxu0  ;;  %v488_v62 = vpop.f32.mrb[5].mxu1 }
 0x104   : > { %v950_v63 = vpack.c.bf16 %v600_v59, %v599_v51  ;;  %v990_v0 = vpack.c.bf16 %v616_v60, %v615_v52  ;;  %v433_v1 = vadd.f32 %v1088_v55, %v1251_v24  ;;  %v497_v2 = vadd.f32 %v1104_v56, %v1251_v24  ;;  %v1089_v3 = vpop.f32.mrb[6].mxu0  ;;  %v1105_v4 = vpop.f32.mrb[6].mxu1 }
 0x105   : > { %1027 = vst [vmem:[%s1268_s13 + $0x8] sm:$0xff] %v955_v57   ;;  %1035 = vst [vmem:[%s1268_s13 + $0x48] sm:$0xff] %v995_v58   ;;  %v425_v5 = vadd.f32 %v1251_v24, %v424_v61  ;;  %v489_v6 = vadd.f32 %v1251_v24, %v488_v62  ;;  %v436_v7 = vadd.f32 %v1089_v3, %v1251_v24  ;;  %v427_v9 = vpop.f32.mrb[7].mxu0  ;;  %v491_v10 = vpop.f32.mrb[7].mxu1 }
 0x106   : > { %v500_v8 = vadd.f32 %v1105_v4, %v1251_v24  ;;  %951 = vst [vmem:[%s1268_s13] sm:$0xff] %v950_v63   ;;  %1034 = vst [vmem:[%s1268_s13 + $0x40] sm:$0xff] %v990_v0   ;;  %vm541_vm8 = vcmp.gt.f32.partialorder %v433_v1, 0.0  ;;  %v573_v11 = vmul.f32 0.2, %v433_v1  ;;  %vm557_vm9 = vcmp.gt.f32.partialorder %v497_v2, 0.0 }
 0x107   : > { %v589_v12 = vmul.f32 0.2, %v497_v2  ;;  %vm539_vm10 = vcmp.gt.f32.partialorder %v425_v5, 0.0  ;;  %v571_v13 = vmul.f32 0.2, %v425_v5  ;;  %vm555_vm11 = vcmp.gt.f32.partialorder %v489_v6, 0.0 }
 0x108   : > { %v605_v14 = vsel %vm541_vm8, %v433_v1, %v573_v11  ;;  %v587_v15 = vmul.f32 0.2, %v489_v6  ;;  %vm542_vm12 = vcmp.gt.f32.partialorder %v436_v7, 0.0  ;;  %v574_v16 = vmul.f32 0.2, %v436_v7 }
 0x109   : > { %v621_v17 = vsel %vm557_vm9, %v497_v2, %v589_v12  ;;  %v603_v18 = vsel %vm539_vm10, %v425_v5, %v571_v13  ;;  %vm558_vm13 = vcmp.gt.f32.partialorder %v500_v8, 0.0  ;;  %v590_v19 = vmul.f32 0.2, %v500_v8  ;;  %v1092_v20 = vpop.f32.mrb[8].mxu0  ;;  %v1108_v21 = vpop.f32.mrb[8].mxu1 }
 0x10a   : > { %v606_v22 = vsel %vm542_vm12, %v436_v7, %v574_v16  ;;  %v428_v23 = vadd.f32 %v1251_v24, %v427_v9  ;;  %v492_v25 = vadd.f32 %v1251_v24, %v491_v10  ;;  %v449_v26 = vadd.f32 %v1092_v20, %v1251_v24  ;;  %v440_v27 = vpop.f32.mrb[9].mxu0  ;;  %v504_v28 = vpop.f32.mrb[9].mxu1 }
 0x10b   : > { %v965_v29 = vpack.c.bf16 %v606_v22, %v605_v14  ;;  %v622_v30 = vsel %vm558_vm13, %v500_v8, %v590_v19  ;;  %v513_v31 = vadd.f32 %v1108_v21, %v1251_v24  ;;  %v441_v32 = vadd.f32 %v1251_v24, %v440_v27  ;;  %v1093_v33 = vpop.f32.mrb[10].mxu0  ;;  %v1109_v34 = vpop.f32.mrb[10].mxu1 }
 0x10c   : > { %v1005_v35 = vpack.c.bf16 %v622_v30, %v621_v17  ;;  %vm540_vm14 = vcmp.gt.f32.partialorder %v428_v23, 0.0  ;;  %v572_v36 = vmul.f32 0.2, %v428_v23  ;;  %vm556_vm15 = vcmp.gt.f32.partialorder %v492_v25, 0.0  ;;  %v443_v37 = vpop.f32.mrb[11].mxu0  ;;  %v507_v38 = vpop.f32.mrb[11].mxu1 }
 0x10d   : > { %1029 = vst [vmem:[%s1268_s13 + $0x18] sm:$0xff] %v965_v29   ;;  %v588_v39 = vmul.f32 0.2, %v492_v25  ;;  %vm545_vm0 = vcmp.gt.f32.partialorder %v449_v26, 0.0  ;;  %v577_v40 = vmul.f32 0.2, %v449_v26  ;;  %v619_v41 = vsel %vm555_vm11, %v489_v6, %v587_v15 }
 0x10e   : > { %vm561_vm1 = vcmp.gt.f32.partialorder %v513_v31, 0.0  ;;  %1037 = vst [vmem:[%s1268_s13 + $0x58] sm:$0xff] %v1005_v35   ;;  %v604_v42 = vsel %vm540_vm14, %v428_v23, %v572_v36  ;;  %v593_v43 = vmul.f32 0.2, %v513_v31  ;;  %vm543_vm2 = vcmp.gt.f32.partialorder %v441_v32, 0.0 }
 0x10f   : > { %v960_v44 = vpack.c.bf16 %v604_v42, %v603_v18  ;;  %v620_v45 = vsel %vm556_vm15, %v492_v25, %v588_v39  ;;  %v575_v46 = vmul.f32 0.2, %v441_v32  ;;  %v505_v47 = vadd.f32 %v1251_v24, %v504_v28 }
 0x110   : > { %v1000_v48 = vpack.c.bf16 %v620_v45, %v619_v41  ;;  %v609_v49 = vsel %vm545_vm0, %v449_v26, %v577_v40  ;;  %v625_v50 = vsel %vm561_vm1, %v513_v31, %v593_v43  ;;  %v452_v51 = vadd.f32 %v1093_v33, %v1251_v24 }
 0x111   : > { %1028 = vst [vmem:[%s1268_s13 + $0x10] sm:$0xff] %v960_v44   ;;  %vm559_vm3 = vcmp.gt.f32.partialorder %v505_v47, 0.0  ;;  %v591_v52 = vmul.f32 0.2, %v505_v47  ;;  %v516_v53 = vadd.f32 %v1109_v34, %v1251_v24  ;;  %v444_v54 = vadd.f32 %v1251_v24, %v443_v37  ;;  %v1096_v55 = vpop.f32.mrb[12].mxu0  ;;  %v1112_v56 = vpop.f32.mrb[12].mxu1 }
 0x112   : > { %1036 = vst [vmem:[%s1268_s13 + $0x50] sm:$0xff] %v1000_v48   ;;  %vm546_vm4 = vcmp.gt.f32.partialorder %v452_v51, 0.0  ;;  %v578_v57 = vmul.f32 0.2, %v452_v51  ;;  %v508_v58 = vadd.f32 %v1251_v24, %v507_v38  ;;  %v465_v59 = vadd.f32 %v1096_v55, %v1251_v24  ;;  %v456_v60 = vpop.f32.mrb[13].mxu0  ;;  %v520_v61 = vpop.f32.mrb[13].mxu1 }
 0x113   : > { %v607_v62 = vsel %vm543_vm2, %v441_v32, %v575_v46  ;;  %vm562_vm5 = vcmp.gt.f32.partialorder %v516_v53, 0.0  ;;  %v594_v63 = vmul.f32 0.2, %v516_v53  ;;  %vm544_vm6 = vcmp.gt.f32.partialorder %v444_v54, 0.0  ;;  %v1097_v0 = vpop.f32.mrb[14].mxu0  ;;  %v1113_v1 = vpop.f32.mrb[14].mxu1 }
 0x114   : > { %v610_v2 = vsel %vm546_vm4, %v452_v51, %v578_v57  ;;  %v576_v3 = vmul.f32 0.2, %v444_v54  ;;  %vm560_vm7 = vcmp.gt.f32.partialorder %v508_v58, 0.0  ;;  %v592_v4 = vmul.f32 0.2, %v508_v58  ;;  %v459_v5 = vpop.f32.mrb[15].mxu0 }
 0x115   : > { %v623_v6 = vsel %vm559_vm3, %v505_v47, %v591_v52  ;;  %v975_v7 = vpack.c.bf16 %v610_v2, %v609_v49  ;;  %v626_v8 = vsel %vm562_vm5, %v516_v53, %v594_v63  ;;  %v581_v9 = vmul.f32 0.2, %v465_v59  ;;  %v523_v10 = vpop.f32.mrb[15].mxu1 }
 0x116   : > { %v1015_v11 = vpack.c.bf16 %v626_v8, %v625_v50  ;;  %v608_v12 = vsel %vm544_vm6, %v444_v54, %v576_v3  ;;  %v624_v13 = vsel %vm560_vm7, %v508_v58, %v592_v4  ;;  %v529_v14 = vadd.f32 %v1112_v56, %v1251_v24 }
 0x117   : > { %1031 = vst [vmem:[%s1268_s13 + $0x28] sm:$0xff] %v975_v7   ;;  %v970_v15 = vpack.c.bf16 %v608_v12, %v607_v62  ;;  %v1010_v16 = vpack.c.bf16 %v624_v13, %v623_v6  ;;  %vm549_vm8 = vcmp.gt.f32.partialorder %v465_v59, 0.0  ;;  %v457_v17 = vadd.f32 %v1251_v24, %v456_v60 }
 0x118   : > { %1039 = vst [vmem:[%s1268_s13 + $0x68] sm:$0xff] %v1015_v11   ;;  %vm565_vm9 = vcmp.gt.f32.partialorder %v529_v14, 0.0  ;;  %v597_v18 = vmul.f32 0.2, %v529_v14  ;;  %v521_v19 = vadd.f32 %v1251_v24, %v520_v61  ;;  %v468_v20 = vadd.f32 %v1097_v0, %v1251_v24 }
 0x119   : > { %1030 = vst [vmem:[%s1268_s13 + $0x20] sm:$0xff] %v970_v15   ;;  %1038 = vst [vmem:[%s1268_s13 + $0x60] sm:$0xff] %v1010_v16   ;;  %v579_v21 = vmul.f32 0.2, %v457_v17  ;;  %v532_v22 = vadd.f32 %v1113_v1, %v1251_v24  ;;  %v460_v23 = vadd.f32 %v1251_v24, %v459_v5  ;;  %v613_v25 = vsel %vm549_vm8, %v465_v59, %v581_v9 }
 0x11a   : > { %vm547_vm10 = vcmp.gt.f32.partialorder %v457_v17, 0.0  ;;  %vm550_vm11 = vcmp.gt.f32.partialorder %v468_v20, 0.0  ;;  %v629_v26 = vsel %vm565_vm9, %v529_v14, %v597_v18  ;;  %v582_v27 = vmul.f32 0.2, %v468_v20 }
 0x11b   : > { %vm566_vm12 = vcmp.gt.f32.partialorder %v532_v22, 0.0  ;;  %v598_v28 = vmul.f32 0.2, %v532_v22  ;;  %vm563_vm13 = vcmp.gt.f32.partialorder %v521_v19, 0.0  ;;  %vm548_vm14 = vcmp.gt.f32.partialorder %v460_v23, 0.0 }
 0x11c   : > { %v580_v29 = vmul.f32 0.2, %v460_v23  ;;  %v524_v30 = vadd.f32 %v1251_v24, %v523_v10  ;;  %v611_v31 = vsel %vm547_vm10, %v457_v17, %v579_v21  ;;  %v595_v32 = vmul.f32 0.2, %v521_v19 }
 0x11d   : > { %v614_v33 = vsel %vm550_vm11, %v468_v20, %v582_v27  ;;  %v630_v34 = vsel %vm566_vm12, %v532_v22, %v598_v28 }
 0x11e   : > { %v985_v35 = vpack.c.bf16 %v614_v33, %v613_v25  ;;  %v1025_v36 = vpack.c.bf16 %v630_v34, %v629_v26  ;;  %v612_v37 = vsel %vm548_vm14, %v460_v23, %v580_v29  ;;  %vm564_vm15 = vcmp.gt.f32.partialorder %v524_v30, 0.0 }
 0x11f   : > { %v980_v38 = vpack.c.bf16 %v612_v37, %v611_v31  ;;  %v596_v39 = vmul.f32 0.2, %v524_v30  ;;  %v627_v40 = vsel %vm563_vm13, %v521_v19, %v595_v32 }
 0x120   : > { %1033 = vst [vmem:[%s1268_s13 + $0x38] sm:$0xff] %v985_v35   ;;  %1041 = vst [vmem:[%s1268_s13 + $0x78] sm:$0xff] %v1025_v36  }
 0x121   : > { %1032 = vst [vmem:[%s1268_s13 + $0x30] sm:$0xff] %v980_v38   ;;  %v628_v41 = vsel %vm564_vm15, %v524_v30, %v596_v39 }
 0x122   : > { %v1020_v42 = vpack.c.bf16 %v628_v41, %v627_v40 }
 0x124   : > { %1040 = vst [vmem:[%s1268_s13 + $0x70] sm:$0xff] %v1020_v42  }
 0x125 PF: > { %s13_s12 = sadd.s32 1, %s1168_s12  }
 0x126   : > { %p10_p4 = scmp.ge.s32.totalorder %s13_s12, 4  }
 0x128   :  { %12 = sbr.rel (!%p10_p4) target bundleno = 1 (0x1), region = 62 }

// kernel: discriminator_forward.6
= control target key start
LH: loop header
LB: loop body
LE: loop exit
PB: predicated region body
PF: predicated region fallthrough
CT: control target
= control target key end

     0   :  { %vm1462_vm0 = vcmask 1040384   ;;  %s2506_s1 = inlined_call_operand.vmem [shape: bf16[1024,128], index: 1, kind: input, shape index: {}]   ;;  %s2507_s0 = inlined_call_operand.vmem [shape: bf16[128,1024], index: 0, kind: input, shape index: {}]   ;;  %s2508_s2 = inlined_call_operand.vmem [shape: f32[1,128], index: 2, kind: input, shape index: {}]   ;;  %s2509_s3 = inlined_call_operand.vmem [shape: bf16[128,128], index: 3, kind: output, shape index: {0}]   ;;  %s2510_s4 = inlined_call_operand.vmem [shape: f32[1,2,128], index: 4, kind: output, shape index: {1}]  }
   0x1   :  { %v1937_v0 = vld [vmem:[%s2506_s1 + $0x40] sm:$0xff]   ;;  %v1941_v4 = vld [vmem:[%s2506_s1 + $0x48] sm:$0xff]   ;;  %v1945_v8 = vld [vmem:[%s2506_s1 + $0x50] sm:$0xff]  }
   0x2   :  { %v1938_v1 = vld [vmem:[%s2506_s1 + $0xc0] sm:$0xff]   ;;  %1681 = vmatprep.subr.bf16.mxu0 %v1937_v0  ;;  %v1942_v5 = vld [vmem:[%s2506_s1 + $0xc8] sm:$0xff]   ;;  %v1946_v9 = vld [vmem:[%s2506_s1 + $0xd0] sm:$0xff]  }
   0x3   :  { %v1939_v2 = vld [vmem:[%s2506_s1] sm:$0xff]   ;;  %1745 = vmatprep.subr.bf16.mxu1 %v1938_v1  ;;  %v1943_v6 = vld [vmem:[%s2506_s1 + $0x8] sm:$0xff]   ;;  %v1947_v10 = vld [vmem:[%s2506_s1 + $0x10] sm:$0xff]  }
   0x4   :  { %v1940_v3 = vld [vmem:[%s2506_s1 + $0x80] sm:$0xff]   ;;  %1682 = vmatpush3.bf16.msra.mxu0 %v1939_v2  ;;  %v1944_v7 = vld [vmem:[%s2506_s1 + $0x88] sm:$0xff]   ;;  %v1948_v11 = vld [vmem:[%s2506_s1 + $0x90] sm:$0xff]  }
   0x5   :  { %1746 = vmatpush3.bf16.msra.mxu1 %v1940_v3  ;;  %1683 = vmatprep.subr.bf16.mxu0 %v1941_v4  ;;  %v1949_v12 = vld [vmem:[%s2506_s1 + $0x58] sm:$0xff]   ;;  %v1953_v16 = vld [vmem:[%s2506_s1 + $0x60] sm:$0xff]   ;;  %v1957_v20 = vld [vmem:[%s2506_s1 + $0x68] sm:$0xff]  }
   0x6   :  { %1747 = vmatprep.subr.bf16.mxu1 %v1942_v5  ;;  %v1950_v13 = vld [vmem:[%s2506_s1 + $0xd8] sm:$0xff]   ;;  %v1954_v17 = vld [vmem:[%s2506_s1 + $0xe0] sm:$0xff]   ;;  %v1958_v21 = vld [vmem:[%s2506_s1 + $0xe8] sm:$0xff]  }
   0x7   :  { %v1951_v14 = vld [vmem:[%s2506_s1 + $0x18] sm:$0xff]   ;;  %v1955_v18 = vld [vmem:[%s2506_s1 + $0x20] sm:$0xff]   ;;  %v1959_v22 = vld [vmem:[%s2506_s1 + $0x28] sm:$0xff]  }
   0x8   :  { %1684 = vmatpush3.bf16.msra.mxu0 %v1943_v6  ;;  %v1952_v15 = vld [vmem:[%s2506_s1 + $0x98] sm:$0xff]   ;;  %v1956_v19 = vld [vmem:[%s2506_s1 + $0xa0] sm:$0xff]   ;;  %v1960_v23 = vld [vmem:[%s2506_s1 + $0xa8] sm:$0xff]  }
   0x9   :  { %1748 = vmatpush3.bf16.msra.mxu1 %v1944_v7  ;;  %1685 = vmatprep.subr.bf16.mxu0 %v1945_v8  ;;  %v1961_v24 = vld [vmem:[%s2506_s1 + $0x70] sm:$0xff]   ;;  %v1965_v28 = vld [vmem:[%s2506_s1 + $0x78] sm:$0xff]   ;;  %v17_v32 = vld [vmem:[%s2507_s0] sm:$0xff] }
   0xa   :  { %1749 = vmatprep.subr.bf16.mxu1 %v1946_v9  ;;  %v1962_v25 = vld [vmem:[%s2506_s1 + $0xf0] sm:$0xff]   ;;  %v1966_v29 = vld [vmem:[%s2506_s1 + $0xf8] sm:$0xff]   ;;  %v21_v33 = vld [vmem:[%s2507_s0 + $0x20] sm:$0xff] }
   0xb   :  { %v1963_v26 = vld [vmem:[%s2506_s1 + $0x30] sm:$0xff]   ;;  %v1967_v30 = vld [vmem:[%s2506_s1 + $0x38] sm:$0xff]   ;;  %v18_v34 = vld [vmem:[%s2507_s0 + $0x8] sm:$0xff]  ;;  %v1473_v35 = vcombine.low %v17_v32, %v21_v33  ;;  %v1474_v36 = vcombine.high %v17_v32, %v21_v33 }
   0xc   :  { %1686 = vmatpush3.bf16.msra.mxu0 %v1947_v10  ;;  %v1964_v27 = vld [vmem:[%s2506_s1 + $0xb0] sm:$0xff]   ;;  %v1968_v31 = vld [vmem:[%s2506_s1 + $0xb8] sm:$0xff]   ;;  %v22_v37 = vld [vmem:[%s2507_s0 + $0x28] sm:$0xff] }
   0xd   :  { %1750 = vmatpush3.bf16.msra.mxu1 %v1948_v11  ;;  %1687 = vmatprep.subr.bf16.mxu0 %v1949_v12  ;;  %v1475_v38 = vcombine.low %v18_v34, %v22_v37  ;;  %v1476_v39 = vcombine.high %v18_v34, %v22_v37  ;;  %v1969_v40 = vld [vmem:[%s2506_s1 + $0x140] sm:$0xff]   ;;  %v26_v47 = vld [vmem:[%s2507_s0 + $0x48] sm:$0xff]  ;;  %v1977_v62 = vld [vmem:[%s2506_s1 + $0x150] sm:$0xff]  }
   0xe   :  { %1751 = vmatprep.subr.bf16.mxu1 %v1950_v13  ;;  %945 = vmatprep.mubr.bf16.mxu0 %v1474_v36  ;;  %v1970_v41 = vld [vmem:[%s2506_s1 + $0x100] sm:$0xff]   ;;  %v30_v48 = vld [vmem:[%s2507_s0 + $0x68] sm:$0xff]  ;;  %v1978_v63 = vld [vmem:[%s2506_s1 + $0x110] sm:$0xff]  }
   0xf   :  { %1042 = vmatprep.mubr.bf16.mxu1 %v1476_v39  ;;  %v1971_v42 = vld [vmem:[%s2506_s1 + $0x1c0] sm:$0xff]   ;;  %v1484_v49 = vcombine.high %v26_v47, %v30_v48  ;;  %v1973_v50 = vld [vmem:[%s2506_s1 + $0x148] sm:$0xff]   ;;  %v1483_v53 = vcombine.low %v26_v47, %v30_v48  ;;  %v1979_v0 = vld [vmem:[%s2506_s1 + $0x1d0] sm:$0xff]  }
  0x10   :  { %1688 = vmatpush3.bf16.msra.mxu0 %v1951_v14  ;;  %v1972_v43 = vld [vmem:[%s2506_s1 + $0x180] sm:$0xff]   ;;  %v1974_v52 = vld [vmem:[%s2506_s1 + $0x108] sm:$0xff]   ;;  %v1980_v1 = vld [vmem:[%s2506_s1 + $0x190] sm:$0xff]  }
  0x11   :  { %1752 = vmatpush3.bf16.msra.mxu1 %v1952_v15  ;;  %1689 = vmatprep.subr.bf16.mxu0 %v1953_v16  ;;  %v25_v44 = vld [vmem:[%s2507_s0 + $0x40] sm:$0xff]  ;;  %v1975_v54 = vld [vmem:[%s2506_s1 + $0x1c8] sm:$0xff]   ;;  %v1981_v10 = vld [vmem:[%s2506_s1 + $0x158] sm:$0xff]  }
  0x12   :  { %1753 = vmatprep.subr.bf16.mxu1 %v1954_v17  ;;  %v29_v45 = vld [vmem:[%s2507_s0 + $0x60] sm:$0xff]  ;;  %v1976_v55 = vld [vmem:[%s2506_s1 + $0x188] sm:$0xff]   ;;  %v1982_v11 = vld [vmem:[%s2506_s1 + $0x118] sm:$0xff]  }
  0x13   :  { %v1482_v46 = vcombine.high %v25_v44, %v29_v45  ;;  %v1481_v51 = vcombine.low %v25_v44, %v29_v45  ;;  %v33_v56 = vld [vmem:[%s2507_s0 + $0x80] sm:$0xff]  ;;  %v34_v58 = vld [vmem:[%s2507_s0 + $0x88] sm:$0xff]  ;;  %v1983_v12 = vld [vmem:[%s2506_s1 + $0x1d8] sm:$0xff]  }
  0x14   :  { %1690 = vmatpush3.bf16.msra.mxu0 %v1955_v18  ;;  %v37_v57 = vld [vmem:[%s2507_s0 + $0xa0] sm:$0xff]  ;;  %v38_v59 = vld [vmem:[%s2507_s0 + $0xa8] sm:$0xff]  ;;  %v1984_v13 = vld [vmem:[%s2506_s1 + $0x198] sm:$0xff]  }
  0x15   :  { %1754 = vmatpush3.bf16.msra.mxu1 %v1956_v19  ;;  %1691 = vmatprep.subr.bf16.mxu0 %v1957_v20  ;;  %v1490_v60 = vcombine.high %v33_v56, %v37_v57  ;;  %v1492_v61 = vcombine.high %v34_v58, %v38_v59  ;;  %v1489_v2 = vcombine.low %v33_v56, %v37_v57  ;;  %v41_v3 = vld [vmem:[%s2507_s0 + $0xc0] sm:$0xff]  ;;  %v42_v5 = vld [vmem:[%s2507_s0 + $0xc8] sm:$0xff]  ;;  %v1994_v39 = vld [vmem:[%s2506_s1 + $0x130] sm:$0xff]  }
  0x16   :  { %1755 = vmatprep.subr.bf16.mxu1 %v1958_v21  ;;  %v45_v4 = vld [vmem:[%s2507_s0 + $0xe0] sm:$0xff]  ;;  %v1491_v6 = vcombine.low %v34_v58, %v38_v59  ;;  %v46_v8 = vld [vmem:[%s2507_s0 + $0xe8] sm:$0xff]  ;;  %v1998_v48 = vld [vmem:[%s2506_s1 + $0x138] sm:$0xff]  }
  0x17   :  { %v1498_v7 = vcombine.high %v41_v3, %v45_v4  ;;  %v1500_v9 = vcombine.high %v42_v5, %v46_v8  ;;  %v49_v14 = vld [vmem:[%s2507_s0 + $0x100] sm:$0xff]  ;;  %v50_v16 = vld [vmem:[%s2507_s0 + $0x108] sm:$0xff]  ;;  %v1497_v19 = vcombine.low %v41_v3, %v45_v4  ;;  %v1499_v21 = vcombine.low %v42_v5, %v46_v8  ;;  %v28_v8 = vld [vmem:[%s2507_s0 + $0x58] sm:$0xff] }
  0x18   :  { %1692 = vmatpush3.bf16.msra.mxu0 %v1959_v22  ;;  %v53_v15 = vld [vmem:[%s2507_s0 + $0x120] sm:$0xff]  ;;  %v54_v17 = vld [vmem:[%s2507_s0 + $0x128] sm:$0xff] }
  0x19   :  { %1756 = vmatpush3.bf16.msra.mxu1 %v1960_v23  ;;  %1693 = vmatprep.subr.bf16.mxu0 %v1961_v24  ;;  %v1985_v18 = vld [vmem:[%s2506_s1 + $0x160] sm:$0xff]   ;;  %v1506_v22 = vcombine.high %v49_v14, %v53_v15  ;;  %v1508_v24 = vcombine.high %v50_v16, %v54_v17  ;;  %v1991_v32 = vld [vmem:[%s2506_s1 + $0x1e8] sm:$0xff]   ;;  %v1505_v34 = vcombine.low %v49_v14, %v53_v15  ;;  %v35_v14 = vld [vmem:[%s2507_s0 + $0x90] sm:$0xff] }
  0x1a   :  { %1757 = vmatprep.subr.bf16.mxu1 %v1962_v25  ;;  %v1986_v20 = vld [vmem:[%s2506_s1 + $0x120] sm:$0xff]   ;;  %v1992_v33 = vld [vmem:[%s2506_s1 + $0x1a8] sm:$0xff]   ;;  %v39_v15 = vld [vmem:[%s2507_s0 + $0xb0] sm:$0xff] }
  0x1b   :  { %v1987_v23 = vld [vmem:[%s2506_s1 + $0x1e0] sm:$0xff]   ;;  %v66_v44 = vld [vmem:[%s2507_s0 + $0x188] sm:$0xff] }
  0x1c   :  { %1694 = vmatpush3.bf16.msra.mxu0 %v1963_v26  ;;  %v1988_v25 = vld [vmem:[%s2506_s1 + $0x1a0] sm:$0xff]   ;;  %v70_v45 = vld [vmem:[%s2507_s0 + $0x1a8] sm:$0xff] }
  0x1d   :  { %1758 = vmatpush3.bf16.msra.mxu1 %v1964_v27  ;;  %1695 = vmatprep.subr.bf16.mxu0 %v1965_v28  ;;  %v57_v26 = vld [vmem:[%s2507_s0 + $0x140] sm:$0xff]  ;;  %v1989_v28 = vld [vmem:[%s2506_s1 + $0x168] sm:$0xff]   ;;  %v1523_v59 = vcombine.low %v66_v44, %v70_v45 }
  0x1e   :  { %1759 = vmatprep.subr.bf16.mxu1 %v1966_v29  ;;  %v61_v27 = vld [vmem:[%s2507_s0 + $0x160] sm:$0xff]  ;;  %v58_v29 = vld [vmem:[%s2507_s0 + $0x148] sm:$0xff] }
  0x1f   :  { %v1514_v36 = vcombine.high %v57_v26, %v61_v27  ;;  %v1513_v47 = vcombine.low %v57_v26, %v61_v27  ;;  %v74_v56 = vld [vmem:[%s2507_s0 + $0x1c8] sm:$0xff]  ;;  %v1493_v26 = vcombine.low %v35_v14, %v39_v15 }
  0x20   :  { %1696 = vmatpush3.bf16.msra.mxu0 %v1967_v30  ;;  %v62_v30 = vld [vmem:[%s2507_s0 + $0x168] sm:$0xff] }
  0x21   :  { %1760 = vmatpush3.bf16.msra.mxu1 %v1968_v31  ;;  %1809 = vmatprep.subr.bf16.mxu0 %v1969_v40  ;;  %v1990_v31 = vld [vmem:[%s2506_s1 + $0x128] sm:$0xff]   ;;  %v1516_v37 = vcombine.high %v58_v29, %v62_v30  ;;  %v1995_v40 = vld [vmem:[%s2506_s1 + $0x1f0] sm:$0xff]  }
  0x22   :  { %1873 = vmatprep.subr.bf16.mxu1 %v1971_v42  ;;  %v69_v42 = vld [vmem:[%s2507_s0 + $0x1a0] sm:$0xff]  ;;  %v78_v57 = vld [vmem:[%s2507_s0 + $0x1e8] sm:$0xff] }
  0x23   :  { %946 = vmatmul.mubr.bf16.vlgmr.msra.gmra.mrb[0].mxu0 %v1473_v35  ;;  %v1507_v35 = vcombine.low %v50_v16, %v54_v17  ;;  %v1531_v3 = vcombine.low %v74_v56, %v78_v57  ;;  %v36_v16 = vld [vmem:[%s2507_s0 + $0x98] sm:$0xff] }
  0x24   :  { %1043 = vmatmul.mubr.bf16.vlgmr.msra.gmra.mrb[0].mxu1 %v1475_v38  ;;  %1810 = vmatpush3.bf16.msra.mxu0 %v1970_v41  ;;  %v1993_v38 = vld [vmem:[%s2506_s1 + $0x170] sm:$0xff]   ;;  %v65_v41 = vld [vmem:[%s2507_s0 + $0x180] sm:$0xff]  ;;  %v40_v17 = vld [vmem:[%s2507_s0 + $0xb8] sm:$0xff] }
  0x25   :  { %1874 = vmatpush3.bf16.msra.mxu1 %v1972_v43  ;;  %953 = vmatprep.mubr.bf16.mxu0 %v1482_v46  ;;  %v1996_v43 = vld [vmem:[%s2506_s1 + $0x1b0] sm:$0xff]   ;;  %v1997_v46 = vld [vmem:[%s2506_s1 + $0x178] sm:$0xff]   ;;  %v1521_v58 = vcombine.low %v65_v41, %v69_v42  ;;  %v1495_v27 = vcombine.low %v36_v16, %v40_v17 }
  0x26   :  { %1050 = vmatprep.mubr.bf16.mxu1 %v1484_v49  ;;  %1811 = vmatprep.subr.bf16.mxu0 %v1973_v50  ;;  %v1515_v49 = vcombine.low %v58_v29, %v62_v30  ;;  %v1522_v50 = vcombine.high %v65_v41, %v69_v42  ;;  %v51_v30 = vld [vmem:[%s2507_s0 + $0x110] sm:$0xff]  ;;  %v64_v41 = vld [vmem:[%s2507_s0 + $0x178] sm:$0xff] }
  0x27   :  { %1875 = vmatprep.subr.bf16.mxu1 %v1975_v54  ;;  %v73_v54 = vld [vmem:[%s2507_s0 + $0x1c0] sm:$0xff] }
  0x28   :  { %1812 = vmatpush3.bf16.msra.mxu0 %v1974_v52  ;;  %v1524_v52 = vcombine.high %v66_v44, %v70_v45 }
  0x29   :  { %1876 = vmatpush3.bf16.msra.mxu1 %v1976_v55  ;;  %1813 = vmatprep.subr.bf16.mxu0 %v1977_v62  ;;  %v77_v55 = vld [vmem:[%s2507_s0 + $0x1e0] sm:$0xff]  ;;  %v19_v62 = vld [vmem:[%s2507_s0 + $0x10] sm:$0xff] }
  0x2a   :  { %1877 = vmatprep.subr.bf16.mxu1 %v1979_v0  ;;  %v20_v0 = vld [vmem:[%s2507_s0 + $0x18] sm:$0xff] }
  0x2b   :  { %954 = vmatmul.mubr.bf16.gmra.mrb[4].mxu0 %v1481_v51  ;;  %v1999_v51 = vld [vmem:[%s2506_s1 + $0x1f8] sm:$0xff]  }
  0x2c   :  { %1051 = vmatmul.mubr.bf16.gmra.mrb[4].mxu1 %v1483_v53  ;;  %961 = vmatprep.mubr.bf16.mxu0 %v1490_v60  ;;  %v2000_v53 = vld [vmem:[%s2506_s1 + $0x1b8] sm:$0xff]   ;;  %v1530_v60 = vcombine.high %v73_v54, %v77_v55 }
  0x2d   :  { %1058 = vmatprep.mubr.bf16.mxu1 %v1492_v61  ;;  %1814 = vmatpush3.bf16.msra.mxu0 %v1978_v63  ;;  %v1532_v61 = vcombine.high %v74_v56, %v78_v57  ;;  %v23_v63 = vld [vmem:[%s2507_s0 + $0x30] sm:$0xff]  ;;  %v76_v56 = vld [vmem:[%s2507_s0 + $0x1d8] sm:$0xff] }
  0x2e   :  { %1878 = vmatpush3.bf16.msra.mxu1 %v1980_v1  ;;  %1815 = vmatprep.subr.bf16.mxu0 %v1981_v10  ;;  %v24_v1 = vld [vmem:[%s2507_s0 + $0x38] sm:$0xff]  ;;  %v1478_v4 = vcombine.high %v19_v62, %v23_v63  ;;  %v1477_v10 = vcombine.low %v19_v62, %v23_v63 }
  0x2f   :  { %1879 = vmatprep.subr.bf16.mxu1 %v1983_v12  ;;  %v1480_v5 = vcombine.high %v20_v0, %v24_v1  ;;  %v80_v57 = vld [vmem:[%s2507_s0 + $0x1f8] sm:$0xff] }
  0x30   :  { %v1535_v63 = vcombine.low %v76_v56, %v80_v57 }
  0x31   :  { %1816 = vmatpush3.bf16.msra.mxu0 %v1982_v11  ;;  %v1479_v11 = vcombine.low %v20_v0, %v24_v1 }
  0x32   :  { %1880 = vmatpush3.bf16.msra.mxu1 %v1984_v13  ;;  %1817 = vmatprep.subr.bf16.mxu0 %v1985_v18 }
  0x33   :  { %962 = vmatmul.mubr.bf16.gmra.mrb[8].mxu0 %v1489_v2  ;;  %1881 = vmatprep.subr.bf16.mxu1 %v1987_v23  ;;  %v1529_v2 = vcombine.low %v73_v54, %v77_v55  ;;  %v47_v23 = vld [vmem:[%s2507_s0 + $0xf0] sm:$0xff] }
  0x34   :  { %1059 = vmatmul.mubr.bf16.gmra.mrb[8].mxu1 %v1491_v6  ;;  %969 = vmatprep.mubr.bf16.mxu0 %v1498_v7  ;;  %v27_v6 = vld [vmem:[%s2507_s0 + $0x50] sm:$0xff] }
  0x35   :  { %1066 = vmatprep.mubr.bf16.mxu1 %v1500_v9  ;;  %1818 = vmatpush3.bf16.msra.mxu0 %v1986_v20  ;;  %v31_v7 = vld [vmem:[%s2507_s0 + $0x70] sm:$0xff]  ;;  %v32_v9 = vld [vmem:[%s2507_s0 + $0x78] sm:$0xff]  ;;  %v1494_v20 = vcombine.high %v35_v14, %v39_v15 }
  0x36   :  { %1882 = vmatpush3.bf16.msra.mxu1 %v1988_v25  ;;  %1819 = vmatprep.subr.bf16.mxu0 %v1989_v28  ;;  %v1486_v12 = vcombine.high %v27_v6, %v31_v7  ;;  %v1488_v13 = vcombine.high %v28_v8, %v32_v9  ;;  %v1485_v18 = vcombine.low %v27_v6, %v31_v7  ;;  %v48_v25 = vld [vmem:[%s2507_s0 + $0xf8] sm:$0xff]  ;;  %v75_v54 = vld [vmem:[%s2507_s0 + $0x1d0] sm:$0xff] }
  0x37   :  { %1883 = vmatprep.subr.bf16.mxu1 %v1991_v32  ;;  %v52_v32 = vld [vmem:[%s2507_s0 + $0x118] sm:$0xff]  ;;  %v79_v55 = vld [vmem:[%s2507_s0 + $0x1f0] sm:$0xff] }
  0x38   :  { %v1533_v62 = vcombine.low %v75_v54, %v79_v55 }
  0x39   :  { %1820 = vmatpush3.bf16.msra.mxu0 %v1990_v31  ;;  %v55_v31 = vld [vmem:[%s2507_s0 + $0x130] sm:$0xff] }
  0x3a   :  { %1884 = vmatpush3.bf16.msra.mxu1 %v1992_v33  ;;  %1821 = vmatprep.subr.bf16.mxu0 %v1993_v38  ;;  %v56_v33 = vld [vmem:[%s2507_s0 + $0x138] sm:$0xff]  ;;  %v59_v38 = vld [vmem:[%s2507_s0 + $0x150] sm:$0xff]  ;;  %v1509_v42 = vcombine.low %v51_v30, %v55_v31 }
  0x3b   :  { %970 = vmatmul.mubr.bf16.gmra.mrb[12].mxu0 %v1497_v19  ;;  %1885 = vmatprep.subr.bf16.mxu1 %v1995_v40  ;;  %v1487_v19 = vcombine.low %v28_v8, %v32_v9  ;;  %v60_v40 = vld [vmem:[%s2507_s0 + $0x158] sm:$0xff] }
  0x3c   :  { %1067 = vmatmul.mubr.bf16.gmra.mrb[12].mxu1 %v1499_v21  ;;  %977 = vmatprep.mubr.bf16.mxu0 %v1506_v22  ;;  %v1496_v21 = vcombine.high %v36_v16, %v40_v17  ;;  %v43_v22 = vld [vmem:[%s2507_s0 + $0xd0] sm:$0xff]  ;;  %v1520_v45 = vcombine.high %v60_v40, %v64_v41 }
  0x3d   :  { %1074 = vmatprep.mubr.bf16.mxu1 %v1508_v24  ;;  %1822 = vmatpush3.bf16.msra.mxu0 %v1994_v39  ;;  %v44_v24 = vld [vmem:[%s2507_s0 + $0xd8] sm:$0xff]  ;;  %v1502_v28 = vcombine.high %v43_v22, %v47_v23  ;;  %v63_v39 = vld [vmem:[%s2507_s0 + $0x170] sm:$0xff] }
  0x3e   :  { %1886 = vmatpush3.bf16.msra.mxu1 %v1996_v43  ;;  %1823 = vmatprep.subr.bf16.mxu0 %v1997_v46  ;;  %v1504_v29 = vcombine.high %v44_v24, %v48_v25  ;;  %v1511_v43 = vcombine.low %v52_v32, %v56_v33  ;;  %v1518_v44 = vcombine.high %v59_v38, %v63_v39  ;;  %v67_v46 = vld [vmem:[%s2507_s0 + $0x190] sm:$0xff] }
  0x3f   :  { %1887 = vmatprep.subr.bf16.mxu1 %v1999_v51  ;;  %v1519_v51 = vcombine.low %v60_v40, %v64_v41 }
  0x41   :  { %1824 = vmatpush3.bf16.msra.mxu0 %v1998_v48  ;;  %v68_v48 = vld [vmem:[%s2507_s0 + $0x198] sm:$0xff] }
  0x42   :  { %1888 = vmatpush3.bf16.msra.mxu1 %v2000_v53 }
  0x43   :  { %978 = vmatmul.mubr.bf16.gmra.mrb[16].mxu0 %v1505_v34  ;;  %v1501_v34 = vcombine.low %v43_v22, %v47_v23 }
  0x44   :  { %1075 = vmatmul.mubr.bf16.gmra.mrb[16].mxu1 %v1507_v35  ;;  %985 = vmatprep.mubr.bf16.mxu0 %v1514_v36  ;;  %v1503_v35 = vcombine.low %v44_v24, %v48_v25  ;;  %v1510_v36 = vcombine.high %v51_v30, %v55_v31 }
  0x45   :  { %1082 = vmatprep.mubr.bf16.mxu1 %v1516_v37  ;;  %v1512_v37 = vcombine.high %v52_v32, %v56_v33 }
  0x4b   :  { %986 = vmatmul.mubr.bf16.gmra.mrb[20].mxu0 %v1513_v47  ;;  %v71_v47 = vld [vmem:[%s2507_s0 + $0x1b0] sm:$0xff] }
  0x4c   :  { %1083 = vmatmul.mubr.bf16.gmra.mrb[20].mxu1 %v1515_v49  ;;  %993 = vmatprep.mubr.bf16.mxu0 %v1522_v50  ;;  %v72_v49 = vld [vmem:[%s2507_s0 + $0x1b8] sm:$0xff]  ;;  %v1517_v50 = vcombine.low %v59_v38, %v63_v39 }
  0x4d   :  { %1090 = vmatprep.mubr.bf16.mxu1 %v1524_v52  ;;  %v1526_v52 = vcombine.high %v67_v46, %v71_v47  ;;  %v1528_v53 = vcombine.high %v68_v48, %v72_v49 }
  0x53   :  { %994 = vmatmul.mubr.bf16.gmra.mrb[24].mxu0 %v1521_v58  ;;  %v1525_v58 = vcombine.low %v67_v46, %v71_v47 }
  0x54   :  { %1091 = vmatmul.mubr.bf16.gmra.mrb[24].mxu1 %v1523_v59  ;;  %1001 = vmatprep.mubr.bf16.mxu0 %v1530_v60  ;;  %v1527_v59 = vcombine.low %v68_v48, %v72_v49  ;;  %v1534_v60 = vcombine.high %v75_v54, %v79_v55 }
  0x55   :  { %1098 = vmatprep.mubr.bf16.mxu1 %v1532_v61  ;;  %v1536_v61 = vcombine.high %v76_v56, %v80_v57 }
  0x5b   :  { %1002 = vmatmul.mubr.bf16.gmra.mrb[28].mxu0 %v1529_v2 }
  0x5c   :  { %1099 = vmatmul.mubr.bf16.gmra.mrb[28].mxu1 %v1531_v3  ;;  %1139 = vmatprep.mubr.bf16.mxu0 %v1478_v4 }
  0x5d   :  { %1236 = vmatprep.mubr.bf16.mxu1 %v1480_v5 }
  0x63   :  { %1140 = vmatmul.mubr.bf16.vlgmr.msra.gmra.mrb[32].mxu0 %v1477_v10 }
  0x64   :  { %1237 = vmatmul.mubr.bf16.vlgmr.msra.gmra.mrb[32].mxu1 %v1479_v11  ;;  %1147 = vmatprep.mubr.bf16.mxu0 %v1486_v12 }
  0x65   :  { %1244 = vmatprep.mubr.bf16.mxu1 %v1488_v13 }
  0x6b   :  { %1148 = vmatmul.mubr.bf16.gmra.mrb[36].mxu0 %v1485_v18 }
  0x6c   :  { %1245 = vmatmul.mubr.bf16.gmra.mrb[36].mxu1 %v1487_v19  ;;  %1155 = vmatprep.mubr.bf16.mxu0 %v1494_v20 }
  0x6d   :  { %1252 = vmatprep.mubr.bf16.mxu1 %v1496_v21 }
  0x73   :  { %1156 = vmatmul.mubr.bf16.gmra.mrb[40].mxu0 %v1493_v26 }
  0x74   :  { %1253 = vmatmul.mubr.bf16.gmra.mrb[40].mxu1 %v1495_v27  ;;  %1163 = vmatprep.mubr.bf16.mxu0 %v1502_v28 }
  0x75   :  { %1260 = vmatprep.mubr.bf16.mxu1 %v1504_v29 }
  0x7b   :  { %1164 = vmatmul.mubr.bf16.gmra.mrb[44].mxu0 %v1501_v34 }
  0x7c   :  { %1261 = vmatmul.mubr.bf16.gmra.mrb[44].mxu1 %v1503_v35  ;;  %1171 = vmatprep.mubr.bf16.mxu0 %v1510_v36 }
  0x7d   :  { %1268 = vmatprep.mubr.bf16.mxu1 %v1512_v37 }
  0x83   :  { %1172 = vmatmul.mubr.bf16.gmra.mrb[48].mxu0 %v1509_v42 }
  0x84   :  { %1269 = vmatmul.mubr.bf16.gmra.mrb[48].mxu1 %v1511_v43  ;;  %1179 = vmatprep.mubr.bf16.mxu0 %v1518_v44 }
  0x85   :  { %1276 = vmatprep.mubr.bf16.mxu1 %v1520_v45 }
  0x8b   :  { %1180 = vmatmul.mubr.bf16.gmra.mrb[52].mxu0 %v1517_v50 }
  0x8c   :  { %1277 = vmatmul.mubr.bf16.gmra.mrb[52].mxu1 %v1519_v51  ;;  %1187 = vmatprep.mubr.bf16.mxu0 %v1526_v52 }
  0x8d   :  { %1284 = vmatprep.mubr.bf16.mxu1 %v1528_v53 }
  0x93   :  { %1188 = vmatmul.mubr.bf16.gmra.mrb[56].mxu0 %v1525_v58 }
  0x94   :  { %1285 = vmatmul.mubr.bf16.gmra.mrb[56].mxu1 %v1527_v59  ;;  %1195 = vmatprep.mubr.bf16.mxu0 %v1534_v60 }
  0x95   :  { %1292 = vmatprep.mubr.bf16.mxu1 %v1536_v61 }
  0x9b   :  { %1196 = vmatmul.mubr.bf16.gmra.mrb[60].mxu0 %v1533_v62 }
  0x9c   :  { %1293 = vmatmul.mubr.bf16.gmra.mrb[60].mxu1 %v1535_v63 }
  0xf6   :  { %v1697_v0 = vpop.f32.mrb[0].mxu0 }
  0xf7   :  { %v1761_v1 = vpop.f32.mrb[0].mxu1  ;;  %v1698_v2 = vpop.f32.mrb[1].mxu0 }
  0xf8   :  { %v1699_v3 = vadd.f32 %v1698_v2, %v1697_v0  ;;  %v1762_v4 = vpop.f32.mrb[1].mxu1  ;;  %v1700_v5 = vpop.f32.mrb[2].mxu0 }
  0xf9   :  { %v1763_v6 = vadd.f32 %v1762_v4, %v1761_v1  ;;  %v1764_v7 = vpop.f32.mrb[2].mxu1  ;;  %v1701_v8 = vpop.f32.mrb[3].mxu0 }
  0xfa   :  { %v1702_v9 = vadd.f32 %v1701_v8, %v1700_v5  ;;  %v1765_v10 = vpop.f32.mrb[3].mxu1 }
  0xfb   :  { %v2410_v11 = vadd.f32 %v1763_v6, %v1699_v3  ;;  %v1766_v12 = vadd.f32 %v1765_v10, %v1764_v7 }
  0xfd   :  { %v2412_v13 = vadd.f32 %v1766_v12, %v1702_v9 }
  0xfe   :  { %v1703_v14 = vpop.f32.mrb[4].mxu0 }
  0xff   :  { %v1767_v15 = vpop.f32.mrb[4].mxu1  ;;  %v1704_v16 = vpop.f32.mrb[5].mxu0 }
 0x100   :  { %v1705_v17 = vadd.f32 %v1704_v16, %v1703_v14  ;;  %v1768_v18 = vpop.f32.mrb[5].mxu1  ;;  %v1706_v19 = vpop.f32.mrb[6].mxu0 }
 0x101   :  { %v1769_v20 = vadd.f32 %v1768_v18, %v1767_v15  ;;  %v1770_v21 = vpop.f32.mrb[6].mxu1  ;;  %v1707_v22 = vpop.f32.mrb[7].mxu0 }
 0x102   :  { %v1708_v23 = vadd.f32 %v1707_v22, %v1706_v19  ;;  %v1771_v24 = vpop.f32.mrb[7].mxu1 }
 0x103   :  { %v2414_v25 = vadd.f32 %v1769_v20, %v1705_v17  ;;  %v1772_v26 = vadd.f32 %v1771_v24, %v1770_v21 }
 0x105   :  { %v2416_v27 = vadd.f32 %v1772_v26, %v1708_v23 }
 0x106   :  { %v1709_v28 = vpop.f32.mrb[8].mxu0 }
 0x107   :  { %v1773_v29 = vpop.f32.mrb[8].mxu1  ;;  %v1710_v30 = vpop.f32.mrb[9].mxu0 }
 0x108   :  { %v1711_v31 = vadd.f32 %v1710_v30, %v1709_v28  ;;  %v1774_v32 = vpop.f32.mrb[9].mxu1  ;;  %v1712_v33 = vpop.f32.mrb[10].mxu0 }
 0x109   :  { %v1775_v34 = vadd.f32 %v1774_v32, %v1773_v29  ;;  %v1776_v35 = vpop.f32.mrb[10].mxu1  ;;  %v1713_v36 = vpop.f32.mrb[11].mxu0 }
 0x10a   :  { %v1714_v37 = vadd.f32 %v1713_v36, %v1712_v33  ;;  %v1777_v38 = vpop.f32.mrb[11].mxu1 }
 0x10b   :  { %v2418_v39 = vadd.f32 %v1775_v34, %v1711_v31  ;;  %v1778_v40 = vadd.f32 %v1777_v38, %v1776_v35 }
 0x10d   :  { %v2420_v41 = vadd.f32 %v1778_v40, %v1714_v37 }
 0x10e   :  { %v1715_v42 = vpop.f32.mrb[12].mxu0 }
 0x10f   :  { %v1779_v43 = vpop.f32.mrb[12].mxu1  ;;  %v1716_v44 = vpop.f32.mrb[13].mxu0 }
 0x110   :  { %v1717_v45 = vadd.f32 %v1716_v44, %v1715_v42  ;;  %v1780_v46 = vpop.f32.mrb[13].mxu1  ;;  %v1718_v47 = vpop.f32.mrb[14].mxu0 }
 0x111   :  { %v1781_v48 = vadd.f32 %v1780_v46, %v1779_v43  ;;  %v1782_v49 = vpop.f32.mrb[14].mxu1  ;;  %v1719_v50 = vpop.f32.mrb[15].mxu0 }
 0x112   :  { %v1720_v51 = vadd.f32 %v1719_v50, %v1718_v47  ;;  %v1783_v52 = vpop.f32.mrb[15].mxu1 }
 0x113   :  { %v2422_v53 = vadd.f32 %v1781_v48, %v1717_v45  ;;  %v1784_v54 = vadd.f32 %v1783_v52, %v1782_v49 }
 0x115   :  { %v2424_v55 = vadd.f32 %v1784_v54, %v1720_v51 }
 0x116   :  { %v1721_v56 = vpop.f32.mrb[16].mxu0 }
 0x117   :  { %v1785_v57 = vpop.f32.mrb[16].mxu1  ;;  %v1722_v58 = vpop.f32.mrb[17].mxu0 }
 0x118   :  { %v1723_v59 = vadd.f32 %v1722_v58, %v1721_v56  ;;  %v1786_v60 = vpop.f32.mrb[17].mxu1  ;;  %v1724_v61 = vpop.f32.mrb[18].mxu0 }
 0x119   :  { %v1787_v62 = vadd.f32 %v1786_v60, %v1785_v57  ;;  %v1788_v63 = vpop.f32.mrb[18].mxu1  ;;  %v1725_v0 = vpop.f32.mrb[19].mxu0 }
 0x11a   :  { %v1726_v1 = vadd.f32 %v1725_v0, %v1724_v61  ;;  %v1789_v2 = vpop.f32.mrb[19].mxu1 }
 0x11b   :  { %v2426_v3 = vadd.f32 %v1787_v62, %v1723_v59  ;;  %v1790_v4 = vadd.f32 %v1789_v2, %v1788_v63 }
 0x11d   :  { %v2428_v5 = vadd.f32 %v1790_v4, %v1726_v1 }
 0x11e   :  { %v1727_v6 = vpop.f32.mrb[20].mxu0 }
 0x11f   :  { %v1791_v7 = vpop.f32.mrb[20].mxu1  ;;  %v1728_v8 = vpop.f32.mrb[21].mxu0 }
 0x120   :  { %v1729_v9 = vadd.f32 %v1728_v8, %v1727_v6  ;;  %v1792_v10 = vpop.f32.mrb[21].mxu1  ;;  %v1730_v12 = vpop.f32.mrb[22].mxu0  ;;  %v2446_v8 = vld [vmem:[%s2508_s2] ss:$0 sm:$0xff] }
 0x121   :  { %v1793_v14 = vadd.f32 %v1792_v10, %v1791_v7  ;;  %v1794_v15 = vpop.f32.mrb[22].mxu1  ;;  %v1731_v16 = vpop.f32.mrb[23].mxu0 }
 0x122   :  { %v1732_v17 = vadd.f32 %v1731_v16, %v1730_v12  ;;  %v1795_v18 = vpop.f32.mrb[23].mxu1 }
 0x123   :  { %v2430_v19 = vadd.f32 %v1793_v14, %v1729_v9  ;;  %v1796_v20 = vadd.f32 %v1795_v18, %v1794_v15 }
 0x125   :  { %v2432_v21 = vadd.f32 %v1796_v20, %v1732_v17 }
 0x126   :  { %v1733_v22 = vpop.f32.mrb[24].mxu0 }
 0x127   :  { %v1797_v23 = vpop.f32.mrb[24].mxu1  ;;  %v1734_v24 = vpop.f32.mrb[25].mxu0 }
 0x128   :  { %v1735_v26 = vadd.f32 %v1734_v24, %v1733_v22  ;;  %v1798_v28 = vpop.f32.mrb[25].mxu1  ;;  %v1736_v29 = vpop.f32.mrb[26].mxu0 }
 0x129   :  { %v1799_v30 = vadd.f32 %v1798_v28, %v1797_v23  ;;  %v1800_v31 = vpop.f32.mrb[26].mxu1  ;;  %v1737_v32 = vpop.f32.mrb[27].mxu0 }
 0x12a   :  { %v1738_v33 = vadd.f32 %v1737_v32, %v1736_v29  ;;  %v1801_v34 = vpop.f32.mrb[27].mxu1 }
 0x12b   :  { %v2434_v35 = vadd.f32 %v1799_v30, %v1735_v26  ;;  %v1802_v36 = vadd.f32 %v1801_v34, %v1800_v31 }
 0x12d   :  { %v2436_v37 = vadd.f32 %v1802_v36, %v1738_v33 }
 0x12e   :  { %v1739_v38 = vpop.f32.mrb[28].mxu0 }
 0x12f   :  { %v1803_v40 = vpop.f32.mrb[28].mxu1  ;;  %v1740_v42 = vpop.f32.mrb[29].mxu0 }
 0x130   :  { %v1741_v43 = vadd.f32 %v1740_v42, %v1739_v38  ;;  %v1804_v44 = vpop.f32.mrb[29].mxu1  ;;  %v1742_v45 = vpop.f32.mrb[30].mxu0 }
 0x131   :  { %v1805_v46 = vadd.f32 %v1804_v44, %v1803_v40  ;;  %v1806_v47 = vpop.f32.mrb[30].mxu1  ;;  %v1743_v48 = vpop.f32.mrb[31].mxu0 }
 0x132   :  { %v1744_v49 = vadd.f32 %v1743_v48, %v1742_v45  ;;  %v1807_v50 = vpop.f32.mrb[31].mxu1 }
 0x133   :  { %v2438_v51 = vadd.f32 %v1805_v46, %v1741_v43  ;;  %v1808_v52 = vadd.f32 %v1807_v50, %v1806_v47 }
 0x135   :  { %v2440_v54 = vadd.f32 %v1808_v52, %v1744_v49 }
 0x136   :  { %v1825_v56 = vpop.f32.mrb[32].mxu0 }
 0x137   :  { %v1889_v57 = vpop.f32.mrb[32].mxu1  ;;  %v1826_v58 = vpop.f32.mrb[33].mxu0 }
 0x138   :  { %v1827_v59 = vadd.f32 %v1826_v58, %v1825_v56  ;;  %v1890_v60 = vpop.f32.mrb[33].mxu1  ;;  %v1828_v61 = vpop.f32.mrb[34].mxu0 }
 0x139   :  { %v1891_v62 = vadd.f32 %v1890_v60, %v1889_v57  ;;  %v1892_v63 = vpop.f32.mrb[34].mxu1  ;;  %v1829_v0 = vpop.f32.mrb[35].mxu0 }
 0x13a   :  { %v1142_v1 = vadd.f32 %v1827_v59, %v2410_v11  ;;  %v1830_v2 = vadd.f32 %v1829_v0, %v1828_v61  ;;  %v1893_v4 = vpop.f32.mrb[35].mxu1 }
 0x13b   :  { %v1894_v6 = vadd.f32 %v1893_v4, %v1892_v63 }
 0x13c   :  { %v1239_v7 = vadd.f32 %v1891_v62, %v1142_v1  ;;  %v1145_v9 = vadd.f32 %v1830_v2, %v2412_v13 }
 0x13e   :  { %v1242_v10 = vadd.f32 %v1894_v6, %v1145_v9  ;;  %v1831_v12 = vpop.f32.mrb[36].mxu0  ;;  %v1308_v14 = vadd.f32 %v2446_v8, %v1239_v7  ;;  %v1425_v15 = vmul.f32 %v1239_v7, %v1239_v7 }
 0x13f   :  { %v1895_v16 = vpop.f32.mrb[36].mxu1  ;;  %v1832_v17 = vpop.f32.mrb[37].mxu0 }
 0x140   :  { %v1309_v11 = vadd.f32 %v2446_v8, %v1242_v10  ;;  %v1404_v18 = vadd.f32 %v1242_v10, %v1239_v7  ;;  %v1426_v20 = vmul.f32 %v1242_v10, %v1242_v10  ;;  %v1833_v22 = vadd.f32 %v1832_v17, %v1831_v12  ;;  %v1896_v23 = vpop.f32.mrb[37].mxu1  ;;  %v1834_v24 = vpop.f32.mrb[38].mxu0 }
 0x141   :  { %v1897_v26 = vadd.f32 %v1896_v23, %v1895_v16  ;;  %v1898_v28 = vpop.f32.mrb[38].mxu1  ;;  %v1835_v29 = vpop.f32.mrb[39].mxu0 }
 0x142   :  { %v1637_v30 = vpack.c.bf16 %v1309_v11, %v1308_v14  ;;  %v1441_v31 = vadd.f32 %v1426_v20, %v1425_v15  ;;  %v1150_v13 = vadd.f32 %v1833_v22, %v2414_v25  ;;  %v1836_v32 = vadd.f32 %v1835_v29, %v1834_v24  ;;  %v1899_v33 = vpop.f32.mrb[39].mxu1 }
 0x143   :  { %v1900_v34 = vadd.f32 %v1899_v33, %v1898_v28 }
 0x144   :  { %1638 = vst [vmem:[%s2509_s3] sm:$0xff] %v1637_v30   ;;  %v1247_v36 = vadd.f32 %v1897_v26, %v1150_v13  ;;  %v1153_v38 = vadd.f32 %v1836_v32, %v2416_v27 }
 0x146   :  { %v1405_v40 = vadd.f32 %v1404_v18, %v1247_v36  ;;  %v1427_v42 = vmul.f32 %v1247_v36, %v1247_v36  ;;  %v1250_v43 = vadd.f32 %v1900_v34, %v1153_v38  ;;  %v1837_v44 = vpop.f32.mrb[40].mxu0  ;;  %v1310_v45 = vadd.f32 %v2446_v8, %v1247_v36 }
 0x147   :  { %v1901_v46 = vpop.f32.mrb[40].mxu1  ;;  %v1838_v47 = vpop.f32.mrb[41].mxu0 }
 0x148   :  { %v1442_v48 = vadd.f32 %v1441_v31, %v1427_v42  ;;  %v1311_v25 = vadd.f32 %v2446_v8, %v1250_v43  ;;  %v1406_v49 = vadd.f32 %v1405_v40, %v1250_v43  ;;  %v1428_v50 = vmul.f32 %v1250_v43, %v1250_v43  ;;  %v1902_v52 = vpop.f32.mrb[41].mxu1  ;;  %v1840_v56 = vpop.f32.mrb[42].mxu0 }
 0x149   :  { %v1839_v57 = vadd.f32 %v1838_v47, %v1837_v44  ;;  %v1903_v58 = vadd.f32 %v1902_v52, %v1901_v46  ;;  %v1904_v59 = vpop.f32.mrb[42].mxu1  ;;  %v1841_v60 = vpop.f32.mrb[43].mxu0 }
 0x14a   :  { %v1642_v27 = vpack.c.bf16 %v1311_v25, %v1310_v45  ;;  %v1443_v61 = vadd.f32 %v1442_v48, %v1428_v50  ;;  %v1842_v62 = vadd.f32 %v1841_v60, %v1840_v56  ;;  %v1905_v63 = vpop.f32.mrb[43].mxu1 }
 0x14b   :  { %v1158_v0 = vadd.f32 %v1839_v57, %v2418_v39  ;;  %v1906_v1 = vadd.f32 %v1905_v63, %v1904_v59 }
 0x14c   :  { %1674 = vst [vmem:[%s2509_s3 + $0x8] sm:$0xff] %v1642_v27   ;;  %v1161_v2 = vadd.f32 %v1842_v62, %v2420_v41 }
 0x14d   :  { %v1255_v4 = vadd.f32 %v1903_v58, %v1158_v0 }
 0x14e   :  { %v1258_v6 = vadd.f32 %v1906_v1, %v1161_v2  ;;  %v1843_v7 = vpop.f32.mrb[44].mxu0 }
 0x14f   :  { %v1407_v9 = vadd.f32 %v1406_v49, %v1255_v4  ;;  %v1429_v10 = vmul.f32 %v1255_v4, %v1255_v4  ;;  %v1907_v12 = vpop.f32.mrb[44].mxu1  ;;  %v1844_v14 = vpop.f32.mrb[45].mxu0  ;;  %v1312_v15 = vadd.f32 %v2446_v8, %v1255_v4 }
 0x150   :  { %v1313_v16 = vadd.f32 %v2446_v8, %v1258_v6  ;;  %v1430_v17 = vmul.f32 %v1258_v6, %v1258_v6  ;;  %v1845_v39 = vadd.f32 %v1844_v14, %v1843_v7  ;;  %v1908_v11 = vpop.f32.mrb[45].mxu1  ;;  %v1846_v18 = vpop.f32.mrb[46].mxu0 }
 0x151   :  { %v1444_v20 = vadd.f32 %v1443_v61, %v1429_v10  ;;  %v1408_v22 = vadd.f32 %v1407_v9, %v1258_v6  ;;  %v1909_v23 = vadd.f32 %v1908_v11, %v1907_v12  ;;  %v1910_v24 = vpop.f32.mrb[46].mxu1  ;;  %v1847_v41 = vpop.f32.mrb[47].mxu0 }
 0x152   :  { %v1647_v26 = vpack.c.bf16 %v1313_v16, %v1312_v15  ;;  %v1166_v28 = vadd.f32 %v1845_v39, %v2422_v53  ;;  %v1848_v29 = vadd.f32 %v1847_v41, %v1846_v18  ;;  %v1911_v30 = vpop.f32.mrb[47].mxu1 }
 0x153   :  { %v1445_v31 = vadd.f32 %v1444_v20, %v1430_v17  ;;  %v1912_v13 = vadd.f32 %v1911_v30, %v1910_v24 }
 0x154   :  { %1675 = vst [vmem:[%s2509_s3 + $0x10] sm:$0xff] %v1647_v26   ;;  %v1263_v32 = vadd.f32 %v1909_v23, %v1166_v28  ;;  %v1169_v33 = vadd.f32 %v1848_v29, %v2424_v55 }
 0x156   :  { %v1409_v34 = vadd.f32 %v1408_v22, %v1263_v32  ;;  %v1431_v36 = vmul.f32 %v1263_v32, %v1263_v32  ;;  %v1266_v38 = vadd.f32 %v1912_v13, %v1169_v33  ;;  %v1849_v40 = vpop.f32.mrb[48].mxu0  ;;  %v1314_v42 = vadd.f32 %v2446_v8, %v1263_v32 }
 0x157   :  { %v1913_v43 = vpop.f32.mrb[48].mxu1  ;;  %v1850_v44 = vpop.f32.mrb[49].mxu0 }
 0x158   :  { %v1446_v53 = vadd.f32 %v1445_v31, %v1431_v36  ;;  %v1315_v45 = vadd.f32 %v2446_v8, %v1266_v38  ;;  %v1410_v46 = vadd.f32 %v1409_v34, %v1266_v38  ;;  %v1432_v47 = vmul.f32 %v1266_v38, %v1266_v38  ;;  %v1914_v48 = vpop.f32.mrb[49].mxu1  ;;  %v1852_v25 = vpop.f32.mrb[50].mxu0 }
 0x159   :  { %v1851_v49 = vadd.f32 %v1850_v44, %v1849_v40  ;;  %v1915_v50 = vadd.f32 %v1914_v48, %v1913_v43  ;;  %v1916_v52 = vpop.f32.mrb[50].mxu1  ;;  %v1853_v56 = vpop.f32.mrb[51].mxu0 }
 0x15a   :  { %v1652_v55 = vpack.c.bf16 %v1315_v45, %v1314_v42  ;;  %v1447_v57 = vadd.f32 %v1446_v53, %v1432_v47  ;;  %v1854_v58 = vadd.f32 %v1853_v56, %v1852_v25  ;;  %v1917_v59 = vpop.f32.mrb[51].mxu1 }
 0x15b   :  { %v1174_v60 = vadd.f32 %v1851_v49, %v2426_v3  ;;  %v1918_v27 = vadd.f32 %v1917_v59, %v1916_v52 }
 0x15c   :  { %1676 = vst [vmem:[%s2509_s3 + $0x18] sm:$0xff] %v1652_v55   ;;  %v1177_v61 = vadd.f32 %v1854_v58, %v2428_v5 }
 0x15d   :  { %v1271_v62 = vadd.f32 %v1915_v50, %v1174_v60 }
 0x15e   :  { %v1274_v63 = vadd.f32 %v1918_v27, %v1177_v61  ;;  %v1855_v0 = vpop.f32.mrb[52].mxu0 }
 0x15f   :  { %v1411_v1 = vadd.f32 %v1410_v46, %v1271_v62  ;;  %v1433_v2 = vmul.f32 %v1271_v62, %v1271_v62  ;;  %v1919_v4 = vpop.f32.mrb[52].mxu1  ;;  %v1856_v6 = vpop.f32.mrb[53].mxu0  ;;  %v1316_v7 = vadd.f32 %v2446_v8, %v1271_v62 }
 0x160   :  { %v1317_v9 = vadd.f32 %v2446_v8, %v1274_v63  ;;  %v1434_v10 = vmul.f32 %v1274_v63, %v1274_v63  ;;  %v1857_v3 = vadd.f32 %v1856_v6, %v1855_v0  ;;  %v1920_v12 = vpop.f32.mrb[53].mxu1  ;;  %v1858_v14 = vpop.f32.mrb[54].mxu0 }
 0x161   :  { %v1448_v15 = vadd.f32 %v1447_v57, %v1433_v2  ;;  %v1412_v16 = vadd.f32 %v1411_v1, %v1274_v63  ;;  %v1921_v17 = vadd.f32 %v1920_v12, %v1919_v4  ;;  %v1922_v39 = vpop.f32.mrb[54].mxu1  ;;  %v1859_v5 = vpop.f32.mrb[55].mxu0 }
 0x162   :  { %v1657_v11 = vpack.c.bf16 %v1317_v9, %v1316_v7  ;;  %v1182_v18 = vadd.f32 %v1857_v3, %v2430_v19  ;;  %v1860_v20 = vadd.f32 %v1859_v5, %v1858_v14  ;;  %v1923_v22 = vpop.f32.mrb[55].mxu1 }
 0x163   :  { %v1449_v23 = vadd.f32 %v1448_v15, %v1434_v10  ;;  %v1924_v24 = vadd.f32 %v1923_v22, %v1922_v39 }
 0x164   :  { %1677 = vst [vmem:[%s2509_s3 + $0x20] sm:$0xff] %v1657_v11   ;;  %v1279_v41 = vadd.f32 %v1921_v17, %v1182_v18  ;;  %v1185_v26 = vadd.f32 %v1860_v20, %v2432_v21 }
 0x166   :  { %v1413_v28 = vadd.f32 %v1412_v16, %v1279_v41  ;;  %v1435_v29 = vmul.f32 %v1279_v41, %v1279_v41  ;;  %v1282_v30 = vadd.f32 %v1924_v24, %v1185_v26  ;;  %v1861_v31 = vpop.f32.mrb[56].mxu0  ;;  %v1318_v13 = vadd.f32 %v2446_v8, %v1279_v41 }
 0x167   :  { %v1925_v32 = vpop.f32.mrb[56].mxu1  ;;  %v1862_v33 = vpop.f32.mrb[57].mxu0 }
 0x168   :  { %v1450_v19 = vadd.f32 %v1449_v23, %v1435_v29  ;;  %v1319_v34 = vadd.f32 %v2446_v8, %v1282_v30  ;;  %v1414_v36 = vadd.f32 %v1413_v28, %v1282_v30  ;;  %v1436_v38 = vmul.f32 %v1282_v30, %v1282_v30  ;;  %v1926_v40 = vpop.f32.mrb[57].mxu1  ;;  %v1864_v42 = vpop.f32.mrb[58].mxu0 }
 0x169   :  { %v1863_v43 = vadd.f32 %v1862_v33, %v1861_v31  ;;  %v1927_v44 = vadd.f32 %v1926_v40, %v1925_v32  ;;  %v1928_v53 = vpop.f32.mrb[58].mxu1  ;;  %v1865_v45 = vpop.f32.mrb[59].mxu0 }
 0x16a   :  { %v1662_v21 = vpack.c.bf16 %v1319_v34, %v1318_v13  ;;  %v1451_v46 = vadd.f32 %v1450_v19, %v1436_v38  ;;  %v1866_v47 = vadd.f32 %v1865_v45, %v1864_v42  ;;  %v1929_v48 = vpop.f32.mrb[59].mxu1 }
 0x16b   :  { %v1190_v25 = vadd.f32 %v1863_v43, %v2434_v35  ;;  %v1930_v49 = vadd.f32 %v1929_v48, %v1928_v53 }
 0x16c   :  { %1678 = vst [vmem:[%s2509_s3 + $0x28] sm:$0xff] %v1662_v21   ;;  %v1193_v50 = vadd.f32 %v1866_v47, %v2436_v37 }
 0x16d   :  { %v1287_v52 = vadd.f32 %v1927_v44, %v1190_v25 }
 0x16e   :  { %v1290_v56 = vadd.f32 %v1930_v49, %v1193_v50  ;;  %v1867_v55 = vpop.f32.mrb[60].mxu0 }
 0x16f   :  { %v1415_v57 = vadd.f32 %v1414_v36, %v1287_v52  ;;  %v1437_v58 = vmul.f32 %v1287_v52, %v1287_v52  ;;  %v1931_v59 = vpop.f32.mrb[60].mxu1  ;;  %v1868_v60 = vpop.f32.mrb[61].mxu0  ;;  %v1320_v27 = vadd.f32 %v2446_v8, %v1287_v52 }
 0x170   :  { %v1321_v61 = vadd.f32 %v2446_v8, %v1290_v56  ;;  %v1438_v62 = vmul.f32 %v1290_v56, %v1290_v56  ;;  %v1869_v35 = vadd.f32 %v1868_v60, %v1867_v55  ;;  %v1932_v63 = vpop.f32.mrb[61].mxu1  ;;  %v1870_v0 = vpop.f32.mrb[62].mxu0 }
 0x171   :  { %v1452_v1 = vadd.f32 %v1451_v46, %v1437_v58  ;;  %v1416_v2 = vadd.f32 %v1415_v57, %v1290_v56  ;;  %v1933_v4 = vadd.f32 %v1932_v63, %v1931_v59  ;;  %v1934_v6 = vpop.f32.mrb[62].mxu1  ;;  %v1871_v37 = vpop.f32.mrb[63].mxu0 }
 0x172   :  { %v1667_v7 = vpack.c.bf16 %v1321_v61, %v1320_v27  ;;  %v1198_v9 = vadd.f32 %v1869_v35, %v2438_v51  ;;  %v1872_v10 = vadd.f32 %v1871_v37, %v1870_v0  ;;  %v1935_v3 = vpop.f32.mrb[63].mxu1 }
 0x173   :  { %v1453_v12 = vadd.f32 %v1452_v1, %v1438_v62  ;;  %v1936_v14 = vadd.f32 %v1935_v3, %v1934_v6 }
 0x174   :  { %1679 = vst [vmem:[%s2509_s3 + $0x30] sm:$0xff] %v1667_v7   ;;  %v1295_v15 = vadd.f32 %v1933_v4, %v1198_v9  ;;  %v1201_v16 = vadd.f32 %v1872_v10, %v2440_v54 }
 0x176   :  { %v1417_v17 = vadd.f32 %v1416_v2, %v1295_v15  ;;  %v1439_v39 = vmul.f32 %v1295_v15, %v1295_v15  ;;  %v1298_v5 = vadd.f32 %v1936_v14, %v1201_v16  ;;  %v1322_v11 = vadd.f32 %v2446_v8, %v1295_v15 }
 0x178   :  { %v1454_v18 = vadd.f32 %v1453_v12, %v1439_v39  ;;  %v1323_v20 = vadd.f32 %v2446_v8, %v1298_v5  ;;  %v1418_v51 = vadd.f32 %v1417_v17, %v1298_v5  ;;  %v1440_v22 = vmul.f32 %v1298_v5, %v1298_v5 }
 0x17a   :  { %v1672_v23 = vpack.c.bf16 %v1323_v20, %v1322_v11  ;;  %v1419_v24 = vrot.slane %v1418_v51, 4  ;;  %v1455_v41 = vadd.f32 %v1454_v18, %v1440_v22 }
 0x17c   :  { %1680 = vst [vmem:[%s2509_s3 + $0x38] sm:$0xff] %v1672_v23   ;;  %v1420_v26 = vadd.f32 %v1419_v24, %v1418_v51  ;;  %v1456_v28 = vrot.slane %v1455_v41, 4 }
 0x17e   :  { %v1421_v54 = vrot.slane %v1420_v26, 2  ;;  %v1457_v29 = vadd.f32 %v1456_v28, %v1455_v41 }
 0x180   :  { %v1422_v30 = vadd.f32 %v1421_v54, %v1420_v26  ;;  %v1458_v31 = vrot.slane %v1457_v29, 2 }
 0x182   :  { %v1423_v13 = vrot.slane %v1422_v30, 1  ;;  %v1459_v32 = vadd.f32 %v1458_v31, %v1457_v29 }
 0x184   :  { %v1460_v33 = vrot.slane %v1459_v32, 1  ;;  %v1424_v8 = vadd.f32 %v1423_v13, %v1422_v30 }
 0x186   :  { %v1461_v19 = vadd.f32 %v1460_v33, %v1459_v32 }
 0x188   :  { %v1463_v34 = vsel %vm1462_vm0, %v1424_v8, %v1461_v19 }
 0x189   :  { %1464 = vst [vmem:[%s2510_s4] sm:$0x3] %v1463_v34 }

// kernel: discriminator_forward.7
= control target key start
LH: loop header
LB: loop body
LE: loop exit
PB: predicated region body
PF: predicated region fallthrough
CT: control target
= control target key end

     0   :  { %vm2260_vm0 = vcmask 1040384   ;;  %s3975_s1 = inlined_call_operand.vmem [shape: bf16[2048,256], index: 1, kind: input, shape index: {}]   ;;  %s3976_s0 = inlined_call_operand.vmem [shape: bf16[32,2048], index: 0, kind: input, shape index: {}]   ;;  %s3977_s2 = inlined_call_operand.vmem [shape: f32[1,256], index: 2, kind: input, shape index: {}]   ;;  %s3978_s3 = inlined_call_operand.vmem [shape: bf16[32,256], index: 3, kind: output, shape index: {0}]   ;;  %s3979_s4 = inlined_call_operand.vmem [shape: f32[1,2,256], index: 4, kind: output, shape index: {1}]  }
   0x1   :  { %v2636_v0 = vld [vmem:[%s3975_s1 + $0x4] ss:$8 sps:$4 sm:$0xff]   ;;  %v2640_v2 = vld [vmem:[%s3975_s1] ss:$8 sps:$4 sm:$0xff]   ;;  %v2642_v4 = vld [vmem:[%s3975_s1 + $0x14] ss:$8 sps:$4 sm:$0xff]  }
   0x2   :  { %v2638_v1 = vld [vmem:[%s3975_s1 + $0x404] ss:$8 sps:$4 sm:$0xff]   ;;  %1744 = vmatprep.subr.bf16.mxu1 %v2636_v0  ;;  %v2641_v3 = vld [vmem:[%s3975_s1 + $0x400] ss:$8 sps:$4 sm:$0xff]   ;;  %v2644_v5 = vld [vmem:[%s3975_s1 + $0x414] ss:$8 sps:$4 sm:$0xff]  }
   0x3   :  { %1956 = vmatprep.subr.bf16.mxu0 %v2638_v1  ;;  %1745 = vmatpush1.bf16.msra.mxu1 %v2640_v2  ;;  %v2646_v6 = vld [vmem:[%s3975_s1 + $0x10] ss:$8 sps:$4 sm:$0xff]   ;;  %v2648_v8 = vld [vmem:[%s3975_s1 + $0x24] ss:$8 sps:$4 sm:$0xff]   ;;  %v2652_v10 = vld [vmem:[%s3975_s1 + $0x20] ss:$8 sps:$4 sm:$0xff]  }
   0x4   :  { %1957 = vmatpush1.bf16.msra.mxu0 %v2641_v3  ;;  %1746 = vmatprep.subr.bf16.mxu1 %v2642_v4  ;;  %v2647_v7 = vld [vmem:[%s3975_s1 + $0x410] ss:$8 sps:$4 sm:$0xff]   ;;  %v2650_v9 = vld [vmem:[%s3975_s1 + $0x424] ss:$8 sps:$4 sm:$0xff]   ;;  %v2653_v11 = vld [vmem:[%s3975_s1 + $0x420] ss:$8 sps:$4 sm:$0xff]  }
   0x5   :  { %1958 = vmatprep.subr.bf16.mxu0 %v2644_v5  ;;  %v2654_v12 = vld [vmem:[%s3975_s1 + $0x34] ss:$8 sps:$4 sm:$0xff]   ;;  %v2658_v14 = vld [vmem:[%s3975_s1 + $0x30] ss:$8 sps:$4 sm:$0xff]   ;;  %v2660_v16 = vld [vmem:[%s3975_s1 + $0x44] ss:$8 sps:$4 sm:$0xff]  }
   0x6   :  { %v2656_v13 = vld [vmem:[%s3975_s1 + $0x434] ss:$8 sps:$4 sm:$0xff]   ;;  %v2659_v15 = vld [vmem:[%s3975_s1 + $0x430] ss:$8 sps:$4 sm:$0xff]   ;;  %v2662_v17 = vld [vmem:[%s3975_s1 + $0x444] ss:$8 sps:$4 sm:$0xff]  }
   0x7   :  { %1747 = vmatpush1.bf16.msra.mxu1 %v2646_v6  ;;  %v2664_v18 = vld [vmem:[%s3975_s1 + $0x40] ss:$8 sps:$4 sm:$0xff]   ;;  %v2666_v20 = vld [vmem:[%s3975_s1 + $0x54] ss:$8 sps:$4 sm:$0xff]   ;;  %v2670_v22 = vld [vmem:[%s3975_s1 + $0x50] ss:$8 sps:$4 sm:$0xff]  }
   0x8   :  { %1959 = vmatpush1.bf16.msra.mxu0 %v2647_v7  ;;  %1748 = vmatprep.subr.bf16.mxu1 %v2648_v8  ;;  %v2665_v19 = vld [vmem:[%s3975_s1 + $0x440] ss:$8 sps:$4 sm:$0xff]   ;;  %v2668_v21 = vld [vmem:[%s3975_s1 + $0x454] ss:$8 sps:$4 sm:$0xff]   ;;  %v2671_v23 = vld [vmem:[%s3975_s1 + $0x450] ss:$8 sps:$4 sm:$0xff]  }
   0x9   :  { %1960 = vmatprep.subr.bf16.mxu0 %v2650_v9  ;;  %v2672_v24 = vld [vmem:[%s3975_s1 + $0x64] ss:$8 sps:$4 sm:$0xff]   ;;  %v2676_v26 = vld [vmem:[%s3975_s1 + $0x60] ss:$8 sps:$4 sm:$0xff]   ;;  %v2678_v28 = vld [vmem:[%s3975_s1 + $0x74] ss:$8 sps:$4 sm:$0xff]  }
   0xa   :  { %v2674_v25 = vld [vmem:[%s3975_s1 + $0x464] ss:$8 sps:$4 sm:$0xff]   ;;  %v2677_v27 = vld [vmem:[%s3975_s1 + $0x460] ss:$8 sps:$4 sm:$0xff]   ;;  %v2680_v29 = vld [vmem:[%s3975_s1 + $0x474] ss:$8 sps:$4 sm:$0xff]  }
   0xb   :  { %1749 = vmatpush1.bf16.msra.mxu1 %v2652_v10  ;;  %v2682_v30 = vld [vmem:[%s3975_s1 + $0x70] ss:$8 sps:$4 sm:$0xff]   ;;  %v2684_v32 = vld [vmem:[%s3975_s1 + $0x84] ss:$8 sps:$4 sm:$0xff]   ;;  %v2688_v34 = vld [vmem:[%s3975_s1 + $0x80] ss:$8 sps:$4 sm:$0xff]  }
   0xc   :  { %1961 = vmatpush1.bf16.msra.mxu0 %v2653_v11  ;;  %1750 = vmatprep.subr.bf16.mxu1 %v2654_v12  ;;  %v2683_v31 = vld [vmem:[%s3975_s1 + $0x470] ss:$8 sps:$4 sm:$0xff]   ;;  %v2686_v33 = vld [vmem:[%s3975_s1 + $0x484] ss:$8 sps:$4 sm:$0xff]   ;;  %v2689_v35 = vld [vmem:[%s3975_s1 + $0x480] ss:$8 sps:$4 sm:$0xff]  }
   0xd   :  { %1962 = vmatprep.subr.bf16.mxu0 %v2656_v13  ;;  %v2690_v36 = vld [vmem:[%s3975_s1 + $0x94] ss:$8 sps:$4 sm:$0xff]   ;;  %v2694_v38 = vld [vmem:[%s3975_s1 + $0x90] ss:$8 sps:$4 sm:$0xff]   ;;  %v2696_v40 = vld [vmem:[%s3975_s1 + $0xa4] ss:$8 sps:$4 sm:$0xff]  }
   0xe   :  { %v2692_v37 = vld [vmem:[%s3975_s1 + $0x494] ss:$8 sps:$4 sm:$0xff]   ;;  %v2695_v39 = vld [vmem:[%s3975_s1 + $0x490] ss:$8 sps:$4 sm:$0xff]   ;;  %v2698_v41 = vld [vmem:[%s3975_s1 + $0x4a4] ss:$8 sps:$4 sm:$0xff]  }
   0xf   :  { %1751 = vmatpush1.bf16.msra.mxu1 %v2658_v14  ;;  %v2700_v42 = vld [vmem:[%s3975_s1 + $0xa0] ss:$8 sps:$4 sm:$0xff]   ;;  %v2702_v44 = vld [vmem:[%s3975_s1 + $0xb4] ss:$8 sps:$4 sm:$0xff]   ;;  %v2706_v46 = vld [vmem:[%s3975_s1 + $0xb0] ss:$8 sps:$4 sm:$0xff]  }
  0x10   :  { %1963 = vmatpush1.bf16.msra.mxu0 %v2659_v15  ;;  %1752 = vmatprep.subr.bf16.mxu1 %v2660_v16  ;;  %v2701_v43 = vld [vmem:[%s3975_s1 + $0x4a0] ss:$8 sps:$4 sm:$0xff]   ;;  %v2704_v45 = vld [vmem:[%s3975_s1 + $0x4b4] ss:$8 sps:$4 sm:$0xff]   ;;  %v2707_v47 = vld [vmem:[%s3975_s1 + $0x4b0] ss:$8 sps:$4 sm:$0xff]  }
  0x11   :  { %1964 = vmatprep.subr.bf16.mxu0 %v2662_v17  ;;  %v16_v48 = vld [vmem:[%s3976_s0] sm:$0xff]  ;;  %v2714_v58 = vld [vmem:[%s3975_s1 + $0xd4] ss:$8 sps:$4 sm:$0xff]   ;;  %v2718_v60 = vld [vmem:[%s3975_s1 + $0xd0] ss:$8 sps:$4 sm:$0xff]  }
  0x12   :  { %v24_v49 = vld [vmem:[%s3976_s0 + $0x40] sm:$0xff]  ;;  %v2716_v59 = vld [vmem:[%s3975_s1 + $0x4d4] ss:$8 sps:$4 sm:$0xff]   ;;  %v2719_v61 = vld [vmem:[%s3975_s1 + $0x4d0] ss:$8 sps:$4 sm:$0xff]  }
  0x13   :  { %1753 = vmatpush1.bf16.msra.mxu1 %v2664_v18  ;;  %v2708_v50 = vld [vmem:[%s3975_s1 + $0xc4] ss:$8 sps:$4 sm:$0xff]   ;;  %v2284_v52 = vcombine.high %v16_v48, %v24_v49  ;;  %v2712_v56 = vld [vmem:[%s3975_s1 + $0xc0] ss:$8 sps:$4 sm:$0xff]   ;;  %v2726_v2 = vld [vmem:[%s3975_s1 + $0xf4] ss:$8 sps:$4 sm:$0xff]   ;;  %v2283_v8 = vcombine.low %v16_v48, %v24_v49 }
  0x14   :  { %1965 = vmatpush1.bf16.msra.mxu0 %v2665_v19  ;;  %1754 = vmatprep.subr.bf16.mxu1 %v2666_v20  ;;  %v2710_v51 = vld [vmem:[%s3975_s1 + $0x4c4] ss:$8 sps:$4 sm:$0xff]   ;;  %v2713_v57 = vld [vmem:[%s3975_s1 + $0x4c0] ss:$8 sps:$4 sm:$0xff]   ;;  %v2728_v3 = vld [vmem:[%s3975_s1 + $0x4f4] ss:$8 sps:$4 sm:$0xff]  }
  0x15   :  { %1966 = vmatprep.subr.bf16.mxu0 %v2668_v21  ;;  %v20_v53 = vld [vmem:[%s3976_s0 + $0x20] sm:$0xff]  ;;  %1776 = vmatprep.mubr.bf16.mxu1 %v2284_v52  ;;  %v2730_v4 = vld [vmem:[%s3975_s1 + $0xf0] ss:$8 sps:$4 sm:$0xff]   ;;  %v2740_v12 = vld [vmem:[%s3975_s1 + $0x114] ss:$8 sps:$4 sm:$0xff]  }
  0x16   :  { %v28_v54 = vld [vmem:[%s3976_s0 + $0x60] sm:$0xff]  ;;  %v2731_v5 = vld [vmem:[%s3975_s1 + $0x4f0] ss:$8 sps:$4 sm:$0xff]   ;;  %v2743_v13 = vld [vmem:[%s3975_s1 + $0x514] ss:$8 sps:$4 sm:$0xff]  }
  0x17   :  { %1755 = vmatpush1.bf16.msra.mxu1 %v2670_v22  ;;  %v2292_v55 = vcombine.high %v20_v53, %v28_v54  ;;  %v2720_v62 = vld [vmem:[%s3975_s1 + $0xe4] ss:$8 sps:$4 sm:$0xff]   ;;  %v2724_v0 = vld [vmem:[%s3975_s1 + $0xe0] ss:$8 sps:$4 sm:$0xff]   ;;  %v2291_v10 = vcombine.low %v20_v53, %v28_v54  ;;  %v2738_v14 = vld [vmem:[%s3975_s1 + $0x110] ss:$8 sps:$4 sm:$0xff]  }
  0x18   :  { %1967 = vmatpush1.bf16.msra.mxu0 %v2671_v23  ;;  %1756 = vmatprep.subr.bf16.mxu1 %v2672_v24  ;;  %v2722_v63 = vld [vmem:[%s3975_s1 + $0x4e4] ss:$8 sps:$4 sm:$0xff]   ;;  %v2725_v1 = vld [vmem:[%s3975_s1 + $0x4e0] ss:$8 sps:$4 sm:$0xff]   ;;  %v2741_v15 = vld [vmem:[%s3975_s1 + $0x510] ss:$8 sps:$4 sm:$0xff]  }
  0x19   :  { %1968 = vmatprep.subr.bf16.mxu0 %v2674_v25  ;;  %1988 = vmatprep.mubr.bf16.mxu0 %v2292_v55  ;;  %v2734_v6 = vld [vmem:[%s3975_s1 + $0x104] ss:$8 sps:$4 sm:$0xff]   ;;  %v2732_v9 = vld [vmem:[%s3975_s1 + $0x100] ss:$8 sps:$4 sm:$0xff]   ;;  %v2752_v20 = vld [vmem:[%s3975_s1 + $0x134] ss:$8 sps:$4 sm:$0xff]  }
  0x1a   :  { %v2737_v7 = vld [vmem:[%s3975_s1 + $0x504] ss:$8 sps:$4 sm:$0xff]   ;;  %v2735_v11 = vld [vmem:[%s3975_s1 + $0x500] ss:$8 sps:$4 sm:$0xff]   ;;  %v2755_v21 = vld [vmem:[%s3975_s1 + $0x534] ss:$8 sps:$4 sm:$0xff]  }
  0x1b   :  { %1757 = vmatpush1.bf16.msra.mxu1 %v2676_v26  ;;  %v2746_v16 = vld [vmem:[%s3975_s1 + $0x124] ss:$8 sps:$4 sm:$0xff]   ;;  %v2744_v18 = vld [vmem:[%s3975_s1 + $0x120] ss:$8 sps:$4 sm:$0xff]   ;;  %v2750_v22 = vld [vmem:[%s3975_s1 + $0x130] ss:$8 sps:$4 sm:$0xff]  }
  0x1c   :  { %1969 = vmatpush1.bf16.msra.mxu0 %v2677_v27  ;;  %1758 = vmatprep.subr.bf16.mxu1 %v2678_v28  ;;  %v2749_v17 = vld [vmem:[%s3975_s1 + $0x524] ss:$8 sps:$4 sm:$0xff]   ;;  %v2747_v19 = vld [vmem:[%s3975_s1 + $0x520] ss:$8 sps:$4 sm:$0xff]   ;;  %v2753_v23 = vld [vmem:[%s3975_s1 + $0x530] ss:$8 sps:$4 sm:$0xff]  }
  0x1d   :  { %1970 = vmatprep.subr.bf16.mxu0 %v2680_v29  ;;  %v2758_v24 = vld [vmem:[%s3975_s1 + $0x144] ss:$8 sps:$4 sm:$0xff]   ;;  %v2756_v26 = vld [vmem:[%s3975_s1 + $0x140] ss:$8 sps:$4 sm:$0xff]   ;;  %v2764_v28 = vld [vmem:[%s3975_s1 + $0x154] ss:$8 sps:$4 sm:$0xff]  }
  0x1e   :  { %v2761_v25 = vld [vmem:[%s3975_s1 + $0x544] ss:$8 sps:$4 sm:$0xff]   ;;  %v2759_v27 = vld [vmem:[%s3975_s1 + $0x540] ss:$8 sps:$4 sm:$0xff]   ;;  %v2767_v29 = vld [vmem:[%s3975_s1 + $0x554] ss:$8 sps:$4 sm:$0xff]  }
  0x1f   :  { %1759 = vmatpush1.bf16.msra.mxu1 %v2682_v30  ;;  %v32_v30 = vld [vmem:[%s3976_s0 + $0x80] sm:$0xff]  ;;  %v3366_v49 = vld [vmem:[%s3976_s0 + $0x28] sm:$0xff]  ;;  %v2777_v52 = vld [vmem:[%s3975_s1 + $0x570] ss:$8 sps:$4 sm:$0xff]  }
  0x20   :  { %1971 = vmatpush1.bf16.msra.mxu0 %v2683_v31  ;;  %1760 = vmatprep.subr.bf16.mxu1 %v2684_v32  ;;  %v40_v31 = vld [vmem:[%s3976_s0 + $0xc0] sm:$0xff]  ;;  %v2762_v32 = vld [vmem:[%s3975_s1 + $0x150] ss:$8 sps:$4 sm:$0xff]  }
  0x21   :  { %1972 = vmatprep.subr.bf16.mxu0 %v2686_v33  ;;  %v2300_v33 = vcombine.high %v32_v30, %v40_v31  ;;  %v2782_v54 = vld [vmem:[%s3975_s1 + $0x184] ss:$8 sps:$4 sm:$0xff]  }
  0x22   :  { %v2785_v55 = vld [vmem:[%s3975_s1 + $0x584] ss:$8 sps:$4 sm:$0xff]  }
  0x23   :  { %1761 = vmatpush1.bf16.msra.mxu1 %v2688_v34  ;;  %v2765_v34 = vld [vmem:[%s3975_s1 + $0x550] ss:$8 sps:$4 sm:$0xff]  }
  0x24   :  { %1973 = vmatpush1.bf16.msra.mxu0 %v2689_v35  ;;  %1762 = vmatprep.subr.bf16.mxu1 %v2690_v36  ;;  %v36_v35 = vld [vmem:[%s3976_s0 + $0xa0] sm:$0xff] }
  0x25   :  { %1974 = vmatprep.subr.bf16.mxu0 %v2692_v37  ;;  %v44_v36 = vld [vmem:[%s3976_s0 + $0xe0] sm:$0xff]  ;;  %v2299_v37 = vcombine.low %v32_v30, %v40_v31  ;;  %v2836_v30 = vld [vmem:[%s3975_s1 + $0x214] ss:$8 sps:$4 sm:$0xff]  }
  0x26   :  { %v2839_v31 = vld [vmem:[%s3975_s1 + $0x614] ss:$8 sps:$4 sm:$0xff]  }
  0x27   :  { %1763 = vmatpush1.bf16.msra.mxu1 %v2694_v38  ;;  %v2770_v38 = vld [vmem:[%s3975_s1 + $0x164] ss:$8 sps:$4 sm:$0xff]  }
  0x28   :  { %1975 = vmatpush1.bf16.msra.mxu0 %v2695_v39  ;;  %1764 = vmatprep.subr.bf16.mxu1 %v2696_v40  ;;  %v2308_v39 = vcombine.high %v36_v35, %v44_v36  ;;  %v2307_v40 = vcombine.low %v36_v35, %v44_v36  ;;  %v2834_v36 = vld [vmem:[%s3975_s1 + $0x210] ss:$8 sps:$4 sm:$0xff]  }
  0x29   :  { %1976 = vmatprep.subr.bf16.mxu0 %v2698_v41  ;;  %v2773_v41 = vld [vmem:[%s3975_s1 + $0x564] ss:$8 sps:$4 sm:$0xff]  }
  0x2b   :  { %1765 = vmatpush1.bf16.msra.mxu1 %v2700_v42  ;;  %v2768_v42 = vld [vmem:[%s3975_s1 + $0x160] ss:$8 sps:$4 sm:$0xff]  }
  0x2c   :  { %1977 = vmatpush1.bf16.msra.mxu0 %v2701_v43  ;;  %1766 = vmatprep.subr.bf16.mxu1 %v2702_v44  ;;  %v2771_v43 = vld [vmem:[%s3975_s1 + $0x560] ss:$8 sps:$4 sm:$0xff]  }
  0x2d   :  { %1978 = vmatprep.subr.bf16.mxu0 %v2704_v45  ;;  %v3348_v44 = vld [vmem:[%s3976_s0 + $0x8] sm:$0xff] }
  0x2e   :  { %v3353_v45 = vld [vmem:[%s3976_s0 + $0x48] sm:$0xff] }
  0x2f   :  { %1767 = vmatpush1.bf16.msra.mxu1 %v2706_v46  ;;  %v2776_v46 = vld [vmem:[%s3975_s1 + $0x174] ss:$8 sps:$4 sm:$0xff]   ;;  %v2286_v48 = vcombine.high %v3348_v44, %v3353_v45 }
  0x30   :  { %1979 = vmatpush1.bf16.msra.mxu0 %v2707_v47  ;;  %1768 = vmatprep.subr.bf16.mxu1 %v2708_v50  ;;  %v2779_v47 = vld [vmem:[%s3975_s1 + $0x574] ss:$8 sps:$4 sm:$0xff]   ;;  %v3371_v50 = vld [vmem:[%s3976_s0 + $0x68] sm:$0xff] }
  0x31   :  { %1980 = vmatprep.subr.bf16.mxu0 %v2710_v51  ;;  %v2774_v51 = vld [vmem:[%s3975_s1 + $0x170] ss:$8 sps:$4 sm:$0xff]   ;;  %v2294_v53 = vcombine.high %v3366_v49, %v3371_v50 }
  0x33   :  { %1769 = vmatpush1.bf16.msra.mxu1 %v2712_v56  ;;  %v2780_v56 = vld [vmem:[%s3975_s1 + $0x180] ss:$8 sps:$4 sm:$0xff]  }
  0x34   :  { %1981 = vmatpush1.bf16.msra.mxu0 %v2713_v57  ;;  %1770 = vmatprep.subr.bf16.mxu1 %v2714_v58  ;;  %v2783_v57 = vld [vmem:[%s3975_s1 + $0x580] ss:$8 sps:$4 sm:$0xff]   ;;  %v2788_v58 = vld [vmem:[%s3975_s1 + $0x194] ss:$8 sps:$4 sm:$0xff]  }
  0x35   :  { %1982 = vmatprep.subr.bf16.mxu0 %v2716_v59  ;;  %v2791_v59 = vld [vmem:[%s3975_s1 + $0x594] ss:$8 sps:$4 sm:$0xff]  }
  0x37   :  { %1771 = vmatpush1.bf16.msra.mxu1 %v2718_v60  ;;  %v2786_v60 = vld [vmem:[%s3975_s1 + $0x190] ss:$8 sps:$4 sm:$0xff]  }
  0x38   :  { %1983 = vmatpush1.bf16.msra.mxu0 %v2719_v61  ;;  %1772 = vmatprep.subr.bf16.mxu1 %v2720_v62  ;;  %v2789_v61 = vld [vmem:[%s3975_s1 + $0x590] ss:$8 sps:$4 sm:$0xff]   ;;  %v2794_v62 = vld [vmem:[%s3975_s1 + $0x1a4] ss:$8 sps:$4 sm:$0xff]  }
  0x39   :  { %1984 = vmatprep.subr.bf16.mxu0 %v2722_v63  ;;  %v2797_v63 = vld [vmem:[%s3975_s1 + $0x5a4] ss:$8 sps:$4 sm:$0xff]  }
  0x3b   :  { %1773 = vmatpush1.bf16.msra.mxu1 %v2724_v0  ;;  %v2792_v0 = vld [vmem:[%s3975_s1 + $0x1a0] ss:$8 sps:$4 sm:$0xff]  }
  0x3c   :  { %1985 = vmatpush1.bf16.msra.mxu0 %v2725_v1  ;;  %1774 = vmatprep.subr.bf16.mxu1 %v2726_v2  ;;  %v2795_v1 = vld [vmem:[%s3975_s1 + $0x5a0] ss:$8 sps:$4 sm:$0xff]   ;;  %v2800_v2 = vld [vmem:[%s3975_s1 + $0x1b4] ss:$8 sps:$4 sm:$0xff]  }
  0x3d   :  { %1986 = vmatprep.subr.bf16.mxu0 %v2728_v3  ;;  %v2803_v3 = vld [vmem:[%s3975_s1 + $0x5b4] ss:$8 sps:$4 sm:$0xff]  }
  0x3f   :  { %1775 = vmatpush1.bf16.msra.mxu1 %v2730_v4  ;;  %v2798_v4 = vld [vmem:[%s3975_s1 + $0x1b0] ss:$8 sps:$4 sm:$0xff]  }
  0x40   :  { %1987 = vmatpush1.bf16.msra.mxu0 %v2731_v5  ;;  %1797 = vmatprep.subr.bf16.mxu1 %v2734_v6  ;;  %v2801_v5 = vld [vmem:[%s3975_s1 + $0x5b0] ss:$8 sps:$4 sm:$0xff]   ;;  %v2806_v6 = vld [vmem:[%s3975_s1 + $0x1c4] ss:$8 sps:$4 sm:$0xff]  }
  0x41   :  { %2009 = vmatprep.subr.bf16.mxu0 %v2737_v7  ;;  %v2809_v7 = vld [vmem:[%s3975_s1 + $0x5c4] ss:$8 sps:$4 sm:$0xff]  }
  0x42   :  { %1777 = vmatmul.mubr.bf16.vlgmr.msra.gmra.mrb[0].mxu1 %v2283_v8  ;;  %v2804_v8 = vld [vmem:[%s3975_s1 + $0x1c0] ss:$8 sps:$4 sm:$0xff]  }
  0x43   :  { %1989 = vmatmul.mubr.bf16.vlgmr.msra.gmra.mrb[0].mxu0 %v2291_v10  ;;  %1798 = vmatpush1.bf16.msra.mxu1 %v2732_v9  ;;  %v2807_v9 = vld [vmem:[%s3975_s1 + $0x5c0] ss:$8 sps:$4 sm:$0xff]   ;;  %v2812_v10 = vld [vmem:[%s3975_s1 + $0x1d4] ss:$8 sps:$4 sm:$0xff]  }
  0x44   :  { %2010 = vmatpush1.bf16.msra.mxu0 %v2735_v11  ;;  %1799 = vmatprep.subr.bf16.mxu1 %v2740_v12  ;;  %v2815_v11 = vld [vmem:[%s3975_s1 + $0x5d4] ss:$8 sps:$4 sm:$0xff]   ;;  %v2810_v12 = vld [vmem:[%s3975_s1 + $0x1d0] ss:$8 sps:$4 sm:$0xff]  }
  0x45   :  { %2011 = vmatprep.subr.bf16.mxu0 %v2743_v13  ;;  %1786 = vmatprep.mubr.bf16.mxu1 %v2300_v33  ;;  %v2813_v13 = vld [vmem:[%s3975_s1 + $0x5d0] ss:$8 sps:$4 sm:$0xff]   ;;  %v45_v33 = vld [vmem:[%s3976_s0 + $0xe8] sm:$0xff] }
  0x46   :  { %1998 = vmatprep.mubr.bf16.mxu0 %v2308_v39  ;;  %v2845_v39 = vld [vmem:[%s3975_s1 + $0x624] ss:$8 sps:$4 sm:$0xff]  }
  0x47   :  { %1800 = vmatpush1.bf16.msra.mxu1 %v2738_v14  ;;  %v2818_v14 = vld [vmem:[%s3975_s1 + $0x1e4] ss:$8 sps:$4 sm:$0xff]  }
  0x48   :  { %2012 = vmatpush1.bf16.msra.mxu0 %v2741_v15  ;;  %1801 = vmatprep.subr.bf16.mxu1 %v2746_v16  ;;  %v2821_v15 = vld [vmem:[%s3975_s1 + $0x5e4] ss:$8 sps:$4 sm:$0xff]   ;;  %v2816_v16 = vld [vmem:[%s3975_s1 + $0x1e0] ss:$8 sps:$4 sm:$0xff]  }
  0x49   :  { %2013 = vmatprep.subr.bf16.mxu0 %v2749_v17  ;;  %v2819_v17 = vld [vmem:[%s3975_s1 + $0x5e0] ss:$8 sps:$4 sm:$0xff]  }
  0x4a   :  { %1787 = vmatmul.mubr.bf16.gmra.mrb[4].mxu1 %v2299_v37  ;;  %v2837_v37 = vld [vmem:[%s3975_s1 + $0x610] ss:$8 sps:$4 sm:$0xff]  }
  0x4b   :  { %1802 = vmatpush1.bf16.msra.mxu1 %v2744_v18  ;;  %1999 = vmatmul.mubr.bf16.gmra.mrb[4].mxu0 %v2307_v40  ;;  %v2824_v18 = vld [vmem:[%s3975_s1 + $0x1f4] ss:$8 sps:$4 sm:$0xff]   ;;  %v2840_v40 = vld [vmem:[%s3975_s1 + $0x220] ss:$8 sps:$4 sm:$0xff]  }
  0x4c   :  { %2014 = vmatpush1.bf16.msra.mxu0 %v2747_v19  ;;  %1803 = vmatprep.subr.bf16.mxu1 %v2752_v20  ;;  %v2827_v19 = vld [vmem:[%s3975_s1 + $0x5f4] ss:$8 sps:$4 sm:$0xff]   ;;  %v2822_v20 = vld [vmem:[%s3975_s1 + $0x1f0] ss:$8 sps:$4 sm:$0xff]  }
  0x4d   :  { %2015 = vmatprep.subr.bf16.mxu0 %v2755_v21  ;;  %1829 = vmatprep.mubr.bf16.mxu1 %v2286_v48  ;;  %v2825_v21 = vld [vmem:[%s3975_s1 + $0x5f0] ss:$8 sps:$4 sm:$0xff]   ;;  %v2848_v48 = vld [vmem:[%s3975_s1 + $0x234] ss:$8 sps:$4 sm:$0xff]  }
  0x4e   :  { %2041 = vmatprep.mubr.bf16.mxu0 %v2294_v53  ;;  %v2849_v53 = vld [vmem:[%s3975_s1 + $0x630] ss:$8 sps:$4 sm:$0xff]  }
  0x4f   :  { %1804 = vmatpush1.bf16.msra.mxu1 %v2750_v22  ;;  %v2830_v22 = vld [vmem:[%s3975_s1 + $0x204] ss:$8 sps:$4 sm:$0xff]  }
  0x50   :  { %2016 = vmatpush1.bf16.msra.mxu0 %v2753_v23  ;;  %1805 = vmatprep.subr.bf16.mxu1 %v2758_v24  ;;  %v2833_v23 = vld [vmem:[%s3975_s1 + $0x604] ss:$8 sps:$4 sm:$0xff]   ;;  %v2828_v24 = vld [vmem:[%s3975_s1 + $0x200] ss:$8 sps:$4 sm:$0xff]  }
  0x51   :  { %2017 = vmatprep.subr.bf16.mxu0 %v2761_v25  ;;  %v2831_v25 = vld [vmem:[%s3975_s1 + $0x600] ss:$8 sps:$4 sm:$0xff]  }
  0x53   :  { %1806 = vmatpush1.bf16.msra.mxu1 %v2756_v26  ;;  %v33_v26 = vld [vmem:[%s3976_s0 + $0x88] sm:$0xff] }
  0x54   :  { %2018 = vmatpush1.bf16.msra.mxu0 %v2759_v27  ;;  %1807 = vmatprep.subr.bf16.mxu1 %v2764_v28  ;;  %v2285_v27 = vcombine.low %v3348_v44, %v3353_v45  ;;  %v2293_v28 = vcombine.low %v3366_v49, %v3371_v50  ;;  %v3537_v45 = vld [vmem:[%s3976_s0 + $0x50] sm:$0xff] }
  0x55   :  { %2019 = vmatprep.subr.bf16.mxu0 %v2767_v29  ;;  %v41_v29 = vld [vmem:[%s3976_s0 + $0xc8] sm:$0xff]  ;;  %v2851_v49 = vld [vmem:[%s3975_s1 + $0x634] ss:$8 sps:$4 sm:$0xff]  }
  0x57   :  { %1808 = vmatpush1.bf16.msra.mxu1 %v2762_v32  ;;  %v37_v32 = vld [vmem:[%s3976_s0 + $0xa8] sm:$0xff] }
  0x58   :  { %2020 = vmatpush1.bf16.msra.mxu0 %v2765_v34  ;;  %1809 = vmatprep.subr.bf16.mxu1 %v2770_v38  ;;  %v2302_v34 = vcombine.high %v33_v26, %v41_v29  ;;  %v2310_v35 = vcombine.high %v37_v32, %v45_v33  ;;  %v2842_v38 = vld [vmem:[%s3975_s1 + $0x224] ss:$8 sps:$4 sm:$0xff]   ;;  %v2309_v44 = vcombine.low %v37_v32, %v45_v33  ;;  %v2912_v32 = vld [vmem:[%s3975_s1 + $0x2e0] ss:$8 sps:$4 sm:$0xff]  }
  0x59   :  { %2021 = vmatprep.subr.bf16.mxu0 %v2773_v41  ;;  %v2843_v41 = vld [vmem:[%s3975_s1 + $0x620] ss:$8 sps:$4 sm:$0xff]  }
  0x5a   :  { %v2915_v33 = vld [vmem:[%s3975_s1 + $0x6e0] ss:$8 sps:$4 sm:$0xff]  }
  0x5b   :  { %1810 = vmatpush1.bf16.msra.mxu1 %v2768_v42  ;;  %v3532_v42 = vld [vmem:[%s3976_s0 + $0x10] sm:$0xff] }
  0x5c   :  { %2022 = vmatpush1.bf16.msra.mxu0 %v2771_v43  ;;  %1811 = vmatprep.subr.bf16.mxu1 %v2776_v46  ;;  %v2301_v43 = vcombine.low %v33_v26, %v41_v29  ;;  %v3542_v46 = vld [vmem:[%s3976_s0 + $0x30] sm:$0xff]  ;;  %v2288_v50 = vcombine.high %v3532_v42, %v3537_v45 }
  0x5d   :  { %2023 = vmatprep.subr.bf16.mxu0 %v2779_v47  ;;  %v3547_v47 = vld [vmem:[%s3976_s0 + $0x70] sm:$0xff] }
  0x5e   :  { %v2908_v26 = vld [vmem:[%s3975_s1 + $0x2d4] ss:$8 sps:$4 sm:$0xff]   ;;  %v2909_v29 = vld [vmem:[%s3975_s1 + $0x6d0] ss:$8 sps:$4 sm:$0xff]  }
  0x5f   :  { %1812 = vmatpush1.bf16.msra.mxu1 %v2774_v51  ;;  %v2296_v51 = vcombine.high %v3542_v46, %v3547_v47 }
  0x60   :  { %2024 = vmatpush1.bf16.msra.mxu0 %v2777_v52  ;;  %1813 = vmatprep.subr.bf16.mxu1 %v2782_v54  ;;  %v2846_v52 = vld [vmem:[%s3975_s1 + $0x230] ss:$8 sps:$4 sm:$0xff]   ;;  %v2854_v54 = vld [vmem:[%s3975_s1 + $0x244] ss:$8 sps:$4 sm:$0xff]  }
  0x61   :  { %2025 = vmatprep.subr.bf16.mxu0 %v2785_v55  ;;  %v2857_v55 = vld [vmem:[%s3975_s1 + $0x644] ss:$8 sps:$4 sm:$0xff]  }
  0x63   :  { %1814 = vmatpush1.bf16.msra.mxu1 %v2780_v56  ;;  %v2852_v56 = vld [vmem:[%s3975_s1 + $0x240] ss:$8 sps:$4 sm:$0xff]  }
  0x64   :  { %2026 = vmatpush1.bf16.msra.mxu0 %v2783_v57  ;;  %1815 = vmatprep.subr.bf16.mxu1 %v2788_v58  ;;  %v2855_v57 = vld [vmem:[%s3975_s1 + $0x640] ss:$8 sps:$4 sm:$0xff]   ;;  %v2860_v58 = vld [vmem:[%s3975_s1 + $0x254] ss:$8 sps:$4 sm:$0xff]  }
  0x65   :  { %2027 = vmatprep.subr.bf16.mxu0 %v2791_v59  ;;  %v2863_v59 = vld [vmem:[%s3975_s1 + $0x654] ss:$8 sps:$4 sm:$0xff]  }
  0x67   :  { %1816 = vmatpush1.bf16.msra.mxu1 %v2786_v60  ;;  %v2858_v60 = vld [vmem:[%s3975_s1 + $0x250] ss:$8 sps:$4 sm:$0xff]  }
  0x68   :  { %2028 = vmatpush1.bf16.msra.mxu0 %v2789_v61  ;;  %1817 = vmatprep.subr.bf16.mxu1 %v2794_v62  ;;  %v2861_v61 = vld [vmem:[%s3975_s1 + $0x650] ss:$8 sps:$4 sm:$0xff]   ;;  %v2866_v62 = vld [vmem:[%s3975_s1 + $0x264] ss:$8 sps:$4 sm:$0xff]  }
  0x69   :  { %2029 = vmatprep.subr.bf16.mxu0 %v2797_v63  ;;  %v2869_v63 = vld [vmem:[%s3975_s1 + $0x664] ss:$8 sps:$4 sm:$0xff]  }
  0x6b   :  { %1818 = vmatpush1.bf16.msra.mxu1 %v2792_v0  ;;  %v2864_v0 = vld [vmem:[%s3975_s1 + $0x260] ss:$8 sps:$4 sm:$0xff]  }
  0x6c   :  { %2030 = vmatpush1.bf16.msra.mxu0 %v2795_v1  ;;  %1819 = vmatprep.subr.bf16.mxu1 %v2800_v2  ;;  %v2867_v1 = vld [vmem:[%s3975_s1 + $0x660] ss:$8 sps:$4 sm:$0xff]   ;;  %v2872_v2 = vld [vmem:[%s3975_s1 + $0x274] ss:$8 sps:$4 sm:$0xff]  }
  0x6d   :  { %2031 = vmatprep.subr.bf16.mxu0 %v2803_v3  ;;  %v2875_v3 = vld [vmem:[%s3975_s1 + $0x674] ss:$8 sps:$4 sm:$0xff]  }
  0x6f   :  { %1820 = vmatpush1.bf16.msra.mxu1 %v2798_v4  ;;  %v2870_v4 = vld [vmem:[%s3975_s1 + $0x270] ss:$8 sps:$4 sm:$0xff]  }
  0x70   :  { %2032 = vmatpush1.bf16.msra.mxu0 %v2801_v5  ;;  %1821 = vmatprep.subr.bf16.mxu1 %v2806_v6  ;;  %v2873_v5 = vld [vmem:[%s3975_s1 + $0x670] ss:$8 sps:$4 sm:$0xff]   ;;  %v2878_v6 = vld [vmem:[%s3975_s1 + $0x284] ss:$8 sps:$4 sm:$0xff]  }
  0x71   :  { %2033 = vmatprep.subr.bf16.mxu0 %v2809_v7  ;;  %v2881_v7 = vld [vmem:[%s3975_s1 + $0x684] ss:$8 sps:$4 sm:$0xff]  }
  0x73   :  { %1822 = vmatpush1.bf16.msra.mxu1 %v2804_v8  ;;  %v2876_v8 = vld [vmem:[%s3975_s1 + $0x280] ss:$8 sps:$4 sm:$0xff]  }
  0x74   :  { %2034 = vmatpush1.bf16.msra.mxu0 %v2807_v9  ;;  %1823 = vmatprep.subr.bf16.mxu1 %v2812_v10  ;;  %v2879_v9 = vld [vmem:[%s3975_s1 + $0x680] ss:$8 sps:$4 sm:$0xff]   ;;  %v2884_v10 = vld [vmem:[%s3975_s1 + $0x294] ss:$8 sps:$4 sm:$0xff]  }
  0x75   :  { %2035 = vmatprep.subr.bf16.mxu0 %v2815_v11  ;;  %v2887_v11 = vld [vmem:[%s3975_s1 + $0x694] ss:$8 sps:$4 sm:$0xff]  }
  0x77   :  { %1824 = vmatpush1.bf16.msra.mxu1 %v2810_v12  ;;  %v2882_v12 = vld [vmem:[%s3975_s1 + $0x290] ss:$8 sps:$4 sm:$0xff]  }
  0x78   :  { %2036 = vmatpush1.bf16.msra.mxu0 %v2813_v13  ;;  %1825 = vmatprep.subr.bf16.mxu1 %v2818_v14  ;;  %v2885_v13 = vld [vmem:[%s3975_s1 + $0x690] ss:$8 sps:$4 sm:$0xff]   ;;  %v2890_v14 = vld [vmem:[%s3975_s1 + $0x2a4] ss:$8 sps:$4 sm:$0xff]  }
  0x79   :  { %2037 = vmatprep.subr.bf16.mxu0 %v2821_v15  ;;  %v2893_v15 = vld [vmem:[%s3975_s1 + $0x6a4] ss:$8 sps:$4 sm:$0xff]  }
  0x7b   :  { %1826 = vmatpush1.bf16.msra.mxu1 %v2816_v16  ;;  %v2888_v16 = vld [vmem:[%s3975_s1 + $0x2a0] ss:$8 sps:$4 sm:$0xff]  }
  0x7c   :  { %2038 = vmatpush1.bf16.msra.mxu0 %v2819_v17  ;;  %1827 = vmatprep.subr.bf16.mxu1 %v2824_v18  ;;  %v2891_v17 = vld [vmem:[%s3975_s1 + $0x6a0] ss:$8 sps:$4 sm:$0xff]   ;;  %v2896_v18 = vld [vmem:[%s3975_s1 + $0x2b4] ss:$8 sps:$4 sm:$0xff]  }
  0x7d   :  { %2039 = vmatprep.subr.bf16.mxu0 %v2827_v19  ;;  %v2899_v19 = vld [vmem:[%s3975_s1 + $0x6b4] ss:$8 sps:$4 sm:$0xff]  }
  0x7f   :  { %1828 = vmatpush1.bf16.msra.mxu1 %v2822_v20  ;;  %v2894_v20 = vld [vmem:[%s3975_s1 + $0x2b0] ss:$8 sps:$4 sm:$0xff]  }
  0x80   :  { %2040 = vmatpush1.bf16.msra.mxu0 %v2825_v21  ;;  %1850 = vmatprep.subr.bf16.mxu1 %v2830_v22  ;;  %v2897_v21 = vld [vmem:[%s3975_s1 + $0x6b0] ss:$8 sps:$4 sm:$0xff]   ;;  %v2902_v22 = vld [vmem:[%s3975_s1 + $0x2c4] ss:$8 sps:$4 sm:$0xff]  }
  0x81   :  { %2062 = vmatprep.subr.bf16.mxu0 %v2833_v23  ;;  %v2905_v23 = vld [vmem:[%s3975_s1 + $0x6c4] ss:$8 sps:$4 sm:$0xff]  }
  0x82   :  { %1830 = vmatmul.mubr.bf16.vlgmr.msra.gmra.mrb[0].mxu1 %v2285_v27  ;;  %v2911_v27 = vld [vmem:[%s3975_s1 + $0x6d4] ss:$8 sps:$4 sm:$0xff]  }
  0x83   :  { %2042 = vmatmul.mubr.bf16.vlgmr.msra.gmra.mrb[0].mxu0 %v2293_v28  ;;  %1851 = vmatpush1.bf16.msra.mxu1 %v2828_v24  ;;  %v2900_v24 = vld [vmem:[%s3975_s1 + $0x2c0] ss:$8 sps:$4 sm:$0xff]   ;;  %v2906_v28 = vld [vmem:[%s3975_s1 + $0x2d0] ss:$8 sps:$4 sm:$0xff]  }
  0x84   :  { %2063 = vmatpush1.bf16.msra.mxu0 %v2831_v25  ;;  %1852 = vmatprep.subr.bf16.mxu1 %v2836_v30  ;;  %v2903_v25 = vld [vmem:[%s3975_s1 + $0x6c0] ss:$8 sps:$4 sm:$0xff]   ;;  %v2914_v30 = vld [vmem:[%s3975_s1 + $0x2e4] ss:$8 sps:$4 sm:$0xff]  }
  0x85   :  { %2064 = vmatprep.subr.bf16.mxu0 %v2839_v31  ;;  %1839 = vmatprep.mubr.bf16.mxu1 %v2302_v34  ;;  %v2917_v31 = vld [vmem:[%s3975_s1 + $0x6e4] ss:$8 sps:$4 sm:$0xff]   ;;  %v2920_v34 = vld [vmem:[%s3975_s1 + $0x2f4] ss:$8 sps:$4 sm:$0xff]  }
  0x86   :  { %2051 = vmatprep.mubr.bf16.mxu0 %v2310_v35  ;;  %v2923_v35 = vld [vmem:[%s3975_s1 + $0x6f4] ss:$8 sps:$4 sm:$0xff]  }
  0x87   :  { %1853 = vmatpush1.bf16.msra.mxu1 %v2834_v36  ;;  %v2918_v36 = vld [vmem:[%s3975_s1 + $0x2f0] ss:$8 sps:$4 sm:$0xff]  }
  0x88   :  { %2065 = vmatpush1.bf16.msra.mxu0 %v2837_v37  ;;  %1854 = vmatprep.subr.bf16.mxu1 %v2842_v38  ;;  %v2921_v37 = vld [vmem:[%s3975_s1 + $0x6f0] ss:$8 sps:$4 sm:$0xff]   ;;  %v2926_v38 = vld [vmem:[%s3975_s1 + $0x304] ss:$8 sps:$4 sm:$0xff]  }
  0x89   :  { %2066 = vmatprep.subr.bf16.mxu0 %v2845_v39  ;;  %v2929_v39 = vld [vmem:[%s3975_s1 + $0x704] ss:$8 sps:$4 sm:$0xff]  }
  0x8a   :  { %1840 = vmatmul.mubr.bf16.gmra.mrb[4].mxu1 %v2301_v43  ;;  %v2295_v43 = vcombine.low %v3542_v46, %v3547_v47  ;;  %v2932_v46 = vld [vmem:[%s3975_s1 + $0x314] ss:$8 sps:$4 sm:$0xff]  }
  0x8b   :  { %2052 = vmatmul.mubr.bf16.gmra.mrb[4].mxu0 %v2309_v44  ;;  %1855 = vmatpush1.bf16.msra.mxu1 %v2840_v40  ;;  %v34_v40 = vld [vmem:[%s3976_s0 + $0x90] sm:$0xff] }
  0x8c   :  { %2067 = vmatpush1.bf16.msra.mxu0 %v2843_v41  ;;  %1856 = vmatprep.subr.bf16.mxu1 %v2848_v48  ;;  %v2287_v41 = vcombine.low %v3532_v42, %v3537_v45  ;;  %v42_v44 = vld [vmem:[%s3976_s0 + $0xd0] sm:$0xff]  ;;  %v2924_v42 = vld [vmem:[%s3975_s1 + $0x300] ss:$8 sps:$4 sm:$0xff]  }
  0x8d   :  { %2068 = vmatprep.subr.bf16.mxu0 %v2851_v49  ;;  %1882 = vmatprep.mubr.bf16.mxu1 %v2288_v50  ;;  %v38_v48 = vld [vmem:[%s3976_s0 + $0xb0] sm:$0xff]  ;;  %v2927_v45 = vld [vmem:[%s3975_s1 + $0x700] ss:$8 sps:$4 sm:$0xff]   ;;  %v2304_v50 = vcombine.high %v34_v40, %v42_v44 }
  0x8e   :  { %2094 = vmatprep.mubr.bf16.mxu0 %v2296_v51  ;;  %v46_v49 = vld [vmem:[%s3976_s0 + $0xf0] sm:$0xff] }
  0x8f   :  { %1857 = vmatpush1.bf16.msra.mxu1 %v2846_v52  ;;  %v2935_v47 = vld [vmem:[%s3975_s1 + $0x714] ss:$8 sps:$4 sm:$0xff]   ;;  %v2312_v51 = vcombine.high %v38_v48, %v46_v49  ;;  %v2930_v52 = vld [vmem:[%s3975_s1 + $0x310] ss:$8 sps:$4 sm:$0xff]  }
  0x90   :  { %2069 = vmatpush1.bf16.msra.mxu0 %v2849_v53  ;;  %1858 = vmatprep.subr.bf16.mxu1 %v2854_v54  ;;  %v2933_v53 = vld [vmem:[%s3975_s1 + $0x710] ss:$8 sps:$4 sm:$0xff]   ;;  %v2938_v54 = vld [vmem:[%s3975_s1 + $0x324] ss:$8 sps:$4 sm:$0xff]  }
  0x91   :  { %2070 = vmatprep.subr.bf16.mxu0 %v2857_v55  ;;  %v2941_v55 = vld [vmem:[%s3975_s1 + $0x724] ss:$8 sps:$4 sm:$0xff]  }
  0x93   :  { %1859 = vmatpush1.bf16.msra.mxu1 %v2852_v56  ;;  %v3758_v56 = vld [vmem:[%s3976_s0 + $0x18] sm:$0xff] }
  0x94   :  { %2071 = vmatpush1.bf16.msra.mxu0 %v2855_v57  ;;  %1860 = vmatprep.subr.bf16.mxu1 %v2860_v58  ;;  %v2303_v57 = vcombine.low %v34_v40, %v42_v44  ;;  %v2311_v58 = vcombine.low %v38_v48, %v46_v49  ;;  %v2996_v40 = vld [vmem:[%s3975_s1 + $0x3c0] ss:$8 sps:$4 sm:$0xff]   ;;  %v3007_v44 = vld [vmem:[%s3975_s1 + $0x7d4] ss:$8 sps:$4 sm:$0xff]   ;;  %v3002_v48 = vld [vmem:[%s3975_s1 + $0x3d0] ss:$8 sps:$4 sm:$0xff]  }
  0x95   :  { %2072 = vmatprep.subr.bf16.mxu0 %v2863_v59  ;;  %v3763_v59 = vld [vmem:[%s3976_s0 + $0x58] sm:$0xff] }
  0x96   :  { %v3005_v49 = vld [vmem:[%s3975_s1 + $0x7d0] ss:$8 sps:$4 sm:$0xff]  }
  0x97   :  { %1861 = vmatpush1.bf16.msra.mxu1 %v2858_v60  ;;  %v3768_v60 = vld [vmem:[%s3976_s0 + $0x38] sm:$0xff] }
  0x98   :  { %2073 = vmatpush1.bf16.msra.mxu0 %v2861_v61  ;;  %1862 = vmatprep.subr.bf16.mxu1 %v2866_v62  ;;  %v3773_v61 = vld [vmem:[%s3976_s0 + $0x78] sm:$0xff]  ;;  %v2936_v62 = vld [vmem:[%s3975_s1 + $0x320] ss:$8 sps:$4 sm:$0xff]  }
  0x99   :  { %2074 = vmatprep.subr.bf16.mxu0 %v2869_v63  ;;  %v2939_v63 = vld [vmem:[%s3975_s1 + $0x720] ss:$8 sps:$4 sm:$0xff]  }
  0x9b   :  { %1863 = vmatpush1.bf16.msra.mxu1 %v2864_v0  ;;  %v2944_v0 = vld [vmem:[%s3975_s1 + $0x334] ss:$8 sps:$4 sm:$0xff]  }
  0x9c   :  { %2075 = vmatpush1.bf16.msra.mxu0 %v2867_v1  ;;  %1864 = vmatprep.subr.bf16.mxu1 %v2872_v2  ;;  %v2947_v1 = vld [vmem:[%s3975_s1 + $0x734] ss:$8 sps:$4 sm:$0xff]   ;;  %v2290_v2 = vcombine.high %v3758_v56, %v3763_v59 }
  0x9d   :  { %2076 = vmatprep.subr.bf16.mxu0 %v2875_v3  ;;  %v2298_v3 = vcombine.high %v3768_v60, %v3773_v61 }
  0x9f   :  { %1865 = vmatpush1.bf16.msra.mxu1 %v2870_v4  ;;  %v2942_v4 = vld [vmem:[%s3975_s1 + $0x330] ss:$8 sps:$4 sm:$0xff]  }
  0xa0   :  { %2077 = vmatpush1.bf16.msra.mxu0 %v2873_v5  ;;  %1866 = vmatprep.subr.bf16.mxu1 %v2878_v6  ;;  %v2945_v5 = vld [vmem:[%s3975_s1 + $0x730] ss:$8 sps:$4 sm:$0xff]   ;;  %v2950_v6 = vld [vmem:[%s3975_s1 + $0x344] ss:$8 sps:$4 sm:$0xff]  }
  0xa1   :  { %2078 = vmatprep.subr.bf16.mxu0 %v2881_v7  ;;  %v2953_v7 = vld [vmem:[%s3975_s1 + $0x744] ss:$8 sps:$4 sm:$0xff]  }
  0xa3   :  { %1867 = vmatpush1.bf16.msra.mxu1 %v2876_v8  ;;  %v2948_v8 = vld [vmem:[%s3975_s1 + $0x340] ss:$8 sps:$4 sm:$0xff]  }
  0xa4   :  { %2079 = vmatpush1.bf16.msra.mxu0 %v2879_v9  ;;  %1868 = vmatprep.subr.bf16.mxu1 %v2884_v10  ;;  %v2951_v9 = vld [vmem:[%s3975_s1 + $0x740] ss:$8 sps:$4 sm:$0xff]   ;;  %v2956_v10 = vld [vmem:[%s3975_s1 + $0x354] ss:$8 sps:$4 sm:$0xff]  }
  0xa5   :  { %2080 = vmatprep.subr.bf16.mxu0 %v2887_v11  ;;  %v2959_v11 = vld [vmem:[%s3975_s1 + $0x754] ss:$8 sps:$4 sm:$0xff]  }
  0xa7   :  { %1869 = vmatpush1.bf16.msra.mxu1 %v2882_v12  ;;  %v2954_v12 = vld [vmem:[%s3975_s1 + $0x350] ss:$8 sps:$4 sm:$0xff]  }
  0xa8   :  { %2081 = vmatpush1.bf16.msra.mxu0 %v2885_v13  ;;  %1870 = vmatprep.subr.bf16.mxu1 %v2890_v14  ;;  %v2957_v13 = vld [vmem:[%s3975_s1 + $0x750] ss:$8 sps:$4 sm:$0xff]   ;;  %v2962_v14 = vld [vmem:[%s3975_s1 + $0x364] ss:$8 sps:$4 sm:$0xff]  }
  0xa9   :  { %2082 = vmatprep.subr.bf16.mxu0 %v2893_v15  ;;  %v2965_v15 = vld [vmem:[%s3975_s1 + $0x764] ss:$8 sps:$4 sm:$0xff]  }
  0xab   :  { %1871 = vmatpush1.bf16.msra.mxu1 %v2888_v16  ;;  %v2960_v16 = vld [vmem:[%s3975_s1 + $0x360] ss:$8 sps:$4 sm:$0xff]  }
  0xac   :  { %2083 = vmatpush1.bf16.msra.mxu0 %v2891_v17  ;;  %1872 = vmatprep.subr.bf16.mxu1 %v2896_v18  ;;  %v2963_v17 = vld [vmem:[%s3975_s1 + $0x760] ss:$8 sps:$4 sm:$0xff]   ;;  %v2968_v18 = vld [vmem:[%s3975_s1 + $0x374] ss:$8 sps:$4 sm:$0xff]  }
  0xad   :  { %2084 = vmatprep.subr.bf16.mxu0 %v2899_v19  ;;  %v2971_v19 = vld [vmem:[%s3975_s1 + $0x774] ss:$8 sps:$4 sm:$0xff]  }
  0xaf   :  { %1873 = vmatpush1.bf16.msra.mxu1 %v2894_v20  ;;  %v2966_v20 = vld [vmem:[%s3975_s1 + $0x370] ss:$8 sps:$4 sm:$0xff]  }
  0xb0   :  { %2085 = vmatpush1.bf16.msra.mxu0 %v2897_v21  ;;  %1874 = vmatprep.subr.bf16.mxu1 %v2902_v22  ;;  %v2969_v21 = vld [vmem:[%s3975_s1 + $0x770] ss:$8 sps:$4 sm:$0xff]   ;;  %v2974_v22 = vld [vmem:[%s3975_s1 + $0x384] ss:$8 sps:$4 sm:$0xff]  }
  0xb1   :  { %2086 = vmatprep.subr.bf16.mxu0 %v2905_v23  ;;  %v2977_v23 = vld [vmem:[%s3975_s1 + $0x784] ss:$8 sps:$4 sm:$0xff]  }
  0xb3   :  { %1875 = vmatpush1.bf16.msra.mxu1 %v2900_v24  ;;  %v2972_v24 = vld [vmem:[%s3975_s1 + $0x380] ss:$8 sps:$4 sm:$0xff]  }
  0xb4   :  { %2087 = vmatpush1.bf16.msra.mxu0 %v2903_v25  ;;  %1876 = vmatprep.subr.bf16.mxu1 %v2908_v26  ;;  %v2975_v25 = vld [vmem:[%s3975_s1 + $0x780] ss:$8 sps:$4 sm:$0xff]   ;;  %v2980_v26 = vld [vmem:[%s3975_s1 + $0x394] ss:$8 sps:$4 sm:$0xff]  }
  0xb5   :  { %2088 = vmatprep.subr.bf16.mxu0 %v2911_v27  ;;  %v2983_v27 = vld [vmem:[%s3975_s1 + $0x794] ss:$8 sps:$4 sm:$0xff]  }
  0xb7   :  { %1877 = vmatpush1.bf16.msra.mxu1 %v2906_v28  ;;  %v2978_v28 = vld [vmem:[%s3975_s1 + $0x390] ss:$8 sps:$4 sm:$0xff]  }
  0xb8   :  { %2089 = vmatpush1.bf16.msra.mxu0 %v2909_v29  ;;  %1878 = vmatprep.subr.bf16.mxu1 %v2914_v30  ;;  %v2981_v29 = vld [vmem:[%s3975_s1 + $0x790] ss:$8 sps:$4 sm:$0xff]   ;;  %v2986_v30 = vld [vmem:[%s3975_s1 + $0x3a4] ss:$8 sps:$4 sm:$0xff]  }
  0xb9   :  { %2090 = vmatprep.subr.bf16.mxu0 %v2917_v31  ;;  %v2989_v31 = vld [vmem:[%s3975_s1 + $0x7a4] ss:$8 sps:$4 sm:$0xff]  }
  0xbb   :  { %1879 = vmatpush1.bf16.msra.mxu1 %v2912_v32  ;;  %v2984_v32 = vld [vmem:[%s3975_s1 + $0x3a0] ss:$8 sps:$4 sm:$0xff]  }
  0xbc   :  { %2091 = vmatpush1.bf16.msra.mxu0 %v2915_v33  ;;  %1880 = vmatprep.subr.bf16.mxu1 %v2920_v34  ;;  %v2987_v33 = vld [vmem:[%s3975_s1 + $0x7a0] ss:$8 sps:$4 sm:$0xff]   ;;  %v2992_v34 = vld [vmem:[%s3975_s1 + $0x3b4] ss:$8 sps:$4 sm:$0xff]  }
  0xbd   :  { %2092 = vmatprep.subr.bf16.mxu0 %v2923_v35  ;;  %v2995_v35 = vld [vmem:[%s3975_s1 + $0x7b4] ss:$8 sps:$4 sm:$0xff]  }
  0xbf   :  { %1881 = vmatpush1.bf16.msra.mxu1 %v2918_v36  ;;  %v2990_v36 = vld [vmem:[%s3975_s1 + $0x3b0] ss:$8 sps:$4 sm:$0xff]  }
  0xc0   :  { %2093 = vmatpush1.bf16.msra.mxu0 %v2921_v37  ;;  %1903 = vmatprep.subr.bf16.mxu1 %v2926_v38  ;;  %v2993_v37 = vld [vmem:[%s3975_s1 + $0x7b0] ss:$8 sps:$4 sm:$0xff]   ;;  %v2998_v38 = vld [vmem:[%s3975_s1 + $0x3c4] ss:$8 sps:$4 sm:$0xff]  }
  0xc1   :  { %2115 = vmatprep.subr.bf16.mxu0 %v2929_v39  ;;  %v3001_v39 = vld [vmem:[%s3975_s1 + $0x7c4] ss:$8 sps:$4 sm:$0xff]  }
  0xc2   :  { %1883 = vmatmul.mubr.bf16.vlgmr.msra.gmra.mrb[0].mxu1 %v2287_v41  ;;  %v2999_v41 = vld [vmem:[%s3975_s1 + $0x7c0] ss:$8 sps:$4 sm:$0xff]  }
  0xc3   :  { %2095 = vmatmul.mubr.bf16.vlgmr.msra.gmra.mrb[0].mxu0 %v2295_v43  ;;  %1904 = vmatpush1.bf16.msra.mxu1 %v2924_v42  ;;  %v3004_v43 = vld [vmem:[%s3975_s1 + $0x3d4] ss:$8 sps:$4 sm:$0xff]   ;;  %v3010_v42 = vld [vmem:[%s3975_s1 + $0x3e4] ss:$8 sps:$4 sm:$0xff]  }
  0xc4   :  { %2116 = vmatpush1.bf16.msra.mxu0 %v2927_v45  ;;  %1905 = vmatprep.subr.bf16.mxu1 %v2932_v46  ;;  %v3013_v45 = vld [vmem:[%s3975_s1 + $0x7e4] ss:$8 sps:$4 sm:$0xff]   ;;  %v3008_v46 = vld [vmem:[%s3975_s1 + $0x3e0] ss:$8 sps:$4 sm:$0xff]  }
  0xc5   :  { %2117 = vmatprep.subr.bf16.mxu0 %v2935_v47  ;;  %1892 = vmatprep.mubr.bf16.mxu1 %v2304_v50  ;;  %v3011_v47 = vld [vmem:[%s3975_s1 + $0x7e0] ss:$8 sps:$4 sm:$0xff]   ;;  %v3016_v50 = vld [vmem:[%s3975_s1 + $0x3f4] ss:$8 sps:$4 sm:$0xff]  }
  0xc6   :  { %2104 = vmatprep.mubr.bf16.mxu0 %v2312_v51  ;;  %v3019_v51 = vld [vmem:[%s3975_s1 + $0x7f4] ss:$8 sps:$4 sm:$0xff]  }
  0xc7   :  { %1906 = vmatpush1.bf16.msra.mxu1 %v2930_v52  ;;  %v3014_v52 = vld [vmem:[%s3975_s1 + $0x3f0] ss:$8 sps:$4 sm:$0xff]  }
  0xc8   :  { %2118 = vmatpush1.bf16.msra.mxu0 %v2933_v53  ;;  %1907 = vmatprep.subr.bf16.mxu1 %v2938_v54  ;;  %v3017_v53 = vld [vmem:[%s3975_s1 + $0x7f0] ss:$8 sps:$4 sm:$0xff]  }
  0xc9   :  { %2119 = vmatprep.subr.bf16.mxu0 %v2941_v55  ;;  %v35_v54 = vld [vmem:[%s3976_s0 + $0x98] sm:$0xff] }
  0xca   :  { %1893 = vmatmul.mubr.bf16.gmra.mrb[4].mxu1 %v2303_v57  ;;  %v43_v55 = vld [vmem:[%s3976_s0 + $0xd8] sm:$0xff] }
  0xcb   :  { %2105 = vmatmul.mubr.bf16.gmra.mrb[4].mxu0 %v2311_v58  ;;  %1908 = vmatpush1.bf16.msra.mxu1 %v2936_v62  ;;  %v39_v57 = vld [vmem:[%s3976_s0 + $0xb8] sm:$0xff]  ;;  %v2289_v62 = vcombine.low %v3758_v56, %v3763_v59  ;;  %v2168_v56 = vld [vmem:[%s3977_s2] sm:$0x3] }
  0xcc   :  { %2120 = vmatpush1.bf16.msra.mxu0 %v2939_v63  ;;  %1909 = vmatprep.subr.bf16.mxu1 %v2944_v0  ;;  %v47_v58 = vld [vmem:[%s3976_s0 + $0xf8] sm:$0xff]  ;;  %v2297_v63 = vcombine.low %v3768_v60, %v3773_v61  ;;  %v2306_v0 = vcombine.high %v35_v54, %v43_v55 }
  0xcd   :  { %2121 = vmatprep.subr.bf16.mxu0 %v2947_v1  ;;  %1935 = vmatprep.mubr.bf16.mxu1 %v2290_v2  ;;  %v2314_v1 = vcombine.high %v39_v57, %v47_v58  ;;  %v2305_v2 = vcombine.low %v35_v54, %v43_v55 }
  0xce   :  { %2147 = vmatprep.mubr.bf16.mxu0 %v2298_v3  ;;  %v2313_v3 = vcombine.low %v39_v57, %v47_v58 }
  0xcf   :  { %1910 = vmatpush1.bf16.msra.mxu1 %v2942_v4  ;;  %v2170_v4 = vlaneseq }
  0xd0   :  { %2122 = vmatpush1.bf16.msra.mxu0 %v2945_v5  ;;  %1911 = vmatprep.subr.bf16.mxu1 %v2950_v6 }
  0xd1   :  { %2123 = vmatprep.subr.bf16.mxu0 %v2953_v7  ;;  %v2171_v5 = vshrl.u32 %v2170_v4, 7 }
  0xd3   :  { %1912 = vmatpush1.bf16.msra.mxu1 %v2948_v8  ;;  %v2172_v6 = vsub.s32 0, %v2171_v5  ;;  %v2176_v59 = vsub.s32 1, %v2171_v5 }
  0xd4   :  { %2124 = vmatpush1.bf16.msra.mxu0 %v2951_v9  ;;  %1913 = vmatprep.subr.bf16.mxu1 %v2956_v10 }
  0xd5   :  { %2125 = vmatprep.subr.bf16.mxu0 %v2959_v11  ;;  %v2173_v60 = vrot.slane %v2168_v56, %v2172_v6  ;;  %v2177_v8 = vrot.slane %v2168_v56, %v2176_v59 }
  0xd7   :  { %1914 = vmatpush1.bf16.msra.mxu1 %v2954_v12 }
  0xd8   :  { %2126 = vmatpush1.bf16.msra.mxu0 %v2957_v13  ;;  %1915 = vmatprep.subr.bf16.mxu1 %v2962_v14 }
  0xd9   :  { %2127 = vmatprep.subr.bf16.mxu0 %v2965_v15 }
  0xdb   :  { %1916 = vmatpush1.bf16.msra.mxu1 %v2960_v16 }
  0xdc   :  { %2128 = vmatpush1.bf16.msra.mxu0 %v2963_v17  ;;  %1917 = vmatprep.subr.bf16.mxu1 %v2968_v18 }
  0xdd   :  { %2129 = vmatprep.subr.bf16.mxu0 %v2971_v19 }
  0xdf   :  { %1918 = vmatpush1.bf16.msra.mxu1 %v2966_v20 }
  0xe0   :  { %2130 = vmatpush1.bf16.msra.mxu0 %v2969_v21  ;;  %1919 = vmatprep.subr.bf16.mxu1 %v2974_v22 }
  0xe1   :  { %2131 = vmatprep.subr.bf16.mxu0 %v2977_v23 }
  0xe3   :  { %1920 = vmatpush1.bf16.msra.mxu1 %v2972_v24 }
  0xe4   :  { %2132 = vmatpush1.bf16.msra.mxu0 %v2975_v25  ;;  %1921 = vmatprep.subr.bf16.mxu1 %v2980_v26 }
  0xe5   :  { %2133 = vmatprep.subr.bf16.mxu0 %v2983_v27 }
  0xe7   :  { %1922 = vmatpush1.bf16.msra.mxu1 %v2978_v28 }
  0xe8   :  { %2134 = vmatpush1.bf16.msra.mxu0 %v2981_v29  ;;  %1923 = vmatprep.subr.bf16.mxu1 %v2986_v30 }
  0xe9   :  { %2135 = vmatprep.subr.bf16.mxu0 %v2989_v31 }
  0xeb   :  { %1924 = vmatpush1.bf16.msra.mxu1 %v2984_v32 }
  0xec   :  { %2136 = vmatpush1.bf16.msra.mxu0 %v2987_v33  ;;  %1925 = vmatprep.subr.bf16.mxu1 %v2992_v34 }
  0xed   :  { %2137 = vmatprep.subr.bf16.mxu0 %v2995_v35 }
  0xef   :  { %1926 = vmatpush1.bf16.msra.mxu1 %v2990_v36 }
  0xf0   :  { %2138 = vmatpush1.bf16.msra.mxu0 %v2993_v37  ;;  %1927 = vmatprep.subr.bf16.mxu1 %v2998_v38 }
  0xf1   :  { %2139 = vmatprep.subr.bf16.mxu0 %v3001_v39 }
  0xf3   :  { %1928 = vmatpush1.bf16.msra.mxu1 %v2996_v40 }
  0xf4   :  { %2140 = vmatpush1.bf16.msra.mxu0 %v2999_v41  ;;  %1929 = vmatprep.subr.bf16.mxu1 %v3004_v43 }
  0xf5   :  { %2141 = vmatprep.subr.bf16.mxu0 %v3007_v44 }
  0xf7   :  { %1930 = vmatpush1.bf16.msra.mxu1 %v3002_v48 }
  0xf8   :  { %2142 = vmatpush1.bf16.msra.mxu0 %v3005_v49  ;;  %1931 = vmatprep.subr.bf16.mxu1 %v3010_v42 }
  0xf9   :  { %2143 = vmatprep.subr.bf16.mxu0 %v3013_v45 }
  0xfb   :  { %1932 = vmatpush1.bf16.msra.mxu1 %v3008_v46 }
  0xfc   :  { %2144 = vmatpush1.bf16.msra.mxu0 %v3011_v47  ;;  %1933 = vmatprep.subr.bf16.mxu1 %v3016_v50 }
  0xfd   :  { %2145 = vmatprep.subr.bf16.mxu0 %v3019_v51 }
  0xff   :  { %1934 = vmatpush1.bf16.msra.mxu1 %v3014_v52 }
 0x100   :  { %2146 = vmatpush1.bf16.msra.mxu0 %v3017_v53 }
 0x102   :  { %1936 = vmatmul.mubr.bf16.vlgmr.msra.gmra.mrb[0].mxu1 %v2289_v62 }
 0x103   :  { %2148 = vmatmul.mubr.bf16.vlgmr.msra.gmra.mrb[0].mxu0 %v2297_v63  ;;  %1945 = vmatprep.mubr.bf16.mxu1 %v2306_v0 }
 0x104   :  { %2157 = vmatprep.mubr.bf16.mxu0 %v2314_v1 }
 0x10a   :  { %1946 = vmatmul.mubr.bf16.gmra.mrb[4].mxu1 %v2305_v2 }
 0x10b   :  { %2158 = vmatmul.mubr.bf16.gmra.mrb[4].mxu0 %v2313_v3 }
 0x1d5   :  { %v1937_v61 = vpop.f32.mrb[0].mxu1 }
 0x1d6   :  { %v2149_v7 = vpop.f32.mrb[0].mxu0  ;;  %v1939_v10 = vpop.f32.mrb[1].mxu1 }
 0x1d7   :  { %v2580_v9 = vadd.f32 %v2149_v7, %v1937_v61  ;;  %v2151_v11 = vpop.f32.mrb[1].mxu0  ;;  %v1941_v13 = vpop.f32.mrb[2].mxu1 }
 0x1d8   :  { %v2581_v12 = vadd.f32 %v2151_v11, %v1939_v10  ;;  %v2153_v14 = vpop.f32.mrb[2].mxu0  ;;  %v1943_v17 = vpop.f32.mrb[3].mxu1 }
 0x1d9   :  { %v2180_v15 = vadd.f32 %v2580_v9, %v2173_v60  ;;  %v2582_v16 = vadd.f32 %v2153_v14, %v1941_v13  ;;  %v2155_v18 = vpop.f32.mrb[3].mxu0  ;;  %v2234_v19 = vmul.f32 %v2580_v9, %v2580_v9 }
 0x1da   :  { %v2181_v20 = vadd.f32 %v2581_v12, %v2177_v8  ;;  %v2583_v21 = vadd.f32 %v2155_v18, %v1943_v17  ;;  %v2235_v22 = vmul.f32 %v2581_v12, %v2581_v12 }
 0x1db   :  { %v2182_v23 = vadd.f32 %v2582_v16, %v2173_v60  ;;  %v2216_v24 = vadd.f32 %v2582_v16, %v2580_v9  ;;  %v2236_v25 = vmul.f32 %v2582_v16, %v2582_v16 }
 0x1dc   :  { %v2576_v26 = vpack.c.bf16 %v2181_v20, %v2180_v15  ;;  %v2183_v27 = vadd.f32 %v2583_v21, %v2177_v8  ;;  %v2225_v28 = vadd.f32 %v2583_v21, %v2581_v12  ;;  %v2237_v29 = vmul.f32 %v2583_v21, %v2583_v21 }
 0x1dd   :  { %v2242_v30 = vadd.f32 %v2236_v25, %v2234_v19  ;;  %v1947_v33 = vpop.f32.mrb[4].mxu1 }
 0x1de   :  { %2212 = vst [vmem:[%s3978_s3] sm:$0xff] %v2576_v26  ;;  %v2577_v31 = vpack.c.bf16 %v2183_v27, %v2182_v23  ;;  %v2251_v32 = vadd.f32 %v2237_v29, %v2235_v22  ;;  %v2159_v34 = vpop.f32.mrb[4].mxu0  ;;  %v1949_v36 = vpop.f32.mrb[5].mxu1 }
 0x1df   :  { %v2584_v35 = vadd.f32 %v2159_v34, %v1947_v33  ;;  %v2161_v37 = vpop.f32.mrb[5].mxu0  ;;  %v1951_v39 = vpop.f32.mrb[6].mxu1 }
 0x1e0   :  { %2213 = vst [vmem:[%s3978_s3 + $0x8] sm:$0xff] %v2577_v31  ;;  %v2585_v38 = vadd.f32 %v2161_v37, %v1949_v36  ;;  %v2163_v40 = vpop.f32.mrb[6].mxu0  ;;  %v1953_v49 = vpop.f32.mrb[7].mxu1 }
 0x1e1   :  { %v2184_v41 = vadd.f32 %v2584_v35, %v2173_v60  ;;  %v2217_v43 = vadd.f32 %v2584_v35, %v2216_v24  ;;  %v2238_v44 = vmul.f32 %v2584_v35, %v2584_v35  ;;  %v2586_v48 = vadd.f32 %v2163_v40, %v1951_v39  ;;  %v2165_v42 = vpop.f32.mrb[7].mxu0 }
 0x1e2   :  { %v2185_v45 = vadd.f32 %v2585_v38, %v2177_v8  ;;  %v2226_v46 = vadd.f32 %v2585_v38, %v2225_v28  ;;  %v2239_v47 = vmul.f32 %v2585_v38, %v2585_v38  ;;  %v2587_v50 = vadd.f32 %v2165_v42, %v1953_v49 }
 0x1e3   :  { %v2243_v51 = vadd.f32 %v2242_v30, %v2238_v44  ;;  %v2186_v52 = vadd.f32 %v2586_v48, %v2173_v60  ;;  %v2218_v53 = vadd.f32 %v2586_v48, %v2217_v43  ;;  %v2240_v54 = vmul.f32 %v2586_v48, %v2586_v48 }
 0x1e4   :  { %v2578_v55 = vpack.c.bf16 %v2185_v45, %v2184_v41  ;;  %v2252_v57 = vadd.f32 %v2251_v32, %v2239_v47  ;;  %v2187_v58 = vadd.f32 %v2587_v50, %v2177_v8  ;;  %v2227_v62 = vadd.f32 %v2587_v50, %v2226_v46 }
 0x1e5   :  { %v2219_v63 = vrot.slane %v2218_v53, 4  ;;  %v2244_v0 = vadd.f32 %v2243_v51, %v2240_v54  ;;  %v2241_v1 = vmul.f32 %v2587_v50, %v2587_v50 }
 0x1e6   :  { %2214 = vst [vmem:[%s3978_s3 + $0x10] sm:$0xff] %v2578_v55  ;;  %v2579_v2 = vpack.c.bf16 %v2187_v58, %v2186_v52  ;;  %v2228_v3 = vrot.slane %v2227_v62, 4 }
 0x1e7   :  { %v2220_v4 = vadd.f32 %v2219_v63, %v2218_v53  ;;  %v2245_v5 = vrot.slane %v2244_v0, 4  ;;  %v2253_v6 = vadd.f32 %v2252_v57, %v2241_v1 }
 0x1e8   :  { %2215 = vst [vmem:[%s3978_s3 + $0x18] sm:$0xff] %v2579_v2  ;;  %v2229_v56 = vadd.f32 %v2228_v3, %v2227_v62 }
 0x1e9   :  { %v2221_v59 = vrot.slane %v2220_v4, 2  ;;  %v2246_v60 = vadd.f32 %v2245_v5, %v2244_v0  ;;  %v2254_v61 = vrot.slane %v2253_v6, 4 }
 0x1ea   :  { %v2230_v7 = vrot.slane %v2229_v56, 2 }
 0x1eb   :  { %v2222_v8 = vadd.f32 %v2221_v59, %v2220_v4  ;;  %v2247_v9 = vrot.slane %v2246_v60, 2  ;;  %v2255_v10 = vadd.f32 %v2254_v61, %v2253_v6 }
 0x1ec   :  { %v2231_v11 = vadd.f32 %v2230_v7, %v2229_v56 }
 0x1ed   :  { %v2223_v12 = vrot.slane %v2222_v8, 1  ;;  %v2248_v13 = vadd.f32 %v2247_v9, %v2246_v60  ;;  %v2256_v14 = vrot.slane %v2255_v10, 2 }
 0x1ee   :  { %v2232_v16 = vrot.slane %v2231_v11, 1 }
 0x1ef   :  { %v2249_v15 = vrot.slane %v2248_v13, 1  ;;  %v2257_v17 = vadd.f32 %v2256_v14, %v2255_v10  ;;  %v2224_v18 = vadd.f32 %v2223_v12, %v2222_v8 }
 0x1f0   :  { %v2233_v22 = vadd.f32 %v2232_v16, %v2231_v11 }
 0x1f1   :  { %v2250_v19 = vadd.f32 %v2249_v15, %v2248_v13  ;;  %v2258_v20 = vrot.slane %v2257_v17, 1 }
 0x1f3   :  { %v2261_v21 = vsel %vm2260_vm0, %v2224_v18, %v2250_v19  ;;  %v2259_v23 = vadd.f32 %v2258_v20, %v2257_v17 }
 0x1f5   :  { %v2262_v24 = vsel %vm2260_vm0, %v2233_v22, %v2259_v23 }
 0x1f6   :  { %v2265_v25 = vcombine.low %v2261_v21, %v2262_v24 }
 0x1f8   :  { %2575 = vst.sshfl [vmem:[%s3979_s4] sm:$0x33 pattern:$0x76325410] %v2265_v25 }

// kernel: discriminator_forward.9
= control target key start
LH: loop header
LB: loop body
LE: loop exit
PB: predicated region body
PF: predicated region fallthrough
CT: control target
= control target key end

     0   :  { %s9440_s1 = inlined_call_operand.vmem [shape: bf16[8192,128], index: 1, kind: input, shape index: {}]   ;;  %s9441_s0 = inlined_call_operand.vmem [shape: bf16[16,8192], index: 0, kind: input, shape index: {}]   ;;  %s9442_s2 = inlined_call_operand.vmem [shape: f32[1,128], index: 2, kind: input, shape index: {}]   ;;  %s9443_s3 = inlined_call_operand.vmem [shape: f32[16,128], index: 3, kind: output, shape index: {}]  }
   0x1   :  { %v7115_v0 = vld [vmem:[%s9440_s1 + $0x40] sm:$0xff]   ;;  %v7119_v4 = vld [vmem:[%s9440_s1 + $0x48] sm:$0xff]   ;;  %v7123_v8 = vld [vmem:[%s9440_s1 + $0x50] sm:$0xff]  }
   0x2   :  { %v7116_v1 = vld [vmem:[%s9440_s1 + $0xc0] sm:$0xff]   ;;  %6411 = vmatprep.subr.bf16.mxu0 %v7115_v0  ;;  %v7120_v5 = vld [vmem:[%s9440_s1 + $0xc8] sm:$0xff]   ;;  %v7124_v9 = vld [vmem:[%s9440_s1 + $0xd0] sm:$0xff]  }
   0x3   :  { %v7117_v2 = vld [vmem:[%s9440_s1] sm:$0xff]   ;;  %6433 = vmatprep.subr.bf16.mxu1 %v7116_v1  ;;  %v7121_v6 = vld [vmem:[%s9440_s1 + $0x8] sm:$0xff]   ;;  %v7125_v10 = vld [vmem:[%s9440_s1 + $0x10] sm:$0xff]  }
   0x4   :  { %v7118_v3 = vld [vmem:[%s9440_s1 + $0x80] sm:$0xff]   ;;  %6412 = vmatpush3.bf16.msra.mxu0 %v7117_v2  ;;  %v7122_v7 = vld [vmem:[%s9440_s1 + $0x88] sm:$0xff]   ;;  %v7126_v11 = vld [vmem:[%s9440_s1 + $0x90] sm:$0xff]  }
   0x5   :  { %6434 = vmatpush3.bf16.msra.mxu1 %v7118_v3  ;;  %6413 = vmatprep.subr.bf16.mxu0 %v7119_v4  ;;  %v7127_v12 = vld [vmem:[%s9440_s1 + $0x58] sm:$0xff]   ;;  %v7131_v16 = vld [vmem:[%s9440_s1 + $0x60] sm:$0xff]   ;;  %v7135_v20 = vld [vmem:[%s9440_s1 + $0x68] sm:$0xff]  }
   0x6   :  { %6435 = vmatprep.subr.bf16.mxu1 %v7120_v5  ;;  %v7128_v13 = vld [vmem:[%s9440_s1 + $0xd8] sm:$0xff]   ;;  %v7132_v17 = vld [vmem:[%s9440_s1 + $0xe0] sm:$0xff]   ;;  %v7136_v21 = vld [vmem:[%s9440_s1 + $0xe8] sm:$0xff]  }
   0x7   :  { %v7129_v14 = vld [vmem:[%s9440_s1 + $0x18] sm:$0xff]   ;;  %v7133_v18 = vld [vmem:[%s9440_s1 + $0x20] sm:$0xff]   ;;  %v7137_v22 = vld [vmem:[%s9440_s1 + $0x28] sm:$0xff]  }
   0x8   :  { %6414 = vmatpush3.bf16.msra.mxu0 %v7121_v6  ;;  %v7130_v15 = vld [vmem:[%s9440_s1 + $0x98] sm:$0xff]   ;;  %v7134_v19 = vld [vmem:[%s9440_s1 + $0xa0] sm:$0xff]   ;;  %v7138_v23 = vld [vmem:[%s9440_s1 + $0xa8] sm:$0xff]  }
   0x9   :  { %6436 = vmatpush3.bf16.msra.mxu1 %v7122_v7  ;;  %6415 = vmatprep.subr.bf16.mxu0 %v7123_v8  ;;  %v7139_v24 = vld [vmem:[%s9440_s1 + $0x70] sm:$0xff]   ;;  %v7143_v28 = vld [vmem:[%s9440_s1 + $0x78] sm:$0xff]   ;;  %v15_v32 = vld [vmem:[%s9441_s0] sm:$0xff] }
   0xa   :  { %6437 = vmatprep.subr.bf16.mxu1 %v7124_v9  ;;  %v7140_v25 = vld [vmem:[%s9440_s1 + $0xf0] sm:$0xff]   ;;  %v7144_v29 = vld [vmem:[%s9440_s1 + $0xf8] sm:$0xff]   ;;  %v47_v33 = vld [vmem:[%s9441_s0 + $0x100] sm:$0xff] }
   0xb   :  { %v7141_v26 = vld [vmem:[%s9440_s1 + $0x30] sm:$0xff]   ;;  %v7145_v30 = vld [vmem:[%s9440_s1 + $0x38] sm:$0xff]   ;;  %v16_v34 = vld [vmem:[%s9441_s0 + $0x8] sm:$0xff]  ;;  %v5833_v35 = vcombine.low %v15_v32, %v47_v33  ;;  %v5834_v36 = vcombine.high %v15_v32, %v47_v33 }
   0xc   :  { %6416 = vmatpush3.bf16.msra.mxu0 %v7125_v10  ;;  %v7142_v27 = vld [vmem:[%s9440_s1 + $0xb0] sm:$0xff]   ;;  %v7146_v31 = vld [vmem:[%s9440_s1 + $0xb8] sm:$0xff]   ;;  %v48_v37 = vld [vmem:[%s9441_s0 + $0x108] sm:$0xff] }
   0xd   :  { %6438 = vmatpush3.bf16.msra.mxu1 %v7126_v11  ;;  %6417 = vmatprep.subr.bf16.mxu0 %v7127_v12  ;;  %v5835_v38 = vcombine.low %v16_v34, %v48_v37  ;;  %v5836_v39 = vcombine.high %v16_v34, %v48_v37  ;;  %v7147_v40 = vld [vmem:[%s9440_s1 + $0x140] sm:$0xff]   ;;  %v7151_v44 = vld [vmem:[%s9440_s1 + $0x148] sm:$0xff]   ;;  %v7155_v48 = vld [vmem:[%s9440_s1 + $0x150] sm:$0xff]  }
   0xe   :  { %6439 = vmatprep.subr.bf16.mxu1 %v7128_v13  ;;  %4534 = vmatprep.mubr.bf16.mxu0 %v5834_v36  ;;  %v7148_v41 = vld [vmem:[%s9440_s1 + $0x1c0] sm:$0xff]   ;;  %v7152_v45 = vld [vmem:[%s9440_s1 + $0x1c8] sm:$0xff]   ;;  %v7156_v49 = vld [vmem:[%s9440_s1 + $0x1d0] sm:$0xff]  }
   0xf   :  { %4575 = vmatprep.mubr.bf16.mxu1 %v5836_v39  ;;  %v7149_v42 = vld [vmem:[%s9440_s1 + $0x100] sm:$0xff]   ;;  %v7153_v46 = vld [vmem:[%s9440_s1 + $0x108] sm:$0xff]   ;;  %v7157_v50 = vld [vmem:[%s9440_s1 + $0x110] sm:$0xff]  }
  0x10   :  { %6418 = vmatpush3.bf16.msra.mxu0 %v7129_v14  ;;  %v7150_v43 = vld [vmem:[%s9440_s1 + $0x180] sm:$0xff]   ;;  %v7154_v47 = vld [vmem:[%s9440_s1 + $0x188] sm:$0xff]   ;;  %v7158_v51 = vld [vmem:[%s9440_s1 + $0x190] sm:$0xff]  }
  0x11   :  { %6440 = vmatpush3.bf16.msra.mxu1 %v7130_v15  ;;  %6419 = vmatprep.subr.bf16.mxu0 %v7131_v16  ;;  %v7159_v52 = vld [vmem:[%s9440_s1 + $0x158] sm:$0xff]   ;;  %v7163_v56 = vld [vmem:[%s9440_s1 + $0x160] sm:$0xff]   ;;  %v7167_v60 = vld [vmem:[%s9440_s1 + $0x168] sm:$0xff]  }
  0x12   :  { %6441 = vmatprep.subr.bf16.mxu1 %v7132_v17  ;;  %v7160_v53 = vld [vmem:[%s9440_s1 + $0x1d8] sm:$0xff]   ;;  %v7164_v57 = vld [vmem:[%s9440_s1 + $0x1e0] sm:$0xff]   ;;  %v7168_v61 = vld [vmem:[%s9440_s1 + $0x1e8] sm:$0xff]  }
  0x13   :  { %v7161_v54 = vld [vmem:[%s9440_s1 + $0x118] sm:$0xff]   ;;  %v7165_v58 = vld [vmem:[%s9440_s1 + $0x120] sm:$0xff]   ;;  %v7169_v62 = vld [vmem:[%s9440_s1 + $0x128] sm:$0xff]  }
  0x14   :  { %6420 = vmatpush3.bf16.msra.mxu0 %v7133_v18  ;;  %v7162_v55 = vld [vmem:[%s9440_s1 + $0x198] sm:$0xff]   ;;  %v7166_v59 = vld [vmem:[%s9440_s1 + $0x1a0] sm:$0xff]   ;;  %v7170_v63 = vld [vmem:[%s9440_s1 + $0x1a8] sm:$0xff]  }
  0x15   :  { %6442 = vmatpush3.bf16.msra.mxu1 %v7134_v19  ;;  %6421 = vmatprep.subr.bf16.mxu0 %v7135_v20  ;;  %v7171_v0 = vld [vmem:[%s9440_s1 + $0x170] sm:$0xff]   ;;  %v7175_v4 = vld [vmem:[%s9440_s1 + $0x178] sm:$0xff]   ;;  %v7179_v16 = vld [vmem:[%s9440_s1 + $0x240] sm:$0xff]  }
  0x16   :  { %6443 = vmatprep.subr.bf16.mxu1 %v7136_v21  ;;  %v7172_v1 = vld [vmem:[%s9440_s1 + $0x1f0] sm:$0xff]   ;;  %v7176_v5 = vld [vmem:[%s9440_s1 + $0x1f8] sm:$0xff]   ;;  %v7180_v17 = vld [vmem:[%s9440_s1 + $0x2c0] sm:$0xff]  }
  0x17   :  { %v7173_v2 = vld [vmem:[%s9440_s1 + $0x130] sm:$0xff]   ;;  %v7177_v6 = vld [vmem:[%s9440_s1 + $0x138] sm:$0xff]   ;;  %v7181_v18 = vld [vmem:[%s9440_s1 + $0x200] sm:$0xff]  }
  0x18   :  { %6422 = vmatpush3.bf16.msra.mxu0 %v7137_v22  ;;  %v7174_v3 = vld [vmem:[%s9440_s1 + $0x1b0] sm:$0xff]   ;;  %v7178_v7 = vld [vmem:[%s9440_s1 + $0x1b8] sm:$0xff]   ;;  %v7182_v19 = vld [vmem:[%s9440_s1 + $0x280] sm:$0xff]  }
  0x19   :  { %6444 = vmatpush3.bf16.msra.mxu1 %v7138_v23  ;;  %6423 = vmatprep.subr.bf16.mxu0 %v7139_v24  ;;  %v17_v8 = vld [vmem:[%s9441_s0 + $0x10] sm:$0xff]  ;;  %v18_v12 = vld [vmem:[%s9441_s0 + $0x18] sm:$0xff]  ;;  %v7183_v20 = vld [vmem:[%s9440_s1 + $0x248] sm:$0xff]  }
  0x1a   :  { %6445 = vmatprep.subr.bf16.mxu1 %v7140_v25  ;;  %v49_v9 = vld [vmem:[%s9441_s0 + $0x110] sm:$0xff]  ;;  %v50_v13 = vld [vmem:[%s9441_s0 + $0x118] sm:$0xff]  ;;  %v7184_v21 = vld [vmem:[%s9440_s1 + $0x2c8] sm:$0xff]  }
  0x1b   :  { %v5837_v10 = vcombine.low %v17_v8, %v49_v9  ;;  %v5838_v11 = vcombine.high %v17_v8, %v49_v9  ;;  %v5839_v14 = vcombine.low %v18_v12, %v50_v13  ;;  %v5840_v15 = vcombine.high %v18_v12, %v50_v13  ;;  %v7185_v22 = vld [vmem:[%s9440_s1 + $0x208] sm:$0xff]   ;;  %v7187_v24 = vld [vmem:[%s9440_s1 + $0x250] sm:$0xff]   ;;  %v7195_v32 = vld [vmem:[%s9440_s1 + $0x260] sm:$0xff]  }
  0x1c   :  { %6424 = vmatpush3.bf16.msra.mxu0 %v7141_v26  ;;  %v7186_v23 = vld [vmem:[%s9440_s1 + $0x288] sm:$0xff]   ;;  %v7188_v25 = vld [vmem:[%s9440_s1 + $0x2d0] sm:$0xff]   ;;  %v7196_v33 = vld [vmem:[%s9440_s1 + $0x2e0] sm:$0xff]  }
  0x1d   :  { %6446 = vmatpush3.bf16.msra.mxu1 %v7142_v27  ;;  %6425 = vmatprep.subr.bf16.mxu0 %v7143_v28  ;;  %v7189_v26 = vld [vmem:[%s9440_s1 + $0x210] sm:$0xff]   ;;  %v7191_v28 = vld [vmem:[%s9440_s1 + $0x258] sm:$0xff]   ;;  %v7197_v34 = vld [vmem:[%s9440_s1 + $0x220] sm:$0xff]  }
  0x1e   :  { %6447 = vmatprep.subr.bf16.mxu1 %v7144_v29  ;;  %v7190_v27 = vld [vmem:[%s9440_s1 + $0x290] sm:$0xff]   ;;  %v7192_v29 = vld [vmem:[%s9440_s1 + $0x2d8] sm:$0xff]   ;;  %v7199_v36 = vld [vmem:[%s9440_s1 + $0x268] sm:$0xff]  }
  0x1f   :  { %v7200_v37 = vld [vmem:[%s9440_s1 + $0x2e8] sm:$0xff]   ;;  %v7227_v8 = vld [vmem:[%s9440_s1 + $0x360] sm:$0xff]  }
  0x20   :  { %6426 = vmatpush3.bf16.msra.mxu0 %v7145_v30  ;;  %v7193_v30 = vld [vmem:[%s9440_s1 + $0x218] sm:$0xff]   ;;  %v7202_v39 = vld [vmem:[%s9440_s1 + $0x2a8] sm:$0xff]   ;;  %v7228_v9 = vld [vmem:[%s9440_s1 + $0x3e0] sm:$0xff]  }
  0x21   :  { %6448 = vmatpush3.bf16.msra.mxu1 %v7146_v31  ;;  %6455 = vmatprep.subr.bf16.mxu0 %v7147_v40  ;;  %v7194_v31 = vld [vmem:[%s9440_s1 + $0x298] sm:$0xff]   ;;  %v7203_v40 = vld [vmem:[%s9440_s1 + $0x270] sm:$0xff]   ;;  %v7231_v12 = vld [vmem:[%s9440_s1 + $0x368] sm:$0xff]  }
  0x22   :  { %6477 = vmatprep.subr.bf16.mxu1 %v7148_v41  ;;  %v7204_v41 = vld [vmem:[%s9440_s1 + $0x2f0] sm:$0xff]   ;;  %v7232_v13 = vld [vmem:[%s9440_s1 + $0x3e8] sm:$0xff]  }
  0x23   :  { %4535 = vmatmul.mubr.bf16.vlgmr.msra.gmra.mrb[0].mxu0 %v5833_v35  ;;  %v7198_v35 = vld [vmem:[%s9440_s1 + $0x2a0] sm:$0xff]  }
  0x24   :  { %4576 = vmatmul.mubr.bf16.vlgmr.msra.gmra.mrb[0].mxu1 %v5835_v38  ;;  %6456 = vmatpush3.bf16.msra.mxu0 %v7149_v42  ;;  %v7201_v38 = vld [vmem:[%s9440_s1 + $0x228] sm:$0xff]   ;;  %v7205_v42 = vld [vmem:[%s9440_s1 + $0x230] sm:$0xff]  }
  0x25   :  { %6478 = vmatpush3.bf16.msra.mxu1 %v7150_v43  ;;  %6457 = vmatprep.subr.bf16.mxu0 %v7151_v44  ;;  %v7206_v43 = vld [vmem:[%s9440_s1 + $0x2b0] sm:$0xff]   ;;  %v7207_v44 = vld [vmem:[%s9440_s1 + $0x278] sm:$0xff]  }
  0x26   :  { %6479 = vmatprep.subr.bf16.mxu1 %v7152_v45  ;;  %4616 = vmatprep.mubr.bf16.mxu0 %v5838_v11  ;;  %v7208_v45 = vld [vmem:[%s9440_s1 + $0x2f8] sm:$0xff]   ;;  %v7230_v11 = vld [vmem:[%s9440_s1 + $0x3a0] sm:$0xff]  }
  0x27   :  { %4657 = vmatprep.mubr.bf16.mxu1 %v5840_v15  ;;  %v7234_v15 = vld [vmem:[%s9440_s1 + $0x3a8] sm:$0xff]  }
  0x28   :  { %6458 = vmatpush3.bf16.msra.mxu0 %v7153_v46  ;;  %v7209_v46 = vld [vmem:[%s9440_s1 + $0x238] sm:$0xff]  }
  0x29   :  { %6480 = vmatpush3.bf16.msra.mxu1 %v7154_v47  ;;  %6459 = vmatprep.subr.bf16.mxu0 %v7155_v48  ;;  %v7210_v47 = vld [vmem:[%s9440_s1 + $0x2b8] sm:$0xff]   ;;  %v19_v48 = vld [vmem:[%s9441_s0 + $0x20] sm:$0xff] }
  0x2a   :  { %6481 = vmatprep.subr.bf16.mxu1 %v7156_v49  ;;  %v51_v49 = vld [vmem:[%s9441_s0 + $0x120] sm:$0xff] }
  0x2c   :  { %6460 = vmatpush3.bf16.msra.mxu0 %v7157_v50  ;;  %v20_v50 = vld [vmem:[%s9441_s0 + $0x28] sm:$0xff] }
  0x2d   :  { %6482 = vmatpush3.bf16.msra.mxu1 %v7158_v51  ;;  %6461 = vmatprep.subr.bf16.mxu0 %v7159_v52  ;;  %v52_v51 = vld [vmem:[%s9441_s0 + $0x128] sm:$0xff]  ;;  %v5841_v52 = vcombine.low %v19_v48, %v51_v49 }
  0x2e   :  { %6483 = vmatprep.subr.bf16.mxu1 %v7160_v53  ;;  %v5842_v53 = vcombine.high %v19_v48, %v51_v49  ;;  %v7259_v48 = vld [vmem:[%s9440_s1 + $0x460] sm:$0xff]  }
  0x2f   :  { %v7260_v49 = vld [vmem:[%s9440_s1 + $0x4e0] sm:$0xff]  }
  0x30   :  { %6462 = vmatpush3.bf16.msra.mxu0 %v7161_v54  ;;  %v5843_v54 = vcombine.low %v20_v50, %v52_v51 }
  0x31   :  { %6484 = vmatpush3.bf16.msra.mxu1 %v7162_v55  ;;  %6463 = vmatprep.subr.bf16.mxu0 %v7163_v56  ;;  %v5844_v55 = vcombine.high %v20_v50, %v52_v51  ;;  %v7211_v56 = vld [vmem:[%s9440_s1 + $0x340] sm:$0xff]  }
  0x32   :  { %6485 = vmatprep.subr.bf16.mxu1 %v7164_v57  ;;  %v7212_v57 = vld [vmem:[%s9440_s1 + $0x3c0] sm:$0xff]  }
  0x33   :  { %v7261_v50 = vld [vmem:[%s9440_s1 + $0x420] sm:$0xff]  }
  0x34   :  { %6464 = vmatpush3.bf16.msra.mxu0 %v7165_v58  ;;  %v7213_v58 = vld [vmem:[%s9440_s1 + $0x300] sm:$0xff]  }
  0x35   :  { %6486 = vmatpush3.bf16.msra.mxu1 %v7166_v59  ;;  %6465 = vmatprep.subr.bf16.mxu0 %v7167_v60  ;;  %v7214_v59 = vld [vmem:[%s9440_s1 + $0x380] sm:$0xff]   ;;  %v7215_v60 = vld [vmem:[%s9440_s1 + $0x348] sm:$0xff]  }
  0x36   :  { %6487 = vmatprep.subr.bf16.mxu1 %v7168_v61  ;;  %v7216_v61 = vld [vmem:[%s9440_s1 + $0x3c8] sm:$0xff]   ;;  %v7262_v51 = vld [vmem:[%s9440_s1 + $0x4a0] sm:$0xff]  }
  0x38   :  { %6466 = vmatpush3.bf16.msra.mxu0 %v7169_v62  ;;  %v7217_v62 = vld [vmem:[%s9440_s1 + $0x308] sm:$0xff]  }
  0x39   :  { %6488 = vmatpush3.bf16.msra.mxu1 %v7170_v63  ;;  %6467 = vmatprep.subr.bf16.mxu0 %v7171_v0  ;;  %v7218_v63 = vld [vmem:[%s9440_s1 + $0x388] sm:$0xff]   ;;  %v7219_v0 = vld [vmem:[%s9440_s1 + $0x350] sm:$0xff]  }
  0x3a   :  { %6489 = vmatprep.subr.bf16.mxu1 %v7172_v1  ;;  %v7220_v1 = vld [vmem:[%s9440_s1 + $0x3d0] sm:$0xff]  }
  0x3c   :  { %6468 = vmatpush3.bf16.msra.mxu0 %v7173_v2  ;;  %v7221_v2 = vld [vmem:[%s9440_s1 + $0x310] sm:$0xff]  }
  0x3d   :  { %6490 = vmatpush3.bf16.msra.mxu1 %v7174_v3  ;;  %6469 = vmatprep.subr.bf16.mxu0 %v7175_v4  ;;  %v7222_v3 = vld [vmem:[%s9440_s1 + $0x390] sm:$0xff]   ;;  %v7223_v4 = vld [vmem:[%s9440_s1 + $0x358] sm:$0xff]  }
  0x3e   :  { %6491 = vmatprep.subr.bf16.mxu1 %v7176_v5  ;;  %v7224_v5 = vld [vmem:[%s9440_s1 + $0x3d8] sm:$0xff]  }
  0x40   :  { %6470 = vmatpush3.bf16.msra.mxu0 %v7177_v6  ;;  %v7225_v6 = vld [vmem:[%s9440_s1 + $0x318] sm:$0xff]  }
  0x41   :  { %6492 = vmatpush3.bf16.msra.mxu1 %v7178_v7  ;;  %6499 = vmatprep.subr.bf16.mxu0 %v7179_v16  ;;  %v7226_v7 = vld [vmem:[%s9440_s1 + $0x398] sm:$0xff]   ;;  %v7235_v16 = vld [vmem:[%s9440_s1 + $0x370] sm:$0xff]  }
  0x42   :  { %6521 = vmatprep.subr.bf16.mxu1 %v7180_v17  ;;  %v7236_v17 = vld [vmem:[%s9440_s1 + $0x3f0] sm:$0xff]  }
  0x43   :  { %4617 = vmatmul.mubr.bf16.vlgmr.msra.gmra.mrb[4].mxu0 %v5837_v10  ;;  %v7229_v10 = vld [vmem:[%s9440_s1 + $0x320] sm:$0xff]  }
  0x44   :  { %4658 = vmatmul.mubr.bf16.vlgmr.msra.gmra.mrb[4].mxu1 %v5839_v14  ;;  %6500 = vmatpush3.bf16.msra.mxu0 %v7181_v18  ;;  %v7233_v14 = vld [vmem:[%s9440_s1 + $0x328] sm:$0xff]   ;;  %v7237_v18 = vld [vmem:[%s9440_s1 + $0x330] sm:$0xff]  }
  0x45   :  { %6522 = vmatpush3.bf16.msra.mxu1 %v7182_v19  ;;  %6501 = vmatprep.subr.bf16.mxu0 %v7183_v20  ;;  %v7238_v19 = vld [vmem:[%s9440_s1 + $0x3b0] sm:$0xff]   ;;  %v7239_v20 = vld [vmem:[%s9440_s1 + $0x378] sm:$0xff]  }
  0x46   :  { %6523 = vmatprep.subr.bf16.mxu1 %v7184_v21  ;;  %4698 = vmatprep.mubr.bf16.mxu0 %v5842_v53  ;;  %v7240_v21 = vld [vmem:[%s9440_s1 + $0x3f8] sm:$0xff]   ;;  %v7264_v53 = vld [vmem:[%s9440_s1 + $0x4e8] sm:$0xff]  }
  0x47   :  { %4739 = vmatprep.mubr.bf16.mxu1 %v5844_v55  ;;  %v7266_v55 = vld [vmem:[%s9440_s1 + $0x4a8] sm:$0xff]  }
  0x48   :  { %6502 = vmatpush3.bf16.msra.mxu0 %v7185_v22  ;;  %v7241_v22 = vld [vmem:[%s9440_s1 + $0x338] sm:$0xff]  }
  0x49   :  { %6524 = vmatpush3.bf16.msra.mxu1 %v7186_v23  ;;  %6503 = vmatprep.subr.bf16.mxu0 %v7187_v24  ;;  %v7242_v23 = vld [vmem:[%s9440_s1 + $0x3b8] sm:$0xff]   ;;  %v21_v24 = vld [vmem:[%s9441_s0 + $0x30] sm:$0xff] }
  0x4a   :  { %6525 = vmatprep.subr.bf16.mxu1 %v7188_v25  ;;  %v53_v25 = vld [vmem:[%s9441_s0 + $0x130] sm:$0xff] }
  0x4c   :  { %6504 = vmatpush3.bf16.msra.mxu0 %v7189_v26  ;;  %v22_v26 = vld [vmem:[%s9441_s0 + $0x38] sm:$0xff] }
  0x4d   :  { %6526 = vmatpush3.bf16.msra.mxu1 %v7190_v27  ;;  %6505 = vmatprep.subr.bf16.mxu0 %v7191_v28  ;;  %v5845_v27 = vcombine.low %v21_v24, %v53_v25  ;;  %v5846_v28 = vcombine.high %v21_v24, %v53_v25  ;;  %v7291_v24 = vld [vmem:[%s9440_s1 + $0x560] sm:$0xff]  }
  0x4e   :  { %6527 = vmatprep.subr.bf16.mxu1 %v7192_v29  ;;  %v54_v29 = vld [vmem:[%s9441_s0 + $0x138] sm:$0xff]  ;;  %v7292_v25 = vld [vmem:[%s9440_s1 + $0x5e0] sm:$0xff]  }
  0x50   :  { %6506 = vmatpush3.bf16.msra.mxu0 %v7193_v30  ;;  %v5847_v30 = vcombine.low %v22_v26, %v54_v29 }
  0x51   :  { %6528 = vmatpush3.bf16.msra.mxu1 %v7194_v31  ;;  %6507 = vmatprep.subr.bf16.mxu0 %v7195_v32  ;;  %v5848_v31 = vcombine.high %v22_v26, %v54_v29  ;;  %v7243_v32 = vld [vmem:[%s9440_s1 + $0x440] sm:$0xff]   ;;  %v7296_v29 = vld [vmem:[%s9440_s1 + $0x5e8] sm:$0xff]  }
  0x52   :  { %6529 = vmatprep.subr.bf16.mxu1 %v7196_v33  ;;  %v7244_v33 = vld [vmem:[%s9440_s1 + $0x4c0] sm:$0xff]  }
  0x53   :  { %v7293_v26 = vld [vmem:[%s9440_s1 + $0x520] sm:$0xff]  }
  0x54   :  { %6508 = vmatpush3.bf16.msra.mxu0 %v7197_v34  ;;  %v7245_v34 = vld [vmem:[%s9440_s1 + $0x400] sm:$0xff]  }
  0x55   :  { %6530 = vmatpush3.bf16.msra.mxu1 %v7198_v35  ;;  %6509 = vmatprep.subr.bf16.mxu0 %v7199_v36  ;;  %v7246_v35 = vld [vmem:[%s9440_s1 + $0x480] sm:$0xff]   ;;  %v7247_v36 = vld [vmem:[%s9440_s1 + $0x448] sm:$0xff]  }
  0x56   :  { %6531 = vmatprep.subr.bf16.mxu1 %v7200_v37  ;;  %v7248_v37 = vld [vmem:[%s9440_s1 + $0x4c8] sm:$0xff]  }
  0x58   :  { %6510 = vmatpush3.bf16.msra.mxu0 %v7201_v38  ;;  %v7249_v38 = vld [vmem:[%s9440_s1 + $0x408] sm:$0xff]  }
  0x59   :  { %6532 = vmatpush3.bf16.msra.mxu1 %v7202_v39  ;;  %6511 = vmatprep.subr.bf16.mxu0 %v7203_v40  ;;  %v7250_v39 = vld [vmem:[%s9440_s1 + $0x488] sm:$0xff]   ;;  %v7251_v40 = vld [vmem:[%s9440_s1 + $0x450] sm:$0xff]  }
  0x5a   :  { %6533 = vmatprep.subr.bf16.mxu1 %v7204_v41  ;;  %v7252_v41 = vld [vmem:[%s9440_s1 + $0x4d0] sm:$0xff]  }
  0x5c   :  { %6512 = vmatpush3.bf16.msra.mxu0 %v7205_v42  ;;  %v7253_v42 = vld [vmem:[%s9440_s1 + $0x410] sm:$0xff]  }
  0x5d   :  { %6534 = vmatpush3.bf16.msra.mxu1 %v7206_v43  ;;  %6513 = vmatprep.subr.bf16.mxu0 %v7207_v44  ;;  %v7254_v43 = vld [vmem:[%s9440_s1 + $0x490] sm:$0xff]   ;;  %v7255_v44 = vld [vmem:[%s9440_s1 + $0x458] sm:$0xff]  }
  0x5e   :  { %6535 = vmatprep.subr.bf16.mxu1 %v7208_v45  ;;  %v7256_v45 = vld [vmem:[%s9440_s1 + $0x4d8] sm:$0xff]  }
  0x60   :  { %6514 = vmatpush3.bf16.msra.mxu0 %v7209_v46  ;;  %v7257_v46 = vld [vmem:[%s9440_s1 + $0x418] sm:$0xff]  }
  0x61   :  { %6536 = vmatpush3.bf16.msra.mxu1 %v7210_v47  ;;  %6543 = vmatprep.subr.bf16.mxu0 %v7211_v56  ;;  %v7258_v47 = vld [vmem:[%s9440_s1 + $0x498] sm:$0xff]   ;;  %v7267_v56 = vld [vmem:[%s9440_s1 + $0x470] sm:$0xff]  }
  0x62   :  { %6565 = vmatprep.subr.bf16.mxu1 %v7212_v57  ;;  %v7268_v57 = vld [vmem:[%s9440_s1 + $0x4f0] sm:$0xff]  }
  0x63   :  { %4699 = vmatmul.mubr.bf16.vlgmr.msra.gmra.mrb[8].mxu0 %v5841_v52  ;;  %v7263_v52 = vld [vmem:[%s9440_s1 + $0x468] sm:$0xff]  }
  0x64   :  { %4740 = vmatmul.mubr.bf16.vlgmr.msra.gmra.mrb[8].mxu1 %v5843_v54  ;;  %6544 = vmatpush3.bf16.msra.mxu0 %v7213_v58  ;;  %v7265_v54 = vld [vmem:[%s9440_s1 + $0x428] sm:$0xff]   ;;  %v7269_v58 = vld [vmem:[%s9440_s1 + $0x430] sm:$0xff]  }
  0x65   :  { %6566 = vmatpush3.bf16.msra.mxu1 %v7214_v59  ;;  %6545 = vmatprep.subr.bf16.mxu0 %v7215_v60  ;;  %v7270_v59 = vld [vmem:[%s9440_s1 + $0x4b0] sm:$0xff]   ;;  %v7271_v60 = vld [vmem:[%s9440_s1 + $0x478] sm:$0xff]  }
  0x66   :  { %6567 = vmatprep.subr.bf16.mxu1 %v7216_v61  ;;  %4780 = vmatprep.mubr.bf16.mxu0 %v5846_v28  ;;  %v7272_v61 = vld [vmem:[%s9440_s1 + $0x4f8] sm:$0xff]   ;;  %v7295_v28 = vld [vmem:[%s9440_s1 + $0x568] sm:$0xff]  }
  0x67   :  { %4821 = vmatprep.mubr.bf16.mxu1 %v5848_v31  ;;  %v7298_v31 = vld [vmem:[%s9440_s1 + $0x5a8] sm:$0xff]  }
  0x68   :  { %6546 = vmatpush3.bf16.msra.mxu0 %v7217_v62  ;;  %v7273_v62 = vld [vmem:[%s9440_s1 + $0x438] sm:$0xff]  }
  0x69   :  { %6568 = vmatpush3.bf16.msra.mxu1 %v7218_v63  ;;  %6547 = vmatprep.subr.bf16.mxu0 %v7219_v0  ;;  %v7274_v63 = vld [vmem:[%s9440_s1 + $0x4b8] sm:$0xff]   ;;  %v23_v0 = vld [vmem:[%s9441_s0 + $0x40] sm:$0xff] }
  0x6a   :  { %6569 = vmatprep.subr.bf16.mxu1 %v7220_v1  ;;  %v55_v1 = vld [vmem:[%s9441_s0 + $0x140] sm:$0xff] }
  0x6c   :  { %6548 = vmatpush3.bf16.msra.mxu0 %v7221_v2  ;;  %v5849_v2 = vcombine.low %v23_v0, %v55_v1 }
  0x6d   :  { %6570 = vmatpush3.bf16.msra.mxu1 %v7222_v3  ;;  %6549 = vmatprep.subr.bf16.mxu0 %v7223_v4  ;;  %v5850_v3 = vcombine.high %v23_v0, %v55_v1  ;;  %v24_v4 = vld [vmem:[%s9441_s0 + $0x48] sm:$0xff]  ;;  %v7323_v0 = vld [vmem:[%s9440_s1 + $0x660] sm:$0xff]  }
  0x6e   :  { %6571 = vmatprep.subr.bf16.mxu1 %v7224_v5  ;;  %v56_v5 = vld [vmem:[%s9441_s0 + $0x148] sm:$0xff]  ;;  %v7324_v1 = vld [vmem:[%s9440_s1 + $0x6e0] sm:$0xff]  }
  0x70   :  { %6550 = vmatpush3.bf16.msra.mxu0 %v7225_v6  ;;  %v5851_v6 = vcombine.low %v24_v4, %v56_v5 }
  0x71   :  { %6572 = vmatpush3.bf16.msra.mxu1 %v7226_v7  ;;  %6551 = vmatprep.subr.bf16.mxu0 %v7227_v8  ;;  %v5852_v7 = vcombine.high %v24_v4, %v56_v5  ;;  %v7275_v8 = vld [vmem:[%s9440_s1 + $0x540] sm:$0xff]   ;;  %v7327_v4 = vld [vmem:[%s9440_s1 + $0x668] sm:$0xff]  }
  0x72   :  { %6573 = vmatprep.subr.bf16.mxu1 %v7228_v9  ;;  %v7276_v9 = vld [vmem:[%s9440_s1 + $0x5c0] sm:$0xff]   ;;  %v7328_v5 = vld [vmem:[%s9440_s1 + $0x6e8] sm:$0xff]  }
  0x74   :  { %6552 = vmatpush3.bf16.msra.mxu0 %v7229_v10  ;;  %v7277_v10 = vld [vmem:[%s9440_s1 + $0x500] sm:$0xff]  }
  0x75   :  { %6574 = vmatpush3.bf16.msra.mxu1 %v7230_v11  ;;  %6553 = vmatprep.subr.bf16.mxu0 %v7231_v12  ;;  %v7278_v11 = vld [vmem:[%s9440_s1 + $0x580] sm:$0xff]   ;;  %v7279_v12 = vld [vmem:[%s9440_s1 + $0x548] sm:$0xff]  }
  0x76   :  { %6575 = vmatprep.subr.bf16.mxu1 %v7232_v13  ;;  %v7280_v13 = vld [vmem:[%s9440_s1 + $0x5c8] sm:$0xff]  }
  0x78   :  { %6554 = vmatpush3.bf16.msra.mxu0 %v7233_v14  ;;  %v7281_v14 = vld [vmem:[%s9440_s1 + $0x508] sm:$0xff]  }
  0x79   :  { %6576 = vmatpush3.bf16.msra.mxu1 %v7234_v15  ;;  %6555 = vmatprep.subr.bf16.mxu0 %v7235_v16  ;;  %v7282_v15 = vld [vmem:[%s9440_s1 + $0x588] sm:$0xff]   ;;  %v7283_v16 = vld [vmem:[%s9440_s1 + $0x550] sm:$0xff]  }
  0x7a   :  { %6577 = vmatprep.subr.bf16.mxu1 %v7236_v17  ;;  %v7284_v17 = vld [vmem:[%s9440_s1 + $0x5d0] sm:$0xff]  }
  0x7c   :  { %6556 = vmatpush3.bf16.msra.mxu0 %v7237_v18  ;;  %v7285_v18 = vld [vmem:[%s9440_s1 + $0x510] sm:$0xff]  }
  0x7d   :  { %6578 = vmatpush3.bf16.msra.mxu1 %v7238_v19  ;;  %6557 = vmatprep.subr.bf16.mxu0 %v7239_v20  ;;  %v7286_v19 = vld [vmem:[%s9440_s1 + $0x590] sm:$0xff]   ;;  %v7287_v20 = vld [vmem:[%s9440_s1 + $0x558] sm:$0xff]  }
  0x7e   :  { %6579 = vmatprep.subr.bf16.mxu1 %v7240_v21  ;;  %v7288_v21 = vld [vmem:[%s9440_s1 + $0x5d8] sm:$0xff]  }
  0x80   :  { %6558 = vmatpush3.bf16.msra.mxu0 %v7241_v22  ;;  %v7289_v22 = vld [vmem:[%s9440_s1 + $0x518] sm:$0xff]  }
  0x81   :  { %6580 = vmatpush3.bf16.msra.mxu1 %v7242_v23  ;;  %6587 = vmatprep.subr.bf16.mxu0 %v7243_v32  ;;  %v7290_v23 = vld [vmem:[%s9440_s1 + $0x598] sm:$0xff]   ;;  %v7299_v32 = vld [vmem:[%s9440_s1 + $0x570] sm:$0xff]  }
  0x82   :  { %6609 = vmatprep.subr.bf16.mxu1 %v7244_v33  ;;  %v7300_v33 = vld [vmem:[%s9440_s1 + $0x5f0] sm:$0xff]  }
  0x83   :  { %4781 = vmatmul.mubr.bf16.vlgmr.msra.gmra.mrb[12].mxu0 %v5845_v27  ;;  %v7294_v27 = vld [vmem:[%s9440_s1 + $0x5a0] sm:$0xff]  }
  0x84   :  { %4822 = vmatmul.mubr.bf16.vlgmr.msra.gmra.mrb[12].mxu1 %v5847_v30  ;;  %6588 = vmatpush3.bf16.msra.mxu0 %v7245_v34  ;;  %v7297_v30 = vld [vmem:[%s9440_s1 + $0x528] sm:$0xff]   ;;  %v7301_v34 = vld [vmem:[%s9440_s1 + $0x530] sm:$0xff]  }
  0x85   :  { %6610 = vmatpush3.bf16.msra.mxu1 %v7246_v35  ;;  %6589 = vmatprep.subr.bf16.mxu0 %v7247_v36  ;;  %v7302_v35 = vld [vmem:[%s9440_s1 + $0x5b0] sm:$0xff]   ;;  %v7303_v36 = vld [vmem:[%s9440_s1 + $0x578] sm:$0xff]  }
  0x86   :  { %6611 = vmatprep.subr.bf16.mxu1 %v7248_v37  ;;  %4862 = vmatprep.mubr.bf16.mxu0 %v5850_v3  ;;  %v7304_v37 = vld [vmem:[%s9440_s1 + $0x5f8] sm:$0xff]   ;;  %v7326_v3 = vld [vmem:[%s9440_s1 + $0x6a0] sm:$0xff]  }
  0x87   :  { %4903 = vmatprep.mubr.bf16.mxu1 %v5852_v7  ;;  %v7330_v7 = vld [vmem:[%s9440_s1 + $0x6a8] sm:$0xff]  }
  0x88   :  { %6590 = vmatpush3.bf16.msra.mxu0 %v7249_v38  ;;  %v7305_v38 = vld [vmem:[%s9440_s1 + $0x538] sm:$0xff]  }
  0x89   :  { %6612 = vmatpush3.bf16.msra.mxu1 %v7250_v39  ;;  %6591 = vmatprep.subr.bf16.mxu0 %v7251_v40  ;;  %v7306_v39 = vld [vmem:[%s9440_s1 + $0x5b8] sm:$0xff]   ;;  %v25_v40 = vld [vmem:[%s9441_s0 + $0x50] sm:$0xff] }
  0x8a   :  { %6613 = vmatprep.subr.bf16.mxu1 %v7252_v41  ;;  %v57_v41 = vld [vmem:[%s9441_s0 + $0x150] sm:$0xff] }
  0x8c   :  { %6592 = vmatpush3.bf16.msra.mxu0 %v7253_v42  ;;  %v26_v42 = vld [vmem:[%s9441_s0 + $0x58] sm:$0xff] }
  0x8d   :  { %6614 = vmatpush3.bf16.msra.mxu1 %v7254_v43  ;;  %6593 = vmatprep.subr.bf16.mxu0 %v7255_v44  ;;  %v58_v43 = vld [vmem:[%s9441_s0 + $0x158] sm:$0xff]  ;;  %v5853_v44 = vcombine.low %v25_v40, %v57_v41 }
  0x8e   :  { %6615 = vmatprep.subr.bf16.mxu1 %v7256_v45  ;;  %v5854_v45 = vcombine.high %v25_v40, %v57_v41  ;;  %v7354_v41 = vld [vmem:[%s9440_s1 + $0x798] sm:$0xff]  }
  0x90   :  { %6594 = vmatpush3.bf16.msra.mxu0 %v7257_v46  ;;  %v5855_v46 = vcombine.low %v26_v42, %v58_v43 }
  0x91   :  { %6616 = vmatpush3.bf16.msra.mxu1 %v7258_v47  ;;  %6595 = vmatprep.subr.bf16.mxu0 %v7259_v48  ;;  %v5856_v47 = vcombine.high %v26_v42, %v58_v43  ;;  %v7307_v48 = vld [vmem:[%s9440_s1 + $0x640] sm:$0xff]  }
  0x92   :  { %6617 = vmatprep.subr.bf16.mxu1 %v7260_v49  ;;  %v7308_v49 = vld [vmem:[%s9440_s1 + $0x6c0] sm:$0xff]  }
  0x93   :  { %v7355_v43 = vld [vmem:[%s9440_s1 + $0x760] sm:$0xff]  }
  0x94   :  { %6596 = vmatpush3.bf16.msra.mxu0 %v7261_v50  ;;  %v7309_v50 = vld [vmem:[%s9440_s1 + $0x600] sm:$0xff]  }
  0x95   :  { %6618 = vmatpush3.bf16.msra.mxu1 %v7262_v51  ;;  %6597 = vmatprep.subr.bf16.mxu0 %v7263_v52  ;;  %v7310_v51 = vld [vmem:[%s9440_s1 + $0x680] sm:$0xff]   ;;  %v7311_v52 = vld [vmem:[%s9440_s1 + $0x648] sm:$0xff]  }
  0x96   :  { %6619 = vmatprep.subr.bf16.mxu1 %v7264_v53  ;;  %v7312_v53 = vld [vmem:[%s9440_s1 + $0x6c8] sm:$0xff]  }
  0x98   :  { %6598 = vmatpush3.bf16.msra.mxu0 %v7265_v54  ;;  %v7313_v54 = vld [vmem:[%s9440_s1 + $0x608] sm:$0xff]  }
  0x99   :  { %6620 = vmatpush3.bf16.msra.mxu1 %v7266_v55  ;;  %6599 = vmatprep.subr.bf16.mxu0 %v7267_v56  ;;  %v7314_v55 = vld [vmem:[%s9440_s1 + $0x688] sm:$0xff]   ;;  %v7315_v56 = vld [vmem:[%s9440_s1 + $0x650] sm:$0xff]  }
  0x9a   :  { %6621 = vmatprep.subr.bf16.mxu1 %v7268_v57  ;;  %v7316_v57 = vld [vmem:[%s9440_s1 + $0x6d0] sm:$0xff]  }
  0x9c   :  { %6600 = vmatpush3.bf16.msra.mxu0 %v7269_v58  ;;  %v7317_v58 = vld [vmem:[%s9440_s1 + $0x610] sm:$0xff]  }
  0x9d   :  { %6622 = vmatpush3.bf16.msra.mxu1 %v7270_v59  ;;  %6601 = vmatprep.subr.bf16.mxu0 %v7271_v60  ;;  %v7318_v59 = vld [vmem:[%s9440_s1 + $0x690] sm:$0xff]   ;;  %v7319_v60 = vld [vmem:[%s9440_s1 + $0x658] sm:$0xff]  }
  0x9e   :  { %6623 = vmatprep.subr.bf16.mxu1 %v7272_v61  ;;  %v7320_v61 = vld [vmem:[%s9440_s1 + $0x6d8] sm:$0xff]  }
  0xa0   :  { %6602 = vmatpush3.bf16.msra.mxu0 %v7273_v62  ;;  %v7321_v62 = vld [vmem:[%s9440_s1 + $0x618] sm:$0xff]  }
  0xa1   :  { %6624 = vmatpush3.bf16.msra.mxu1 %v7274_v63  ;;  %6631 = vmatprep.subr.bf16.mxu0 %v7275_v8  ;;  %v7322_v63 = vld [vmem:[%s9440_s1 + $0x698] sm:$0xff]   ;;  %v7331_v8 = vld [vmem:[%s9440_s1 + $0x670] sm:$0xff]  }
  0xa2   :  { %6653 = vmatprep.subr.bf16.mxu1 %v7276_v9  ;;  %v7332_v9 = vld [vmem:[%s9440_s1 + $0x6f0] sm:$0xff]  }
  0xa3   :  { %4863 = vmatmul.mubr.bf16.vlgmr.msra.gmra.mrb[16].mxu0 %v5849_v2  ;;  %v7325_v2 = vld [vmem:[%s9440_s1 + $0x620] sm:$0xff]  }
  0xa4   :  { %4904 = vmatmul.mubr.bf16.vlgmr.msra.gmra.mrb[16].mxu1 %v5851_v6  ;;  %6632 = vmatpush3.bf16.msra.mxu0 %v7277_v10  ;;  %v7329_v6 = vld [vmem:[%s9440_s1 + $0x628] sm:$0xff]   ;;  %v7333_v10 = vld [vmem:[%s9440_s1 + $0x630] sm:$0xff]  }
  0xa5   :  { %6654 = vmatpush3.bf16.msra.mxu1 %v7278_v11  ;;  %6633 = vmatprep.subr.bf16.mxu0 %v7279_v12  ;;  %v7334_v11 = vld [vmem:[%s9440_s1 + $0x6b0] sm:$0xff]   ;;  %v7335_v12 = vld [vmem:[%s9440_s1 + $0x678] sm:$0xff]  }
  0xa6   :  { %6655 = vmatprep.subr.bf16.mxu1 %v7280_v13  ;;  %4944 = vmatprep.mubr.bf16.mxu0 %v5854_v45  ;;  %v7336_v13 = vld [vmem:[%s9440_s1 + $0x6f8] sm:$0xff]  }
  0xa7   :  { %4985 = vmatprep.mubr.bf16.mxu1 %v5856_v47 }
  0xa8   :  { %6634 = vmatpush3.bf16.msra.mxu0 %v7281_v14  ;;  %v7337_v14 = vld [vmem:[%s9440_s1 + $0x638] sm:$0xff]  }
  0xa9   :  { %6656 = vmatpush3.bf16.msra.mxu1 %v7282_v15  ;;  %6635 = vmatprep.subr.bf16.mxu0 %v7283_v16  ;;  %v7338_v15 = vld [vmem:[%s9440_s1 + $0x6b8] sm:$0xff]   ;;  %v27_v16 = vld [vmem:[%s9441_s0 + $0x60] sm:$0xff] }
  0xaa   :  { %6657 = vmatprep.subr.bf16.mxu1 %v7284_v17  ;;  %v59_v17 = vld [vmem:[%s9441_s0 + $0x160] sm:$0xff] }
  0xac   :  { %6636 = vmatpush3.bf16.msra.mxu0 %v7285_v18  ;;  %v28_v18 = vld [vmem:[%s9441_s0 + $0x68] sm:$0xff] }
  0xad   :  { %6658 = vmatpush3.bf16.msra.mxu1 %v7286_v19  ;;  %6637 = vmatprep.subr.bf16.mxu0 %v7287_v20  ;;  %v5857_v19 = vcombine.low %v27_v16, %v59_v17  ;;  %v5858_v20 = vcombine.high %v27_v16, %v59_v17  ;;  %v7371_v17 = vld [vmem:[%s9440_s1 + $0x840] sm:$0xff]  }
  0xae   :  { %6659 = vmatprep.subr.bf16.mxu1 %v7288_v21  ;;  %v60_v21 = vld [vmem:[%s9441_s0 + $0x168] sm:$0xff] }
  0xb0   :  { %6638 = vmatpush3.bf16.msra.mxu0 %v7289_v22  ;;  %v5859_v22 = vcombine.low %v28_v18, %v60_v21 }
  0xb1   :  { %6660 = vmatpush3.bf16.msra.mxu1 %v7290_v23  ;;  %6639 = vmatprep.subr.bf16.mxu0 %v7291_v24  ;;  %v5860_v23 = vcombine.high %v28_v18, %v60_v21  ;;  %v7339_v24 = vld [vmem:[%s9440_s1 + $0x740] sm:$0xff]   ;;  %v7375_v21 = vld [vmem:[%s9440_s1 + $0x848] sm:$0xff]  }
  0xb2   :  { %6661 = vmatprep.subr.bf16.mxu1 %v7292_v25  ;;  %v7340_v25 = vld [vmem:[%s9440_s1 + $0x7c0] sm:$0xff]  }
  0xb3   :  { %v7372_v18 = vld [vmem:[%s9440_s1 + $0x8c0] sm:$0xff]  }
  0xb4   :  { %6640 = vmatpush3.bf16.msra.mxu0 %v7293_v26  ;;  %v7341_v26 = vld [vmem:[%s9440_s1 + $0x700] sm:$0xff]  }
  0xb5   :  { %6662 = vmatpush3.bf16.msra.mxu1 %v7294_v27  ;;  %6641 = vmatprep.subr.bf16.mxu0 %v7295_v28  ;;  %v7342_v27 = vld [vmem:[%s9440_s1 + $0x780] sm:$0xff]   ;;  %v7343_v28 = vld [vmem:[%s9440_s1 + $0x748] sm:$0xff]  }
  0xb6   :  { %6663 = vmatprep.subr.bf16.mxu1 %v7296_v29  ;;  %v7344_v29 = vld [vmem:[%s9440_s1 + $0x7c8] sm:$0xff]  }
  0xb8   :  { %6642 = vmatpush3.bf16.msra.mxu0 %v7297_v30  ;;  %v7345_v30 = vld [vmem:[%s9440_s1 + $0x708] sm:$0xff]  }
  0xb9   :  { %6664 = vmatpush3.bf16.msra.mxu1 %v7298_v31  ;;  %6643 = vmatprep.subr.bf16.mxu0 %v7299_v32  ;;  %v7346_v31 = vld [vmem:[%s9440_s1 + $0x788] sm:$0xff]   ;;  %v7347_v32 = vld [vmem:[%s9440_s1 + $0x750] sm:$0xff]  }
  0xba   :  { %6665 = vmatprep.subr.bf16.mxu1 %v7300_v33  ;;  %v7348_v33 = vld [vmem:[%s9440_s1 + $0x7d0] sm:$0xff]  }
  0xbc   :  { %6644 = vmatpush3.bf16.msra.mxu0 %v7301_v34  ;;  %v7349_v34 = vld [vmem:[%s9440_s1 + $0x710] sm:$0xff]  }
  0xbd   :  { %6666 = vmatpush3.bf16.msra.mxu1 %v7302_v35  ;;  %6645 = vmatprep.subr.bf16.mxu0 %v7303_v36  ;;  %v7350_v35 = vld [vmem:[%s9440_s1 + $0x790] sm:$0xff]   ;;  %v7351_v36 = vld [vmem:[%s9440_s1 + $0x758] sm:$0xff]  }
  0xbe   :  { %6667 = vmatprep.subr.bf16.mxu1 %v7304_v37  ;;  %v7352_v37 = vld [vmem:[%s9440_s1 + $0x7d8] sm:$0xff]  }
  0xc0   :  { %6646 = vmatpush3.bf16.msra.mxu0 %v7305_v38 }
  0xc1   :  { %6668 = vmatpush3.bf16.msra.mxu1 %v7306_v39  ;;  %6675 = vmatprep.subr.bf16.mxu0 %v7307_v48  ;;  %v7353_v39 = vld [vmem:[%s9440_s1 + $0x718] sm:$0xff]  }
  0xc2   :  { %6697 = vmatprep.subr.bf16.mxu1 %v7308_v49  ;;  %v7357_v49 = vld [vmem:[%s9440_s1 + $0x720] sm:$0xff]  }
  0xc3   :  { %4945 = vmatmul.mubr.bf16.vlgmr.msra.gmra.mrb[20].mxu0 %v5853_v44 }
  0xc4   :  { %4986 = vmatmul.mubr.bf16.vlgmr.msra.gmra.mrb[20].mxu1 %v5855_v46  ;;  %6676 = vmatpush3.bf16.msra.mxu0 %v7309_v50  ;;  %v7356_v46 = vld [vmem:[%s9440_s1 + $0x7e0] sm:$0xff]  }
  0xc5   :  { %6698 = vmatpush3.bf16.msra.mxu1 %v7310_v51  ;;  %6677 = vmatprep.subr.bf16.mxu0 %v7311_v52  ;;  %v7358_v51 = vld [vmem:[%s9440_s1 + $0x7a0] sm:$0xff]  }
  0xc6   :  { %6699 = vmatprep.subr.bf16.mxu1 %v7312_v53  ;;  %5026 = vmatprep.mubr.bf16.mxu0 %v5858_v20  ;;  %v5832_v52 = vld [vmem:[%s9442_s2] ss:$0 sm:$0xff] }
  0xc7   :  { %5067 = vmatprep.mubr.bf16.mxu1 %v5860_v23  ;;  %v7374_v20 = vld [vmem:[%s9440_s1 + $0x880] sm:$0xff]   ;;  %v7377_v23 = vld [vmem:[%s9440_s1 + $0x808] sm:$0xff]  }
  0xc8   :  { %6678 = vmatpush3.bf16.msra.mxu0 %v7313_v54 }
  0xc9   :  { %6700 = vmatpush3.bf16.msra.mxu1 %v7314_v55  ;;  %6679 = vmatprep.subr.bf16.mxu0 %v7315_v56  ;;  %v7359_v55 = vld [vmem:[%s9440_s1 + $0x768] sm:$0xff]  }
  0xca   :  { %6701 = vmatprep.subr.bf16.mxu1 %v7316_v57 }
  0xcc   :  { %6680 = vmatpush3.bf16.msra.mxu0 %v7317_v58  ;;  %v7360_v58 = vld [vmem:[%s9440_s1 + $0x7e8] sm:$0xff]  }
  0xcd   :  { %6702 = vmatpush3.bf16.msra.mxu1 %v7318_v59  ;;  %6681 = vmatprep.subr.bf16.mxu0 %v7319_v60 }
  0xce   :  { %6703 = vmatprep.subr.bf16.mxu1 %v7320_v61  ;;  %v7361_v61 = vld [vmem:[%s9440_s1 + $0x728] sm:$0xff]  }
  0xd0   :  { %6682 = vmatpush3.bf16.msra.mxu0 %v7321_v62 }
  0xd1   :  { %6704 = vmatpush3.bf16.msra.mxu1 %v7322_v63  ;;  %6683 = vmatprep.subr.bf16.mxu0 %v7323_v0  ;;  %v7362_v63 = vld [vmem:[%s9440_s1 + $0x7a8] sm:$0xff]  }
  0xd2   :  { %6705 = vmatprep.subr.bf16.mxu1 %v7324_v1  ;;  %v7363_v1 = vld [vmem:[%s9440_s1 + $0x770] sm:$0xff]  }
  0xd4   :  { %6684 = vmatpush3.bf16.msra.mxu0 %v7325_v2  ;;  %v7364_v2 = vld [vmem:[%s9440_s1 + $0x7f0] sm:$0xff]  }
  0xd5   :  { %6706 = vmatpush3.bf16.msra.mxu1 %v7326_v3  ;;  %6685 = vmatprep.subr.bf16.mxu0 %v7327_v4  ;;  %v7365_v3 = vld [vmem:[%s9440_s1 + $0x730] sm:$0xff]  }
  0xd6   :  { %6707 = vmatprep.subr.bf16.mxu1 %v7328_v5  ;;  %v7366_v4 = vld [vmem:[%s9440_s1 + $0x7b0] sm:$0xff]   ;;  %v7367_v5 = vld [vmem:[%s9440_s1 + $0x778] sm:$0xff]  }
  0xd8   :  { %6686 = vmatpush3.bf16.msra.mxu0 %v7329_v6  ;;  %v7368_v6 = vld [vmem:[%s9440_s1 + $0x7f8] sm:$0xff]  }
  0xd9   :  { %6708 = vmatpush3.bf16.msra.mxu1 %v7330_v7  ;;  %6687 = vmatprep.subr.bf16.mxu0 %v7331_v8  ;;  %v7369_v7 = vld [vmem:[%s9440_s1 + $0x738] sm:$0xff]  }
  0xda   :  { %6709 = vmatprep.subr.bf16.mxu1 %v7332_v9  ;;  %v7370_v8 = vld [vmem:[%s9440_s1 + $0x7b8] sm:$0xff]   ;;  %v29_v9 = vld [vmem:[%s9441_s0 + $0x70] sm:$0xff] }
  0xdc   :  { %6688 = vmatpush3.bf16.msra.mxu0 %v7333_v10  ;;  %v61_v10 = vld [vmem:[%s9441_s0 + $0x170] sm:$0xff] }
  0xdd   :  { %6710 = vmatpush3.bf16.msra.mxu1 %v7334_v11  ;;  %6689 = vmatprep.subr.bf16.mxu0 %v7335_v12  ;;  %v30_v11 = vld [vmem:[%s9441_s0 + $0x78] sm:$0xff] }
  0xde   :  { %6711 = vmatprep.subr.bf16.mxu1 %v7336_v13  ;;  %v62_v12 = vld [vmem:[%s9441_s0 + $0x178] sm:$0xff]  ;;  %v5861_v13 = vcombine.low %v29_v9, %v61_v10 }
  0xdf   :  { %v5864_v16 = vcombine.high %v30_v11, %v62_v12 }
  0xe0   :  { %6690 = vmatpush3.bf16.msra.mxu0 %v7337_v14  ;;  %v5862_v14 = vcombine.high %v29_v9, %v61_v10  ;;  %v7403_v9 = vld [vmem:[%s9440_s1 + $0x940] sm:$0xff]  }
  0xe1   :  { %6712 = vmatpush3.bf16.msra.mxu1 %v7338_v15  ;;  %6719 = vmatprep.subr.bf16.mxu0 %v7339_v24  ;;  %v5863_v15 = vcombine.low %v30_v11, %v62_v12  ;;  %v7378_v24 = vld [vmem:[%s9440_s1 + $0x888] sm:$0xff]   ;;  %v7404_v10 = vld [vmem:[%s9440_s1 + $0x9c0] sm:$0xff]  }
  0xe2   :  { %6741 = vmatprep.subr.bf16.mxu1 %v7340_v25  ;;  %v7379_v25 = vld [vmem:[%s9440_s1 + $0x850] sm:$0xff]   ;;  %v7405_v11 = vld [vmem:[%s9440_s1 + $0x900] sm:$0xff]  }
  0xe3   :  { %5027 = vmatmul.mubr.bf16.vlgmr.msra.gmra.mrb[24].mxu0 %v5857_v19  ;;  %v7373_v19 = vld [vmem:[%s9440_s1 + $0x800] sm:$0xff]  }
  0xe4   :  { %5068 = vmatmul.mubr.bf16.vlgmr.msra.gmra.mrb[24].mxu1 %v5859_v22  ;;  %6720 = vmatpush3.bf16.msra.mxu0 %v7341_v26  ;;  %v7376_v22 = vld [vmem:[%s9440_s1 + $0x8c8] sm:$0xff]   ;;  %v7380_v26 = vld [vmem:[%s9440_s1 + $0x8d0] sm:$0xff]   ;;  %v7406_v12 = vld [vmem:[%s9440_s1 + $0x980] sm:$0xff]  }
  0xe5   :  { %6742 = vmatpush3.bf16.msra.mxu1 %v7342_v27  ;;  %6721 = vmatprep.subr.bf16.mxu0 %v7343_v28  ;;  %v7381_v27 = vld [vmem:[%s9440_s1 + $0x810] sm:$0xff]  }
  0xe6   :  { %6743 = vmatprep.subr.bf16.mxu1 %v7344_v29  ;;  %5108 = vmatprep.mubr.bf16.mxu0 %v5862_v14  ;;  %v7382_v28 = vld [vmem:[%s9440_s1 + $0x890] sm:$0xff]   ;;  %v7383_v29 = vld [vmem:[%s9440_s1 + $0x858] sm:$0xff]   ;;  %v7408_v14 = vld [vmem:[%s9440_s1 + $0x9c8] sm:$0xff]  }
  0xe7   :  { %5149 = vmatprep.mubr.bf16.mxu1 %v5864_v16  ;;  %v7410_v16 = vld [vmem:[%s9440_s1 + $0x988] sm:$0xff]  }
  0xe8   :  { %6722 = vmatpush3.bf16.msra.mxu0 %v7345_v30  ;;  %v7384_v30 = vld [vmem:[%s9440_s1 + $0x8d8] sm:$0xff]  }
  0xe9   :  { %6744 = vmatpush3.bf16.msra.mxu1 %v7346_v31  ;;  %6723 = vmatprep.subr.bf16.mxu0 %v7347_v32  ;;  %v7385_v32 = vld [vmem:[%s9440_s1 + $0x818] sm:$0xff]  }
  0xea   :  { %6745 = vmatprep.subr.bf16.mxu1 %v7348_v33 }
  0xec   :  { %6724 = vmatpush3.bf16.msra.mxu0 %v7349_v34  ;;  %v7386_v34 = vld [vmem:[%s9440_s1 + $0x898] sm:$0xff]  }
  0xed   :  { %6746 = vmatpush3.bf16.msra.mxu1 %v7350_v35  ;;  %6725 = vmatprep.subr.bf16.mxu0 %v7351_v36  ;;  %v7387_v36 = vld [vmem:[%s9440_s1 + $0x860] sm:$0xff]  }
  0xee   :  { %6747 = vmatprep.subr.bf16.mxu1 %v7352_v37 }
  0xf0   :  { %6726 = vmatpush3.bf16.msra.mxu0 %v7353_v39  ;;  %v7388_v39 = vld [vmem:[%s9440_s1 + $0x8e0] sm:$0xff]  }
  0xf1   :  { %6748 = vmatpush3.bf16.msra.mxu1 %v7354_v41  ;;  %6727 = vmatprep.subr.bf16.mxu0 %v7355_v43 }
  0xf2   :  { %6749 = vmatprep.subr.bf16.mxu1 %v7356_v46 }
  0xf4   :  { %6728 = vmatpush3.bf16.msra.mxu0 %v7357_v49 }
  0xf5   :  { %6750 = vmatpush3.bf16.msra.mxu1 %v7358_v51  ;;  %6729 = vmatprep.subr.bf16.mxu0 %v7359_v55  ;;  %v7392_v51 = vld [vmem:[%s9440_s1 + $0x8e8] sm:$0xff]  }
  0xf6   :  { %v6427_v38 = vpop.f32.mrb[0].mxu0  ;;  %6751 = vmatprep.subr.bf16.mxu1 %v7360_v58  ;;  %v7394_v55 = vld [vmem:[%s9440_s1 + $0x8a8] sm:$0xff]   ;;  %v7396_v58 = vld [vmem:[%s9440_s1 + $0x8f0] sm:$0xff]  }
  0xf7   :  { %v6449_v40 = vpop.f32.mrb[0].mxu1  ;;  %v6428_v42 = vpop.f32.mrb[1].mxu0 }
  0xf8   :  { %v6429_v44 = vadd.f32 %v6428_v42, %v6427_v38  ;;  %v6450_v45 = vpop.f32.mrb[1].mxu1  ;;  %v6430_v48 = vpop.f32.mrb[2].mxu0  ;;  %6730 = vmatpush3.bf16.msra.mxu0 %v7361_v61  ;;  %v7389_v42 = vld [vmem:[%s9440_s1 + $0x820] sm:$0xff]   ;;  %v7399_v61 = vld [vmem:[%s9440_s1 + $0x878] sm:$0xff]  }
  0xf9   :  { %v6451_v47 = vadd.f32 %v6450_v45, %v6449_v40  ;;  %v6452_v50 = vpop.f32.mrb[2].mxu1  ;;  %v6431_v53 = vpop.f32.mrb[3].mxu0  ;;  %6752 = vmatpush3.bf16.msra.mxu1 %v7362_v63  ;;  %6731 = vmatprep.subr.bf16.mxu0 %v7363_v1  ;;  %v7390_v45 = vld [vmem:[%s9440_s1 + $0x8a0] sm:$0xff]   ;;  %v7401_v63 = vld [vmem:[%s9440_s1 + $0x838] sm:$0xff]  }
  0xfa   :  { %v4537_v54 = vadd.f32 %v6429_v44, %v5832_v52  ;;  %v6432_v56 = vadd.f32 %v6431_v53, %v6430_v48  ;;  %v6453_v57 = vpop.f32.mrb[3].mxu1  ;;  %6753 = vmatprep.subr.bf16.mxu1 %v7364_v2  ;;  %v7391_v48 = vld [vmem:[%s9440_s1 + $0x868] sm:$0xff]   ;;  %v31_v1 = vld [vmem:[%s9441_s0 + $0x80] sm:$0xff] }
  0xfb   :  { %v6454_v59 = vadd.f32 %v6453_v57, %v6452_v50  ;;  %v7393_v53 = vld [vmem:[%s9440_s1 + $0x828] sm:$0xff]   ;;  %v7395_v57 = vld [vmem:[%s9440_s1 + $0x870] sm:$0xff]   ;;  %v63_v2 = vld [vmem:[%s9441_s0 + $0x180] sm:$0xff] }
  0xfc   :  { %v8480_v60 = vadd.f32 %v6451_v47, %v4537_v54  ;;  %v4540_v62 = vadd.f32 %v6432_v56, %v5832_v52  ;;  %6732 = vmatpush3.bf16.msra.mxu0 %v7365_v3  ;;  %v32_v3 = vld [vmem:[%s9441_s0 + $0x88] sm:$0xff] }
  0xfd   :  { %6754 = vmatpush3.bf16.msra.mxu1 %v7366_v4  ;;  %6733 = vmatprep.subr.bf16.mxu0 %v7367_v5  ;;  %v5865_v4 = vcombine.low %v31_v1, %v63_v2  ;;  %v5866_v5 = vcombine.high %v31_v1, %v63_v2  ;;  %v7435_v1 = vld [vmem:[%s9440_s1 + $0xa40] sm:$0xff]  }
  0xfe   :  { %v8488_v0 = vadd.f32 %v6454_v59, %v4540_v62  ;;  %6755 = vmatprep.subr.bf16.mxu1 %v7368_v6  ;;  %v7397_v59 = vld [vmem:[%s9440_s1 + $0x830] sm:$0xff]   ;;  %v7400_v62 = vld [vmem:[%s9440_s1 + $0x8f8] sm:$0xff]   ;;  %v64_v6 = vld [vmem:[%s9441_s0 + $0x188] sm:$0xff] }
  0xff   :  { %v7436_v2 = vld [vmem:[%s9440_s1 + $0xac0] sm:$0xff]  }
 0x100   :  { %6734 = vmatpush3.bf16.msra.mxu0 %v7369_v7  ;;  %v5867_v7 = vcombine.low %v32_v3, %v64_v6 }
 0x101   :  { %6756 = vmatpush3.bf16.msra.mxu1 %v7370_v8  ;;  %6763 = vmatprep.subr.bf16.mxu0 %v7371_v17  ;;  %v5868_v8 = vcombine.high %v32_v3, %v64_v6  ;;  %v7411_v17 = vld [vmem:[%s9440_s1 + $0x950] sm:$0xff]   ;;  %v7437_v3 = vld [vmem:[%s9440_s1 + $0xa00] sm:$0xff]   ;;  %v7440_v6 = vld [vmem:[%s9440_s1 + $0xac8] sm:$0xff]  }
 0x102   :  { %6785 = vmatprep.subr.bf16.mxu1 %v7372_v18  ;;  %v7412_v18 = vld [vmem:[%s9440_s1 + $0x9d0] sm:$0xff]  }
 0x103   :  { %5109 = vmatmul.mubr.bf16.vlgmr.msra.gmra.mrb[28].mxu0 %v5861_v13  ;;  %v7407_v13 = vld [vmem:[%s9440_s1 + $0x948] sm:$0xff]  }
 0x104   :  { %5150 = vmatmul.mubr.bf16.vlgmr.msra.gmra.mrb[28].mxu1 %v5863_v15  ;;  %6764 = vmatpush3.bf16.msra.mxu0 %v7373_v19  ;;  %v7409_v15 = vld [vmem:[%s9440_s1 + $0x908] sm:$0xff]   ;;  %v7413_v19 = vld [vmem:[%s9440_s1 + $0x910] sm:$0xff]  }
 0x105   :  { %6786 = vmatpush3.bf16.msra.mxu1 %v7374_v20  ;;  %6765 = vmatprep.subr.bf16.mxu0 %v7375_v21  ;;  %v7414_v20 = vld [vmem:[%s9440_s1 + $0x990] sm:$0xff]   ;;  %v7415_v21 = vld [vmem:[%s9440_s1 + $0x958] sm:$0xff]  }
 0x106   :  { %6787 = vmatprep.subr.bf16.mxu1 %v7376_v22  ;;  %5190 = vmatprep.mubr.bf16.mxu0 %v5866_v5  ;;  %v7416_v22 = vld [vmem:[%s9440_s1 + $0x9d8] sm:$0xff]   ;;  %v7439_v5 = vld [vmem:[%s9440_s1 + $0xa48] sm:$0xff]  }
 0x107   :  { %5231 = vmatprep.mubr.bf16.mxu1 %v5868_v8  ;;  %v7442_v8 = vld [vmem:[%s9440_s1 + $0xa88] sm:$0xff]  }
 0x108   :  { %6766 = vmatpush3.bf16.msra.mxu0 %v7377_v23 }
 0x109   :  { %6788 = vmatpush3.bf16.msra.mxu1 %v7378_v24  ;;  %6767 = vmatprep.subr.bf16.mxu0 %v7379_v25  ;;  %v7417_v24 = vld [vmem:[%s9440_s1 + $0x918] sm:$0xff]  }
 0x10a   :  { %6789 = vmatprep.subr.bf16.mxu1 %v7380_v26  ;;  %v7418_v26 = vld [vmem:[%s9440_s1 + $0x998] sm:$0xff]  }
 0x10c   :  { %6768 = vmatpush3.bf16.msra.mxu0 %v7381_v27 }
 0x10d   :  { %6790 = vmatpush3.bf16.msra.mxu1 %v7382_v28  ;;  %6769 = vmatprep.subr.bf16.mxu0 %v7383_v29  ;;  %v7419_v28 = vld [vmem:[%s9440_s1 + $0x960] sm:$0xff]  }
 0x10e   :  { %6791 = vmatprep.subr.bf16.mxu1 %v7384_v30 }
 0x110   :  { %6770 = vmatpush3.bf16.msra.mxu0 %v7385_v32 }
 0x111   :  { %6792 = vmatpush3.bf16.msra.mxu1 %v7386_v34  ;;  %6771 = vmatprep.subr.bf16.mxu0 %v7387_v36  ;;  %v7421_v34 = vld [vmem:[%s9440_s1 + $0x920] sm:$0xff]  }
 0x112   :  { %6793 = vmatprep.subr.bf16.mxu1 %v7388_v39 }
 0x114   :  { %6772 = vmatpush3.bf16.msra.mxu0 %v7389_v42 }
 0x115   :  { %6794 = vmatpush3.bf16.msra.mxu1 %v7390_v45  ;;  %6773 = vmatprep.subr.bf16.mxu0 %v7391_v48  ;;  %v7425_v45 = vld [vmem:[%s9440_s1 + $0x928] sm:$0xff]  }
 0x116   :  { %v6471_v31 = vpop.f32.mrb[4].mxu0  ;;  %6795 = vmatprep.subr.bf16.mxu1 %v7392_v51  ;;  %v7429_v51 = vld [vmem:[%s9440_s1 + $0x930] sm:$0xff]  }
 0x117   :  { %v6493_v33 = vpop.f32.mrb[4].mxu1  ;;  %v6472_v35 = vpop.f32.mrb[5].mxu0 }
 0x118   :  { %v6473_v37 = vadd.f32 %v6472_v35, %v6471_v31  ;;  %v6494_v38 = vpop.f32.mrb[5].mxu1  ;;  %v6474_v41 = vpop.f32.mrb[6].mxu0  ;;  %6774 = vmatpush3.bf16.msra.mxu0 %v7393_v53  ;;  %v7420_v31 = vld [vmem:[%s9440_s1 + $0x9e0] sm:$0xff]   ;;  %v7431_v53 = vld [vmem:[%s9440_s1 + $0x978] sm:$0xff]  }
 0x119   :  { %v6495_v40 = vadd.f32 %v6494_v38, %v6493_v33  ;;  %v6496_v44 = vpop.f32.mrb[6].mxu1  ;;  %v6475_v46 = vpop.f32.mrb[7].mxu0  ;;  %6796 = vmatpush3.bf16.msra.mxu1 %v7394_v55  ;;  %6775 = vmatprep.subr.bf16.mxu0 %v7395_v57  ;;  %v7433_v55 = vld [vmem:[%s9440_s1 + $0x938] sm:$0xff]   ;;  %v33_v57 = vld [vmem:[%s9441_s0 + $0x90] sm:$0xff] }
 0x11a   :  { %v4619_v43 = vadd.f32 %v6473_v37, %v8480_v60  ;;  %v6476_v49 = vadd.f32 %v6475_v46, %v6474_v41  ;;  %v6497_v50 = vpop.f32.mrb[7].mxu1  ;;  %6797 = vmatprep.subr.bf16.mxu1 %v7396_v58  ;;  %v7398_v60 = vld [vmem:[%s9440_s1 + $0x8b0] sm:$0xff]   ;;  %v7422_v37 = vld [vmem:[%s9440_s1 + $0x9a0] sm:$0xff]  }
 0x11b   :  { %v6498_v52 = vadd.f32 %v6497_v50, %v6496_v44  ;;  %v7428_v50 = vld [vmem:[%s9440_s1 + $0x9f0] sm:$0xff]  }
 0x11c   :  { %v8587_v47 = vadd.f32 %v6495_v40, %v4619_v43  ;;  %v4622_v54 = vadd.f32 %v6476_v49, %v8488_v0  ;;  %6776 = vmatpush3.bf16.msra.mxu0 %v7397_v59  ;;  %v7402_v0 = vld [vmem:[%s9440_s1 + $0x8b8] sm:$0xff]   ;;  %v7423_v40 = vld [vmem:[%s9440_s1 + $0x968] sm:$0xff]   ;;  %v7427_v49 = vld [vmem:[%s9440_s1 + $0x970] sm:$0xff]  }
 0x11d   :  { %6798 = vmatpush3.bf16.msra.mxu1 %v7398_v60  ;;  %6777 = vmatprep.subr.bf16.mxu0 %v7399_v61  ;;  %v7424_v43 = vld [vmem:[%s9440_s1 + $0x9e8] sm:$0xff]   ;;  %v65_v58 = vld [vmem:[%s9441_s0 + $0x190] sm:$0xff]  ;;  %v34_v61 = vld [vmem:[%s9441_s0 + $0x98] sm:$0xff] }
 0x11e   :  { %v8602_v56 = vadd.f32 %v6498_v52, %v4622_v54  ;;  %6799 = vmatprep.subr.bf16.mxu1 %v7400_v62  ;;  %v7430_v52 = vld [vmem:[%s9440_s1 + $0x9b0] sm:$0xff]   ;;  %v7432_v54 = vld [vmem:[%s9440_s1 + $0x9f8] sm:$0xff]   ;;  %v5869_v59 = vcombine.low %v33_v57, %v65_v58  ;;  %v5870_v60 = vcombine.high %v33_v57, %v65_v58  ;;  %v7467_v57 = vld [vmem:[%s9440_s1 + $0xb40] sm:$0xff]  }
 0x11f   :  { %v66_v62 = vld [vmem:[%s9441_s0 + $0x198] sm:$0xff]  ;;  %v7468_v58 = vld [vmem:[%s9440_s1 + $0xbc0] sm:$0xff]  }
 0x120   :  { %6778 = vmatpush3.bf16.msra.mxu0 %v7401_v63  ;;  %v5871_v63 = vcombine.low %v34_v61, %v66_v62 }
 0x121   :  { %6800 = vmatpush3.bf16.msra.mxu1 %v7402_v0  ;;  %6807 = vmatprep.subr.bf16.mxu0 %v7403_v9  ;;  %v5872_v0 = vcombine.high %v34_v61, %v66_v62  ;;  %v7443_v9 = vld [vmem:[%s9440_s1 + $0xa50] sm:$0xff]   ;;  %v7471_v61 = vld [vmem:[%s9440_s1 + $0xb48] sm:$0xff]  }
 0x122   :  { %6829 = vmatprep.subr.bf16.mxu1 %v7404_v10  ;;  %v7444_v10 = vld [vmem:[%s9440_s1 + $0xad0] sm:$0xff]   ;;  %v7472_v62 = vld [vmem:[%s9440_s1 + $0xbc8] sm:$0xff]  }
 0x123   :  { %5191 = vmatmul.mubr.bf16.vlgmr.msra.gmra.mrb[32].mxu0 %v5865_v4  ;;  %v7438_v4 = vld [vmem:[%s9440_s1 + $0xa80] sm:$0xff]  }
 0x124   :  { %5232 = vmatmul.mubr.bf16.vlgmr.msra.gmra.mrb[32].mxu1 %v5867_v7  ;;  %6808 = vmatpush3.bf16.msra.mxu0 %v7405_v11  ;;  %v7441_v7 = vld [vmem:[%s9440_s1 + $0xa08] sm:$0xff]   ;;  %v7445_v11 = vld [vmem:[%s9440_s1 + $0xa10] sm:$0xff]  }
 0x125   :  { %6830 = vmatpush3.bf16.msra.mxu1 %v7406_v12  ;;  %6809 = vmatprep.subr.bf16.mxu0 %v7407_v13  ;;  %v7446_v12 = vld [vmem:[%s9440_s1 + $0xa90] sm:$0xff]   ;;  %v7447_v13 = vld [vmem:[%s9440_s1 + $0xa58] sm:$0xff]  }
 0x126   :  { %6831 = vmatprep.subr.bf16.mxu1 %v7408_v14  ;;  %5272 = vmatprep.mubr.bf16.mxu0 %v5870_v60  ;;  %v7448_v14 = vld [vmem:[%s9440_s1 + $0xad8] sm:$0xff]   ;;  %v7470_v60 = vld [vmem:[%s9440_s1 + $0xb80] sm:$0xff]  }
 0x127   :  { %5313 = vmatprep.mubr.bf16.mxu1 %v5872_v0  ;;  %v7474_v0 = vld [vmem:[%s9440_s1 + $0xb88] sm:$0xff]  }
 0x128   :  { %6810 = vmatpush3.bf16.msra.mxu0 %v7409_v15 }
 0x129   :  { %6832 = vmatpush3.bf16.msra.mxu1 %v7410_v16  ;;  %6811 = vmatprep.subr.bf16.mxu0 %v7411_v17  ;;  %v7449_v16 = vld [vmem:[%s9440_s1 + $0xa18] sm:$0xff]  }
 0x12a   :  { %6833 = vmatprep.subr.bf16.mxu1 %v7412_v18  ;;  %v7450_v18 = vld [vmem:[%s9440_s1 + $0xa98] sm:$0xff]  }
 0x12c   :  { %6812 = vmatpush3.bf16.msra.mxu0 %v7413_v19 }
 0x12d   :  { %6834 = vmatpush3.bf16.msra.mxu1 %v7414_v20  ;;  %6813 = vmatprep.subr.bf16.mxu0 %v7415_v21  ;;  %v7451_v20 = vld [vmem:[%s9440_s1 + $0xa60] sm:$0xff]  }
 0x12e   :  { %6835 = vmatprep.subr.bf16.mxu1 %v7416_v22 }
 0x130   :  { %6814 = vmatpush3.bf16.msra.mxu0 %v7417_v24 }
 0x131   :  { %6836 = vmatpush3.bf16.msra.mxu1 %v7418_v26  ;;  %6815 = vmatprep.subr.bf16.mxu0 %v7419_v28  ;;  %v7453_v26 = vld [vmem:[%s9440_s1 + $0xa20] sm:$0xff]  }
 0x132   :  { %6837 = vmatprep.subr.bf16.mxu1 %v7420_v31 }
 0x134   :  { %6816 = vmatpush3.bf16.msra.mxu0 %v7421_v34 }
 0x135   :  { %6838 = vmatpush3.bf16.msra.mxu1 %v7422_v37  ;;  %6817 = vmatprep.subr.bf16.mxu0 %v7423_v40  ;;  %v7457_v37 = vld [vmem:[%s9440_s1 + $0xa28] sm:$0xff]  }
 0x136   :  { %v6515_v23 = vpop.f32.mrb[8].mxu0  ;;  %6839 = vmatprep.subr.bf16.mxu1 %v7424_v43  ;;  %v7461_v43 = vld [vmem:[%s9440_s1 + $0xa30] sm:$0xff]  }
 0x137   :  { %v6537_v25 = vpop.f32.mrb[8].mxu1  ;;  %v6516_v27 = vpop.f32.mrb[9].mxu0 }
 0x138   :  { %v6517_v29 = vadd.f32 %v6516_v27, %v6515_v23  ;;  %v6538_v30 = vpop.f32.mrb[9].mxu1  ;;  %v6518_v33 = vpop.f32.mrb[10].mxu0  ;;  %6818 = vmatpush3.bf16.msra.mxu0 %v7425_v45  ;;  %v7452_v23 = vld [vmem:[%s9440_s1 + $0xae0] sm:$0xff]   ;;  %v7463_v45 = vld [vmem:[%s9440_s1 + $0xa78] sm:$0xff]  }
 0x139   :  { %v6539_v32 = vadd.f32 %v6538_v30, %v6537_v25  ;;  %v6540_v36 = vpop.f32.mrb[10].mxu1  ;;  %v6519_v38 = vpop.f32.mrb[11].mxu0  ;;  %6819 = vmatprep.subr.bf16.mxu0 %v7427_v49  ;;  %v35_v49 = vld [vmem:[%s9441_s0 + $0xa0] sm:$0xff] }
 0x13a   :  { %v4701_v35 = vadd.f32 %v6517_v29, %v8587_v47  ;;  %v6520_v41 = vadd.f32 %v6519_v38, %v6518_v33  ;;  %v6541_v42 = vpop.f32.mrb[11].mxu1  ;;  %v7426_v47 = vld [vmem:[%s9440_s1 + $0x9a8] sm:$0xff]   ;;  %v7454_v29 = vld [vmem:[%s9440_s1 + $0xaa0] sm:$0xff]  }
 0x13b   :  { %v6542_v44 = vadd.f32 %v6541_v42, %v6540_v36  ;;  %6840 = vmatpush3.bf16.msra.mxu1 %v7426_v47  ;;  %v7460_v42 = vld [vmem:[%s9440_s1 + $0xaf0] sm:$0xff]   ;;  %v7465_v47 = vld [vmem:[%s9440_s1 + $0xa38] sm:$0xff]  }
 0x13c   :  { %v8701_v39 = vadd.f32 %v6539_v32, %v4701_v35  ;;  %v4704_v46 = vadd.f32 %v6520_v41, %v8602_v56  ;;  %6841 = vmatprep.subr.bf16.mxu1 %v7428_v50  ;;  %6820 = vmatpush3.bf16.msra.mxu0 %v7429_v51  ;;  %v7434_v56 = vld [vmem:[%s9440_s1 + $0x9b8] sm:$0xff]   ;;  %v7455_v32 = vld [vmem:[%s9440_s1 + $0xa68] sm:$0xff]   ;;  %v7459_v41 = vld [vmem:[%s9440_s1 + $0xa70] sm:$0xff]  }
 0x13d   :  { %6821 = vmatprep.subr.bf16.mxu0 %v7431_v53  ;;  %v7456_v35 = vld [vmem:[%s9440_s1 + $0xae8] sm:$0xff]   ;;  %v67_v50 = vld [vmem:[%s9441_s0 + $0x1a0] sm:$0xff] }
 0x13e   :  { %v8716_v48 = vadd.f32 %v6542_v44, %v4704_v46  ;;  %v7462_v44 = vld [vmem:[%s9440_s1 + $0xab0] sm:$0xff]   ;;  %v7464_v46 = vld [vmem:[%s9440_s1 + $0xaf8] sm:$0xff]   ;;  %v36_v51 = vld [vmem:[%s9441_s0 + $0xa8] sm:$0xff]  ;;  %v5873_v53 = vcombine.low %v35_v49, %v67_v50 }
 0x13f   :  { %6842 = vmatpush3.bf16.msra.mxu1 %v7430_v52  ;;  %v68_v52 = vld [vmem:[%s9441_s0 + $0x1a8] sm:$0xff] }
 0x140   :  { %6843 = vmatprep.subr.bf16.mxu1 %v7432_v54  ;;  %6822 = vmatpush3.bf16.msra.mxu0 %v7433_v55  ;;  %v5874_v54 = vcombine.high %v35_v49, %v67_v50  ;;  %v5875_v55 = vcombine.low %v36_v51, %v68_v52  ;;  %v7499_v49 = vld [vmem:[%s9440_s1 + $0xc40] sm:$0xff]  }
 0x141   :  { %6851 = vmatprep.subr.bf16.mxu0 %v7435_v1  ;;  %v7475_v1 = vld [vmem:[%s9440_s1 + $0xb50] sm:$0xff]   ;;  %v7500_v50 = vld [vmem:[%s9440_s1 + $0xcc0] sm:$0xff]  }
 0x143   :  { %6844 = vmatpush3.bf16.msra.mxu1 %v7434_v56  ;;  %5273 = vmatmul.mubr.bf16.vlgmr.msra.gmra.mrb[36].mxu0 %v5869_v59  ;;  %v5876_v56 = vcombine.high %v36_v51, %v68_v52  ;;  %v7469_v59 = vld [vmem:[%s9440_s1 + $0xb00] sm:$0xff]  }
 0x144   :  { %6873 = vmatprep.subr.bf16.mxu1 %v7436_v2  ;;  %6852 = vmatpush3.bf16.msra.mxu0 %v7437_v3  ;;  %v7476_v2 = vld [vmem:[%s9440_s1 + $0xbd0] sm:$0xff]   ;;  %v7501_v51 = vld [vmem:[%s9440_s1 + $0xc00] sm:$0xff]  }
 0x145   :  { %6853 = vmatprep.subr.bf16.mxu0 %v7439_v5  ;;  %5354 = vmatprep.mubr.bf16.mxu0 %v5874_v54  ;;  %v7477_v3 = vld [vmem:[%s9440_s1 + $0xb10] sm:$0xff]   ;;  %v7479_v5 = vld [vmem:[%s9440_s1 + $0xb58] sm:$0xff]   ;;  %v7502_v52 = vld [vmem:[%s9440_s1 + $0xc80] sm:$0xff]  }
 0x146   :  { %5314 = vmatmul.mubr.bf16.vlgmr.msra.gmra.mrb[36].mxu1 %v5871_v63  ;;  %v7473_v63 = vld [vmem:[%s9440_s1 + $0xb08] sm:$0xff]  }
 0x147   :  { %6874 = vmatpush3.bf16.msra.mxu1 %v7438_v4  ;;  %5395 = vmatprep.mubr.bf16.mxu1 %v5876_v56  ;;  %v7478_v4 = vld [vmem:[%s9440_s1 + $0xb90] sm:$0xff]   ;;  %v7504_v54 = vld [vmem:[%s9440_s1 + $0xcc8] sm:$0xff]  }
 0x148   :  { %6875 = vmatprep.subr.bf16.mxu1 %v7440_v6  ;;  %6854 = vmatpush3.bf16.msra.mxu0 %v7441_v7  ;;  %v7480_v6 = vld [vmem:[%s9440_s1 + $0xbd8] sm:$0xff]   ;;  %v7506_v56 = vld [vmem:[%s9440_s1 + $0xc88] sm:$0xff]  }
 0x149   :  { %6855 = vmatprep.subr.bf16.mxu0 %v7443_v9 }
 0x14b   :  { %6876 = vmatpush3.bf16.msra.mxu1 %v7442_v8  ;;  %v7481_v8 = vld [vmem:[%s9440_s1 + $0xb18] sm:$0xff]  }
 0x14c   :  { %6877 = vmatprep.subr.bf16.mxu1 %v7444_v10  ;;  %6856 = vmatpush3.bf16.msra.mxu0 %v7445_v11  ;;  %v7482_v10 = vld [vmem:[%s9440_s1 + $0xb98] sm:$0xff]  }
 0x14d   :  { %6857 = vmatprep.subr.bf16.mxu0 %v7447_v13 }
 0x14f   :  { %6878 = vmatpush3.bf16.msra.mxu1 %v7446_v12  ;;  %v7483_v12 = vld [vmem:[%s9440_s1 + $0xb60] sm:$0xff]  }
 0x150   :  { %6879 = vmatprep.subr.bf16.mxu1 %v7448_v14  ;;  %6858 = vmatpush3.bf16.msra.mxu0 %v7449_v16 }
 0x151   :  { %6859 = vmatprep.subr.bf16.mxu0 %v7451_v20 }
 0x153   :  { %6880 = vmatpush3.bf16.msra.mxu1 %v7450_v18  ;;  %v7485_v18 = vld [vmem:[%s9440_s1 + $0xb20] sm:$0xff]  }
 0x154   :  { %6881 = vmatprep.subr.bf16.mxu1 %v7452_v23  ;;  %6860 = vmatpush3.bf16.msra.mxu0 %v7453_v26 }
 0x155   :  { %6861 = vmatprep.subr.bf16.mxu0 %v7455_v32 }
 0x156   :  { %v6559_v15 = vpop.f32.mrb[12].mxu0 }
 0x157   :  { %v6581_v17 = vpop.f32.mrb[12].mxu1  ;;  %v6560_v19 = vpop.f32.mrb[13].mxu0  ;;  %6882 = vmatpush3.bf16.msra.mxu1 %v7454_v29  ;;  %v7489_v29 = vld [vmem:[%s9440_s1 + $0xb28] sm:$0xff]  }
 0x158   :  { %v6561_v21 = vadd.f32 %v6560_v19, %v6559_v15  ;;  %v6582_v22 = vpop.f32.mrb[13].mxu1  ;;  %v6562_v25 = vpop.f32.mrb[14].mxu0  ;;  %6883 = vmatprep.subr.bf16.mxu1 %v7456_v35  ;;  %6862 = vmatpush3.bf16.msra.mxu0 %v7457_v37  ;;  %v7484_v15 = vld [vmem:[%s9440_s1 + $0xbe0] sm:$0xff]   ;;  %v7493_v35 = vld [vmem:[%s9440_s1 + $0xb30] sm:$0xff]   ;;  %v7495_v37 = vld [vmem:[%s9440_s1 + $0xb78] sm:$0xff]  }
 0x159   :  { %v6583_v24 = vadd.f32 %v6582_v22, %v6581_v17  ;;  %v6584_v28 = vpop.f32.mrb[14].mxu1  ;;  %v6563_v30 = vpop.f32.mrb[15].mxu0  ;;  %6863 = vmatprep.subr.bf16.mxu0 %v7459_v41  ;;  %v37_v41 = vld [vmem:[%s9441_s0 + $0xb0] sm:$0xff] }
 0x15a   :  { %v4783_v27 = vadd.f32 %v6561_v21, %v8701_v39  ;;  %v6564_v33 = vadd.f32 %v6563_v30, %v6562_v25  ;;  %v6585_v34 = vpop.f32.mrb[15].mxu1  ;;  %v7458_v39 = vld [vmem:[%s9440_s1 + $0xaa8] sm:$0xff]   ;;  %v7486_v21 = vld [vmem:[%s9440_s1 + $0xba0] sm:$0xff]  }
 0x15b   :  { %v6586_v36 = vadd.f32 %v6585_v34, %v6584_v28  ;;  %6884 = vmatpush3.bf16.msra.mxu1 %v7458_v39  ;;  %v7492_v34 = vld [vmem:[%s9440_s1 + $0xbf0] sm:$0xff]   ;;  %v7497_v39 = vld [vmem:[%s9440_s1 + $0xb38] sm:$0xff]  }
 0x15c   :  { %v8815_v31 = vadd.f32 %v6583_v24, %v4783_v27  ;;  %v4786_v38 = vadd.f32 %v6564_v33, %v8716_v48  ;;  %6885 = vmatprep.subr.bf16.mxu1 %v7460_v42  ;;  %6864 = vmatpush3.bf16.msra.mxu0 %v7461_v43  ;;  %v7466_v48 = vld [vmem:[%s9440_s1 + $0xab8] sm:$0xff]   ;;  %v7487_v24 = vld [vmem:[%s9440_s1 + $0xb68] sm:$0xff]   ;;  %v7491_v33 = vld [vmem:[%s9440_s1 + $0xb70] sm:$0xff]  }
 0x15d   :  { %6865 = vmatprep.subr.bf16.mxu0 %v7463_v45  ;;  %v7488_v27 = vld [vmem:[%s9440_s1 + $0xbe8] sm:$0xff]   ;;  %v69_v42 = vld [vmem:[%s9441_s0 + $0x1b0] sm:$0xff]  ;;  %v38_v43 = vld [vmem:[%s9441_s0 + $0xb8] sm:$0xff] }
 0x15e   :  { %v8830_v40 = vadd.f32 %v6586_v36, %v4786_v38  ;;  %v7494_v36 = vld [vmem:[%s9440_s1 + $0xbb0] sm:$0xff]   ;;  %v7496_v38 = vld [vmem:[%s9440_s1 + $0xbf8] sm:$0xff]   ;;  %v5878_v45 = vcombine.high %v37_v41, %v69_v42 }
 0x15f   :  { %6886 = vmatpush3.bf16.msra.mxu1 %v7462_v44  ;;  %v5877_v44 = vcombine.low %v37_v41, %v69_v42  ;;  %v7531_v41 = vld [vmem:[%s9440_s1 + $0xd40] sm:$0xff]  }
 0x160   :  { %6887 = vmatprep.subr.bf16.mxu1 %v7464_v46  ;;  %6866 = vmatpush3.bf16.msra.mxu0 %v7465_v47  ;;  %v70_v46 = vld [vmem:[%s9441_s0 + $0x1b8] sm:$0xff]  ;;  %v7532_v42 = vld [vmem:[%s9440_s1 + $0xdc0] sm:$0xff]  }
 0x161   :  { %6895 = vmatprep.subr.bf16.mxu0 %v7467_v57  ;;  %v5879_v47 = vcombine.low %v38_v43, %v70_v46  ;;  %v7507_v57 = vld [vmem:[%s9440_s1 + $0xc50] sm:$0xff]  }
 0x163   :  { %6888 = vmatpush3.bf16.msra.mxu1 %v7466_v48  ;;  %5355 = vmatmul.mubr.bf16.vlgmr.msra.gmra.mrb[40].mxu0 %v5873_v53  ;;  %v5880_v48 = vcombine.high %v38_v43, %v70_v46  ;;  %v7503_v53 = vld [vmem:[%s9440_s1 + $0xc48] sm:$0xff]   ;;  %v7533_v43 = vld [vmem:[%s9440_s1 + $0xd00] sm:$0xff]  }
 0x164   :  { %6917 = vmatprep.subr.bf16.mxu1 %v7468_v58  ;;  %6896 = vmatpush3.bf16.msra.mxu0 %v7469_v59  ;;  %v7508_v58 = vld [vmem:[%s9440_s1 + $0xcd0] sm:$0xff]   ;;  %v7536_v46 = vld [vmem:[%s9440_s1 + $0xdc8] sm:$0xff]  }
 0x165   :  { %6897 = vmatprep.subr.bf16.mxu0 %v7471_v61  ;;  %5436 = vmatprep.mubr.bf16.mxu0 %v5878_v45  ;;  %v7509_v59 = vld [vmem:[%s9440_s1 + $0xc10] sm:$0xff]   ;;  %v7511_v61 = vld [vmem:[%s9440_s1 + $0xc58] sm:$0xff]   ;;  %v7535_v45 = vld [vmem:[%s9440_s1 + $0xd48] sm:$0xff]  }
 0x166   :  { %5396 = vmatmul.mubr.bf16.vlgmr.msra.gmra.mrb[40].mxu1 %v5875_v55  ;;  %v7505_v55 = vld [vmem:[%s9440_s1 + $0xc08] sm:$0xff]  }
 0x167   :  { %6918 = vmatpush3.bf16.msra.mxu1 %v7470_v60  ;;  %5477 = vmatprep.mubr.bf16.mxu1 %v5880_v48  ;;  %v7510_v60 = vld [vmem:[%s9440_s1 + $0xc90] sm:$0xff]   ;;  %v7538_v48 = vld [vmem:[%s9440_s1 + $0xd88] sm:$0xff]  }
 0x168   :  { %6919 = vmatprep.subr.bf16.mxu1 %v7472_v62  ;;  %6898 = vmatpush3.bf16.msra.mxu0 %v7473_v63  ;;  %v7512_v62 = vld [vmem:[%s9440_s1 + $0xcd8] sm:$0xff]  }
 0x169   :  { %6899 = vmatprep.subr.bf16.mxu0 %v7475_v1 }
 0x16b   :  { %6920 = vmatpush3.bf16.msra.mxu1 %v7474_v0  ;;  %v7513_v0 = vld [vmem:[%s9440_s1 + $0xc18] sm:$0xff]  }
 0x16c   :  { %6921 = vmatprep.subr.bf16.mxu1 %v7476_v2  ;;  %6900 = vmatpush3.bf16.msra.mxu0 %v7477_v3  ;;  %v7514_v2 = vld [vmem:[%s9440_s1 + $0xc98] sm:$0xff]  }
 0x16d   :  { %6901 = vmatprep.subr.bf16.mxu0 %v7479_v5 }
 0x16f   :  { %6922 = vmatpush3.bf16.msra.mxu1 %v7478_v4  ;;  %v7515_v4 = vld [vmem:[%s9440_s1 + $0xc60] sm:$0xff]  }
 0x170   :  { %6923 = vmatprep.subr.bf16.mxu1 %v7480_v6  ;;  %6902 = vmatpush3.bf16.msra.mxu0 %v7481_v8 }
 0x171   :  { %6903 = vmatprep.subr.bf16.mxu0 %v7483_v12 }
 0x173   :  { %6924 = vmatpush3.bf16.msra.mxu1 %v7482_v10  ;;  %v7517_v10 = vld [vmem:[%s9440_s1 + $0xc20] sm:$0xff]  }
 0x174   :  { %6925 = vmatprep.subr.bf16.mxu1 %v7484_v15  ;;  %6904 = vmatpush3.bf16.msra.mxu0 %v7485_v18 }
 0x175   :  { %6905 = vmatprep.subr.bf16.mxu0 %v7487_v24 }
 0x176   :  { %v6603_v7 = vpop.f32.mrb[16].mxu0 }
 0x177   :  { %v6625_v9 = vpop.f32.mrb[16].mxu1  ;;  %v6604_v11 = vpop.f32.mrb[17].mxu0  ;;  %6926 = vmatpush3.bf16.msra.mxu1 %v7486_v21  ;;  %v7521_v21 = vld [vmem:[%s9440_s1 + $0xc28] sm:$0xff]  }
 0x178   :  { %v6605_v13 = vadd.f32 %v6604_v11, %v6603_v7  ;;  %v6626_v14 = vpop.f32.mrb[17].mxu1  ;;  %v6606_v17 = vpop.f32.mrb[18].mxu0  ;;  %6927 = vmatprep.subr.bf16.mxu1 %v7488_v27  ;;  %6906 = vmatpush3.bf16.msra.mxu0 %v7489_v29  ;;  %v7516_v7 = vld [vmem:[%s9440_s1 + $0xce0] sm:$0xff]   ;;  %v7525_v27 = vld [vmem:[%s9440_s1 + $0xc30] sm:$0xff]   ;;  %v7527_v29 = vld [vmem:[%s9440_s1 + $0xc78] sm:$0xff]  }
 0x179   :  { %v6627_v16 = vadd.f32 %v6626_v14, %v6625_v9  ;;  %v6628_v20 = vpop.f32.mrb[18].mxu1  ;;  %v6607_v22 = vpop.f32.mrb[19].mxu0  ;;  %6907 = vmatprep.subr.bf16.mxu0 %v7491_v33  ;;  %v39_v33 = vld [vmem:[%s9441_s0 + $0xc0] sm:$0xff] }
 0x17a   :  { %v4865_v19 = vadd.f32 %v6605_v13, %v8815_v31  ;;  %v6608_v25 = vadd.f32 %v6607_v22, %v6606_v17  ;;  %v6629_v26 = vpop.f32.mrb[19].mxu1  ;;  %v7490_v31 = vld [vmem:[%s9440_s1 + $0xba8] sm:$0xff]   ;;  %v7518_v13 = vld [vmem:[%s9440_s1 + $0xca0] sm:$0xff]  }
 0x17b   :  { %v6630_v28 = vadd.f32 %v6629_v26, %v6628_v20  ;;  %6928 = vmatpush3.bf16.msra.mxu1 %v7490_v31  ;;  %v7524_v26 = vld [vmem:[%s9440_s1 + $0xcf0] sm:$0xff]   ;;  %v7529_v31 = vld [vmem:[%s9440_s1 + $0xc38] sm:$0xff]  }
 0x17c   :  { %v8929_v23 = vadd.f32 %v6627_v16, %v4865_v19  ;;  %v4868_v30 = vadd.f32 %v6608_v25, %v8830_v40  ;;  %6929 = vmatprep.subr.bf16.mxu1 %v7492_v34  ;;  %6908 = vmatpush3.bf16.msra.mxu0 %v7493_v35  ;;  %v7498_v40 = vld [vmem:[%s9440_s1 + $0xbb8] sm:$0xff]   ;;  %v7519_v16 = vld [vmem:[%s9440_s1 + $0xc68] sm:$0xff]   ;;  %v7523_v25 = vld [vmem:[%s9440_s1 + $0xc70] sm:$0xff]  }
 0x17d   :  { %6909 = vmatprep.subr.bf16.mxu0 %v7495_v37  ;;  %v7520_v19 = vld [vmem:[%s9440_s1 + $0xce8] sm:$0xff]   ;;  %v71_v34 = vld [vmem:[%s9441_s0 + $0x1c0] sm:$0xff] }
 0x17e   :  { %v8944_v32 = vadd.f32 %v6630_v28, %v4868_v30  ;;  %v7526_v28 = vld [vmem:[%s9440_s1 + $0xcb0] sm:$0xff]   ;;  %v7528_v30 = vld [vmem:[%s9440_s1 + $0xcf8] sm:$0xff]   ;;  %v5881_v35 = vcombine.low %v39_v33, %v71_v34  ;;  %v40_v37 = vld [vmem:[%s9441_s0 + $0xc8] sm:$0xff] }
 0x17f   :  { %6930 = vmatpush3.bf16.msra.mxu1 %v7494_v36  ;;  %v5882_v36 = vcombine.high %v39_v33, %v71_v34  ;;  %v7563_v33 = vld [vmem:[%s9440_s1 + $0xe40] sm:$0xff]  }
 0x180   :  { %6931 = vmatprep.subr.bf16.mxu1 %v7496_v38  ;;  %6910 = vmatpush3.bf16.msra.mxu0 %v7497_v39  ;;  %v72_v38 = vld [vmem:[%s9441_s0 + $0x1c8] sm:$0xff]  ;;  %v7564_v34 = vld [vmem:[%s9440_s1 + $0xec0] sm:$0xff]  }
 0x181   :  { %6939 = vmatprep.subr.bf16.mxu0 %v7499_v49  ;;  %v5883_v39 = vcombine.low %v40_v37, %v72_v38  ;;  %v7539_v49 = vld [vmem:[%s9440_s1 + $0xd50] sm:$0xff]  }
 0x183   :  { %6932 = vmatpush3.bf16.msra.mxu1 %v7498_v40  ;;  %5437 = vmatmul.mubr.bf16.vlgmr.msra.gmra.mrb[44].mxu0 %v5877_v44  ;;  %v5884_v40 = vcombine.high %v40_v37, %v72_v38  ;;  %v7534_v44 = vld [vmem:[%s9440_s1 + $0xd80] sm:$0xff]   ;;  %v7567_v37 = vld [vmem:[%s9440_s1 + $0xe48] sm:$0xff]  }
 0x184   :  { %6961 = vmatprep.subr.bf16.mxu1 %v7500_v50  ;;  %6940 = vmatpush3.bf16.msra.mxu0 %v7501_v51  ;;  %v7540_v50 = vld [vmem:[%s9440_s1 + $0xdd0] sm:$0xff]   ;;  %v7568_v38 = vld [vmem:[%s9440_s1 + $0xec8] sm:$0xff]  }
 0x185   :  { %6941 = vmatprep.subr.bf16.mxu0 %v7503_v53  ;;  %5518 = vmatprep.mubr.bf16.mxu0 %v5882_v36  ;;  %v7541_v51 = vld [vmem:[%s9440_s1 + $0xd10] sm:$0xff]   ;;  %v7543_v53 = vld [vmem:[%s9440_s1 + $0xd58] sm:$0xff]   ;;  %v7566_v36 = vld [vmem:[%s9440_s1 + $0xe80] sm:$0xff]  }
 0x186   :  { %5478 = vmatmul.mubr.bf16.vlgmr.msra.gmra.mrb[44].mxu1 %v5879_v47  ;;  %v7537_v47 = vld [vmem:[%s9440_s1 + $0xd08] sm:$0xff]  }
 0x187   :  { %6962 = vmatpush3.bf16.msra.mxu1 %v7502_v52  ;;  %5559 = vmatprep.mubr.bf16.mxu1 %v5884_v40  ;;  %v7542_v52 = vld [vmem:[%s9440_s1 + $0xd90] sm:$0xff]   ;;  %v7570_v40 = vld [vmem:[%s9440_s1 + $0xe88] sm:$0xff]  }
 0x188   :  { %6963 = vmatprep.subr.bf16.mxu1 %v7504_v54  ;;  %6942 = vmatpush3.bf16.msra.mxu0 %v7505_v55  ;;  %v7544_v54 = vld [vmem:[%s9440_s1 + $0xdd8] sm:$0xff]  }
 0x189   :  { %6943 = vmatprep.subr.bf16.mxu0 %v7507_v57 }
 0x18b   :  { %6964 = vmatpush3.bf16.msra.mxu1 %v7506_v56  ;;  %v7545_v56 = vld [vmem:[%s9440_s1 + $0xd18] sm:$0xff]  }
 0x18c   :  { %6965 = vmatprep.subr.bf16.mxu1 %v7508_v58  ;;  %6944 = vmatpush3.bf16.msra.mxu0 %v7509_v59  ;;  %v7546_v58 = vld [vmem:[%s9440_s1 + $0xd98] sm:$0xff]  }
 0x18d   :  { %6945 = vmatprep.subr.bf16.mxu0 %v7511_v61 }
 0x18f   :  { %6966 = vmatpush3.bf16.msra.mxu1 %v7510_v60  ;;  %v7547_v60 = vld [vmem:[%s9440_s1 + $0xd60] sm:$0xff]  }
 0x190   :  { %6967 = vmatprep.subr.bf16.mxu1 %v7512_v62  ;;  %6946 = vmatpush3.bf16.msra.mxu0 %v7513_v0 }
 0x191   :  { %6947 = vmatprep.subr.bf16.mxu0 %v7515_v4 }
 0x193   :  { %6968 = vmatpush3.bf16.msra.mxu1 %v7514_v2  ;;  %v7549_v2 = vld [vmem:[%s9440_s1 + $0xd20] sm:$0xff]  }
 0x194   :  { %6969 = vmatprep.subr.bf16.mxu1 %v7516_v7  ;;  %6948 = vmatpush3.bf16.msra.mxu0 %v7517_v10 }
 0x195   :  { %6949 = vmatprep.subr.bf16.mxu0 %v7519_v16 }
 0x196   :  { %v6647_v63 = vpop.f32.mrb[20].mxu0 }
 0x197   :  { %v6669_v1 = vpop.f32.mrb[20].mxu1  ;;  %v6648_v3 = vpop.f32.mrb[21].mxu0  ;;  %6970 = vmatpush3.bf16.msra.mxu1 %v7518_v13  ;;  %v7553_v13 = vld [vmem:[%s9440_s1 + $0xd28] sm:$0xff]  }
 0x198   :  { %v6649_v5 = vadd.f32 %v6648_v3, %v6647_v63  ;;  %v6670_v6 = vpop.f32.mrb[21].mxu1  ;;  %v6650_v9 = vpop.f32.mrb[22].mxu0  ;;  %6971 = vmatprep.subr.bf16.mxu1 %v7520_v19  ;;  %6950 = vmatpush3.bf16.msra.mxu0 %v7521_v21  ;;  %v7548_v63 = vld [vmem:[%s9440_s1 + $0xde0] sm:$0xff]   ;;  %v7557_v19 = vld [vmem:[%s9440_s1 + $0xd30] sm:$0xff]   ;;  %v7559_v21 = vld [vmem:[%s9440_s1 + $0xd78] sm:$0xff]  }
 0x199   :  { %v6671_v8 = vadd.f32 %v6670_v6, %v6669_v1  ;;  %v6672_v12 = vpop.f32.mrb[22].mxu1  ;;  %v6651_v14 = vpop.f32.mrb[23].mxu0  ;;  %6951 = vmatprep.subr.bf16.mxu0 %v7523_v25  ;;  %v41_v25 = vld [vmem:[%s9441_s0 + $0xd0] sm:$0xff] }
 0x19a   :  { %v4947_v11 = vadd.f32 %v6649_v5, %v8929_v23  ;;  %v6652_v17 = vadd.f32 %v6651_v14, %v6650_v9  ;;  %v6673_v18 = vpop.f32.mrb[23].mxu1  ;;  %v7522_v23 = vld [vmem:[%s9440_s1 + $0xca8] sm:$0xff]   ;;  %v7550_v5 = vld [vmem:[%s9440_s1 + $0xda0] sm:$0xff]  }
 0x19b   :  { %v6674_v20 = vadd.f32 %v6673_v18, %v6672_v12  ;;  %6972 = vmatpush3.bf16.msra.mxu1 %v7522_v23  ;;  %v7556_v18 = vld [vmem:[%s9440_s1 + $0xdf0] sm:$0xff]   ;;  %v7561_v23 = vld [vmem:[%s9440_s1 + $0xd38] sm:$0xff]  }
 0x19c   :  { %v9043_v15 = vadd.f32 %v6671_v8, %v4947_v11  ;;  %v4950_v22 = vadd.f32 %v6652_v17, %v8944_v32  ;;  %6973 = vmatprep.subr.bf16.mxu1 %v7524_v26  ;;  %6952 = vmatpush3.bf16.msra.mxu0 %v7525_v27  ;;  %v7530_v32 = vld [vmem:[%s9440_s1 + $0xcb8] sm:$0xff]   ;;  %v7551_v8 = vld [vmem:[%s9440_s1 + $0xd68] sm:$0xff]   ;;  %v7555_v17 = vld [vmem:[%s9440_s1 + $0xd70] sm:$0xff]  }
 0x19d   :  { %6953 = vmatprep.subr.bf16.mxu0 %v7527_v29  ;;  %v7552_v11 = vld [vmem:[%s9440_s1 + $0xde8] sm:$0xff]   ;;  %v73_v26 = vld [vmem:[%s9441_s0 + $0x1d0] sm:$0xff]  ;;  %v42_v27 = vld [vmem:[%s9441_s0 + $0xd8] sm:$0xff] }
 0x19e   :  { %v9058_v24 = vadd.f32 %v6674_v20, %v4950_v22  ;;  %v7558_v20 = vld [vmem:[%s9440_s1 + $0xdb0] sm:$0xff]   ;;  %v7560_v22 = vld [vmem:[%s9440_s1 + $0xdf8] sm:$0xff]   ;;  %v5885_v29 = vcombine.low %v41_v25, %v73_v26 }
 0x19f   :  { %6974 = vmatpush3.bf16.msra.mxu1 %v7526_v28  ;;  %v74_v28 = vld [vmem:[%s9441_s0 + $0x1d8] sm:$0xff] }
 0x1a0   :  { %6975 = vmatprep.subr.bf16.mxu1 %v7528_v30  ;;  %6954 = vmatpush3.bf16.msra.mxu0 %v7529_v31  ;;  %v5886_v30 = vcombine.high %v41_v25, %v73_v26  ;;  %v5887_v31 = vcombine.low %v42_v27, %v74_v28  ;;  %v7595_v25 = vld [vmem:[%s9440_s1 + $0xf40] sm:$0xff]  }
 0x1a1   :  { %6983 = vmatprep.subr.bf16.mxu0 %v7531_v41  ;;  %v7571_v41 = vld [vmem:[%s9440_s1 + $0xe50] sm:$0xff]   ;;  %v7596_v26 = vld [vmem:[%s9440_s1 + $0xfc0] sm:$0xff]  }
 0x1a3   :  { %6976 = vmatpush3.bf16.msra.mxu1 %v7530_v32  ;;  %5519 = vmatmul.mubr.bf16.vlgmr.msra.gmra.mrb[48].mxu0 %v5881_v35  ;;  %v5888_v32 = vcombine.high %v42_v27, %v74_v28  ;;  %v7565_v35 = vld [vmem:[%s9440_s1 + $0xe00] sm:$0xff]  }
 0x1a4   :  { %7005 = vmatprep.subr.bf16.mxu1 %v7532_v42  ;;  %6984 = vmatpush3.bf16.msra.mxu0 %v7533_v43  ;;  %v7572_v42 = vld [vmem:[%s9440_s1 + $0xed0] sm:$0xff]   ;;  %v7597_v27 = vld [vmem:[%s9440_s1 + $0xf00] sm:$0xff]  }
 0x1a5   :  { %6985 = vmatprep.subr.bf16.mxu0 %v7535_v45  ;;  %5600 = vmatprep.mubr.bf16.mxu0 %v5886_v30  ;;  %v7573_v43 = vld [vmem:[%s9440_s1 + $0xe10] sm:$0xff]   ;;  %v7575_v45 = vld [vmem:[%s9440_s1 + $0xe58] sm:$0xff]   ;;  %v7598_v28 = vld [vmem:[%s9440_s1 + $0xf80] sm:$0xff]  }
 0x1a6   :  { %5560 = vmatmul.mubr.bf16.vlgmr.msra.gmra.mrb[48].mxu1 %v5883_v39  ;;  %v7569_v39 = vld [vmem:[%s9440_s1 + $0xe08] sm:$0xff]  }
 0x1a7   :  { %7006 = vmatpush3.bf16.msra.mxu1 %v7534_v44  ;;  %5641 = vmatprep.mubr.bf16.mxu1 %v5888_v32  ;;  %v7574_v44 = vld [vmem:[%s9440_s1 + $0xe90] sm:$0xff]   ;;  %v7600_v30 = vld [vmem:[%s9440_s1 + $0xfc8] sm:$0xff]  }
 0x1a8   :  { %7007 = vmatprep.subr.bf16.mxu1 %v7536_v46  ;;  %6986 = vmatpush3.bf16.msra.mxu0 %v7537_v47  ;;  %v7576_v46 = vld [vmem:[%s9440_s1 + $0xed8] sm:$0xff]   ;;  %v7602_v32 = vld [vmem:[%s9440_s1 + $0xf88] sm:$0xff]  }
 0x1a9   :  { %6987 = vmatprep.subr.bf16.mxu0 %v7539_v49  ;;  %v7577_v47 = vld [vmem:[%s9440_s1 + $0xe18] sm:$0xff]  }
 0x1aa   :  { %v7578_v49 = vld [vmem:[%s9440_s1 + $0xe98] sm:$0xff]  }
 0x1ab   :  { %7008 = vmatpush3.bf16.msra.mxu1 %v7538_v48 }
 0x1ac   :  { %7009 = vmatprep.subr.bf16.mxu1 %v7540_v50  ;;  %6988 = vmatpush3.bf16.msra.mxu0 %v7541_v51  ;;  %v7579_v51 = vld [vmem:[%s9440_s1 + $0xe60] sm:$0xff]  }
 0x1ad   :  { %6989 = vmatprep.subr.bf16.mxu0 %v7543_v53  ;;  %v7580_v53 = vld [vmem:[%s9440_s1 + $0xee0] sm:$0xff]  }
 0x1af   :  { %7010 = vmatpush3.bf16.msra.mxu1 %v7542_v52 }
 0x1b0   :  { %7011 = vmatprep.subr.bf16.mxu1 %v7544_v54  ;;  %6990 = vmatpush3.bf16.msra.mxu0 %v7545_v56  ;;  %v7581_v56 = vld [vmem:[%s9440_s1 + $0xe20] sm:$0xff]  }
 0x1b1   :  { %6991 = vmatprep.subr.bf16.mxu0 %v7547_v60 }
 0x1b3   :  { %7012 = vmatpush3.bf16.msra.mxu1 %v7546_v58 }
 0x1b4   :  { %7013 = vmatprep.subr.bf16.mxu1 %v7548_v63  ;;  %6992 = vmatpush3.bf16.msra.mxu0 %v7549_v2 }
 0x1b5   :  { %6993 = vmatprep.subr.bf16.mxu0 %v7551_v8  ;;  %v7587_v8 = vld [vmem:[%s9440_s1 + $0xe70] sm:$0xff]  }
 0x1b6   :  { %v6691_v55 = vpop.f32.mrb[24].mxu0 }
 0x1b7   :  { %v6713_v57 = vpop.f32.mrb[24].mxu1  ;;  %v6692_v59 = vpop.f32.mrb[25].mxu0  ;;  %7014 = vmatpush3.bf16.msra.mxu1 %v7550_v5 }
 0x1b8   :  { %v6693_v61 = vadd.f32 %v6692_v59, %v6691_v55  ;;  %v6714_v62 = vpop.f32.mrb[25].mxu1  ;;  %v6694_v1 = vpop.f32.mrb[26].mxu0  ;;  %7015 = vmatprep.subr.bf16.mxu1 %v7552_v11  ;;  %6994 = vmatpush3.bf16.msra.mxu0 %v7553_v13  ;;  %v7582_v59 = vld [vmem:[%s9440_s1 + $0xea0] sm:$0xff]   ;;  %v7589_v11 = vld [vmem:[%s9440_s1 + $0xe30] sm:$0xff]   ;;  %v7591_v13 = vld [vmem:[%s9440_s1 + $0xe78] sm:$0xff]  }
 0x1b9   :  { %v6715_v0 = vadd.f32 %v6714_v62, %v6713_v57  ;;  %v6716_v4 = vpop.f32.mrb[26].mxu1  ;;  %v6695_v6 = vpop.f32.mrb[27].mxu0  ;;  %6995 = vmatprep.subr.bf16.mxu0 %v7555_v17  ;;  %v7583_v62 = vld [vmem:[%s9440_s1 + $0xe68] sm:$0xff]   ;;  %v43_v17 = vld [vmem:[%s9441_s0 + $0xe0] sm:$0xff] }
 0x1ba   :  { %v5029_v3 = vadd.f32 %v6693_v61, %v9043_v15  ;;  %v6696_v9 = vadd.f32 %v6695_v6, %v6694_v1  ;;  %v6717_v10 = vpop.f32.mrb[27].mxu1  ;;  %v7554_v15 = vld [vmem:[%s9440_s1 + $0xda8] sm:$0xff]  }
 0x1bb   :  { %v6718_v12 = vadd.f32 %v6717_v10, %v6716_v4  ;;  %7016 = vmatpush3.bf16.msra.mxu1 %v7554_v15  ;;  %v7584_v1 = vld [vmem:[%s9440_s1 + $0xee8] sm:$0xff]   ;;  %v7588_v10 = vld [vmem:[%s9440_s1 + $0xef0] sm:$0xff]   ;;  %v7593_v15 = vld [vmem:[%s9440_s1 + $0xe38] sm:$0xff]  }
 0x1bc   :  { %v9157_v7 = vadd.f32 %v6715_v0, %v5029_v3  ;;  %v5032_v14 = vadd.f32 %v6696_v9, %v9058_v24  ;;  %7017 = vmatprep.subr.bf16.mxu1 %v7556_v18  ;;  %6996 = vmatpush3.bf16.msra.mxu0 %v7557_v19  ;;  %v7562_v24 = vld [vmem:[%s9440_s1 + $0xdb8] sm:$0xff]   ;;  %v7585_v4 = vld [vmem:[%s9440_s1 + $0xe28] sm:$0xff]   ;;  %v75_v18 = vld [vmem:[%s9441_s0 + $0x1e0] sm:$0xff] }
 0x1bd   :  { %6997 = vmatprep.subr.bf16.mxu0 %v7559_v21  ;;  %v7586_v6 = vld [vmem:[%s9440_s1 + $0xea8] sm:$0xff]   ;;  %v5890_v21 = vcombine.high %v43_v17, %v75_v18 }
 0x1be   :  { %v9172_v16 = vadd.f32 %v6718_v12, %v5032_v14  ;;  %v7590_v12 = vld [vmem:[%s9440_s1 + $0xeb0] sm:$0xff]   ;;  %v7592_v14 = vld [vmem:[%s9440_s1 + $0xef8] sm:$0xff]   ;;  %v44_v19 = vld [vmem:[%s9441_s0 + $0xe8] sm:$0xff] }
 0x1bf   :  { %7018 = vmatpush3.bf16.msra.mxu1 %v7558_v20  ;;  %v5889_v20 = vcombine.low %v43_v17, %v75_v18 }
 0x1c0   :  { %7019 = vmatprep.subr.bf16.mxu1 %v7560_v22  ;;  %6998 = vmatpush3.bf16.msra.mxu0 %v7561_v23  ;;  %v76_v22 = vld [vmem:[%s9441_s0 + $0x1e8] sm:$0xff] }
 0x1c1   :  { %7027 = vmatprep.subr.bf16.mxu0 %v7563_v33  ;;  %v5891_v23 = vcombine.low %v44_v19, %v76_v22  ;;  %v7603_v33 = vld [vmem:[%s9440_s1 + $0xf50] sm:$0xff]  }
 0x1c3   :  { %7020 = vmatpush3.bf16.msra.mxu1 %v7562_v24  ;;  %5601 = vmatmul.mubr.bf16.vlgmr.msra.gmra.mrb[52].mxu0 %v5885_v29  ;;  %v5892_v24 = vcombine.high %v44_v19, %v76_v22  ;;  %v7599_v29 = vld [vmem:[%s9440_s1 + $0xf48] sm:$0xff]  }
 0x1c4   :  { %7049 = vmatprep.subr.bf16.mxu1 %v7564_v34  ;;  %7028 = vmatpush3.bf16.msra.mxu0 %v7565_v35  ;;  %v7604_v34 = vld [vmem:[%s9440_s1 + $0xfd0] sm:$0xff]  }
 0x1c5   :  { %7029 = vmatprep.subr.bf16.mxu0 %v7567_v37  ;;  %5682 = vmatprep.mubr.bf16.mxu0 %v5890_v21  ;;  %v7605_v35 = vld [vmem:[%s9440_s1 + $0xf10] sm:$0xff]   ;;  %v7607_v37 = vld [vmem:[%s9440_s1 + $0xf58] sm:$0xff]  }
 0x1c6   :  { %5642 = vmatmul.mubr.bf16.vlgmr.msra.gmra.mrb[52].mxu1 %v5887_v31  ;;  %v7601_v31 = vld [vmem:[%s9440_s1 + $0xf08] sm:$0xff]  }
 0x1c7   :  { %7050 = vmatpush3.bf16.msra.mxu1 %v7566_v36  ;;  %5723 = vmatprep.mubr.bf16.mxu1 %v5892_v24  ;;  %v7606_v36 = vld [vmem:[%s9440_s1 + $0xf90] sm:$0xff]  }
 0x1c8   :  { %7051 = vmatprep.subr.bf16.mxu1 %v7568_v38  ;;  %7030 = vmatpush3.bf16.msra.mxu0 %v7569_v39  ;;  %v7608_v38 = vld [vmem:[%s9440_s1 + $0xfd8] sm:$0xff]  }
 0x1c9   :  { %7031 = vmatprep.subr.bf16.mxu0 %v7571_v41 }
 0x1cb   :  { %7052 = vmatpush3.bf16.msra.mxu1 %v7570_v40  ;;  %v7609_v40 = vld [vmem:[%s9440_s1 + $0xf18] sm:$0xff]  }
 0x1cc   :  { %7053 = vmatprep.subr.bf16.mxu1 %v7572_v42  ;;  %7032 = vmatpush3.bf16.msra.mxu0 %v7573_v43  ;;  %v7610_v42 = vld [vmem:[%s9440_s1 + $0xf98] sm:$0xff]  }
 0x1cd   :  { %7033 = vmatprep.subr.bf16.mxu0 %v7575_v45 }
 0x1cf   :  { %7054 = vmatpush3.bf16.msra.mxu1 %v7574_v44  ;;  %v7611_v44 = vld [vmem:[%s9440_s1 + $0xf60] sm:$0xff]  }
 0x1d0   :  { %7055 = vmatprep.subr.bf16.mxu1 %v7576_v46  ;;  %7034 = vmatpush3.bf16.msra.mxu0 %v7577_v47  ;;  %v7612_v47 = vld [vmem:[%s9440_s1 + $0xfe0] sm:$0xff]  }
 0x1d1   :  { %7035 = vmatprep.subr.bf16.mxu0 %v7579_v51 }
 0x1d3   :  { %7056 = vmatpush3.bf16.msra.mxu1 %v7578_v49 }
 0x1d4   :  { %7057 = vmatprep.subr.bf16.mxu1 %v7580_v53  ;;  %7036 = vmatpush3.bf16.msra.mxu0 %v7581_v56  ;;  %v7614_v53 = vld [vmem:[%s9440_s1 + $0xfa0] sm:$0xff]   ;;  %v7615_v56 = vld [vmem:[%s9440_s1 + $0xf68] sm:$0xff]  }
 0x1d5   :  { %7037 = vmatprep.subr.bf16.mxu0 %v7583_v62 }
 0x1d6   :  { %v6735_v48 = vpop.f32.mrb[28].mxu0 }
 0x1d7   :  { %v6757_v50 = vpop.f32.mrb[28].mxu1  ;;  %v6736_v52 = vpop.f32.mrb[29].mxu0  ;;  %7058 = vmatpush3.bf16.msra.mxu1 %v7582_v59  ;;  %v7616_v59 = vld [vmem:[%s9440_s1 + $0xfe8] sm:$0xff]  }
 0x1d8   :  { %v6737_v54 = vadd.f32 %v6736_v52, %v6735_v48  ;;  %v6758_v55 = vpop.f32.mrb[29].mxu1  ;;  %v6738_v58 = vpop.f32.mrb[30].mxu0  ;;  %7059 = vmatprep.subr.bf16.mxu1 %v7584_v1  ;;  %7038 = vmatpush3.bf16.msra.mxu0 %v7585_v4  ;;  %v7619_v1 = vld [vmem:[%s9440_s1 + $0xf70] sm:$0xff]  }
 0x1d9   :  { %v6759_v57 = vadd.f32 %v6758_v55, %v6757_v50  ;;  %v6760_v61 = vpop.f32.mrb[30].mxu1  ;;  %v6739_v63 = vpop.f32.mrb[31].mxu0  ;;  %7039 = vmatprep.subr.bf16.mxu0 %v7587_v8  ;;  %v7613_v50 = vld [vmem:[%s9440_s1 + $0xf20] sm:$0xff]   ;;  %v7622_v4 = vld [vmem:[%s9440_s1 + $0xfb0] sm:$0xff]   ;;  %v7626_v8 = vld [vmem:[%s9440_s1 + $0xfb8] sm:$0xff]  }
 0x1da   :  { %v5111_v60 = vadd.f32 %v6737_v54, %v9157_v7  ;;  %v6740_v2 = vadd.f32 %v6739_v63, %v6738_v58  ;;  %v6761_v3 = vpop.f32.mrb[31].mxu1  ;;  %v7618_v63 = vld [vmem:[%s9440_s1 + $0xfa8] sm:$0xff]  }
 0x1db   :  { %v6762_v5 = vadd.f32 %v6761_v3, %v6760_v61  ;;  %7060 = vmatpush3.bf16.msra.mxu1 %v7586_v6  ;;  %v7617_v61 = vld [vmem:[%s9440_s1 + $0xf28] sm:$0xff]   ;;  %v7621_v3 = vld [vmem:[%s9440_s1 + $0xf30] sm:$0xff]   ;;  %v7624_v6 = vld [vmem:[%s9440_s1 + $0xff8] sm:$0xff]  }
 0x1dc   :  { %v9274_v0 = vadd.f32 %v6759_v57, %v5111_v60  ;;  %v5114_v7 = vadd.f32 %v6740_v2, %v9172_v16  ;;  %7061 = vmatprep.subr.bf16.mxu1 %v7588_v10  ;;  %7040 = vmatpush3.bf16.msra.mxu0 %v7589_v11  ;;  %v7594_v16 = vld [vmem:[%s9440_s1 + $0xeb8] sm:$0xff]   ;;  %v7620_v2 = vld [vmem:[%s9440_s1 + $0xff0] sm:$0xff]  }
 0x1dd   :  { %7041 = vmatprep.subr.bf16.mxu0 %v7591_v13  ;;  %v77_v10 = vld [vmem:[%s9441_s0 + $0x1f0] sm:$0xff]  ;;  %v46_v13 = vld [vmem:[%s9441_s0 + $0xf8] sm:$0xff] }
 0x1de   :  { %v9289_v9 = vadd.f32 %v6762_v5, %v5114_v7  ;;  %v7623_v5 = vld [vmem:[%s9440_s1 + $0xf78] sm:$0xff]  }
 0x1df   :  { %7062 = vmatpush3.bf16.msra.mxu1 %v7590_v12  ;;  %v7625_v7 = vld [vmem:[%s9440_s1 + $0xf38] sm:$0xff]  }
 0x1e0   :  { %7063 = vmatprep.subr.bf16.mxu1 %v7592_v14  ;;  %7042 = vmatpush3.bf16.msra.mxu0 %v7593_v15  ;;  %v78_v14 = vld [vmem:[%s9441_s0 + $0x1f8] sm:$0xff] }
 0x1e1   :  { %7071 = vmatprep.subr.bf16.mxu0 %v7595_v25  ;;  %v5895_v15 = vcombine.low %v46_v13, %v78_v14 }
 0x1e3   :  { %7064 = vmatpush3.bf16.msra.mxu1 %v7594_v16  ;;  %5683 = vmatmul.mubr.bf16.vlgmr.msra.gmra.mrb[56].mxu0 %v5889_v20  ;;  %v5896_v16 = vcombine.high %v46_v13, %v78_v14 }
 0x1e4   :  { %7093 = vmatprep.subr.bf16.mxu1 %v7596_v26  ;;  %7072 = vmatpush3.bf16.msra.mxu0 %v7597_v27 }
 0x1e5   :  { %7073 = vmatprep.subr.bf16.mxu0 %v7599_v29 }
 0x1e6   :  { %5724 = vmatmul.mubr.bf16.vlgmr.msra.gmra.mrb[56].mxu1 %v5891_v23 }
 0x1e7   :  { %7094 = vmatpush3.bf16.msra.mxu1 %v7598_v28  ;;  %5805 = vmatprep.mubr.bf16.mxu1 %v5896_v16 }
 0x1e8   :  { %7095 = vmatprep.subr.bf16.mxu1 %v7600_v30  ;;  %7074 = vmatpush3.bf16.msra.mxu0 %v7601_v31 }
 0x1e9   :  { %7075 = vmatprep.subr.bf16.mxu0 %v7603_v33 }
 0x1eb   :  { %7096 = vmatpush3.bf16.msra.mxu1 %v7602_v32 }
 0x1ec   :  { %7097 = vmatprep.subr.bf16.mxu1 %v7604_v34  ;;  %7076 = vmatpush3.bf16.msra.mxu0 %v7605_v35 }
 0x1ed   :  { %7077 = vmatprep.subr.bf16.mxu0 %v7607_v37 }
 0x1ef   :  { %7098 = vmatpush3.bf16.msra.mxu1 %v7606_v36 }
 0x1f0   :  { %7099 = vmatprep.subr.bf16.mxu1 %v7608_v38  ;;  %7078 = vmatpush3.bf16.msra.mxu0 %v7609_v40 }
 0x1f1   :  { %7079 = vmatprep.subr.bf16.mxu0 %v7611_v44 }
 0x1f3   :  { %7100 = vmatpush3.bf16.msra.mxu1 %v7610_v42 }
 0x1f4   :  { %7101 = vmatprep.subr.bf16.mxu1 %v7612_v47  ;;  %7080 = vmatpush3.bf16.msra.mxu0 %v7613_v50 }
 0x1f5   :  { %7081 = vmatprep.subr.bf16.mxu0 %v7615_v56 }
 0x1f6   :  { %v6779_v39 = vpop.f32.mrb[32].mxu0 }
 0x1f7   :  { %v6801_v41 = vpop.f32.mrb[32].mxu1  ;;  %v6780_v43 = vpop.f32.mrb[33].mxu0  ;;  %7102 = vmatpush3.bf16.msra.mxu1 %v7614_v53 }
 0x1f8   :  { %v6781_v45 = vadd.f32 %v6780_v43, %v6779_v39  ;;  %v6802_v46 = vpop.f32.mrb[33].mxu1  ;;  %v6782_v49 = vpop.f32.mrb[34].mxu0  ;;  %7103 = vmatprep.subr.bf16.mxu1 %v7616_v59  ;;  %7082 = vmatpush3.bf16.msra.mxu0 %v7617_v61 }
 0x1f9   :  { %v6803_v48 = vadd.f32 %v6802_v46, %v6801_v41  ;;  %v6804_v52 = vpop.f32.mrb[34].mxu1  ;;  %v6783_v54 = vpop.f32.mrb[35].mxu0  ;;  %7083 = vmatprep.subr.bf16.mxu0 %v7619_v1 }
 0x1fa   :  { %v5193_v51 = vadd.f32 %v6781_v45, %v9274_v0  ;;  %v6784_v57 = vadd.f32 %v6783_v54, %v6782_v49  ;;  %v6805_v58 = vpop.f32.mrb[35].mxu1 }
 0x1fb   :  { %v6806_v60 = vadd.f32 %v6805_v58, %v6804_v52  ;;  %7104 = vmatpush3.bf16.msra.mxu1 %v7618_v63 }
 0x1fc   :  { %v5234_v55 = vadd.f32 %v6803_v48, %v5193_v51  ;;  %v5196_v62 = vadd.f32 %v6784_v57, %v9289_v9  ;;  %7105 = vmatprep.subr.bf16.mxu1 %v7620_v2  ;;  %7084 = vmatpush3.bf16.msra.mxu0 %v7621_v3  ;;  %v45_v9 = vld [vmem:[%s9441_s0 + $0xf0] sm:$0xff] }
 0x1fd   :  { %7085 = vmatprep.subr.bf16.mxu0 %v7623_v5  ;;  %v5893_v11 = vcombine.low %v45_v9, %v77_v10  ;;  %v5894_v12 = vcombine.high %v45_v9, %v77_v10 }
 0x1fe   :  { %v5237_v0 = vadd.f32 %v6806_v60, %v5196_v62 }
 0x1ff   :  { %7106 = vmatpush3.bf16.msra.mxu1 %v7622_v4  ;;  %5764 = vmatprep.mubr.bf16.mxu0 %v5894_v12 }
 0x200   :  { %7107 = vmatprep.subr.bf16.mxu1 %v7624_v6  ;;  %7086 = vmatpush3.bf16.msra.mxu0 %v7625_v7 }
 0x203   :  { %7108 = vmatpush3.bf16.msra.mxu1 %v7626_v8  ;;  %5765 = vmatmul.mubr.bf16.vlgmr.msra.gmra.mrb[60].mxu0 %v5893_v11 }
 0x206   :  { %5806 = vmatmul.mubr.bf16.vlgmr.msra.gmra.mrb[60].mxu1 %v5895_v15 }
 0x216   :  { %v6823_v17 = vpop.f32.mrb[36].mxu0 }
 0x217   :  { %v6824_v19 = vpop.f32.mrb[37].mxu0 }
 0x218   :  { %v6825_v20 = vadd.f32 %v6824_v19, %v6823_v17  ;;  %v6826_v22 = vpop.f32.mrb[38].mxu0 }
 0x219   :  { %v6845_v18 = vpop.f32.mrb[36].mxu1  ;;  %v6827_v25 = vpop.f32.mrb[39].mxu0 }
 0x21a   :  { %v6846_v21 = vpop.f32.mrb[37].mxu1  ;;  %v5275_v26 = vadd.f32 %v6825_v20, %v5234_v55  ;;  %v6828_v27 = vadd.f32 %v6827_v25, %v6826_v22 }
 0x21b   :  { %v6847_v23 = vadd.f32 %v6846_v21, %v6845_v18  ;;  %v6848_v24 = vpop.f32.mrb[38].mxu1 }
 0x21c   :  { %v6849_v28 = vpop.f32.mrb[39].mxu1  ;;  %v5278_v31 = vadd.f32 %v6828_v27, %v5237_v0 }
 0x21d   :  { %v6850_v29 = vadd.f32 %v6849_v28, %v6848_v24  ;;  %v5316_v30 = vadd.f32 %v6847_v23, %v5275_v26 }
 0x21f   :  { %v5319_v32 = vadd.f32 %v6850_v29, %v5278_v31 }
 0x236   :  { %v6867_v33 = vpop.f32.mrb[40].mxu0 }
 0x237   :  { %v6868_v35 = vpop.f32.mrb[41].mxu0 }
 0x238   :  { %v6869_v37 = vadd.f32 %v6868_v35, %v6867_v33  ;;  %v6870_v39 = vpop.f32.mrb[42].mxu0 }
 0x239   :  { %v6889_v34 = vpop.f32.mrb[40].mxu1  ;;  %v6871_v41 = vpop.f32.mrb[43].mxu0 }
 0x23a   :  { %v6890_v36 = vpop.f32.mrb[41].mxu1  ;;  %v5357_v43 = vadd.f32 %v6869_v37, %v5316_v30  ;;  %v6872_v44 = vadd.f32 %v6871_v41, %v6870_v39 }
 0x23b   :  { %v6891_v38 = vadd.f32 %v6890_v36, %v6889_v34  ;;  %v6892_v40 = vpop.f32.mrb[42].mxu1 }
 0x23c   :  { %v6893_v42 = vpop.f32.mrb[43].mxu1  ;;  %v5360_v47 = vadd.f32 %v6872_v44, %v5319_v32 }
 0x23d   :  { %v6894_v45 = vadd.f32 %v6893_v42, %v6892_v40  ;;  %v5398_v46 = vadd.f32 %v6891_v38, %v5357_v43 }
 0x23f   :  { %v5401_v48 = vadd.f32 %v6894_v45, %v5360_v47 }
 0x256   :  { %v6911_v49 = vpop.f32.mrb[44].mxu0 }
 0x257   :  { %v6912_v51 = vpop.f32.mrb[45].mxu0 }
 0x258   :  { %v6913_v52 = vadd.f32 %v6912_v51, %v6911_v49  ;;  %v6914_v54 = vpop.f32.mrb[46].mxu0 }
 0x259   :  { %v6933_v50 = vpop.f32.mrb[44].mxu1  ;;  %v6915_v57 = vpop.f32.mrb[47].mxu0 }
 0x25a   :  { %v6934_v53 = vpop.f32.mrb[45].mxu1  ;;  %v5439_v58 = vadd.f32 %v6913_v52, %v5398_v46  ;;  %v6916_v59 = vadd.f32 %v6915_v57, %v6914_v54 }
 0x25b   :  { %v6935_v55 = vadd.f32 %v6934_v53, %v6933_v50  ;;  %v6936_v56 = vpop.f32.mrb[46].mxu1 }
 0x25c   :  { %v6937_v60 = vpop.f32.mrb[47].mxu1  ;;  %v5442_v63 = vadd.f32 %v6916_v59, %v5401_v48 }
 0x25d   :  { %v6938_v61 = vadd.f32 %v6937_v60, %v6936_v56  ;;  %v5480_v62 = vadd.f32 %v6935_v55, %v5439_v58 }
 0x25f   :  { %v5483_v0 = vadd.f32 %v6938_v61, %v5442_v63 }
 0x276   :  { %v6955_v1 = vpop.f32.mrb[48].mxu0 }
 0x277   :  { %v6956_v3 = vpop.f32.mrb[49].mxu0 }
 0x278   :  { %v6957_v4 = vadd.f32 %v6956_v3, %v6955_v1  ;;  %v6958_v6 = vpop.f32.mrb[50].mxu0 }
 0x279   :  { %v6977_v2 = vpop.f32.mrb[48].mxu1  ;;  %v6959_v9 = vpop.f32.mrb[51].mxu0 }
 0x27a   :  { %v6978_v5 = vpop.f32.mrb[49].mxu1  ;;  %v5521_v10 = vadd.f32 %v6957_v4, %v5480_v62  ;;  %v6960_v11 = vadd.f32 %v6959_v9, %v6958_v6 }
 0x27b   :  { %v6979_v7 = vadd.f32 %v6978_v5, %v6977_v2  ;;  %v6980_v8 = vpop.f32.mrb[50].mxu1 }
 0x27c   :  { %v6981_v12 = vpop.f32.mrb[51].mxu1  ;;  %v5524_v15 = vadd.f32 %v6960_v11, %v5483_v0 }
 0x27d   :  { %v6982_v13 = vadd.f32 %v6981_v12, %v6980_v8  ;;  %v5562_v14 = vadd.f32 %v6979_v7, %v5521_v10 }
 0x27f   :  { %v5565_v16 = vadd.f32 %v6982_v13, %v5524_v15 }
 0x296   :  { %v6999_v17 = vpop.f32.mrb[52].mxu0 }
 0x297   :  { %v7000_v19 = vpop.f32.mrb[53].mxu0 }
 0x298   :  { %v7001_v21 = vadd.f32 %v7000_v19, %v6999_v17  ;;  %v7002_v23 = vpop.f32.mrb[54].mxu0 }
 0x299   :  { %v7021_v18 = vpop.f32.mrb[52].mxu1  ;;  %v7003_v25 = vpop.f32.mrb[55].mxu0 }
 0x29a   :  { %v7022_v20 = vpop.f32.mrb[53].mxu1  ;;  %v5603_v27 = vadd.f32 %v7001_v21, %v5562_v14  ;;  %v7004_v28 = vadd.f32 %v7003_v25, %v7002_v23 }
 0x29b   :  { %v7023_v22 = vadd.f32 %v7022_v20, %v7021_v18  ;;  %v7024_v24 = vpop.f32.mrb[54].mxu1 }
 0x29c   :  { %v7025_v26 = vpop.f32.mrb[55].mxu1  ;;  %v5606_v31 = vadd.f32 %v7004_v28, %v5565_v16 }
 0x29d   :  { %v7026_v29 = vadd.f32 %v7025_v26, %v7024_v24  ;;  %v5644_v30 = vadd.f32 %v7023_v22, %v5603_v27 }
 0x29f   :  { %v5647_v32 = vadd.f32 %v7026_v29, %v5606_v31 }
 0x2b6   :  { %v7043_v33 = vpop.f32.mrb[56].mxu0 }
 0x2b7   :  { %v7044_v35 = vpop.f32.mrb[57].mxu0 }
 0x2b8   :  { %v7045_v36 = vadd.f32 %v7044_v35, %v7043_v33  ;;  %v7046_v38 = vpop.f32.mrb[58].mxu0 }
 0x2b9   :  { %v7065_v34 = vpop.f32.mrb[56].mxu1  ;;  %v7047_v41 = vpop.f32.mrb[59].mxu0 }
 0x2ba   :  { %v7066_v37 = vpop.f32.mrb[57].mxu1  ;;  %v5685_v42 = vadd.f32 %v7045_v36, %v5644_v30  ;;  %v7048_v43 = vadd.f32 %v7047_v41, %v7046_v38 }
 0x2bb   :  { %v7067_v39 = vadd.f32 %v7066_v37, %v7065_v34  ;;  %v7068_v40 = vpop.f32.mrb[58].mxu1 }
 0x2bc   :  { %v7069_v44 = vpop.f32.mrb[59].mxu1  ;;  %v5688_v47 = vadd.f32 %v7048_v43, %v5647_v32 }
 0x2bd   :  { %v7070_v45 = vadd.f32 %v7069_v44, %v7068_v40  ;;  %v5726_v46 = vadd.f32 %v7067_v39, %v5685_v42 }
 0x2bf   :  { %v5729_v48 = vadd.f32 %v7070_v45, %v5688_v47 }
 0x2d6   :  { %v7087_v49 = vpop.f32.mrb[60].mxu0 }
 0x2d7   :  { %v7088_v51 = vpop.f32.mrb[61].mxu0 }
 0x2d8   :  { %v7089_v52 = vadd.f32 %v7088_v51, %v7087_v49  ;;  %v7090_v54 = vpop.f32.mrb[62].mxu0 }
 0x2d9   :  { %v7109_v50 = vpop.f32.mrb[60].mxu1  ;;  %v7091_v57 = vpop.f32.mrb[63].mxu0 }
 0x2da   :  { %v7110_v53 = vpop.f32.mrb[61].mxu1  ;;  %v5767_v58 = vadd.f32 %v7089_v52, %v5726_v46  ;;  %v7092_v59 = vadd.f32 %v7091_v57, %v7090_v54 }
 0x2db   :  { %v7111_v55 = vadd.f32 %v7110_v53, %v7109_v50  ;;  %v7112_v56 = vpop.f32.mrb[62].mxu1 }
 0x2dc   :  { %v7113_v60 = vpop.f32.mrb[63].mxu1  ;;  %v5770_v63 = vadd.f32 %v7092_v59, %v5729_v48 }
 0x2dd   :  { %v7114_v61 = vadd.f32 %v7113_v60, %v7112_v56  ;;  %v5808_v62 = vadd.f32 %v7111_v55, %v5767_v58 }
 0x2df   :  { %v6409_v0 = vmul.f32 -1.442695, %v5808_v62  ;;  %v5811_v1 = vadd.f32 %v7114_v61, %v5770_v63 }
 0x2e1   :  { %7627 = vpow2.f32 %v6409_v0  ;;  %v6410_v2 = vmul.f32 -1.442695, %v5811_v1 }
 0x2e3   :  { %7629 = vpow2.f32 %v6410_v2 }
 0x2eb   :  { %v7628_v3 = vpop.eup %7627 }
 0x2ec   :  { %v5820_v4 = vadd.f32 1.0, %v7628_v3 }
 0x2ed   :  { %v7630_v5 = vpop.eup %7629 }
 0x2ee   :  { %7631 = vrcp.f32 %v5820_v4  ;;  %v5821_v6 = vadd.f32 1.0, %v7630_v5 }
 0x2f0   :  { %7633 = vrcp.f32 %v5821_v6 }
 0x2f8   :  { %v7632_v7 = vpop.eup %7631 }
 0x2f9   :  { %5826 = vst [vmem:[%s9443_s3] sm:$0xff] %v7632_v7 }
 0x2fa   :  { %v7634_v8 = vpop.eup %7633 }
 0x2fb   :  { %5827 = vst [vmem:[%s9443_s3 + $0x8] sm:$0xff] %v7634_v8 }

// kernel: discriminator_forward.8
= control target key start
LH: loop header
LB: loop body
LE: loop exit
PB: predicated region body
PF: predicated region fallthrough
CT: control target
= control target key end

     0   :  { %vm7850_vm0 = vcmask 1040384   ;;  %s13950_s1 = inlined_call_operand.vmem [shape: bf16[4096,512], index: 1, kind: input, shape index: {}]   ;;  %s13951_s0 = inlined_call_operand.vmem [shape: bf16[16,4096], index: 0, kind: input, shape index: {}]   ;;  %s13952_s2 = inlined_call_operand.vmem [shape: f32[1,512], index: 2, kind: input, shape index: {}]   ;;  %s13953_s3 = inlined_call_operand.vmem [shape: bf16[16,512], index: 3, kind: output, shape index: {0}]   ;;  %s13954_s4 = inlined_call_operand.vmem [shape: f32[1,2,512], index: 4, kind: output, shape index: {1}]  }
   0x1   :  { %v9071_v0 = vld [vmem:[%s13950_s1 + $0x4] ss:$16 sps:$4 sm:$0xff]   ;;  %v9073_v1 = vld [vmem:[%s13950_s1 + $0xc] ss:$16 sps:$4 sm:$0xff]   ;;  %v9075_v2 = vld [vmem:[%s13950_s1] ss:$16 sps:$4 sm:$0xff]  }
   0x2   :  { %6352 = vmatprep.subr.bf16.mxu0 %v9071_v0  ;;  %v9076_v3 = vld [vmem:[%s13950_s1 + $0x8] ss:$16 sps:$4 sm:$0xff]   ;;  %7040 = vmatprep.subr.bf16.mxu1 %v9073_v1  ;;  %v9077_v4 = vld [vmem:[%s13950_s1 + $0x24] ss:$16 sps:$4 sm:$0xff]   ;;  %v9079_v5 = vld [vmem:[%s13950_s1 + $0x2c] ss:$16 sps:$4 sm:$0xff]  }
   0x3   :  { %6353 = vmatpush1.bf16.msra.mxu0 %v9075_v2  ;;  %7041 = vmatpush1.bf16.msra.mxu1 %v9076_v3  ;;  %v9081_v6 = vld [vmem:[%s13950_s1 + $0x20] ss:$16 sps:$4 sm:$0xff]   ;;  %v9082_v7 = vld [vmem:[%s13950_s1 + $0x28] ss:$16 sps:$4 sm:$0xff]   ;;  %v9083_v8 = vld [vmem:[%s13950_s1 + $0x44] ss:$16 sps:$4 sm:$0xff]  }
   0x4   :  { %6354 = vmatprep.subr.bf16.mxu0 %v9077_v4  ;;  %7042 = vmatprep.subr.bf16.mxu1 %v9079_v5  ;;  %v9085_v9 = vld [vmem:[%s13950_s1 + $0x4c] ss:$16 sps:$4 sm:$0xff]   ;;  %v9087_v10 = vld [vmem:[%s13950_s1 + $0x40] ss:$16 sps:$4 sm:$0xff]   ;;  %v9088_v11 = vld [vmem:[%s13950_s1 + $0x48] ss:$16 sps:$4 sm:$0xff]  }
   0x5   :  { %v9089_v12 = vld [vmem:[%s13950_s1 + $0x64] ss:$16 sps:$4 sm:$0xff]   ;;  %v9091_v13 = vld [vmem:[%s13950_s1 + $0x6c] ss:$16 sps:$4 sm:$0xff]   ;;  %v9093_v14 = vld [vmem:[%s13950_s1 + $0x60] ss:$16 sps:$4 sm:$0xff]  }
   0x6   :  { %v9094_v15 = vld [vmem:[%s13950_s1 + $0x68] ss:$16 sps:$4 sm:$0xff]   ;;  %v9095_v16 = vld [vmem:[%s13950_s1 + $0x84] ss:$16 sps:$4 sm:$0xff]   ;;  %v9097_v17 = vld [vmem:[%s13950_s1 + $0x8c] ss:$16 sps:$4 sm:$0xff]  }
   0x7   :  { %6355 = vmatpush1.bf16.msra.mxu0 %v9081_v6  ;;  %7043 = vmatpush1.bf16.msra.mxu1 %v9082_v7  ;;  %v9099_v18 = vld [vmem:[%s13950_s1 + $0x80] ss:$16 sps:$4 sm:$0xff]   ;;  %v9100_v19 = vld [vmem:[%s13950_s1 + $0x88] ss:$16 sps:$4 sm:$0xff]   ;;  %v9101_v20 = vld [vmem:[%s13950_s1 + $0xa4] ss:$16 sps:$4 sm:$0xff]  }
   0x8   :  { %6356 = vmatprep.subr.bf16.mxu0 %v9083_v8  ;;  %7044 = vmatprep.subr.bf16.mxu1 %v9085_v9  ;;  %v9103_v21 = vld [vmem:[%s13950_s1 + $0xac] ss:$16 sps:$4 sm:$0xff]   ;;  %v9105_v22 = vld [vmem:[%s13950_s1 + $0xa0] ss:$16 sps:$4 sm:$0xff]   ;;  %v9106_v23 = vld [vmem:[%s13950_s1 + $0xa8] ss:$16 sps:$4 sm:$0xff]  }
   0x9   :  { %v9107_v24 = vld [vmem:[%s13950_s1 + $0xc4] ss:$16 sps:$4 sm:$0xff]   ;;  %v9109_v25 = vld [vmem:[%s13950_s1 + $0xcc] ss:$16 sps:$4 sm:$0xff]   ;;  %v9111_v26 = vld [vmem:[%s13950_s1 + $0xc0] ss:$16 sps:$4 sm:$0xff]  }
   0xa   :  { %v9112_v27 = vld [vmem:[%s13950_s1 + $0xc8] ss:$16 sps:$4 sm:$0xff]   ;;  %v9113_v28 = vld [vmem:[%s13950_s1 + $0xe4] ss:$16 sps:$4 sm:$0xff]   ;;  %v9115_v29 = vld [vmem:[%s13950_s1 + $0xec] ss:$16 sps:$4 sm:$0xff]  }
   0xb   :  { %6357 = vmatpush1.bf16.msra.mxu0 %v9087_v10  ;;  %7045 = vmatpush1.bf16.msra.mxu1 %v9088_v11  ;;  %v9117_v30 = vld [vmem:[%s13950_s1 + $0xe0] ss:$16 sps:$4 sm:$0xff]   ;;  %v9118_v31 = vld [vmem:[%s13950_s1 + $0xe8] ss:$16 sps:$4 sm:$0xff]   ;;  %v9119_v32 = vld [vmem:[%s13950_s1 + $0x104] ss:$16 sps:$4 sm:$0xff]  }
   0xc   :  { %6358 = vmatprep.subr.bf16.mxu0 %v9089_v12  ;;  %7046 = vmatprep.subr.bf16.mxu1 %v9091_v13  ;;  %v9121_v33 = vld [vmem:[%s13950_s1 + $0x10c] ss:$16 sps:$4 sm:$0xff]   ;;  %v9123_v34 = vld [vmem:[%s13950_s1 + $0x100] ss:$16 sps:$4 sm:$0xff]   ;;  %v9124_v35 = vld [vmem:[%s13950_s1 + $0x108] ss:$16 sps:$4 sm:$0xff]  }
   0xd   :  { %v9125_v36 = vld [vmem:[%s13950_s1 + $0x124] ss:$16 sps:$4 sm:$0xff]   ;;  %v9127_v37 = vld [vmem:[%s13950_s1 + $0x12c] ss:$16 sps:$4 sm:$0xff]   ;;  %v9129_v38 = vld [vmem:[%s13950_s1 + $0x120] ss:$16 sps:$4 sm:$0xff]  }
   0xe   :  { %v9130_v39 = vld [vmem:[%s13950_s1 + $0x128] ss:$16 sps:$4 sm:$0xff]   ;;  %v9131_v40 = vld [vmem:[%s13950_s1 + $0x144] ss:$16 sps:$4 sm:$0xff]   ;;  %v9133_v41 = vld [vmem:[%s13950_s1 + $0x14c] ss:$16 sps:$4 sm:$0xff]  }
   0xf   :  { %6359 = vmatpush1.bf16.msra.mxu0 %v9093_v14  ;;  %7047 = vmatpush1.bf16.msra.mxu1 %v9094_v15  ;;  %v9135_v42 = vld [vmem:[%s13950_s1 + $0x140] ss:$16 sps:$4 sm:$0xff]   ;;  %v9136_v43 = vld [vmem:[%s13950_s1 + $0x148] ss:$16 sps:$4 sm:$0xff]   ;;  %v9137_v44 = vld [vmem:[%s13950_s1 + $0x164] ss:$16 sps:$4 sm:$0xff]  }
  0x10   :  { %6360 = vmatprep.subr.bf16.mxu0 %v9095_v16  ;;  %7048 = vmatprep.subr.bf16.mxu1 %v9097_v17  ;;  %v9139_v45 = vld [vmem:[%s13950_s1 + $0x16c] ss:$16 sps:$4 sm:$0xff]   ;;  %v16_v46 = vld [vmem:[%s13951_s0] sm:$0xff]  ;;  %v9142_v49 = vld [vmem:[%s13950_s1 + $0x168] ss:$16 sps:$4 sm:$0xff]  }
  0x11   :  { %v32_v47 = vld [vmem:[%s13951_s0 + $0x80] sm:$0xff]  ;;  %v9145_v52 = vld [vmem:[%s13950_s1 + $0x18c] ss:$16 sps:$4 sm:$0xff]   ;;  %v9148_v54 = vld [vmem:[%s13950_s1 + $0x188] ss:$16 sps:$4 sm:$0xff]  }
  0x12   :  { %v9141_v48 = vld [vmem:[%s13950_s1 + $0x160] ss:$16 sps:$4 sm:$0xff]   ;;  %v7887_v50 = vcombine.high %v16_v46, %v32_v47  ;;  %v9143_v51 = vld [vmem:[%s13950_s1 + $0x184] ss:$16 sps:$4 sm:$0xff]   ;;  %v9151_v56 = vld [vmem:[%s13950_s1 + $0x1ac] ss:$16 sps:$4 sm:$0xff]   ;;  %v7886_v5 = vcombine.low %v16_v46, %v32_v47 }
  0x13   :  { %6361 = vmatpush1.bf16.msra.mxu0 %v9099_v18  ;;  %7049 = vmatpush1.bf16.msra.mxu1 %v9100_v19  ;;  %v9147_v53 = vld [vmem:[%s13950_s1 + $0x180] ss:$16 sps:$4 sm:$0xff]   ;;  %v9149_v55 = vld [vmem:[%s13950_s1 + $0x1a4] ss:$16 sps:$4 sm:$0xff]   ;;  %v9154_v58 = vld [vmem:[%s13950_s1 + $0x1a8] ss:$16 sps:$4 sm:$0xff]  }
  0x14   :  { %6362 = vmatprep.subr.bf16.mxu0 %v9101_v20  ;;  %7050 = vmatprep.subr.bf16.mxu1 %v9103_v21  ;;  %v9153_v57 = vld [vmem:[%s13950_s1 + $0x1a0] ss:$16 sps:$4 sm:$0xff]   ;;  %v9155_v59 = vld [vmem:[%s13950_s1 + $0x1c4] ss:$16 sps:$4 sm:$0xff]   ;;  %v9157_v60 = vld [vmem:[%s13950_s1 + $0x1cc] ss:$16 sps:$4 sm:$0xff]  }
  0x15   :  { %6384 = vmatprep.mubr.bf16.mxu0 %v7887_v50  ;;  %7072 = vmatprep.mubr.bf16.mxu1 %v7887_v50  ;;  %v9159_v61 = vld [vmem:[%s13950_s1 + $0x1c0] ss:$16 sps:$4 sm:$0xff]   ;;  %v9160_v62 = vld [vmem:[%s13950_s1 + $0x1c8] ss:$16 sps:$4 sm:$0xff]   ;;  %v9161_v63 = vld [vmem:[%s13950_s1 + $0x1e4] ss:$16 sps:$4 sm:$0xff]  }
  0x16   :  { %v9163_v0 = vld [vmem:[%s13950_s1 + $0x1ec] ss:$16 sps:$4 sm:$0xff]   ;;  %v9165_v1 = vld [vmem:[%s13950_s1 + $0x1e0] ss:$16 sps:$4 sm:$0xff]   ;;  %v9166_v2 = vld [vmem:[%s13950_s1 + $0x1e8] ss:$16 sps:$4 sm:$0xff]  }
  0x17   :  { %6363 = vmatpush1.bf16.msra.mxu0 %v9105_v22  ;;  %7051 = vmatpush1.bf16.msra.mxu1 %v9106_v23  ;;  %v9169_v3 = vld [vmem:[%s13950_s1 + $0x204] ss:$16 sps:$4 sm:$0xff]   ;;  %v9172_v4 = vld [vmem:[%s13950_s1 + $0x20c] ss:$16 sps:$4 sm:$0xff]   ;;  %v9167_v6 = vld [vmem:[%s13950_s1 + $0x200] ss:$16 sps:$4 sm:$0xff]  }
  0x18   :  { %6364 = vmatprep.subr.bf16.mxu0 %v9107_v24  ;;  %7052 = vmatprep.subr.bf16.mxu1 %v9109_v25  ;;  %v9170_v7 = vld [vmem:[%s13950_s1 + $0x208] ss:$16 sps:$4 sm:$0xff]   ;;  %v9175_v8 = vld [vmem:[%s13950_s1 + $0x224] ss:$16 sps:$4 sm:$0xff]   ;;  %v9178_v9 = vld [vmem:[%s13950_s1 + $0x22c] ss:$16 sps:$4 sm:$0xff]  }
  0x19   :  { %v9173_v10 = vld [vmem:[%s13950_s1 + $0x220] ss:$16 sps:$4 sm:$0xff]   ;;  %v9176_v11 = vld [vmem:[%s13950_s1 + $0x228] ss:$16 sps:$4 sm:$0xff]   ;;  %v9181_v12 = vld [vmem:[%s13950_s1 + $0x244] ss:$16 sps:$4 sm:$0xff]  }
  0x1a   :  { %v9184_v13 = vld [vmem:[%s13950_s1 + $0x24c] ss:$16 sps:$4 sm:$0xff]   ;;  %v9179_v14 = vld [vmem:[%s13950_s1 + $0x240] ss:$16 sps:$4 sm:$0xff]   ;;  %v9182_v15 = vld [vmem:[%s13950_s1 + $0x248] ss:$16 sps:$4 sm:$0xff]  }
  0x1b   :  { %6365 = vmatpush1.bf16.msra.mxu0 %v9111_v26  ;;  %7053 = vmatpush1.bf16.msra.mxu1 %v9112_v27  ;;  %v9187_v16 = vld [vmem:[%s13950_s1 + $0x264] ss:$16 sps:$4 sm:$0xff]   ;;  %v9190_v17 = vld [vmem:[%s13950_s1 + $0x26c] ss:$16 sps:$4 sm:$0xff]   ;;  %v9185_v18 = vld [vmem:[%s13950_s1 + $0x260] ss:$16 sps:$4 sm:$0xff]  }
  0x1c   :  { %6366 = vmatprep.subr.bf16.mxu0 %v9113_v28  ;;  %7054 = vmatprep.subr.bf16.mxu1 %v9115_v29  ;;  %v9188_v19 = vld [vmem:[%s13950_s1 + $0x268] ss:$16 sps:$4 sm:$0xff]   ;;  %v9193_v20 = vld [vmem:[%s13950_s1 + $0x284] ss:$16 sps:$4 sm:$0xff]   ;;  %v9196_v21 = vld [vmem:[%s13950_s1 + $0x28c] ss:$16 sps:$4 sm:$0xff]  }
  0x1d   :  { %v9191_v22 = vld [vmem:[%s13950_s1 + $0x280] ss:$16 sps:$4 sm:$0xff]   ;;  %v9194_v23 = vld [vmem:[%s13950_s1 + $0x288] ss:$16 sps:$4 sm:$0xff]   ;;  %v9199_v24 = vld [vmem:[%s13950_s1 + $0x2a4] ss:$16 sps:$4 sm:$0xff]  }
  0x1e   :  { %v9202_v25 = vld [vmem:[%s13950_s1 + $0x2ac] ss:$16 sps:$4 sm:$0xff]   ;;  %v9197_v26 = vld [vmem:[%s13950_s1 + $0x2a0] ss:$16 sps:$4 sm:$0xff]   ;;  %v9200_v27 = vld [vmem:[%s13950_s1 + $0x2a8] ss:$16 sps:$4 sm:$0xff]  }
  0x1f   :  { %6367 = vmatpush1.bf16.msra.mxu0 %v9117_v30  ;;  %7055 = vmatpush1.bf16.msra.mxu1 %v9118_v31  ;;  %v9205_v28 = vld [vmem:[%s13950_s1 + $0x2c4] ss:$16 sps:$4 sm:$0xff]   ;;  %v9208_v29 = vld [vmem:[%s13950_s1 + $0x2cc] ss:$16 sps:$4 sm:$0xff]   ;;  %v9224_v46 = vld [vmem:[%s13950_s1 + $0x328] ss:$16 sps:$4 sm:$0xff]  }
  0x20   :  { %6368 = vmatprep.subr.bf16.mxu0 %v9119_v32  ;;  %7056 = vmatprep.subr.bf16.mxu1 %v9121_v33  ;;  %v10912_v30 = vld [vmem:[%s13951_s0 + $0x8] sm:$0xff]  ;;  %v9203_v32 = vld [vmem:[%s13950_s1 + $0x2c0] ss:$16 sps:$4 sm:$0xff]   ;;  %v9229_v47 = vld [vmem:[%s13950_s1 + $0x344] ss:$16 sps:$4 sm:$0xff]  }
  0x21   :  { %v10917_v31 = vld [vmem:[%s13951_s0 + $0x88] sm:$0xff] }
  0x22   :  { %v9206_v33 = vld [vmem:[%s13950_s1 + $0x2c8] ss:$16 sps:$4 sm:$0xff]  }
  0x23   :  { %6369 = vmatpush1.bf16.msra.mxu0 %v9123_v34  ;;  %7057 = vmatpush1.bf16.msra.mxu1 %v9124_v35  ;;  %v7889_v34 = vcombine.high %v10912_v30, %v10917_v31  ;;  %v9211_v35 = vld [vmem:[%s13950_s1 + $0x2e4] ss:$16 sps:$4 sm:$0xff]   ;;  %v9230_v50 = vld [vmem:[%s13950_s1 + $0x348] ss:$16 sps:$4 sm:$0xff]  }
  0x24   :  { %6370 = vmatprep.subr.bf16.mxu0 %v9125_v36  ;;  %7058 = vmatprep.subr.bf16.mxu1 %v9127_v37  ;;  %v9214_v36 = vld [vmem:[%s13950_s1 + $0x2ec] ss:$16 sps:$4 sm:$0xff]   ;;  %v9209_v37 = vld [vmem:[%s13950_s1 + $0x2e0] ss:$16 sps:$4 sm:$0xff]  }
  0x27   :  { %6371 = vmatpush1.bf16.msra.mxu0 %v9129_v38  ;;  %7059 = vmatpush1.bf16.msra.mxu1 %v9130_v39  ;;  %v9212_v38 = vld [vmem:[%s13950_s1 + $0x2e8] ss:$16 sps:$4 sm:$0xff]   ;;  %v9217_v39 = vld [vmem:[%s13950_s1 + $0x304] ss:$16 sps:$4 sm:$0xff]  }
  0x28   :  { %6372 = vmatprep.subr.bf16.mxu0 %v9131_v40  ;;  %7060 = vmatprep.subr.bf16.mxu1 %v9133_v41  ;;  %v9220_v40 = vld [vmem:[%s13950_s1 + $0x30c] ss:$16 sps:$4 sm:$0xff]   ;;  %v9215_v41 = vld [vmem:[%s13950_s1 + $0x300] ss:$16 sps:$4 sm:$0xff]  }
  0x2b   :  { %6373 = vmatpush1.bf16.msra.mxu0 %v9135_v42  ;;  %7061 = vmatpush1.bf16.msra.mxu1 %v9136_v43  ;;  %v9218_v42 = vld [vmem:[%s13950_s1 + $0x308] ss:$16 sps:$4 sm:$0xff]   ;;  %v9223_v43 = vld [vmem:[%s13950_s1 + $0x324] ss:$16 sps:$4 sm:$0xff]  }
  0x2c   :  { %6374 = vmatprep.subr.bf16.mxu0 %v9137_v44  ;;  %7062 = vmatprep.subr.bf16.mxu1 %v9139_v45  ;;  %v9226_v44 = vld [vmem:[%s13950_s1 + $0x32c] ss:$16 sps:$4 sm:$0xff]   ;;  %v9221_v45 = vld [vmem:[%s13950_s1 + $0x320] ss:$16 sps:$4 sm:$0xff]  }
  0x2f   :  { %6375 = vmatpush1.bf16.msra.mxu0 %v9141_v48  ;;  %7063 = vmatpush1.bf16.msra.mxu1 %v9142_v49  ;;  %v9232_v48 = vld [vmem:[%s13950_s1 + $0x34c] ss:$16 sps:$4 sm:$0xff]   ;;  %v9227_v49 = vld [vmem:[%s13950_s1 + $0x340] ss:$16 sps:$4 sm:$0xff]  }
  0x30   :  { %6376 = vmatprep.subr.bf16.mxu0 %v9143_v51  ;;  %7064 = vmatprep.subr.bf16.mxu1 %v9145_v52  ;;  %v9235_v51 = vld [vmem:[%s13950_s1 + $0x364] ss:$16 sps:$4 sm:$0xff]   ;;  %v9238_v52 = vld [vmem:[%s13950_s1 + $0x36c] ss:$16 sps:$4 sm:$0xff]  }
  0x33   :  { %6377 = vmatpush1.bf16.msra.mxu0 %v9147_v53  ;;  %7065 = vmatpush1.bf16.msra.mxu1 %v9148_v54  ;;  %v9233_v53 = vld [vmem:[%s13950_s1 + $0x360] ss:$16 sps:$4 sm:$0xff]   ;;  %v9236_v54 = vld [vmem:[%s13950_s1 + $0x368] ss:$16 sps:$4 sm:$0xff]  }
  0x34   :  { %6378 = vmatprep.subr.bf16.mxu0 %v9149_v55  ;;  %7066 = vmatprep.subr.bf16.mxu1 %v9151_v56  ;;  %v9241_v55 = vld [vmem:[%s13950_s1 + $0x384] ss:$16 sps:$4 sm:$0xff]   ;;  %v9244_v56 = vld [vmem:[%s13950_s1 + $0x38c] ss:$16 sps:$4 sm:$0xff]  }
  0x37   :  { %6379 = vmatpush1.bf16.msra.mxu0 %v9153_v57  ;;  %7067 = vmatpush1.bf16.msra.mxu1 %v9154_v58  ;;  %v9239_v57 = vld [vmem:[%s13950_s1 + $0x380] ss:$16 sps:$4 sm:$0xff]   ;;  %v9242_v58 = vld [vmem:[%s13950_s1 + $0x388] ss:$16 sps:$4 sm:$0xff]  }
  0x38   :  { %6380 = vmatprep.subr.bf16.mxu0 %v9155_v59  ;;  %7068 = vmatprep.subr.bf16.mxu1 %v9157_v60  ;;  %v9247_v59 = vld [vmem:[%s13950_s1 + $0x3a4] ss:$16 sps:$4 sm:$0xff]   ;;  %v9250_v60 = vld [vmem:[%s13950_s1 + $0x3ac] ss:$16 sps:$4 sm:$0xff]  }
  0x3b   :  { %6381 = vmatpush1.bf16.msra.mxu0 %v9159_v61  ;;  %7069 = vmatpush1.bf16.msra.mxu1 %v9160_v62  ;;  %v9245_v61 = vld [vmem:[%s13950_s1 + $0x3a0] ss:$16 sps:$4 sm:$0xff]   ;;  %v9248_v62 = vld [vmem:[%s13950_s1 + $0x3a8] ss:$16 sps:$4 sm:$0xff]  }
  0x3c   :  { %6382 = vmatprep.subr.bf16.mxu0 %v9161_v63  ;;  %7070 = vmatprep.subr.bf16.mxu1 %v9163_v0  ;;  %v9253_v63 = vld [vmem:[%s13950_s1 + $0x3c4] ss:$16 sps:$4 sm:$0xff]   ;;  %v9256_v0 = vld [vmem:[%s13950_s1 + $0x3cc] ss:$16 sps:$4 sm:$0xff]  }
  0x3f   :  { %6383 = vmatpush1.bf16.msra.mxu0 %v9165_v1  ;;  %7071 = vmatpush1.bf16.msra.mxu1 %v9166_v2  ;;  %v9251_v1 = vld [vmem:[%s13950_s1 + $0x3c0] ss:$16 sps:$4 sm:$0xff]   ;;  %v9254_v2 = vld [vmem:[%s13950_s1 + $0x3c8] ss:$16 sps:$4 sm:$0xff]  }
  0x40   :  { %6395 = vmatprep.subr.bf16.mxu0 %v9169_v3  ;;  %7083 = vmatprep.subr.bf16.mxu1 %v9172_v4  ;;  %v9259_v3 = vld [vmem:[%s13950_s1 + $0x3e4] ss:$16 sps:$4 sm:$0xff]   ;;  %v9262_v4 = vld [vmem:[%s13950_s1 + $0x3ec] ss:$16 sps:$4 sm:$0xff]  }
  0x42   :  { %6385 = vmatmul.mubr.bf16.vlgmr.msra.gmra.mrb[0].mxu0 %v7886_v5  ;;  %7073 = vmatmul.mubr.bf16.vlgmr.msra.gmra.mrb[0].mxu1 %v7886_v5  ;;  %v9257_v5 = vld [vmem:[%s13950_s1 + $0x3e0] ss:$16 sps:$4 sm:$0xff]  }
  0x43   :  { %6396 = vmatpush1.bf16.msra.mxu0 %v9167_v6  ;;  %7084 = vmatpush1.bf16.msra.mxu1 %v9170_v7  ;;  %v9260_v6 = vld [vmem:[%s13950_s1 + $0x3e8] ss:$16 sps:$4 sm:$0xff]   ;;  %v9265_v7 = vld [vmem:[%s13950_s1 + $0x404] ss:$16 sps:$4 sm:$0xff]  }
  0x44   :  { %6397 = vmatprep.subr.bf16.mxu0 %v9175_v8  ;;  %7085 = vmatprep.subr.bf16.mxu1 %v9178_v9  ;;  %v9268_v8 = vld [vmem:[%s13950_s1 + $0x40c] ss:$16 sps:$4 sm:$0xff]   ;;  %v7888_v9 = vcombine.low %v10912_v30, %v10917_v31  ;;  %v9290_v30 = vld [vmem:[%s13950_s1 + $0x488] ss:$16 sps:$4 sm:$0xff]   ;;  %v9295_v31 = vld [vmem:[%s13950_s1 + $0x4a4] ss:$16 sps:$4 sm:$0xff]  }
  0x45   :  { %6427 = vmatprep.mubr.bf16.mxu0 %v7889_v34  ;;  %7115 = vmatprep.mubr.bf16.mxu1 %v7889_v34  ;;  %v9296_v34 = vld [vmem:[%s13950_s1 + $0x4a8] ss:$16 sps:$4 sm:$0xff]  }
  0x47   :  { %6398 = vmatpush1.bf16.msra.mxu0 %v9173_v10  ;;  %7086 = vmatpush1.bf16.msra.mxu1 %v9176_v11  ;;  %v9263_v10 = vld [vmem:[%s13950_s1 + $0x400] ss:$16 sps:$4 sm:$0xff]   ;;  %v9266_v11 = vld [vmem:[%s13950_s1 + $0x408] ss:$16 sps:$4 sm:$0xff]  }
  0x48   :  { %6399 = vmatprep.subr.bf16.mxu0 %v9181_v12  ;;  %7087 = vmatprep.subr.bf16.mxu1 %v9184_v13  ;;  %v9271_v12 = vld [vmem:[%s13950_s1 + $0x424] ss:$16 sps:$4 sm:$0xff]   ;;  %v9274_v13 = vld [vmem:[%s13950_s1 + $0x42c] ss:$16 sps:$4 sm:$0xff]  }
  0x4b   :  { %6400 = vmatpush1.bf16.msra.mxu0 %v9179_v14  ;;  %7088 = vmatpush1.bf16.msra.mxu1 %v9182_v15  ;;  %v11058_v14 = vld [vmem:[%s13951_s0 + $0x10] sm:$0xff] }
  0x4c   :  { %6401 = vmatprep.subr.bf16.mxu0 %v9187_v16  ;;  %7089 = vmatprep.subr.bf16.mxu1 %v9190_v17  ;;  %v11063_v15 = vld [vmem:[%s13951_s0 + $0x90] sm:$0xff] }
  0x4d   :  { %v7891_v16 = vcombine.high %v11058_v14, %v11063_v15  ;;  %v9269_v17 = vld [vmem:[%s13950_s1 + $0x420] ss:$16 sps:$4 sm:$0xff]  }
  0x4f   :  { %6402 = vmatpush1.bf16.msra.mxu0 %v9185_v18  ;;  %7090 = vmatpush1.bf16.msra.mxu1 %v9188_v19  ;;  %v9272_v18 = vld [vmem:[%s13950_s1 + $0x428] ss:$16 sps:$4 sm:$0xff]   ;;  %v9277_v19 = vld [vmem:[%s13950_s1 + $0x444] ss:$16 sps:$4 sm:$0xff]  }
  0x50   :  { %6403 = vmatprep.subr.bf16.mxu0 %v9193_v20  ;;  %7091 = vmatprep.subr.bf16.mxu1 %v9196_v21  ;;  %v9280_v20 = vld [vmem:[%s13950_s1 + $0x44c] ss:$16 sps:$4 sm:$0xff]   ;;  %v9275_v21 = vld [vmem:[%s13950_s1 + $0x440] ss:$16 sps:$4 sm:$0xff]  }
  0x53   :  { %6404 = vmatpush1.bf16.msra.mxu0 %v9191_v22  ;;  %7092 = vmatpush1.bf16.msra.mxu1 %v9194_v23  ;;  %v9278_v22 = vld [vmem:[%s13950_s1 + $0x448] ss:$16 sps:$4 sm:$0xff]   ;;  %v9283_v23 = vld [vmem:[%s13950_s1 + $0x464] ss:$16 sps:$4 sm:$0xff]  }
  0x54   :  { %6405 = vmatprep.subr.bf16.mxu0 %v9199_v24  ;;  %7093 = vmatprep.subr.bf16.mxu1 %v9202_v25  ;;  %v9286_v24 = vld [vmem:[%s13950_s1 + $0x46c] ss:$16 sps:$4 sm:$0xff]   ;;  %v9281_v25 = vld [vmem:[%s13950_s1 + $0x460] ss:$16 sps:$4 sm:$0xff]  }
  0x57   :  { %6406 = vmatpush1.bf16.msra.mxu0 %v9197_v26  ;;  %7094 = vmatpush1.bf16.msra.mxu1 %v9200_v27  ;;  %v9284_v26 = vld [vmem:[%s13950_s1 + $0x468] ss:$16 sps:$4 sm:$0xff]   ;;  %v9289_v27 = vld [vmem:[%s13950_s1 + $0x484] ss:$16 sps:$4 sm:$0xff]  }
  0x58   :  { %6407 = vmatprep.subr.bf16.mxu0 %v9205_v28  ;;  %7095 = vmatprep.subr.bf16.mxu1 %v9208_v29  ;;  %v9292_v28 = vld [vmem:[%s13950_s1 + $0x48c] ss:$16 sps:$4 sm:$0xff]   ;;  %v9287_v29 = vld [vmem:[%s13950_s1 + $0x480] ss:$16 sps:$4 sm:$0xff]  }
  0x5b   :  { %6408 = vmatpush1.bf16.msra.mxu0 %v9203_v32  ;;  %7096 = vmatpush1.bf16.msra.mxu1 %v9206_v33  ;;  %v9298_v32 = vld [vmem:[%s13950_s1 + $0x4ac] ss:$16 sps:$4 sm:$0xff]   ;;  %v9293_v33 = vld [vmem:[%s13950_s1 + $0x4a0] ss:$16 sps:$4 sm:$0xff]  }
  0x5c   :  { %6409 = vmatprep.subr.bf16.mxu0 %v9211_v35  ;;  %7097 = vmatprep.subr.bf16.mxu1 %v9214_v36  ;;  %v9301_v35 = vld [vmem:[%s13950_s1 + $0x4c4] ss:$16 sps:$4 sm:$0xff]   ;;  %v9304_v36 = vld [vmem:[%s13950_s1 + $0x4cc] ss:$16 sps:$4 sm:$0xff]  }
  0x5f   :  { %6410 = vmatpush1.bf16.msra.mxu0 %v9209_v37  ;;  %7098 = vmatpush1.bf16.msra.mxu1 %v9212_v38  ;;  %v9299_v37 = vld [vmem:[%s13950_s1 + $0x4c0] ss:$16 sps:$4 sm:$0xff]   ;;  %v9302_v38 = vld [vmem:[%s13950_s1 + $0x4c8] ss:$16 sps:$4 sm:$0xff]  }
  0x60   :  { %6411 = vmatprep.subr.bf16.mxu0 %v9217_v39  ;;  %7099 = vmatprep.subr.bf16.mxu1 %v9220_v40  ;;  %v9307_v39 = vld [vmem:[%s13950_s1 + $0x4e4] ss:$16 sps:$4 sm:$0xff]   ;;  %v9310_v40 = vld [vmem:[%s13950_s1 + $0x4ec] ss:$16 sps:$4 sm:$0xff]  }
  0x63   :  { %6412 = vmatpush1.bf16.msra.mxu0 %v9215_v41  ;;  %7100 = vmatpush1.bf16.msra.mxu1 %v9218_v42  ;;  %v9305_v41 = vld [vmem:[%s13950_s1 + $0x4e0] ss:$16 sps:$4 sm:$0xff]   ;;  %v9308_v42 = vld [vmem:[%s13950_s1 + $0x4e8] ss:$16 sps:$4 sm:$0xff]  }
  0x64   :  { %6413 = vmatprep.subr.bf16.mxu0 %v9223_v43  ;;  %7101 = vmatprep.subr.bf16.mxu1 %v9226_v44  ;;  %v9313_v43 = vld [vmem:[%s13950_s1 + $0x504] ss:$16 sps:$4 sm:$0xff]   ;;  %v9316_v44 = vld [vmem:[%s13950_s1 + $0x50c] ss:$16 sps:$4 sm:$0xff]  }
  0x67   :  { %6414 = vmatpush1.bf16.msra.mxu0 %v9221_v45  ;;  %7102 = vmatpush1.bf16.msra.mxu1 %v9224_v46  ;;  %v9311_v45 = vld [vmem:[%s13950_s1 + $0x500] ss:$16 sps:$4 sm:$0xff]   ;;  %v9314_v46 = vld [vmem:[%s13950_s1 + $0x508] ss:$16 sps:$4 sm:$0xff]  }
  0x68   :  { %6415 = vmatprep.subr.bf16.mxu0 %v9229_v47  ;;  %7103 = vmatprep.subr.bf16.mxu1 %v9232_v48  ;;  %v9319_v47 = vld [vmem:[%s13950_s1 + $0x524] ss:$16 sps:$4 sm:$0xff]   ;;  %v9322_v48 = vld [vmem:[%s13950_s1 + $0x52c] ss:$16 sps:$4 sm:$0xff]  }
  0x6b   :  { %6416 = vmatpush1.bf16.msra.mxu0 %v9227_v49  ;;  %7104 = vmatpush1.bf16.msra.mxu1 %v9230_v50  ;;  %v9317_v49 = vld [vmem:[%s13950_s1 + $0x520] ss:$16 sps:$4 sm:$0xff]   ;;  %v9320_v50 = vld [vmem:[%s13950_s1 + $0x528] ss:$16 sps:$4 sm:$0xff]  }
  0x6c   :  { %6417 = vmatprep.subr.bf16.mxu0 %v9235_v51  ;;  %7105 = vmatprep.subr.bf16.mxu1 %v9238_v52  ;;  %v9325_v51 = vld [vmem:[%s13950_s1 + $0x544] ss:$16 sps:$4 sm:$0xff]   ;;  %v9328_v52 = vld [vmem:[%s13950_s1 + $0x54c] ss:$16 sps:$4 sm:$0xff]  }
  0x6f   :  { %6418 = vmatpush1.bf16.msra.mxu0 %v9233_v53  ;;  %7106 = vmatpush1.bf16.msra.mxu1 %v9236_v54  ;;  %v9323_v53 = vld [vmem:[%s13950_s1 + $0x540] ss:$16 sps:$4 sm:$0xff]   ;;  %v9326_v54 = vld [vmem:[%s13950_s1 + $0x548] ss:$16 sps:$4 sm:$0xff]  }
  0x70   :  { %6419 = vmatprep.subr.bf16.mxu0 %v9241_v55  ;;  %7107 = vmatprep.subr.bf16.mxu1 %v9244_v56  ;;  %v9331_v55 = vld [vmem:[%s13950_s1 + $0x564] ss:$16 sps:$4 sm:$0xff]   ;;  %v9334_v56 = vld [vmem:[%s13950_s1 + $0x56c] ss:$16 sps:$4 sm:$0xff]  }
  0x73   :  { %6420 = vmatpush1.bf16.msra.mxu0 %v9239_v57  ;;  %7108 = vmatpush1.bf16.msra.mxu1 %v9242_v58  ;;  %v9329_v57 = vld [vmem:[%s13950_s1 + $0x560] ss:$16 sps:$4 sm:$0xff]   ;;  %v9332_v58 = vld [vmem:[%s13950_s1 + $0x568] ss:$16 sps:$4 sm:$0xff]  }
  0x74   :  { %6421 = vmatprep.subr.bf16.mxu0 %v9247_v59  ;;  %7109 = vmatprep.subr.bf16.mxu1 %v9250_v60  ;;  %v9337_v59 = vld [vmem:[%s13950_s1 + $0x584] ss:$16 sps:$4 sm:$0xff]   ;;  %v9340_v60 = vld [vmem:[%s13950_s1 + $0x58c] ss:$16 sps:$4 sm:$0xff]  }
  0x77   :  { %6422 = vmatpush1.bf16.msra.mxu0 %v9245_v61  ;;  %7110 = vmatpush1.bf16.msra.mxu1 %v9248_v62  ;;  %v9335_v61 = vld [vmem:[%s13950_s1 + $0x580] ss:$16 sps:$4 sm:$0xff]   ;;  %v9338_v62 = vld [vmem:[%s13950_s1 + $0x588] ss:$16 sps:$4 sm:$0xff]  }
  0x78   :  { %6423 = vmatprep.subr.bf16.mxu0 %v9253_v63  ;;  %7111 = vmatprep.subr.bf16.mxu1 %v9256_v0  ;;  %v9343_v63 = vld [vmem:[%s13950_s1 + $0x5a4] ss:$16 sps:$4 sm:$0xff]   ;;  %v9346_v0 = vld [vmem:[%s13950_s1 + $0x5ac] ss:$16 sps:$4 sm:$0xff]  }
  0x7b   :  { %6424 = vmatpush1.bf16.msra.mxu0 %v9251_v1  ;;  %7112 = vmatpush1.bf16.msra.mxu1 %v9254_v2  ;;  %v9341_v1 = vld [vmem:[%s13950_s1 + $0x5a0] ss:$16 sps:$4 sm:$0xff]   ;;  %v9344_v2 = vld [vmem:[%s13950_s1 + $0x5a8] ss:$16 sps:$4 sm:$0xff]  }
  0x7c   :  { %6425 = vmatprep.subr.bf16.mxu0 %v9259_v3  ;;  %7113 = vmatprep.subr.bf16.mxu1 %v9262_v4  ;;  %v9349_v3 = vld [vmem:[%s13950_s1 + $0x5c4] ss:$16 sps:$4 sm:$0xff]   ;;  %v9352_v4 = vld [vmem:[%s13950_s1 + $0x5cc] ss:$16 sps:$4 sm:$0xff]  }
  0x7f   :  { %6426 = vmatpush1.bf16.msra.mxu0 %v9257_v5  ;;  %7114 = vmatpush1.bf16.msra.mxu1 %v9260_v6  ;;  %v9347_v5 = vld [vmem:[%s13950_s1 + $0x5c0] ss:$16 sps:$4 sm:$0xff]   ;;  %v9350_v6 = vld [vmem:[%s13950_s1 + $0x5c8] ss:$16 sps:$4 sm:$0xff]  }
  0x80   :  { %6438 = vmatprep.subr.bf16.mxu0 %v9265_v7  ;;  %7126 = vmatprep.subr.bf16.mxu1 %v9268_v8  ;;  %v9355_v7 = vld [vmem:[%s13950_s1 + $0x5e4] ss:$16 sps:$4 sm:$0xff]   ;;  %v9358_v8 = vld [vmem:[%s13950_s1 + $0x5ec] ss:$16 sps:$4 sm:$0xff]  }
  0x82   :  { %6428 = vmatmul.mubr.bf16.vlgmr.msra.gmra.mrb[0].mxu0 %v7888_v9  ;;  %7116 = vmatmul.mubr.bf16.vlgmr.msra.gmra.mrb[0].mxu1 %v7888_v9  ;;  %v9353_v9 = vld [vmem:[%s13950_s1 + $0x5e0] ss:$16 sps:$4 sm:$0xff]  }
  0x83   :  { %6439 = vmatpush1.bf16.msra.mxu0 %v9263_v10  ;;  %7127 = vmatpush1.bf16.msra.mxu1 %v9266_v11  ;;  %v9356_v10 = vld [vmem:[%s13950_s1 + $0x5e8] ss:$16 sps:$4 sm:$0xff]   ;;  %v9361_v11 = vld [vmem:[%s13950_s1 + $0x604] ss:$16 sps:$4 sm:$0xff]  }
  0x84   :  { %6440 = vmatprep.subr.bf16.mxu0 %v9271_v12  ;;  %7128 = vmatprep.subr.bf16.mxu1 %v9274_v13  ;;  %v9364_v12 = vld [vmem:[%s13950_s1 + $0x60c] ss:$16 sps:$4 sm:$0xff]   ;;  %v9359_v13 = vld [vmem:[%s13950_s1 + $0x600] ss:$16 sps:$4 sm:$0xff]  }
  0x85   :  { %6470 = vmatprep.mubr.bf16.mxu0 %v7891_v16  ;;  %7158 = vmatprep.mubr.bf16.mxu1 %v7891_v16  ;;  %v9362_v16 = vld [vmem:[%s13950_s1 + $0x608] ss:$16 sps:$4 sm:$0xff]  }
  0x87   :  { %6441 = vmatpush1.bf16.msra.mxu0 %v9269_v17  ;;  %7129 = vmatpush1.bf16.msra.mxu1 %v9272_v18  ;;  %v7890_v17 = vcombine.low %v11058_v14, %v11063_v15  ;;  %v11258_v18 = vld [vmem:[%s13951_s0 + $0x18] sm:$0xff] }
  0x88   :  { %6442 = vmatprep.subr.bf16.mxu0 %v9277_v19  ;;  %7130 = vmatprep.subr.bf16.mxu1 %v9280_v20  ;;  %v11263_v19 = vld [vmem:[%s13951_s0 + $0x98] sm:$0xff]  ;;  %v9367_v20 = vld [vmem:[%s13950_s1 + $0x624] ss:$16 sps:$4 sm:$0xff]  }
  0x89   :  { %v9370_v14 = vld [vmem:[%s13950_s1 + $0x62c] ss:$16 sps:$4 sm:$0xff]   ;;  %v7893_v15 = vcombine.high %v11258_v18, %v11263_v19 }
  0x8b   :  { %6443 = vmatpush1.bf16.msra.mxu0 %v9275_v21  ;;  %7131 = vmatpush1.bf16.msra.mxu1 %v9278_v22  ;;  %v9365_v21 = vld [vmem:[%s13950_s1 + $0x620] ss:$16 sps:$4 sm:$0xff]   ;;  %v9368_v22 = vld [vmem:[%s13950_s1 + $0x628] ss:$16 sps:$4 sm:$0xff]  }
  0x8c   :  { %6444 = vmatprep.subr.bf16.mxu0 %v9283_v23  ;;  %7132 = vmatprep.subr.bf16.mxu1 %v9286_v24  ;;  %v9373_v23 = vld [vmem:[%s13950_s1 + $0x644] ss:$16 sps:$4 sm:$0xff]   ;;  %v9376_v24 = vld [vmem:[%s13950_s1 + $0x64c] ss:$16 sps:$4 sm:$0xff]  }
  0x8f   :  { %6445 = vmatpush1.bf16.msra.mxu0 %v9281_v25  ;;  %7133 = vmatpush1.bf16.msra.mxu1 %v9284_v26  ;;  %v9371_v25 = vld [vmem:[%s13950_s1 + $0x640] ss:$16 sps:$4 sm:$0xff]   ;;  %v9374_v26 = vld [vmem:[%s13950_s1 + $0x648] ss:$16 sps:$4 sm:$0xff]  }
  0x90   :  { %6446 = vmatprep.subr.bf16.mxu0 %v9289_v27  ;;  %7134 = vmatprep.subr.bf16.mxu1 %v9292_v28  ;;  %v9379_v27 = vld [vmem:[%s13950_s1 + $0x664] ss:$16 sps:$4 sm:$0xff]   ;;  %v9382_v28 = vld [vmem:[%s13950_s1 + $0x66c] ss:$16 sps:$4 sm:$0xff]  }
  0x93   :  { %6447 = vmatpush1.bf16.msra.mxu0 %v9287_v29  ;;  %7135 = vmatpush1.bf16.msra.mxu1 %v9290_v30  ;;  %v9377_v29 = vld [vmem:[%s13950_s1 + $0x660] ss:$16 sps:$4 sm:$0xff]   ;;  %v9380_v30 = vld [vmem:[%s13950_s1 + $0x668] ss:$16 sps:$4 sm:$0xff]  }
  0x94   :  { %6448 = vmatprep.subr.bf16.mxu0 %v9295_v31  ;;  %7136 = vmatprep.subr.bf16.mxu1 %v9298_v32  ;;  %v9385_v31 = vld [vmem:[%s13950_s1 + $0x684] ss:$16 sps:$4 sm:$0xff]   ;;  %v9388_v32 = vld [vmem:[%s13950_s1 + $0x68c] ss:$16 sps:$4 sm:$0xff]  }
  0x97   :  { %6449 = vmatpush1.bf16.msra.mxu0 %v9293_v33  ;;  %7137 = vmatpush1.bf16.msra.mxu1 %v9296_v34  ;;  %v9383_v33 = vld [vmem:[%s13950_s1 + $0x680] ss:$16 sps:$4 sm:$0xff]   ;;  %v9386_v34 = vld [vmem:[%s13950_s1 + $0x688] ss:$16 sps:$4 sm:$0xff]  }
  0x98   :  { %6450 = vmatprep.subr.bf16.mxu0 %v9301_v35  ;;  %7138 = vmatprep.subr.bf16.mxu1 %v9304_v36  ;;  %v9391_v35 = vld [vmem:[%s13950_s1 + $0x6a4] ss:$16 sps:$4 sm:$0xff]   ;;  %v9394_v36 = vld [vmem:[%s13950_s1 + $0x6ac] ss:$16 sps:$4 sm:$0xff]  }
  0x9b   :  { %6451 = vmatpush1.bf16.msra.mxu0 %v9299_v37  ;;  %7139 = vmatpush1.bf16.msra.mxu1 %v9302_v38  ;;  %v9389_v37 = vld [vmem:[%s13950_s1 + $0x6a0] ss:$16 sps:$4 sm:$0xff]   ;;  %v9392_v38 = vld [vmem:[%s13950_s1 + $0x6a8] ss:$16 sps:$4 sm:$0xff]  }
  0x9c   :  { %6452 = vmatprep.subr.bf16.mxu0 %v9307_v39  ;;  %7140 = vmatprep.subr.bf16.mxu1 %v9310_v40  ;;  %v9397_v39 = vld [vmem:[%s13950_s1 + $0x6c4] ss:$16 sps:$4 sm:$0xff]   ;;  %v9400_v40 = vld [vmem:[%s13950_s1 + $0x6cc] ss:$16 sps:$4 sm:$0xff]  }
  0x9f   :  { %6453 = vmatpush1.bf16.msra.mxu0 %v9305_v41  ;;  %7141 = vmatpush1.bf16.msra.mxu1 %v9308_v42  ;;  %v9395_v41 = vld [vmem:[%s13950_s1 + $0x6c0] ss:$16 sps:$4 sm:$0xff]   ;;  %v9398_v42 = vld [vmem:[%s13950_s1 + $0x6c8] ss:$16 sps:$4 sm:$0xff]  }
  0xa0   :  { %6454 = vmatprep.subr.bf16.mxu0 %v9313_v43  ;;  %7142 = vmatprep.subr.bf16.mxu1 %v9316_v44  ;;  %v9403_v43 = vld [vmem:[%s13950_s1 + $0x6e4] ss:$16 sps:$4 sm:$0xff]   ;;  %v9406_v44 = vld [vmem:[%s13950_s1 + $0x6ec] ss:$16 sps:$4 sm:$0xff]  }
  0xa3   :  { %6455 = vmatpush1.bf16.msra.mxu0 %v9311_v45  ;;  %7143 = vmatpush1.bf16.msra.mxu1 %v9314_v46  ;;  %v9401_v45 = vld [vmem:[%s13950_s1 + $0x6e0] ss:$16 sps:$4 sm:$0xff]   ;;  %v9404_v46 = vld [vmem:[%s13950_s1 + $0x6e8] ss:$16 sps:$4 sm:$0xff]  }
  0xa4   :  { %6456 = vmatprep.subr.bf16.mxu0 %v9319_v47  ;;  %7144 = vmatprep.subr.bf16.mxu1 %v9322_v48  ;;  %v9409_v47 = vld [vmem:[%s13950_s1 + $0x704] ss:$16 sps:$4 sm:$0xff]   ;;  %v9412_v48 = vld [vmem:[%s13950_s1 + $0x70c] ss:$16 sps:$4 sm:$0xff]  }
  0xa7   :  { %6457 = vmatpush1.bf16.msra.mxu0 %v9317_v49  ;;  %7145 = vmatpush1.bf16.msra.mxu1 %v9320_v50  ;;  %v9407_v49 = vld [vmem:[%s13950_s1 + $0x700] ss:$16 sps:$4 sm:$0xff]   ;;  %v9410_v50 = vld [vmem:[%s13950_s1 + $0x708] ss:$16 sps:$4 sm:$0xff]  }
  0xa8   :  { %6458 = vmatprep.subr.bf16.mxu0 %v9325_v51  ;;  %7146 = vmatprep.subr.bf16.mxu1 %v9328_v52  ;;  %v9415_v51 = vld [vmem:[%s13950_s1 + $0x724] ss:$16 sps:$4 sm:$0xff]   ;;  %v9418_v52 = vld [vmem:[%s13950_s1 + $0x72c] ss:$16 sps:$4 sm:$0xff]  }
  0xab   :  { %6459 = vmatpush1.bf16.msra.mxu0 %v9323_v53  ;;  %7147 = vmatpush1.bf16.msra.mxu1 %v9326_v54  ;;  %v9413_v53 = vld [vmem:[%s13950_s1 + $0x720] ss:$16 sps:$4 sm:$0xff]   ;;  %v9416_v54 = vld [vmem:[%s13950_s1 + $0x728] ss:$16 sps:$4 sm:$0xff]  }
  0xac   :  { %6460 = vmatprep.subr.bf16.mxu0 %v9331_v55  ;;  %7148 = vmatprep.subr.bf16.mxu1 %v9334_v56  ;;  %v9421_v55 = vld [vmem:[%s13950_s1 + $0x744] ss:$16 sps:$4 sm:$0xff]   ;;  %v9424_v56 = vld [vmem:[%s13950_s1 + $0x74c] ss:$16 sps:$4 sm:$0xff]  }
  0xaf   :  { %6461 = vmatpush1.bf16.msra.mxu0 %v9329_v57  ;;  %7149 = vmatpush1.bf16.msra.mxu1 %v9332_v58  ;;  %v9419_v57 = vld [vmem:[%s13950_s1 + $0x740] ss:$16 sps:$4 sm:$0xff]   ;;  %v9422_v58 = vld [vmem:[%s13950_s1 + $0x748] ss:$16 sps:$4 sm:$0xff]  }
  0xb0   :  { %6462 = vmatprep.subr.bf16.mxu0 %v9337_v59  ;;  %7150 = vmatprep.subr.bf16.mxu1 %v9340_v60  ;;  %v9427_v59 = vld [vmem:[%s13950_s1 + $0x764] ss:$16 sps:$4 sm:$0xff]   ;;  %v9430_v60 = vld [vmem:[%s13950_s1 + $0x76c] ss:$16 sps:$4 sm:$0xff]  }
  0xb3   :  { %6463 = vmatpush1.bf16.msra.mxu0 %v9335_v61  ;;  %7151 = vmatpush1.bf16.msra.mxu1 %v9338_v62  ;;  %v9425_v61 = vld [vmem:[%s13950_s1 + $0x760] ss:$16 sps:$4 sm:$0xff]   ;;  %v9428_v62 = vld [vmem:[%s13950_s1 + $0x768] ss:$16 sps:$4 sm:$0xff]  }
  0xb4   :  { %6464 = vmatprep.subr.bf16.mxu0 %v9343_v63  ;;  %7152 = vmatprep.subr.bf16.mxu1 %v9346_v0  ;;  %v9433_v63 = vld [vmem:[%s13950_s1 + $0x784] ss:$16 sps:$4 sm:$0xff]   ;;  %v9436_v0 = vld [vmem:[%s13950_s1 + $0x78c] ss:$16 sps:$4 sm:$0xff]  }
  0xb7   :  { %6465 = vmatpush1.bf16.msra.mxu0 %v9341_v1  ;;  %7153 = vmatpush1.bf16.msra.mxu1 %v9344_v2  ;;  %v9431_v1 = vld [vmem:[%s13950_s1 + $0x780] ss:$16 sps:$4 sm:$0xff]   ;;  %v9434_v2 = vld [vmem:[%s13950_s1 + $0x788] ss:$16 sps:$4 sm:$0xff]  }
  0xb8   :  { %6466 = vmatprep.subr.bf16.mxu0 %v9349_v3  ;;  %7154 = vmatprep.subr.bf16.mxu1 %v9352_v4  ;;  %v9439_v3 = vld [vmem:[%s13950_s1 + $0x7a4] ss:$16 sps:$4 sm:$0xff]   ;;  %v9442_v4 = vld [vmem:[%s13950_s1 + $0x7ac] ss:$16 sps:$4 sm:$0xff]  }
  0xbb   :  { %6467 = vmatpush1.bf16.msra.mxu0 %v9347_v5  ;;  %7155 = vmatpush1.bf16.msra.mxu1 %v9350_v6  ;;  %v9437_v5 = vld [vmem:[%s13950_s1 + $0x7a0] ss:$16 sps:$4 sm:$0xff]   ;;  %v9440_v6 = vld [vmem:[%s13950_s1 + $0x7a8] ss:$16 sps:$4 sm:$0xff]  }
  0xbc   :  { %6468 = vmatprep.subr.bf16.mxu0 %v9355_v7  ;;  %7156 = vmatprep.subr.bf16.mxu1 %v9358_v8  ;;  %v9445_v7 = vld [vmem:[%s13950_s1 + $0x7c4] ss:$16 sps:$4 sm:$0xff]   ;;  %v9448_v8 = vld [vmem:[%s13950_s1 + $0x7cc] ss:$16 sps:$4 sm:$0xff]  }
  0xbf   :  { %6469 = vmatpush1.bf16.msra.mxu0 %v9353_v9  ;;  %7157 = vmatpush1.bf16.msra.mxu1 %v9356_v10  ;;  %v9443_v9 = vld [vmem:[%s13950_s1 + $0x7c0] ss:$16 sps:$4 sm:$0xff]   ;;  %v9446_v10 = vld [vmem:[%s13950_s1 + $0x7c8] ss:$16 sps:$4 sm:$0xff]  }
  0xc0   :  { %6481 = vmatprep.subr.bf16.mxu0 %v9361_v11  ;;  %7169 = vmatprep.subr.bf16.mxu1 %v9364_v12  ;;  %v9451_v11 = vld [vmem:[%s13950_s1 + $0x7e4] ss:$16 sps:$4 sm:$0xff]   ;;  %v9454_v12 = vld [vmem:[%s13950_s1 + $0x7ec] ss:$16 sps:$4 sm:$0xff]  }
  0xc2   :  { %6471 = vmatmul.mubr.bf16.vlgmr.msra.gmra.mrb[0].mxu0 %v7890_v17  ;;  %7159 = vmatmul.mubr.bf16.vlgmr.msra.gmra.mrb[0].mxu1 %v7890_v17  ;;  %v9457_v17 = vld [vmem:[%s13950_s1 + $0x804] ss:$16 sps:$4 sm:$0xff]  }
  0xc3   :  { %6482 = vmatpush1.bf16.msra.mxu0 %v9359_v13  ;;  %7170 = vmatpush1.bf16.msra.mxu1 %v9362_v16  ;;  %v9449_v13 = vld [vmem:[%s13950_s1 + $0x7e0] ss:$16 sps:$4 sm:$0xff]   ;;  %v9452_v16 = vld [vmem:[%s13950_s1 + $0x7e8] ss:$16 sps:$4 sm:$0xff]  }
  0xc4   :  { %6483 = vmatprep.subr.bf16.mxu0 %v9367_v20  ;;  %7171 = vmatprep.subr.bf16.mxu1 %v9370_v14  ;;  %v9460_v20 = vld [vmem:[%s13950_s1 + $0x80c] ss:$16 sps:$4 sm:$0xff]   ;;  %v11456_v14 = vld [vmem:[%s13951_s0 + $0x20] sm:$0xff] }
  0xc5   :  { %6513 = vmatprep.mubr.bf16.mxu0 %v7893_v15  ;;  %7201 = vmatprep.mubr.bf16.mxu1 %v7893_v15  ;;  %v7892_v15 = vcombine.low %v11258_v18, %v11263_v19  ;;  %v9463_v18 = vld [vmem:[%s13950_s1 + $0x824] ss:$16 sps:$4 sm:$0xff]   ;;  %v9466_v19 = vld [vmem:[%s13950_s1 + $0x82c] ss:$16 sps:$4 sm:$0xff]  }
  0xc7   :  { %6484 = vmatpush1.bf16.msra.mxu0 %v9365_v21  ;;  %7172 = vmatpush1.bf16.msra.mxu1 %v9368_v22  ;;  %v11463_v21 = vld [vmem:[%s13951_s0 + $0xa0] sm:$0xff] }
  0xc8   :  { %6485 = vmatprep.subr.bf16.mxu0 %v9373_v23  ;;  %7173 = vmatprep.subr.bf16.mxu1 %v9376_v24  ;;  %v9455_v22 = vld [vmem:[%s13950_s1 + $0x800] ss:$16 sps:$4 sm:$0xff]   ;;  %v9458_v23 = vld [vmem:[%s13950_s1 + $0x808] ss:$16 sps:$4 sm:$0xff]   ;;  %v7895_v24 = vcombine.high %v11456_v14, %v11463_v21 }
  0xcb   :  { %6486 = vmatpush1.bf16.msra.mxu0 %v9371_v25  ;;  %7174 = vmatpush1.bf16.msra.mxu1 %v9374_v26  ;;  %v9461_v25 = vld [vmem:[%s13950_s1 + $0x820] ss:$16 sps:$4 sm:$0xff]   ;;  %v9464_v26 = vld [vmem:[%s13950_s1 + $0x828] ss:$16 sps:$4 sm:$0xff]  }
  0xcc   :  { %6487 = vmatprep.subr.bf16.mxu0 %v9379_v27  ;;  %7175 = vmatprep.subr.bf16.mxu1 %v9382_v28  ;;  %v9469_v27 = vld [vmem:[%s13950_s1 + $0x844] ss:$16 sps:$4 sm:$0xff]   ;;  %v9472_v28 = vld [vmem:[%s13950_s1 + $0x84c] ss:$16 sps:$4 sm:$0xff]  }
  0xcf   :  { %6488 = vmatpush1.bf16.msra.mxu0 %v9377_v29  ;;  %7176 = vmatpush1.bf16.msra.mxu1 %v9380_v30  ;;  %v9467_v29 = vld [vmem:[%s13950_s1 + $0x840] ss:$16 sps:$4 sm:$0xff]   ;;  %v9470_v30 = vld [vmem:[%s13950_s1 + $0x848] ss:$16 sps:$4 sm:$0xff]  }
  0xd0   :  { %6489 = vmatprep.subr.bf16.mxu0 %v9385_v31  ;;  %7177 = vmatprep.subr.bf16.mxu1 %v9388_v32  ;;  %v9475_v31 = vld [vmem:[%s13950_s1 + $0x864] ss:$16 sps:$4 sm:$0xff]   ;;  %v9478_v32 = vld [vmem:[%s13950_s1 + $0x86c] ss:$16 sps:$4 sm:$0xff]  }
  0xd3   :  { %6490 = vmatpush1.bf16.msra.mxu0 %v9383_v33  ;;  %7178 = vmatpush1.bf16.msra.mxu1 %v9386_v34  ;;  %v9473_v33 = vld [vmem:[%s13950_s1 + $0x860] ss:$16 sps:$4 sm:$0xff]   ;;  %v9476_v34 = vld [vmem:[%s13950_s1 + $0x868] ss:$16 sps:$4 sm:$0xff]  }
  0xd4   :  { %6491 = vmatprep.subr.bf16.mxu0 %v9391_v35  ;;  %7179 = vmatprep.subr.bf16.mxu1 %v9394_v36  ;;  %v9481_v35 = vld [vmem:[%s13950_s1 + $0x884] ss:$16 sps:$4 sm:$0xff]   ;;  %v9484_v36 = vld [vmem:[%s13950_s1 + $0x88c] ss:$16 sps:$4 sm:$0xff]  }
  0xd7   :  { %6492 = vmatpush1.bf16.msra.mxu0 %v9389_v37  ;;  %7180 = vmatpush1.bf16.msra.mxu1 %v9392_v38  ;;  %v9479_v37 = vld [vmem:[%s13950_s1 + $0x880] ss:$16 sps:$4 sm:$0xff]   ;;  %v9482_v38 = vld [vmem:[%s13950_s1 + $0x888] ss:$16 sps:$4 sm:$0xff]  }
  0xd8   :  { %6493 = vmatprep.subr.bf16.mxu0 %v9397_v39  ;;  %7181 = vmatprep.subr.bf16.mxu1 %v9400_v40  ;;  %v9487_v39 = vld [vmem:[%s13950_s1 + $0x8a4] ss:$16 sps:$4 sm:$0xff]   ;;  %v9490_v40 = vld [vmem:[%s13950_s1 + $0x8ac] ss:$16 sps:$4 sm:$0xff]  }
  0xdb   :  { %6494 = vmatpush1.bf16.msra.mxu0 %v9395_v41  ;;  %7182 = vmatpush1.bf16.msra.mxu1 %v9398_v42  ;;  %v9485_v41 = vld [vmem:[%s13950_s1 + $0x8a0] ss:$16 sps:$4 sm:$0xff]   ;;  %v9488_v42 = vld [vmem:[%s13950_s1 + $0x8a8] ss:$16 sps:$4 sm:$0xff]  }
  0xdc   :  { %6495 = vmatprep.subr.bf16.mxu0 %v9403_v43  ;;  %7183 = vmatprep.subr.bf16.mxu1 %v9406_v44  ;;  %v9493_v43 = vld [vmem:[%s13950_s1 + $0x8c4] ss:$16 sps:$4 sm:$0xff]   ;;  %v9496_v44 = vld [vmem:[%s13950_s1 + $0x8cc] ss:$16 sps:$4 sm:$0xff]  }
  0xdf   :  { %6496 = vmatpush1.bf16.msra.mxu0 %v9401_v45  ;;  %7184 = vmatpush1.bf16.msra.mxu1 %v9404_v46  ;;  %v9491_v45 = vld [vmem:[%s13950_s1 + $0x8c0] ss:$16 sps:$4 sm:$0xff]   ;;  %v9494_v46 = vld [vmem:[%s13950_s1 + $0x8c8] ss:$16 sps:$4 sm:$0xff]  }
  0xe0   :  { %6497 = vmatprep.subr.bf16.mxu0 %v9409_v47  ;;  %7185 = vmatprep.subr.bf16.mxu1 %v9412_v48  ;;  %v9499_v47 = vld [vmem:[%s13950_s1 + $0x8e4] ss:$16 sps:$4 sm:$0xff]   ;;  %v9502_v48 = vld [vmem:[%s13950_s1 + $0x8ec] ss:$16 sps:$4 sm:$0xff]  }
  0xe3   :  { %6498 = vmatpush1.bf16.msra.mxu0 %v9407_v49  ;;  %7186 = vmatpush1.bf16.msra.mxu1 %v9410_v50  ;;  %v9497_v49 = vld [vmem:[%s13950_s1 + $0x8e0] ss:$16 sps:$4 sm:$0xff]   ;;  %v9500_v50 = vld [vmem:[%s13950_s1 + $0x8e8] ss:$16 sps:$4 sm:$0xff]  }
  0xe4   :  { %6499 = vmatprep.subr.bf16.mxu0 %v9415_v51  ;;  %7187 = vmatprep.subr.bf16.mxu1 %v9418_v52  ;;  %v9505_v51 = vld [vmem:[%s13950_s1 + $0x904] ss:$16 sps:$4 sm:$0xff]   ;;  %v9508_v52 = vld [vmem:[%s13950_s1 + $0x90c] ss:$16 sps:$4 sm:$0xff]  }
  0xe7   :  { %6500 = vmatpush1.bf16.msra.mxu0 %v9413_v53  ;;  %7188 = vmatpush1.bf16.msra.mxu1 %v9416_v54  ;;  %v9503_v53 = vld [vmem:[%s13950_s1 + $0x900] ss:$16 sps:$4 sm:$0xff]   ;;  %v9506_v54 = vld [vmem:[%s13950_s1 + $0x908] ss:$16 sps:$4 sm:$0xff]  }
  0xe8   :  { %6501 = vmatprep.subr.bf16.mxu0 %v9421_v55  ;;  %7189 = vmatprep.subr.bf16.mxu1 %v9424_v56  ;;  %v9511_v55 = vld [vmem:[%s13950_s1 + $0x924] ss:$16 sps:$4 sm:$0xff]   ;;  %v9514_v56 = vld [vmem:[%s13950_s1 + $0x92c] ss:$16 sps:$4 sm:$0xff]  }
  0xeb   :  { %6502 = vmatpush1.bf16.msra.mxu0 %v9419_v57  ;;  %7190 = vmatpush1.bf16.msra.mxu1 %v9422_v58  ;;  %v9509_v57 = vld [vmem:[%s13950_s1 + $0x920] ss:$16 sps:$4 sm:$0xff]   ;;  %v9512_v58 = vld [vmem:[%s13950_s1 + $0x928] ss:$16 sps:$4 sm:$0xff]  }
  0xec   :  { %6503 = vmatprep.subr.bf16.mxu0 %v9427_v59  ;;  %7191 = vmatprep.subr.bf16.mxu1 %v9430_v60  ;;  %v9517_v59 = vld [vmem:[%s13950_s1 + $0x944] ss:$16 sps:$4 sm:$0xff]   ;;  %v9520_v60 = vld [vmem:[%s13950_s1 + $0x94c] ss:$16 sps:$4 sm:$0xff]  }
  0xef   :  { %6504 = vmatpush1.bf16.msra.mxu0 %v9425_v61  ;;  %7192 = vmatpush1.bf16.msra.mxu1 %v9428_v62  ;;  %v9515_v61 = vld [vmem:[%s13950_s1 + $0x940] ss:$16 sps:$4 sm:$0xff]   ;;  %v9518_v62 = vld [vmem:[%s13950_s1 + $0x948] ss:$16 sps:$4 sm:$0xff]  }
  0xf0   :  { %6505 = vmatprep.subr.bf16.mxu0 %v9433_v63  ;;  %7193 = vmatprep.subr.bf16.mxu1 %v9436_v0  ;;  %v9523_v63 = vld [vmem:[%s13950_s1 + $0x964] ss:$16 sps:$4 sm:$0xff]   ;;  %v9526_v0 = vld [vmem:[%s13950_s1 + $0x96c] ss:$16 sps:$4 sm:$0xff]  }
  0xf3   :  { %6506 = vmatpush1.bf16.msra.mxu0 %v9431_v1  ;;  %7194 = vmatpush1.bf16.msra.mxu1 %v9434_v2  ;;  %v9521_v1 = vld [vmem:[%s13950_s1 + $0x960] ss:$16 sps:$4 sm:$0xff]   ;;  %v9524_v2 = vld [vmem:[%s13950_s1 + $0x968] ss:$16 sps:$4 sm:$0xff]  }
  0xf4   :  { %6507 = vmatprep.subr.bf16.mxu0 %v9439_v3  ;;  %7195 = vmatprep.subr.bf16.mxu1 %v9442_v4  ;;  %v9529_v3 = vld [vmem:[%s13950_s1 + $0x984] ss:$16 sps:$4 sm:$0xff]   ;;  %v9532_v4 = vld [vmem:[%s13950_s1 + $0x98c] ss:$16 sps:$4 sm:$0xff]  }
  0xf7   :  { %6508 = vmatpush1.bf16.msra.mxu0 %v9437_v5  ;;  %7196 = vmatpush1.bf16.msra.mxu1 %v9440_v6  ;;  %v9527_v5 = vld [vmem:[%s13950_s1 + $0x980] ss:$16 sps:$4 sm:$0xff]   ;;  %v9530_v6 = vld [vmem:[%s13950_s1 + $0x988] ss:$16 sps:$4 sm:$0xff]  }
  0xf8   :  { %6509 = vmatprep.subr.bf16.mxu0 %v9445_v7  ;;  %7197 = vmatprep.subr.bf16.mxu1 %v9448_v8  ;;  %v9535_v7 = vld [vmem:[%s13950_s1 + $0x9a4] ss:$16 sps:$4 sm:$0xff]   ;;  %v9538_v8 = vld [vmem:[%s13950_s1 + $0x9ac] ss:$16 sps:$4 sm:$0xff]  }
  0xfb   :  { %6510 = vmatpush1.bf16.msra.mxu0 %v9443_v9  ;;  %7198 = vmatpush1.bf16.msra.mxu1 %v9446_v10  ;;  %v9533_v9 = vld [vmem:[%s13950_s1 + $0x9a0] ss:$16 sps:$4 sm:$0xff]   ;;  %v9536_v10 = vld [vmem:[%s13950_s1 + $0x9a8] ss:$16 sps:$4 sm:$0xff]  }
  0xfc   :  { %6511 = vmatprep.subr.bf16.mxu0 %v9451_v11  ;;  %7199 = vmatprep.subr.bf16.mxu1 %v9454_v12  ;;  %v9541_v11 = vld [vmem:[%s13950_s1 + $0x9c4] ss:$16 sps:$4 sm:$0xff]   ;;  %v9544_v12 = vld [vmem:[%s13950_s1 + $0x9cc] ss:$16 sps:$4 sm:$0xff]  }
  0xff   :  { %6512 = vmatpush1.bf16.msra.mxu0 %v9449_v13  ;;  %7200 = vmatpush1.bf16.msra.mxu1 %v9452_v16  ;;  %v9539_v13 = vld [vmem:[%s13950_s1 + $0x9c0] ss:$16 sps:$4 sm:$0xff]   ;;  %v9542_v16 = vld [vmem:[%s13950_s1 + $0x9c8] ss:$16 sps:$4 sm:$0xff]  }
 0x100   :  { %6524 = vmatprep.subr.bf16.mxu0 %v9457_v17  ;;  %7212 = vmatprep.subr.bf16.mxu1 %v9460_v20  ;;  %v9547_v17 = vld [vmem:[%s13950_s1 + $0x9e4] ss:$16 sps:$4 sm:$0xff]   ;;  %v9550_v20 = vld [vmem:[%s13950_s1 + $0x9ec] ss:$16 sps:$4 sm:$0xff]  }
 0x102   :  { %6514 = vmatmul.mubr.bf16.vlgmr.msra.gmra.mrb[0].mxu0 %v7892_v15  ;;  %7202 = vmatmul.mubr.bf16.vlgmr.msra.gmra.mrb[0].mxu1 %v7892_v15  ;;  %v9545_v15 = vld [vmem:[%s13950_s1 + $0x9e0] ss:$16 sps:$4 sm:$0xff]  }
 0x103   :  { %6525 = vmatpush1.bf16.msra.mxu0 %v9455_v22  ;;  %7213 = vmatpush1.bf16.msra.mxu1 %v9458_v23  ;;  %v9548_v22 = vld [vmem:[%s13950_s1 + $0x9e8] ss:$16 sps:$4 sm:$0xff]   ;;  %v9553_v23 = vld [vmem:[%s13950_s1 + $0xa04] ss:$16 sps:$4 sm:$0xff]  }
 0x104   :  { %6526 = vmatprep.subr.bf16.mxu0 %v9463_v18  ;;  %7214 = vmatprep.subr.bf16.mxu1 %v9466_v19  ;;  %v9556_v18 = vld [vmem:[%s13950_s1 + $0xa0c] ss:$16 sps:$4 sm:$0xff]  }
 0x105   :  { %6556 = vmatprep.mubr.bf16.mxu0 %v7895_v24  ;;  %7244 = vmatprep.mubr.bf16.mxu1 %v7895_v24  ;;  %v11662_v19 = vld [vmem:[%s13951_s0 + $0x28] sm:$0xff] }
 0x106   :  { %v11667_v24 = vld [vmem:[%s13951_s0 + $0xa8] sm:$0xff] }
 0x107   :  { %6527 = vmatpush1.bf16.msra.mxu0 %v9461_v25  ;;  %7215 = vmatpush1.bf16.msra.mxu1 %v9464_v26  ;;  %v7894_v25 = vcombine.low %v11456_v14, %v11463_v21  ;;  %v9551_v26 = vld [vmem:[%s13950_s1 + $0xa00] ss:$16 sps:$4 sm:$0xff]   ;;  %v9562_v14 = vld [vmem:[%s13950_s1 + $0xa2c] ss:$16 sps:$4 sm:$0xff]   ;;  %v7897_v21 = vcombine.high %v11662_v19, %v11667_v24 }
 0x108   :  { %6528 = vmatprep.subr.bf16.mxu0 %v9469_v27  ;;  %7216 = vmatprep.subr.bf16.mxu1 %v9472_v28  ;;  %v9554_v27 = vld [vmem:[%s13950_s1 + $0xa08] ss:$16 sps:$4 sm:$0xff]   ;;  %v9559_v28 = vld [vmem:[%s13950_s1 + $0xa24] ss:$16 sps:$4 sm:$0xff]  }
 0x10b   :  { %6529 = vmatpush1.bf16.msra.mxu0 %v9467_v29  ;;  %7217 = vmatpush1.bf16.msra.mxu1 %v9470_v30  ;;  %v9557_v29 = vld [vmem:[%s13950_s1 + $0xa20] ss:$16 sps:$4 sm:$0xff]   ;;  %v9560_v30 = vld [vmem:[%s13950_s1 + $0xa28] ss:$16 sps:$4 sm:$0xff]  }
 0x10c   :  { %6530 = vmatprep.subr.bf16.mxu0 %v9475_v31  ;;  %7218 = vmatprep.subr.bf16.mxu1 %v9478_v32  ;;  %v9565_v31 = vld [vmem:[%s13950_s1 + $0xa44] ss:$16 sps:$4 sm:$0xff]   ;;  %v9568_v32 = vld [vmem:[%s13950_s1 + $0xa4c] ss:$16 sps:$4 sm:$0xff]  }
 0x10f   :  { %6531 = vmatpush1.bf16.msra.mxu0 %v9473_v33  ;;  %7219 = vmatpush1.bf16.msra.mxu1 %v9476_v34  ;;  %v9563_v33 = vld [vmem:[%s13950_s1 + $0xa40] ss:$16 sps:$4 sm:$0xff]   ;;  %v9566_v34 = vld [vmem:[%s13950_s1 + $0xa48] ss:$16 sps:$4 sm:$0xff]  }
 0x110   :  { %6532 = vmatprep.subr.bf16.mxu0 %v9481_v35  ;;  %7220 = vmatprep.subr.bf16.mxu1 %v9484_v36  ;;  %v9571_v35 = vld [vmem:[%s13950_s1 + $0xa64] ss:$16 sps:$4 sm:$0xff]   ;;  %v9574_v36 = vld [vmem:[%s13950_s1 + $0xa6c] ss:$16 sps:$4 sm:$0xff]  }
 0x113   :  { %6533 = vmatpush1.bf16.msra.mxu0 %v9479_v37  ;;  %7221 = vmatpush1.bf16.msra.mxu1 %v9482_v38  ;;  %v9569_v37 = vld [vmem:[%s13950_s1 + $0xa60] ss:$16 sps:$4 sm:$0xff]   ;;  %v9572_v38 = vld [vmem:[%s13950_s1 + $0xa68] ss:$16 sps:$4 sm:$0xff]  }
 0x114   :  { %6534 = vmatprep.subr.bf16.mxu0 %v9487_v39  ;;  %7222 = vmatprep.subr.bf16.mxu1 %v9490_v40  ;;  %v9577_v39 = vld [vmem:[%s13950_s1 + $0xa84] ss:$16 sps:$4 sm:$0xff]   ;;  %v9580_v40 = vld [vmem:[%s13950_s1 + $0xa8c] ss:$16 sps:$4 sm:$0xff]  }
 0x117   :  { %6535 = vmatpush1.bf16.msra.mxu0 %v9485_v41  ;;  %7223 = vmatpush1.bf16.msra.mxu1 %v9488_v42  ;;  %v9575_v41 = vld [vmem:[%s13950_s1 + $0xa80] ss:$16 sps:$4 sm:$0xff]   ;;  %v9578_v42 = vld [vmem:[%s13950_s1 + $0xa88] ss:$16 sps:$4 sm:$0xff]  }
 0x118   :  { %6536 = vmatprep.subr.bf16.mxu0 %v9493_v43  ;;  %7224 = vmatprep.subr.bf16.mxu1 %v9496_v44  ;;  %v9583_v43 = vld [vmem:[%s13950_s1 + $0xaa4] ss:$16 sps:$4 sm:$0xff]   ;;  %v9586_v44 = vld [vmem:[%s13950_s1 + $0xaac] ss:$16 sps:$4 sm:$0xff]  }
 0x11b   :  { %6537 = vmatpush1.bf16.msra.mxu0 %v9491_v45  ;;  %7225 = vmatpush1.bf16.msra.mxu1 %v9494_v46  ;;  %v9581_v45 = vld [vmem:[%s13950_s1 + $0xaa0] ss:$16 sps:$4 sm:$0xff]   ;;  %v9584_v46 = vld [vmem:[%s13950_s1 + $0xaa8] ss:$16 sps:$4 sm:$0xff]  }
 0x11c   :  { %6538 = vmatprep.subr.bf16.mxu0 %v9499_v47  ;;  %7226 = vmatprep.subr.bf16.mxu1 %v9502_v48  ;;  %v9589_v47 = vld [vmem:[%s13950_s1 + $0xac4] ss:$16 sps:$4 sm:$0xff]   ;;  %v9592_v48 = vld [vmem:[%s13950_s1 + $0xacc] ss:$16 sps:$4 sm:$0xff]  }
 0x11f   :  { %6539 = vmatpush1.bf16.msra.mxu0 %v9497_v49  ;;  %7227 = vmatpush1.bf16.msra.mxu1 %v9500_v50  ;;  %v9587_v49 = vld [vmem:[%s13950_s1 + $0xac0] ss:$16 sps:$4 sm:$0xff]   ;;  %v9590_v50 = vld [vmem:[%s13950_s1 + $0xac8] ss:$16 sps:$4 sm:$0xff]  }
 0x120   :  { %6540 = vmatprep.subr.bf16.mxu0 %v9505_v51  ;;  %7228 = vmatprep.subr.bf16.mxu1 %v9508_v52  ;;  %v9595_v51 = vld [vmem:[%s13950_s1 + $0xae4] ss:$16 sps:$4 sm:$0xff]   ;;  %v9598_v52 = vld [vmem:[%s13950_s1 + $0xaec] ss:$16 sps:$4 sm:$0xff]  }
 0x123   :  { %6541 = vmatpush1.bf16.msra.mxu0 %v9503_v53  ;;  %7229 = vmatpush1.bf16.msra.mxu1 %v9506_v54  ;;  %v9593_v53 = vld [vmem:[%s13950_s1 + $0xae0] ss:$16 sps:$4 sm:$0xff]   ;;  %v9596_v54 = vld [vmem:[%s13950_s1 + $0xae8] ss:$16 sps:$4 sm:$0xff]  }
 0x124   :  { %6542 = vmatprep.subr.bf16.mxu0 %v9511_v55  ;;  %7230 = vmatprep.subr.bf16.mxu1 %v9514_v56  ;;  %v9601_v55 = vld [vmem:[%s13950_s1 + $0xb04] ss:$16 sps:$4 sm:$0xff]   ;;  %v9604_v56 = vld [vmem:[%s13950_s1 + $0xb0c] ss:$16 sps:$4 sm:$0xff]  }
 0x127   :  { %6543 = vmatpush1.bf16.msra.mxu0 %v9509_v57  ;;  %7231 = vmatpush1.bf16.msra.mxu1 %v9512_v58  ;;  %v9599_v57 = vld [vmem:[%s13950_s1 + $0xb00] ss:$16 sps:$4 sm:$0xff]   ;;  %v9602_v58 = vld [vmem:[%s13950_s1 + $0xb08] ss:$16 sps:$4 sm:$0xff]  }
 0x128   :  { %6544 = vmatprep.subr.bf16.mxu0 %v9517_v59  ;;  %7232 = vmatprep.subr.bf16.mxu1 %v9520_v60  ;;  %v9607_v59 = vld [vmem:[%s13950_s1 + $0xb24] ss:$16 sps:$4 sm:$0xff]   ;;  %v9610_v60 = vld [vmem:[%s13950_s1 + $0xb2c] ss:$16 sps:$4 sm:$0xff]  }
 0x12b   :  { %6545 = vmatpush1.bf16.msra.mxu0 %v9515_v61  ;;  %7233 = vmatpush1.bf16.msra.mxu1 %v9518_v62  ;;  %v9605_v61 = vld [vmem:[%s13950_s1 + $0xb20] ss:$16 sps:$4 sm:$0xff]   ;;  %v9608_v62 = vld [vmem:[%s13950_s1 + $0xb28] ss:$16 sps:$4 sm:$0xff]  }
 0x12c   :  { %6546 = vmatprep.subr.bf16.mxu0 %v9523_v63  ;;  %7234 = vmatprep.subr.bf16.mxu1 %v9526_v0  ;;  %v9613_v63 = vld [vmem:[%s13950_s1 + $0xb44] ss:$16 sps:$4 sm:$0xff]   ;;  %v9616_v0 = vld [vmem:[%s13950_s1 + $0xb4c] ss:$16 sps:$4 sm:$0xff]  }
 0x12f   :  { %6547 = vmatpush1.bf16.msra.mxu0 %v9521_v1  ;;  %7235 = vmatpush1.bf16.msra.mxu1 %v9524_v2  ;;  %v9611_v1 = vld [vmem:[%s13950_s1 + $0xb40] ss:$16 sps:$4 sm:$0xff]   ;;  %v9614_v2 = vld [vmem:[%s13950_s1 + $0xb48] ss:$16 sps:$4 sm:$0xff]  }
 0x130   :  { %6548 = vmatprep.subr.bf16.mxu0 %v9529_v3  ;;  %7236 = vmatprep.subr.bf16.mxu1 %v9532_v4  ;;  %v9619_v3 = vld [vmem:[%s13950_s1 + $0xb64] ss:$16 sps:$4 sm:$0xff]   ;;  %v9622_v4 = vld [vmem:[%s13950_s1 + $0xb6c] ss:$16 sps:$4 sm:$0xff]  }
 0x133   :  { %6549 = vmatpush1.bf16.msra.mxu0 %v9527_v5  ;;  %7237 = vmatpush1.bf16.msra.mxu1 %v9530_v6  ;;  %v9617_v5 = vld [vmem:[%s13950_s1 + $0xb60] ss:$16 sps:$4 sm:$0xff]   ;;  %v9620_v6 = vld [vmem:[%s13950_s1 + $0xb68] ss:$16 sps:$4 sm:$0xff]  }
 0x134   :  { %6550 = vmatprep.subr.bf16.mxu0 %v9535_v7  ;;  %7238 = vmatprep.subr.bf16.mxu1 %v9538_v8  ;;  %v9625_v7 = vld [vmem:[%s13950_s1 + $0xb84] ss:$16 sps:$4 sm:$0xff]   ;;  %v9628_v8 = vld [vmem:[%s13950_s1 + $0xb8c] ss:$16 sps:$4 sm:$0xff]  }
 0x137   :  { %6551 = vmatpush1.bf16.msra.mxu0 %v9533_v9  ;;  %7239 = vmatpush1.bf16.msra.mxu1 %v9536_v10  ;;  %v9623_v9 = vld [vmem:[%s13950_s1 + $0xb80] ss:$16 sps:$4 sm:$0xff]   ;;  %v9626_v10 = vld [vmem:[%s13950_s1 + $0xb88] ss:$16 sps:$4 sm:$0xff]  }
 0x138   :  { %6552 = vmatprep.subr.bf16.mxu0 %v9541_v11  ;;  %7240 = vmatprep.subr.bf16.mxu1 %v9544_v12  ;;  %v9631_v11 = vld [vmem:[%s13950_s1 + $0xba4] ss:$16 sps:$4 sm:$0xff]   ;;  %v9634_v12 = vld [vmem:[%s13950_s1 + $0xbac] ss:$16 sps:$4 sm:$0xff]  }
 0x13b   :  { %6553 = vmatpush1.bf16.msra.mxu0 %v9539_v13  ;;  %7241 = vmatpush1.bf16.msra.mxu1 %v9542_v16  ;;  %v9629_v13 = vld [vmem:[%s13950_s1 + $0xba0] ss:$16 sps:$4 sm:$0xff]   ;;  %v9632_v16 = vld [vmem:[%s13950_s1 + $0xba8] ss:$16 sps:$4 sm:$0xff]  }
 0x13c   :  { %6554 = vmatprep.subr.bf16.mxu0 %v9547_v17  ;;  %7242 = vmatprep.subr.bf16.mxu1 %v9550_v20  ;;  %v9637_v17 = vld [vmem:[%s13950_s1 + $0xbc4] ss:$16 sps:$4 sm:$0xff]   ;;  %v9640_v20 = vld [vmem:[%s13950_s1 + $0xbcc] ss:$16 sps:$4 sm:$0xff]  }
 0x13f   :  { %6555 = vmatpush1.bf16.msra.mxu0 %v9545_v15  ;;  %7243 = vmatpush1.bf16.msra.mxu1 %v9548_v22  ;;  %v9635_v15 = vld [vmem:[%s13950_s1 + $0xbc0] ss:$16 sps:$4 sm:$0xff]   ;;  %v9638_v22 = vld [vmem:[%s13950_s1 + $0xbc8] ss:$16 sps:$4 sm:$0xff]  }
 0x140   :  { %6567 = vmatprep.subr.bf16.mxu0 %v9553_v23  ;;  %7255 = vmatprep.subr.bf16.mxu1 %v9556_v18  ;;  %v9643_v23 = vld [vmem:[%s13950_s1 + $0xbe4] ss:$16 sps:$4 sm:$0xff]   ;;  %v9646_v18 = vld [vmem:[%s13950_s1 + $0xbec] ss:$16 sps:$4 sm:$0xff]  }
 0x142   :  { %6557 = vmatmul.mubr.bf16.vlgmr.msra.gmra.mrb[0].mxu0 %v7894_v25  ;;  %7245 = vmatmul.mubr.bf16.vlgmr.msra.gmra.mrb[0].mxu1 %v7894_v25  ;;  %v9641_v25 = vld [vmem:[%s13950_s1 + $0xbe0] ss:$16 sps:$4 sm:$0xff]  }
 0x143   :  { %6568 = vmatpush1.bf16.msra.mxu0 %v9551_v26  ;;  %7256 = vmatpush1.bf16.msra.mxu1 %v9554_v27  ;;  %v9644_v26 = vld [vmem:[%s13950_s1 + $0xbe8] ss:$16 sps:$4 sm:$0xff]   ;;  %v9649_v27 = vld [vmem:[%s13950_s1 + $0xc04] ss:$16 sps:$4 sm:$0xff]  }
 0x144   :  { %6569 = vmatprep.subr.bf16.mxu0 %v9559_v28  ;;  %7257 = vmatprep.subr.bf16.mxu1 %v9562_v14  ;;  %v9652_v28 = vld [vmem:[%s13950_s1 + $0xc0c] ss:$16 sps:$4 sm:$0xff]   ;;  %v11868_v14 = vld [vmem:[%s13951_s0 + $0x30] sm:$0xff] }
 0x145   :  { %6599 = vmatprep.mubr.bf16.mxu0 %v7897_v21  ;;  %7287 = vmatprep.mubr.bf16.mxu1 %v7897_v21  ;;  %v11873_v21 = vld [vmem:[%s13951_s0 + $0xb0] sm:$0xff] }
 0x147   :  { %6570 = vmatpush1.bf16.msra.mxu0 %v9557_v29  ;;  %7258 = vmatpush1.bf16.msra.mxu1 %v9560_v30  ;;  %v7896_v29 = vcombine.low %v11662_v19, %v11667_v24  ;;  %v9647_v30 = vld [vmem:[%s13950_s1 + $0xc00] ss:$16 sps:$4 sm:$0xff]   ;;  %v9658_v19 = vld [vmem:[%s13950_s1 + $0xc2c] ss:$16 sps:$4 sm:$0xff]   ;;  %v7899_v24 = vcombine.high %v11868_v14, %v11873_v21 }
 0x148   :  { %6571 = vmatprep.subr.bf16.mxu0 %v9565_v31  ;;  %7259 = vmatprep.subr.bf16.mxu1 %v9568_v32  ;;  %v9650_v31 = vld [vmem:[%s13950_s1 + $0xc08] ss:$16 sps:$4 sm:$0xff]   ;;  %v9655_v32 = vld [vmem:[%s13950_s1 + $0xc24] ss:$16 sps:$4 sm:$0xff]  }
 0x14b   :  { %6572 = vmatpush1.bf16.msra.mxu0 %v9563_v33  ;;  %7260 = vmatpush1.bf16.msra.mxu1 %v9566_v34  ;;  %v9653_v33 = vld [vmem:[%s13950_s1 + $0xc20] ss:$16 sps:$4 sm:$0xff]   ;;  %v9656_v34 = vld [vmem:[%s13950_s1 + $0xc28] ss:$16 sps:$4 sm:$0xff]  }
 0x14c   :  { %6573 = vmatprep.subr.bf16.mxu0 %v9571_v35  ;;  %7261 = vmatprep.subr.bf16.mxu1 %v9574_v36  ;;  %v9661_v35 = vld [vmem:[%s13950_s1 + $0xc44] ss:$16 sps:$4 sm:$0xff]   ;;  %v9664_v36 = vld [vmem:[%s13950_s1 + $0xc4c] ss:$16 sps:$4 sm:$0xff]  }
 0x14f   :  { %6574 = vmatpush1.bf16.msra.mxu0 %v9569_v37  ;;  %7262 = vmatpush1.bf16.msra.mxu1 %v9572_v38  ;;  %v9659_v37 = vld [vmem:[%s13950_s1 + $0xc40] ss:$16 sps:$4 sm:$0xff]   ;;  %v9662_v38 = vld [vmem:[%s13950_s1 + $0xc48] ss:$16 sps:$4 sm:$0xff]  }
 0x150   :  { %6575 = vmatprep.subr.bf16.mxu0 %v9577_v39  ;;  %7263 = vmatprep.subr.bf16.mxu1 %v9580_v40  ;;  %v9667_v39 = vld [vmem:[%s13950_s1 + $0xc64] ss:$16 sps:$4 sm:$0xff]   ;;  %v9670_v40 = vld [vmem:[%s13950_s1 + $0xc6c] ss:$16 sps:$4 sm:$0xff]  }
 0x153   :  { %6576 = vmatpush1.bf16.msra.mxu0 %v9575_v41  ;;  %7264 = vmatpush1.bf16.msra.mxu1 %v9578_v42  ;;  %v9665_v41 = vld [vmem:[%s13950_s1 + $0xc60] ss:$16 sps:$4 sm:$0xff]   ;;  %v9668_v42 = vld [vmem:[%s13950_s1 + $0xc68] ss:$16 sps:$4 sm:$0xff]  }
 0x154   :  { %6577 = vmatprep.subr.bf16.mxu0 %v9583_v43  ;;  %7265 = vmatprep.subr.bf16.mxu1 %v9586_v44  ;;  %v9673_v43 = vld [vmem:[%s13950_s1 + $0xc84] ss:$16 sps:$4 sm:$0xff]   ;;  %v9676_v44 = vld [vmem:[%s13950_s1 + $0xc8c] ss:$16 sps:$4 sm:$0xff]  }
 0x157   :  { %6578 = vmatpush1.bf16.msra.mxu0 %v9581_v45  ;;  %7266 = vmatpush1.bf16.msra.mxu1 %v9584_v46  ;;  %v9671_v45 = vld [vmem:[%s13950_s1 + $0xc80] ss:$16 sps:$4 sm:$0xff]   ;;  %v9674_v46 = vld [vmem:[%s13950_s1 + $0xc88] ss:$16 sps:$4 sm:$0xff]  }
 0x158   :  { %6579 = vmatprep.subr.bf16.mxu0 %v9589_v47  ;;  %7267 = vmatprep.subr.bf16.mxu1 %v9592_v48  ;;  %v9679_v47 = vld [vmem:[%s13950_s1 + $0xca4] ss:$16 sps:$4 sm:$0xff]   ;;  %v9682_v48 = vld [vmem:[%s13950_s1 + $0xcac] ss:$16 sps:$4 sm:$0xff]  }
 0x15b   :  { %6580 = vmatpush1.bf16.msra.mxu0 %v9587_v49  ;;  %7268 = vmatpush1.bf16.msra.mxu1 %v9590_v50  ;;  %v9677_v49 = vld [vmem:[%s13950_s1 + $0xca0] ss:$16 sps:$4 sm:$0xff]   ;;  %v9680_v50 = vld [vmem:[%s13950_s1 + $0xca8] ss:$16 sps:$4 sm:$0xff]  }
 0x15c   :  { %6581 = vmatprep.subr.bf16.mxu0 %v9595_v51  ;;  %7269 = vmatprep.subr.bf16.mxu1 %v9598_v52  ;;  %v9685_v51 = vld [vmem:[%s13950_s1 + $0xcc4] ss:$16 sps:$4 sm:$0xff]   ;;  %v9688_v52 = vld [vmem:[%s13950_s1 + $0xccc] ss:$16 sps:$4 sm:$0xff]  }
 0x15f   :  { %6582 = vmatpush1.bf16.msra.mxu0 %v9593_v53  ;;  %7270 = vmatpush1.bf16.msra.mxu1 %v9596_v54  ;;  %v9683_v53 = vld [vmem:[%s13950_s1 + $0xcc0] ss:$16 sps:$4 sm:$0xff]   ;;  %v9686_v54 = vld [vmem:[%s13950_s1 + $0xcc8] ss:$16 sps:$4 sm:$0xff]  }
 0x160   :  { %6583 = vmatprep.subr.bf16.mxu0 %v9601_v55  ;;  %7271 = vmatprep.subr.bf16.mxu1 %v9604_v56  ;;  %v9691_v55 = vld [vmem:[%s13950_s1 + $0xce4] ss:$16 sps:$4 sm:$0xff]   ;;  %v9694_v56 = vld [vmem:[%s13950_s1 + $0xcec] ss:$16 sps:$4 sm:$0xff]  }
 0x163   :  { %6584 = vmatpush1.bf16.msra.mxu0 %v9599_v57  ;;  %7272 = vmatpush1.bf16.msra.mxu1 %v9602_v58  ;;  %v9689_v57 = vld [vmem:[%s13950_s1 + $0xce0] ss:$16 sps:$4 sm:$0xff]   ;;  %v9692_v58 = vld [vmem:[%s13950_s1 + $0xce8] ss:$16 sps:$4 sm:$0xff]  }
 0x164   :  { %6585 = vmatprep.subr.bf16.mxu0 %v9607_v59  ;;  %7273 = vmatprep.subr.bf16.mxu1 %v9610_v60  ;;  %v9697_v59 = vld [vmem:[%s13950_s1 + $0xd04] ss:$16 sps:$4 sm:$0xff]   ;;  %v9700_v60 = vld [vmem:[%s13950_s1 + $0xd0c] ss:$16 sps:$4 sm:$0xff]  }
 0x167   :  { %6586 = vmatpush1.bf16.msra.mxu0 %v9605_v61  ;;  %7274 = vmatpush1.bf16.msra.mxu1 %v9608_v62  ;;  %v9695_v61 = vld [vmem:[%s13950_s1 + $0xd00] ss:$16 sps:$4 sm:$0xff]   ;;  %v9698_v62 = vld [vmem:[%s13950_s1 + $0xd08] ss:$16 sps:$4 sm:$0xff]  }
 0x168   :  { %6587 = vmatprep.subr.bf16.mxu0 %v9613_v63  ;;  %7275 = vmatprep.subr.bf16.mxu1 %v9616_v0  ;;  %v9703_v63 = vld [vmem:[%s13950_s1 + $0xd24] ss:$16 sps:$4 sm:$0xff]   ;;  %v9706_v0 = vld [vmem:[%s13950_s1 + $0xd2c] ss:$16 sps:$4 sm:$0xff]  }
 0x16b   :  { %6588 = vmatpush1.bf16.msra.mxu0 %v9611_v1  ;;  %7276 = vmatpush1.bf16.msra.mxu1 %v9614_v2  ;;  %v9701_v1 = vld [vmem:[%s13950_s1 + $0xd20] ss:$16 sps:$4 sm:$0xff]   ;;  %v9704_v2 = vld [vmem:[%s13950_s1 + $0xd28] ss:$16 sps:$4 sm:$0xff]  }
 0x16c   :  { %6589 = vmatprep.subr.bf16.mxu0 %v9619_v3  ;;  %7277 = vmatprep.subr.bf16.mxu1 %v9622_v4  ;;  %v9709_v3 = vld [vmem:[%s13950_s1 + $0xd44] ss:$16 sps:$4 sm:$0xff]   ;;  %v9712_v4 = vld [vmem:[%s13950_s1 + $0xd4c] ss:$16 sps:$4 sm:$0xff]  }
 0x16f   :  { %6590 = vmatpush1.bf16.msra.mxu0 %v9617_v5  ;;  %7278 = vmatpush1.bf16.msra.mxu1 %v9620_v6  ;;  %v9707_v5 = vld [vmem:[%s13950_s1 + $0xd40] ss:$16 sps:$4 sm:$0xff]   ;;  %v9710_v6 = vld [vmem:[%s13950_s1 + $0xd48] ss:$16 sps:$4 sm:$0xff]  }
 0x170   :  { %6591 = vmatprep.subr.bf16.mxu0 %v9625_v7  ;;  %7279 = vmatprep.subr.bf16.mxu1 %v9628_v8  ;;  %v9715_v7 = vld [vmem:[%s13950_s1 + $0xd64] ss:$16 sps:$4 sm:$0xff]   ;;  %v9718_v8 = vld [vmem:[%s13950_s1 + $0xd6c] ss:$16 sps:$4 sm:$0xff]  }
 0x173   :  { %6592 = vmatpush1.bf16.msra.mxu0 %v9623_v9  ;;  %7280 = vmatpush1.bf16.msra.mxu1 %v9626_v10  ;;  %v9713_v9 = vld [vmem:[%s13950_s1 + $0xd60] ss:$16 sps:$4 sm:$0xff]   ;;  %v9716_v10 = vld [vmem:[%s13950_s1 + $0xd68] ss:$16 sps:$4 sm:$0xff]  }
 0x174   :  { %6593 = vmatprep.subr.bf16.mxu0 %v9631_v11  ;;  %7281 = vmatprep.subr.bf16.mxu1 %v9634_v12  ;;  %v9721_v11 = vld [vmem:[%s13950_s1 + $0xd84] ss:$16 sps:$4 sm:$0xff]   ;;  %v9724_v12 = vld [vmem:[%s13950_s1 + $0xd8c] ss:$16 sps:$4 sm:$0xff]  }
 0x177   :  { %6594 = vmatpush1.bf16.msra.mxu0 %v9629_v13  ;;  %7282 = vmatpush1.bf16.msra.mxu1 %v9632_v16  ;;  %v9719_v13 = vld [vmem:[%s13950_s1 + $0xd80] ss:$16 sps:$4 sm:$0xff]   ;;  %v9722_v16 = vld [vmem:[%s13950_s1 + $0xd88] ss:$16 sps:$4 sm:$0xff]  }
 0x178   :  { %6595 = vmatprep.subr.bf16.mxu0 %v9637_v17  ;;  %7283 = vmatprep.subr.bf16.mxu1 %v9640_v20  ;;  %v9727_v17 = vld [vmem:[%s13950_s1 + $0xda4] ss:$16 sps:$4 sm:$0xff]   ;;  %v9730_v20 = vld [vmem:[%s13950_s1 + $0xdac] ss:$16 sps:$4 sm:$0xff]  }
 0x17b   :  { %6596 = vmatpush1.bf16.msra.mxu0 %v9635_v15  ;;  %7284 = vmatpush1.bf16.msra.mxu1 %v9638_v22  ;;  %v9725_v15 = vld [vmem:[%s13950_s1 + $0xda0] ss:$16 sps:$4 sm:$0xff]   ;;  %v9728_v22 = vld [vmem:[%s13950_s1 + $0xda8] ss:$16 sps:$4 sm:$0xff]  }
 0x17c   :  { %6597 = vmatprep.subr.bf16.mxu0 %v9643_v23  ;;  %7285 = vmatprep.subr.bf16.mxu1 %v9646_v18  ;;  %v9733_v23 = vld [vmem:[%s13950_s1 + $0xdc4] ss:$16 sps:$4 sm:$0xff]   ;;  %v9736_v18 = vld [vmem:[%s13950_s1 + $0xdcc] ss:$16 sps:$4 sm:$0xff]  }
 0x17f   :  { %6598 = vmatpush1.bf16.msra.mxu0 %v9641_v25  ;;  %7286 = vmatpush1.bf16.msra.mxu1 %v9644_v26  ;;  %v9731_v25 = vld [vmem:[%s13950_s1 + $0xdc0] ss:$16 sps:$4 sm:$0xff]   ;;  %v9734_v26 = vld [vmem:[%s13950_s1 + $0xdc8] ss:$16 sps:$4 sm:$0xff]  }
 0x180   :  { %6610 = vmatprep.subr.bf16.mxu0 %v9649_v27  ;;  %7298 = vmatprep.subr.bf16.mxu1 %v9652_v28  ;;  %v9739_v27 = vld [vmem:[%s13950_s1 + $0xde4] ss:$16 sps:$4 sm:$0xff]   ;;  %v9742_v28 = vld [vmem:[%s13950_s1 + $0xdec] ss:$16 sps:$4 sm:$0xff]  }
 0x182   :  { %6600 = vmatmul.mubr.bf16.vlgmr.msra.gmra.mrb[0].mxu0 %v7896_v29  ;;  %7288 = vmatmul.mubr.bf16.vlgmr.msra.gmra.mrb[0].mxu1 %v7896_v29  ;;  %v9737_v29 = vld [vmem:[%s13950_s1 + $0xde0] ss:$16 sps:$4 sm:$0xff]  }
 0x183   :  { %6611 = vmatpush1.bf16.msra.mxu0 %v9647_v30  ;;  %7299 = vmatpush1.bf16.msra.mxu1 %v9650_v31  ;;  %v9740_v30 = vld [vmem:[%s13950_s1 + $0xde8] ss:$16 sps:$4 sm:$0xff]   ;;  %v9745_v31 = vld [vmem:[%s13950_s1 + $0xe04] ss:$16 sps:$4 sm:$0xff]  }
 0x184   :  { %6612 = vmatprep.subr.bf16.mxu0 %v9655_v32  ;;  %7300 = vmatprep.subr.bf16.mxu1 %v9658_v19  ;;  %v9748_v32 = vld [vmem:[%s13950_s1 + $0xe0c] ss:$16 sps:$4 sm:$0xff]  }
 0x185   :  { %6642 = vmatprep.mubr.bf16.mxu0 %v7899_v24  ;;  %7330 = vmatprep.mubr.bf16.mxu1 %v7899_v24  ;;  %v12074_v19 = vld [vmem:[%s13951_s0 + $0x38] sm:$0xff] }
 0x186   :  { %v12079_v24 = vld [vmem:[%s13951_s0 + $0xb8] sm:$0xff] }
 0x187   :  { %6613 = vmatpush1.bf16.msra.mxu0 %v9653_v33  ;;  %7301 = vmatpush1.bf16.msra.mxu1 %v9656_v34  ;;  %v7898_v33 = vcombine.low %v11868_v14, %v11873_v21  ;;  %v9743_v34 = vld [vmem:[%s13950_s1 + $0xe00] ss:$16 sps:$4 sm:$0xff]   ;;  %v9754_v14 = vld [vmem:[%s13950_s1 + $0xe2c] ss:$16 sps:$4 sm:$0xff]   ;;  %v7901_v21 = vcombine.high %v12074_v19, %v12079_v24 }
 0x188   :  { %6614 = vmatprep.subr.bf16.mxu0 %v9661_v35  ;;  %7302 = vmatprep.subr.bf16.mxu1 %v9664_v36  ;;  %v9746_v35 = vld [vmem:[%s13950_s1 + $0xe08] ss:$16 sps:$4 sm:$0xff]   ;;  %v9751_v36 = vld [vmem:[%s13950_s1 + $0xe24] ss:$16 sps:$4 sm:$0xff]  }
 0x18b   :  { %6615 = vmatpush1.bf16.msra.mxu0 %v9659_v37  ;;  %7303 = vmatpush1.bf16.msra.mxu1 %v9662_v38  ;;  %v9749_v37 = vld [vmem:[%s13950_s1 + $0xe20] ss:$16 sps:$4 sm:$0xff]   ;;  %v9752_v38 = vld [vmem:[%s13950_s1 + $0xe28] ss:$16 sps:$4 sm:$0xff]  }
 0x18c   :  { %6616 = vmatprep.subr.bf16.mxu0 %v9667_v39  ;;  %7304 = vmatprep.subr.bf16.mxu1 %v9670_v40  ;;  %v9757_v39 = vld [vmem:[%s13950_s1 + $0xe44] ss:$16 sps:$4 sm:$0xff]   ;;  %v9760_v40 = vld [vmem:[%s13950_s1 + $0xe4c] ss:$16 sps:$4 sm:$0xff]  }
 0x18f   :  { %6617 = vmatpush1.bf16.msra.mxu0 %v9665_v41  ;;  %7305 = vmatpush1.bf16.msra.mxu1 %v9668_v42  ;;  %v9755_v41 = vld [vmem:[%s13950_s1 + $0xe40] ss:$16 sps:$4 sm:$0xff]   ;;  %v9758_v42 = vld [vmem:[%s13950_s1 + $0xe48] ss:$16 sps:$4 sm:$0xff]  }
 0x190   :  { %6618 = vmatprep.subr.bf16.mxu0 %v9673_v43  ;;  %7306 = vmatprep.subr.bf16.mxu1 %v9676_v44  ;;  %v9763_v43 = vld [vmem:[%s13950_s1 + $0xe64] ss:$16 sps:$4 sm:$0xff]   ;;  %v9766_v44 = vld [vmem:[%s13950_s1 + $0xe6c] ss:$16 sps:$4 sm:$0xff]  }
 0x193   :  { %6619 = vmatpush1.bf16.msra.mxu0 %v9671_v45  ;;  %7307 = vmatpush1.bf16.msra.mxu1 %v9674_v46  ;;  %v9761_v45 = vld [vmem:[%s13950_s1 + $0xe60] ss:$16 sps:$4 sm:$0xff]   ;;  %v9764_v46 = vld [vmem:[%s13950_s1 + $0xe68] ss:$16 sps:$4 sm:$0xff]  }
 0x194   :  { %6620 = vmatprep.subr.bf16.mxu0 %v9679_v47  ;;  %7308 = vmatprep.subr.bf16.mxu1 %v9682_v48  ;;  %v9769_v47 = vld [vmem:[%s13950_s1 + $0xe84] ss:$16 sps:$4 sm:$0xff]   ;;  %v9772_v48 = vld [vmem:[%s13950_s1 + $0xe8c] ss:$16 sps:$4 sm:$0xff]  }
 0x197   :  { %6621 = vmatpush1.bf16.msra.mxu0 %v9677_v49  ;;  %7309 = vmatpush1.bf16.msra.mxu1 %v9680_v50  ;;  %v9767_v49 = vld [vmem:[%s13950_s1 + $0xe80] ss:$16 sps:$4 sm:$0xff]   ;;  %v9770_v50 = vld [vmem:[%s13950_s1 + $0xe88] ss:$16 sps:$4 sm:$0xff]  }
 0x198   :  { %6622 = vmatprep.subr.bf16.mxu0 %v9685_v51  ;;  %7310 = vmatprep.subr.bf16.mxu1 %v9688_v52  ;;  %v9775_v51 = vld [vmem:[%s13950_s1 + $0xea4] ss:$16 sps:$4 sm:$0xff]   ;;  %v9778_v52 = vld [vmem:[%s13950_s1 + $0xeac] ss:$16 sps:$4 sm:$0xff]  }
 0x19b   :  { %6623 = vmatpush1.bf16.msra.mxu0 %v9683_v53  ;;  %7311 = vmatpush1.bf16.msra.mxu1 %v9686_v54  ;;  %v9773_v53 = vld [vmem:[%s13950_s1 + $0xea0] ss:$16 sps:$4 sm:$0xff]   ;;  %v9776_v54 = vld [vmem:[%s13950_s1 + $0xea8] ss:$16 sps:$4 sm:$0xff]  }
 0x19c   :  { %6624 = vmatprep.subr.bf16.mxu0 %v9691_v55  ;;  %7312 = vmatprep.subr.bf16.mxu1 %v9694_v56  ;;  %v9781_v55 = vld [vmem:[%s13950_s1 + $0xec4] ss:$16 sps:$4 sm:$0xff]   ;;  %v9784_v56 = vld [vmem:[%s13950_s1 + $0xecc] ss:$16 sps:$4 sm:$0xff]  }
 0x19f   :  { %6625 = vmatpush1.bf16.msra.mxu0 %v9689_v57  ;;  %7313 = vmatpush1.bf16.msra.mxu1 %v9692_v58  ;;  %v9779_v57 = vld [vmem:[%s13950_s1 + $0xec0] ss:$16 sps:$4 sm:$0xff]   ;;  %v9782_v58 = vld [vmem:[%s13950_s1 + $0xec8] ss:$16 sps:$4 sm:$0xff]  }
 0x1a0   :  { %6626 = vmatprep.subr.bf16.mxu0 %v9697_v59  ;;  %7314 = vmatprep.subr.bf16.mxu1 %v9700_v60  ;;  %v9787_v59 = vld [vmem:[%s13950_s1 + $0xee4] ss:$16 sps:$4 sm:$0xff]   ;;  %v9790_v60 = vld [vmem:[%s13950_s1 + $0xeec] ss:$16 sps:$4 sm:$0xff]  }
 0x1a3   :  { %6627 = vmatpush1.bf16.msra.mxu0 %v9695_v61  ;;  %7315 = vmatpush1.bf16.msra.mxu1 %v9698_v62  ;;  %v9785_v61 = vld [vmem:[%s13950_s1 + $0xee0] ss:$16 sps:$4 sm:$0xff]   ;;  %v9788_v62 = vld [vmem:[%s13950_s1 + $0xee8] ss:$16 sps:$4 sm:$0xff]  }
 0x1a4   :  { %6628 = vmatprep.subr.bf16.mxu0 %v9703_v63  ;;  %7316 = vmatprep.subr.bf16.mxu1 %v9706_v0  ;;  %v9793_v63 = vld [vmem:[%s13950_s1 + $0xf04] ss:$16 sps:$4 sm:$0xff]   ;;  %v9796_v0 = vld [vmem:[%s13950_s1 + $0xf0c] ss:$16 sps:$4 sm:$0xff]  }
 0x1a7   :  { %6629 = vmatpush1.bf16.msra.mxu0 %v9701_v1  ;;  %7317 = vmatpush1.bf16.msra.mxu1 %v9704_v2  ;;  %v9791_v1 = vld [vmem:[%s13950_s1 + $0xf00] ss:$16 sps:$4 sm:$0xff]   ;;  %v9794_v2 = vld [vmem:[%s13950_s1 + $0xf08] ss:$16 sps:$4 sm:$0xff]  }
 0x1a8   :  { %6630 = vmatprep.subr.bf16.mxu0 %v9709_v3  ;;  %7318 = vmatprep.subr.bf16.mxu1 %v9712_v4  ;;  %v9799_v3 = vld [vmem:[%s13950_s1 + $0xf24] ss:$16 sps:$4 sm:$0xff]   ;;  %v9802_v4 = vld [vmem:[%s13950_s1 + $0xf2c] ss:$16 sps:$4 sm:$0xff]  }
 0x1ab   :  { %6631 = vmatpush1.bf16.msra.mxu0 %v9707_v5  ;;  %7319 = vmatpush1.bf16.msra.mxu1 %v9710_v6  ;;  %v9797_v5 = vld [vmem:[%s13950_s1 + $0xf20] ss:$16 sps:$4 sm:$0xff]   ;;  %v9800_v6 = vld [vmem:[%s13950_s1 + $0xf28] ss:$16 sps:$4 sm:$0xff]  }
 0x1ac   :  { %6632 = vmatprep.subr.bf16.mxu0 %v9715_v7  ;;  %7320 = vmatprep.subr.bf16.mxu1 %v9718_v8  ;;  %v9805_v7 = vld [vmem:[%s13950_s1 + $0xf44] ss:$16 sps:$4 sm:$0xff]   ;;  %v9808_v8 = vld [vmem:[%s13950_s1 + $0xf4c] ss:$16 sps:$4 sm:$0xff]  }
 0x1af   :  { %6633 = vmatpush1.bf16.msra.mxu0 %v9713_v9  ;;  %7321 = vmatpush1.bf16.msra.mxu1 %v9716_v10  ;;  %v9803_v9 = vld [vmem:[%s13950_s1 + $0xf40] ss:$16 sps:$4 sm:$0xff]   ;;  %v9806_v10 = vld [vmem:[%s13950_s1 + $0xf48] ss:$16 sps:$4 sm:$0xff]  }
 0x1b0   :  { %6634 = vmatprep.subr.bf16.mxu0 %v9721_v11  ;;  %7322 = vmatprep.subr.bf16.mxu1 %v9724_v12  ;;  %v9811_v11 = vld [vmem:[%s13950_s1 + $0xf64] ss:$16 sps:$4 sm:$0xff]   ;;  %v9814_v12 = vld [vmem:[%s13950_s1 + $0xf6c] ss:$16 sps:$4 sm:$0xff]  }
 0x1b3   :  { %6635 = vmatpush1.bf16.msra.mxu0 %v9719_v13  ;;  %7323 = vmatpush1.bf16.msra.mxu1 %v9722_v16  ;;  %v9809_v13 = vld [vmem:[%s13950_s1 + $0xf60] ss:$16 sps:$4 sm:$0xff]   ;;  %v9812_v16 = vld [vmem:[%s13950_s1 + $0xf68] ss:$16 sps:$4 sm:$0xff]  }
 0x1b4   :  { %6636 = vmatprep.subr.bf16.mxu0 %v9727_v17  ;;  %7324 = vmatprep.subr.bf16.mxu1 %v9730_v20  ;;  %v9817_v17 = vld [vmem:[%s13950_s1 + $0xf84] ss:$16 sps:$4 sm:$0xff]   ;;  %v9820_v20 = vld [vmem:[%s13950_s1 + $0xf8c] ss:$16 sps:$4 sm:$0xff]  }
 0x1b7   :  { %6637 = vmatpush1.bf16.msra.mxu0 %v9725_v15  ;;  %7325 = vmatpush1.bf16.msra.mxu1 %v9728_v22  ;;  %v9815_v15 = vld [vmem:[%s13950_s1 + $0xf80] ss:$16 sps:$4 sm:$0xff]   ;;  %v9818_v22 = vld [vmem:[%s13950_s1 + $0xf88] ss:$16 sps:$4 sm:$0xff]  }
 0x1b8   :  { %6638 = vmatprep.subr.bf16.mxu0 %v9733_v23  ;;  %7326 = vmatprep.subr.bf16.mxu1 %v9736_v18  ;;  %v9823_v23 = vld [vmem:[%s13950_s1 + $0xfa4] ss:$16 sps:$4 sm:$0xff]   ;;  %v9826_v18 = vld [vmem:[%s13950_s1 + $0xfac] ss:$16 sps:$4 sm:$0xff]  }
 0x1bb   :  { %6639 = vmatpush1.bf16.msra.mxu0 %v9731_v25  ;;  %7327 = vmatpush1.bf16.msra.mxu1 %v9734_v26  ;;  %v9821_v25 = vld [vmem:[%s13950_s1 + $0xfa0] ss:$16 sps:$4 sm:$0xff]   ;;  %v9824_v26 = vld [vmem:[%s13950_s1 + $0xfa8] ss:$16 sps:$4 sm:$0xff]  }
 0x1bc   :  { %6640 = vmatprep.subr.bf16.mxu0 %v9739_v27  ;;  %7328 = vmatprep.subr.bf16.mxu1 %v9742_v28  ;;  %v9829_v27 = vld [vmem:[%s13950_s1 + $0xfc4] ss:$16 sps:$4 sm:$0xff]   ;;  %v9832_v28 = vld [vmem:[%s13950_s1 + $0xfcc] ss:$16 sps:$4 sm:$0xff]  }
 0x1bf   :  { %6641 = vmatpush1.bf16.msra.mxu0 %v9737_v29  ;;  %7329 = vmatpush1.bf16.msra.mxu1 %v9740_v30  ;;  %v9827_v29 = vld [vmem:[%s13950_s1 + $0xfc0] ss:$16 sps:$4 sm:$0xff]   ;;  %v9830_v30 = vld [vmem:[%s13950_s1 + $0xfc8] ss:$16 sps:$4 sm:$0xff]  }
 0x1c0   :  { %6653 = vmatprep.subr.bf16.mxu0 %v9745_v31  ;;  %7341 = vmatprep.subr.bf16.mxu1 %v9748_v32  ;;  %v9835_v31 = vld [vmem:[%s13950_s1 + $0xfe4] ss:$16 sps:$4 sm:$0xff]   ;;  %v9838_v32 = vld [vmem:[%s13950_s1 + $0xfec] ss:$16 sps:$4 sm:$0xff]  }
 0x1c2   :  { %6643 = vmatmul.mubr.bf16.vlgmr.msra.gmra.mrb[0].mxu0 %v7898_v33  ;;  %7331 = vmatmul.mubr.bf16.vlgmr.msra.gmra.mrb[0].mxu1 %v7898_v33  ;;  %v9833_v33 = vld [vmem:[%s13950_s1 + $0xfe0] ss:$16 sps:$4 sm:$0xff]  }
 0x1c3   :  { %6654 = vmatpush1.bf16.msra.mxu0 %v9743_v34  ;;  %7342 = vmatpush1.bf16.msra.mxu1 %v9746_v35  ;;  %v9836_v34 = vld [vmem:[%s13950_s1 + $0xfe8] ss:$16 sps:$4 sm:$0xff]   ;;  %v9841_v35 = vld [vmem:[%s13950_s1 + $0x1004] ss:$16 sps:$4 sm:$0xff]  }
 0x1c4   :  { %6655 = vmatprep.subr.bf16.mxu0 %v9751_v36  ;;  %7343 = vmatprep.subr.bf16.mxu1 %v9754_v14  ;;  %v9844_v36 = vld [vmem:[%s13950_s1 + $0x100c] ss:$16 sps:$4 sm:$0xff]   ;;  %v12280_v14 = vld [vmem:[%s13951_s0 + $0x40] sm:$0xff] }
 0x1c5   :  { %6685 = vmatprep.mubr.bf16.mxu0 %v7901_v21  ;;  %7373 = vmatprep.mubr.bf16.mxu1 %v7901_v21  ;;  %v12285_v21 = vld [vmem:[%s13951_s0 + $0xc0] sm:$0xff] }
 0x1c7   :  { %6656 = vmatpush1.bf16.msra.mxu0 %v9749_v37  ;;  %7344 = vmatpush1.bf16.msra.mxu1 %v9752_v38  ;;  %v7900_v37 = vcombine.low %v12074_v19, %v12079_v24  ;;  %v9839_v38 = vld [vmem:[%s13950_s1 + $0x1000] ss:$16 sps:$4 sm:$0xff]   ;;  %v9850_v19 = vld [vmem:[%s13950_s1 + $0x102c] ss:$16 sps:$4 sm:$0xff]   ;;  %v7903_v24 = vcombine.high %v12280_v14, %v12285_v21 }
 0x1c8   :  { %6657 = vmatprep.subr.bf16.mxu0 %v9757_v39  ;;  %7345 = vmatprep.subr.bf16.mxu1 %v9760_v40  ;;  %v9842_v39 = vld [vmem:[%s13950_s1 + $0x1008] ss:$16 sps:$4 sm:$0xff]   ;;  %v9847_v40 = vld [vmem:[%s13950_s1 + $0x1024] ss:$16 sps:$4 sm:$0xff]  }
 0x1cb   :  { %6658 = vmatpush1.bf16.msra.mxu0 %v9755_v41  ;;  %7346 = vmatpush1.bf16.msra.mxu1 %v9758_v42  ;;  %v9845_v41 = vld [vmem:[%s13950_s1 + $0x1020] ss:$16 sps:$4 sm:$0xff]   ;;  %v9848_v42 = vld [vmem:[%s13950_s1 + $0x1028] ss:$16 sps:$4 sm:$0xff]  }
 0x1cc   :  { %6659 = vmatprep.subr.bf16.mxu0 %v9763_v43  ;;  %7347 = vmatprep.subr.bf16.mxu1 %v9766_v44  ;;  %v9853_v43 = vld [vmem:[%s13950_s1 + $0x1044] ss:$16 sps:$4 sm:$0xff]   ;;  %v9856_v44 = vld [vmem:[%s13950_s1 + $0x104c] ss:$16 sps:$4 sm:$0xff]  }
 0x1cf   :  { %6660 = vmatpush1.bf16.msra.mxu0 %v9761_v45  ;;  %7348 = vmatpush1.bf16.msra.mxu1 %v9764_v46  ;;  %v9851_v45 = vld [vmem:[%s13950_s1 + $0x1040] ss:$16 sps:$4 sm:$0xff]   ;;  %v9854_v46 = vld [vmem:[%s13950_s1 + $0x1048] ss:$16 sps:$4 sm:$0xff]  }
 0x1d0   :  { %6661 = vmatprep.subr.bf16.mxu0 %v9769_v47  ;;  %7349 = vmatprep.subr.bf16.mxu1 %v9772_v48  ;;  %v9859_v47 = vld [vmem:[%s13950_s1 + $0x1064] ss:$16 sps:$4 sm:$0xff]   ;;  %v9862_v48 = vld [vmem:[%s13950_s1 + $0x106c] ss:$16 sps:$4 sm:$0xff]  }
 0x1d3   :  { %6662 = vmatpush1.bf16.msra.mxu0 %v9767_v49  ;;  %7350 = vmatpush1.bf16.msra.mxu1 %v9770_v50  ;;  %v9857_v49 = vld [vmem:[%s13950_s1 + $0x1060] ss:$16 sps:$4 sm:$0xff]   ;;  %v9860_v50 = vld [vmem:[%s13950_s1 + $0x1068] ss:$16 sps:$4 sm:$0xff]  }
 0x1d4   :  { %6663 = vmatprep.subr.bf16.mxu0 %v9775_v51  ;;  %7351 = vmatprep.subr.bf16.mxu1 %v9778_v52  ;;  %v9865_v51 = vld [vmem:[%s13950_s1 + $0x1084] ss:$16 sps:$4 sm:$0xff]   ;;  %v9868_v52 = vld [vmem:[%s13950_s1 + $0x108c] ss:$16 sps:$4 sm:$0xff]  }
 0x1d7   :  { %6664 = vmatpush1.bf16.msra.mxu0 %v9773_v53  ;;  %7352 = vmatpush1.bf16.msra.mxu1 %v9776_v54  ;;  %v9863_v53 = vld [vmem:[%s13950_s1 + $0x1080] ss:$16 sps:$4 sm:$0xff]   ;;  %v9866_v54 = vld [vmem:[%s13950_s1 + $0x1088] ss:$16 sps:$4 sm:$0xff]  }
 0x1d8   :  { %6665 = vmatprep.subr.bf16.mxu0 %v9781_v55  ;;  %7353 = vmatprep.subr.bf16.mxu1 %v9784_v56  ;;  %v9871_v55 = vld [vmem:[%s13950_s1 + $0x10a4] ss:$16 sps:$4 sm:$0xff]   ;;  %v9874_v56 = vld [vmem:[%s13950_s1 + $0x10ac] ss:$16 sps:$4 sm:$0xff]  }
 0x1db   :  { %6666 = vmatpush1.bf16.msra.mxu0 %v9779_v57  ;;  %7354 = vmatpush1.bf16.msra.mxu1 %v9782_v58  ;;  %v9869_v57 = vld [vmem:[%s13950_s1 + $0x10a0] ss:$16 sps:$4 sm:$0xff]   ;;  %v9872_v58 = vld [vmem:[%s13950_s1 + $0x10a8] ss:$16 sps:$4 sm:$0xff]  }
 0x1dc   :  { %6667 = vmatprep.subr.bf16.mxu0 %v9787_v59  ;;  %7355 = vmatprep.subr.bf16.mxu1 %v9790_v60  ;;  %v9877_v59 = vld [vmem:[%s13950_s1 + $0x10c4] ss:$16 sps:$4 sm:$0xff]   ;;  %v9880_v60 = vld [vmem:[%s13950_s1 + $0x10cc] ss:$16 sps:$4 sm:$0xff]  }
 0x1df   :  { %6668 = vmatpush1.bf16.msra.mxu0 %v9785_v61  ;;  %7356 = vmatpush1.bf16.msra.mxu1 %v9788_v62  ;;  %v9875_v61 = vld [vmem:[%s13950_s1 + $0x10c0] ss:$16 sps:$4 sm:$0xff]   ;;  %v9878_v62 = vld [vmem:[%s13950_s1 + $0x10c8] ss:$16 sps:$4 sm:$0xff]  }
 0x1e0   :  { %6669 = vmatprep.subr.bf16.mxu0 %v9793_v63  ;;  %7357 = vmatprep.subr.bf16.mxu1 %v9796_v0  ;;  %v9883_v63 = vld [vmem:[%s13950_s1 + $0x10e4] ss:$16 sps:$4 sm:$0xff]   ;;  %v9886_v0 = vld [vmem:[%s13950_s1 + $0x10ec] ss:$16 sps:$4 sm:$0xff]  }
 0x1e3   :  { %6670 = vmatpush1.bf16.msra.mxu0 %v9791_v1  ;;  %7358 = vmatpush1.bf16.msra.mxu1 %v9794_v2  ;;  %v9881_v1 = vld [vmem:[%s13950_s1 + $0x10e0] ss:$16 sps:$4 sm:$0xff]   ;;  %v9884_v2 = vld [vmem:[%s13950_s1 + $0x10e8] ss:$16 sps:$4 sm:$0xff]  }
 0x1e4   :  { %6671 = vmatprep.subr.bf16.mxu0 %v9799_v3  ;;  %7359 = vmatprep.subr.bf16.mxu1 %v9802_v4  ;;  %v9889_v3 = vld [vmem:[%s13950_s1 + $0x1104] ss:$16 sps:$4 sm:$0xff]   ;;  %v9892_v4 = vld [vmem:[%s13950_s1 + $0x110c] ss:$16 sps:$4 sm:$0xff]  }
 0x1e7   :  { %6672 = vmatpush1.bf16.msra.mxu0 %v9797_v5  ;;  %7360 = vmatpush1.bf16.msra.mxu1 %v9800_v6  ;;  %v9887_v5 = vld [vmem:[%s13950_s1 + $0x1100] ss:$16 sps:$4 sm:$0xff]   ;;  %v9890_v6 = vld [vmem:[%s13950_s1 + $0x1108] ss:$16 sps:$4 sm:$0xff]  }
 0x1e8   :  { %6673 = vmatprep.subr.bf16.mxu0 %v9805_v7  ;;  %7361 = vmatprep.subr.bf16.mxu1 %v9808_v8  ;;  %v9895_v7 = vld [vmem:[%s13950_s1 + $0x1124] ss:$16 sps:$4 sm:$0xff]   ;;  %v9898_v8 = vld [vmem:[%s13950_s1 + $0x112c] ss:$16 sps:$4 sm:$0xff]  }
 0x1eb   :  { %6674 = vmatpush1.bf16.msra.mxu0 %v9803_v9  ;;  %7362 = vmatpush1.bf16.msra.mxu1 %v9806_v10  ;;  %v9893_v9 = vld [vmem:[%s13950_s1 + $0x1120] ss:$16 sps:$4 sm:$0xff]   ;;  %v9896_v10 = vld [vmem:[%s13950_s1 + $0x1128] ss:$16 sps:$4 sm:$0xff]  }
 0x1ec   :  { %6675 = vmatprep.subr.bf16.mxu0 %v9811_v11  ;;  %7363 = vmatprep.subr.bf16.mxu1 %v9814_v12  ;;  %v9901_v11 = vld [vmem:[%s13950_s1 + $0x1144] ss:$16 sps:$4 sm:$0xff]   ;;  %v9904_v12 = vld [vmem:[%s13950_s1 + $0x114c] ss:$16 sps:$4 sm:$0xff]  }
 0x1ef   :  { %6676 = vmatpush1.bf16.msra.mxu0 %v9809_v13  ;;  %7364 = vmatpush1.bf16.msra.mxu1 %v9812_v16  ;;  %v9899_v13 = vld [vmem:[%s13950_s1 + $0x1140] ss:$16 sps:$4 sm:$0xff]   ;;  %v9902_v16 = vld [vmem:[%s13950_s1 + $0x1148] ss:$16 sps:$4 sm:$0xff]  }
 0x1f0   :  { %6677 = vmatprep.subr.bf16.mxu0 %v9817_v17  ;;  %7365 = vmatprep.subr.bf16.mxu1 %v9820_v20  ;;  %v9907_v17 = vld [vmem:[%s13950_s1 + $0x1164] ss:$16 sps:$4 sm:$0xff]   ;;  %v9910_v20 = vld [vmem:[%s13950_s1 + $0x116c] ss:$16 sps:$4 sm:$0xff]  }
 0x1f3   :  { %6678 = vmatpush1.bf16.msra.mxu0 %v9815_v15  ;;  %7366 = vmatpush1.bf16.msra.mxu1 %v9818_v22  ;;  %v9905_v15 = vld [vmem:[%s13950_s1 + $0x1160] ss:$16 sps:$4 sm:$0xff]   ;;  %v9908_v22 = vld [vmem:[%s13950_s1 + $0x1168] ss:$16 sps:$4 sm:$0xff]  }
 0x1f4   :  { %6679 = vmatprep.subr.bf16.mxu0 %v9823_v23  ;;  %7367 = vmatprep.subr.bf16.mxu1 %v9826_v18  ;;  %v9913_v23 = vld [vmem:[%s13950_s1 + $0x1184] ss:$16 sps:$4 sm:$0xff]   ;;  %v9916_v18 = vld [vmem:[%s13950_s1 + $0x118c] ss:$16 sps:$4 sm:$0xff]  }
 0x1f7   :  { %6680 = vmatpush1.bf16.msra.mxu0 %v9821_v25  ;;  %7368 = vmatpush1.bf16.msra.mxu1 %v9824_v26  ;;  %v9911_v25 = vld [vmem:[%s13950_s1 + $0x1180] ss:$16 sps:$4 sm:$0xff]   ;;  %v9914_v26 = vld [vmem:[%s13950_s1 + $0x1188] ss:$16 sps:$4 sm:$0xff]  }
 0x1f8   :  { %6681 = vmatprep.subr.bf16.mxu0 %v9829_v27  ;;  %7369 = vmatprep.subr.bf16.mxu1 %v9832_v28  ;;  %v9919_v27 = vld [vmem:[%s13950_s1 + $0x11a4] ss:$16 sps:$4 sm:$0xff]   ;;  %v9922_v28 = vld [vmem:[%s13950_s1 + $0x11ac] ss:$16 sps:$4 sm:$0xff]  }
 0x1fb   :  { %6682 = vmatpush1.bf16.msra.mxu0 %v9827_v29  ;;  %7370 = vmatpush1.bf16.msra.mxu1 %v9830_v30  ;;  %v9917_v29 = vld [vmem:[%s13950_s1 + $0x11a0] ss:$16 sps:$4 sm:$0xff]   ;;  %v9920_v30 = vld [vmem:[%s13950_s1 + $0x11a8] ss:$16 sps:$4 sm:$0xff]  }
 0x1fc   :  { %6683 = vmatprep.subr.bf16.mxu0 %v9835_v31  ;;  %7371 = vmatprep.subr.bf16.mxu1 %v9838_v32  ;;  %v9925_v31 = vld [vmem:[%s13950_s1 + $0x11c4] ss:$16 sps:$4 sm:$0xff]   ;;  %v9928_v32 = vld [vmem:[%s13950_s1 + $0x11cc] ss:$16 sps:$4 sm:$0xff]  }
 0x1ff   :  { %6684 = vmatpush1.bf16.msra.mxu0 %v9833_v33  ;;  %7372 = vmatpush1.bf16.msra.mxu1 %v9836_v34  ;;  %v9923_v33 = vld [vmem:[%s13950_s1 + $0x11c0] ss:$16 sps:$4 sm:$0xff]   ;;  %v9926_v34 = vld [vmem:[%s13950_s1 + $0x11c8] ss:$16 sps:$4 sm:$0xff]  }
 0x200   :  { %6696 = vmatprep.subr.bf16.mxu0 %v9841_v35  ;;  %7384 = vmatprep.subr.bf16.mxu1 %v9844_v36  ;;  %v9931_v35 = vld [vmem:[%s13950_s1 + $0x11e4] ss:$16 sps:$4 sm:$0xff]   ;;  %v9934_v36 = vld [vmem:[%s13950_s1 + $0x11ec] ss:$16 sps:$4 sm:$0xff]  }
 0x202   :  { %6686 = vmatmul.mubr.bf16.vlgmr.msra.gmra.mrb[0].mxu0 %v7900_v37  ;;  %7374 = vmatmul.mubr.bf16.vlgmr.msra.gmra.mrb[0].mxu1 %v7900_v37  ;;  %v9929_v37 = vld [vmem:[%s13950_s1 + $0x11e0] ss:$16 sps:$4 sm:$0xff]  }
 0x203   :  { %6697 = vmatpush1.bf16.msra.mxu0 %v9839_v38  ;;  %7385 = vmatpush1.bf16.msra.mxu1 %v9842_v39  ;;  %v9932_v38 = vld [vmem:[%s13950_s1 + $0x11e8] ss:$16 sps:$4 sm:$0xff]   ;;  %v9937_v39 = vld [vmem:[%s13950_s1 + $0x1204] ss:$16 sps:$4 sm:$0xff]  }
 0x204   :  { %6698 = vmatprep.subr.bf16.mxu0 %v9847_v40  ;;  %7386 = vmatprep.subr.bf16.mxu1 %v9850_v19  ;;  %v9940_v40 = vld [vmem:[%s13950_s1 + $0x120c] ss:$16 sps:$4 sm:$0xff]  }
 0x205   :  { %6728 = vmatprep.mubr.bf16.mxu0 %v7903_v24  ;;  %7416 = vmatprep.mubr.bf16.mxu1 %v7903_v24  ;;  %v12486_v19 = vld [vmem:[%s13951_s0 + $0x48] sm:$0xff] }
 0x206   :  { %v12491_v24 = vld [vmem:[%s13951_s0 + $0xc8] sm:$0xff] }
 0x207   :  { %6699 = vmatpush1.bf16.msra.mxu0 %v9845_v41  ;;  %7387 = vmatpush1.bf16.msra.mxu1 %v9848_v42  ;;  %v7902_v41 = vcombine.low %v12280_v14, %v12285_v21  ;;  %v9935_v42 = vld [vmem:[%s13950_s1 + $0x1200] ss:$16 sps:$4 sm:$0xff]   ;;  %v9946_v14 = vld [vmem:[%s13950_s1 + $0x122c] ss:$16 sps:$4 sm:$0xff]   ;;  %v7905_v21 = vcombine.high %v12486_v19, %v12491_v24 }
 0x208   :  { %6700 = vmatprep.subr.bf16.mxu0 %v9853_v43  ;;  %7388 = vmatprep.subr.bf16.mxu1 %v9856_v44  ;;  %v9938_v43 = vld [vmem:[%s13950_s1 + $0x1208] ss:$16 sps:$4 sm:$0xff]   ;;  %v9943_v44 = vld [vmem:[%s13950_s1 + $0x1224] ss:$16 sps:$4 sm:$0xff]  }
 0x20b   :  { %6701 = vmatpush1.bf16.msra.mxu0 %v9851_v45  ;;  %7389 = vmatpush1.bf16.msra.mxu1 %v9854_v46  ;;  %v9941_v45 = vld [vmem:[%s13950_s1 + $0x1220] ss:$16 sps:$4 sm:$0xff]   ;;  %v9944_v46 = vld [vmem:[%s13950_s1 + $0x1228] ss:$16 sps:$4 sm:$0xff]  }
 0x20c   :  { %6702 = vmatprep.subr.bf16.mxu0 %v9859_v47  ;;  %7390 = vmatprep.subr.bf16.mxu1 %v9862_v48  ;;  %v9949_v47 = vld [vmem:[%s13950_s1 + $0x1244] ss:$16 sps:$4 sm:$0xff]   ;;  %v9952_v48 = vld [vmem:[%s13950_s1 + $0x124c] ss:$16 sps:$4 sm:$0xff]  }
 0x20f   :  { %6703 = vmatpush1.bf16.msra.mxu0 %v9857_v49  ;;  %7391 = vmatpush1.bf16.msra.mxu1 %v9860_v50  ;;  %v9947_v49 = vld [vmem:[%s13950_s1 + $0x1240] ss:$16 sps:$4 sm:$0xff]   ;;  %v9950_v50 = vld [vmem:[%s13950_s1 + $0x1248] ss:$16 sps:$4 sm:$0xff]  }
 0x210   :  { %6704 = vmatprep.subr.bf16.mxu0 %v9865_v51  ;;  %7392 = vmatprep.subr.bf16.mxu1 %v9868_v52  ;;  %v9955_v51 = vld [vmem:[%s13950_s1 + $0x1264] ss:$16 sps:$4 sm:$0xff]   ;;  %v9958_v52 = vld [vmem:[%s13950_s1 + $0x126c] ss:$16 sps:$4 sm:$0xff]  }
 0x213   :  { %6705 = vmatpush1.bf16.msra.mxu0 %v9863_v53  ;;  %7393 = vmatpush1.bf16.msra.mxu1 %v9866_v54  ;;  %v9953_v53 = vld [vmem:[%s13950_s1 + $0x1260] ss:$16 sps:$4 sm:$0xff]   ;;  %v9956_v54 = vld [vmem:[%s13950_s1 + $0x1268] ss:$16 sps:$4 sm:$0xff]  }
 0x214   :  { %6706 = vmatprep.subr.bf16.mxu0 %v9871_v55  ;;  %7394 = vmatprep.subr.bf16.mxu1 %v9874_v56  ;;  %v9961_v55 = vld [vmem:[%s13950_s1 + $0x1284] ss:$16 sps:$4 sm:$0xff]   ;;  %v9964_v56 = vld [vmem:[%s13950_s1 + $0x128c] ss:$16 sps:$4 sm:$0xff]  }
 0x217   :  { %6707 = vmatpush1.bf16.msra.mxu0 %v9869_v57  ;;  %7395 = vmatpush1.bf16.msra.mxu1 %v9872_v58  ;;  %v9959_v57 = vld [vmem:[%s13950_s1 + $0x1280] ss:$16 sps:$4 sm:$0xff]   ;;  %v9962_v58 = vld [vmem:[%s13950_s1 + $0x1288] ss:$16 sps:$4 sm:$0xff]  }
 0x218   :  { %6708 = vmatprep.subr.bf16.mxu0 %v9877_v59  ;;  %7396 = vmatprep.subr.bf16.mxu1 %v9880_v60  ;;  %v9967_v59 = vld [vmem:[%s13950_s1 + $0x12a4] ss:$16 sps:$4 sm:$0xff]   ;;  %v9970_v60 = vld [vmem:[%s13950_s1 + $0x12ac] ss:$16 sps:$4 sm:$0xff]  }
 0x21b   :  { %6709 = vmatpush1.bf16.msra.mxu0 %v9875_v61  ;;  %7397 = vmatpush1.bf16.msra.mxu1 %v9878_v62  ;;  %v9965_v61 = vld [vmem:[%s13950_s1 + $0x12a0] ss:$16 sps:$4 sm:$0xff]   ;;  %v9968_v62 = vld [vmem:[%s13950_s1 + $0x12a8] ss:$16 sps:$4 sm:$0xff]  }
 0x21c   :  { %6710 = vmatprep.subr.bf16.mxu0 %v9883_v63  ;;  %7398 = vmatprep.subr.bf16.mxu1 %v9886_v0  ;;  %v9973_v63 = vld [vmem:[%s13950_s1 + $0x12c4] ss:$16 sps:$4 sm:$0xff]   ;;  %v9976_v0 = vld [vmem:[%s13950_s1 + $0x12cc] ss:$16 sps:$4 sm:$0xff]  }
 0x21f   :  { %6711 = vmatpush1.bf16.msra.mxu0 %v9881_v1  ;;  %7399 = vmatpush1.bf16.msra.mxu1 %v9884_v2  ;;  %v9971_v1 = vld [vmem:[%s13950_s1 + $0x12c0] ss:$16 sps:$4 sm:$0xff]   ;;  %v9974_v2 = vld [vmem:[%s13950_s1 + $0x12c8] ss:$16 sps:$4 sm:$0xff]  }
 0x220   :  { %6712 = vmatprep.subr.bf16.mxu0 %v9889_v3  ;;  %7400 = vmatprep.subr.bf16.mxu1 %v9892_v4  ;;  %v9979_v3 = vld [vmem:[%s13950_s1 + $0x12e4] ss:$16 sps:$4 sm:$0xff]   ;;  %v9982_v4 = vld [vmem:[%s13950_s1 + $0x12ec] ss:$16 sps:$4 sm:$0xff]  }
 0x223   :  { %6713 = vmatpush1.bf16.msra.mxu0 %v9887_v5  ;;  %7401 = vmatpush1.bf16.msra.mxu1 %v9890_v6  ;;  %v9977_v5 = vld [vmem:[%s13950_s1 + $0x12e0] ss:$16 sps:$4 sm:$0xff]   ;;  %v9980_v6 = vld [vmem:[%s13950_s1 + $0x12e8] ss:$16 sps:$4 sm:$0xff]  }
 0x224   :  { %6714 = vmatprep.subr.bf16.mxu0 %v9895_v7  ;;  %7402 = vmatprep.subr.bf16.mxu1 %v9898_v8  ;;  %v9985_v7 = vld [vmem:[%s13950_s1 + $0x1304] ss:$16 sps:$4 sm:$0xff]   ;;  %v9988_v8 = vld [vmem:[%s13950_s1 + $0x130c] ss:$16 sps:$4 sm:$0xff]  }
 0x227   :  { %6715 = vmatpush1.bf16.msra.mxu0 %v9893_v9  ;;  %7403 = vmatpush1.bf16.msra.mxu1 %v9896_v10  ;;  %v9983_v9 = vld [vmem:[%s13950_s1 + $0x1300] ss:$16 sps:$4 sm:$0xff]   ;;  %v9986_v10 = vld [vmem:[%s13950_s1 + $0x1308] ss:$16 sps:$4 sm:$0xff]  }
 0x228   :  { %6716 = vmatprep.subr.bf16.mxu0 %v9901_v11  ;;  %7404 = vmatprep.subr.bf16.mxu1 %v9904_v12  ;;  %v9991_v11 = vld [vmem:[%s13950_s1 + $0x1324] ss:$16 sps:$4 sm:$0xff]   ;;  %v9994_v12 = vld [vmem:[%s13950_s1 + $0x132c] ss:$16 sps:$4 sm:$0xff]  }
 0x22b   :  { %6717 = vmatpush1.bf16.msra.mxu0 %v9899_v13  ;;  %7405 = vmatpush1.bf16.msra.mxu1 %v9902_v16  ;;  %v9989_v13 = vld [vmem:[%s13950_s1 + $0x1320] ss:$16 sps:$4 sm:$0xff]   ;;  %v9992_v16 = vld [vmem:[%s13950_s1 + $0x1328] ss:$16 sps:$4 sm:$0xff]  }
 0x22c   :  { %6718 = vmatprep.subr.bf16.mxu0 %v9907_v17  ;;  %7406 = vmatprep.subr.bf16.mxu1 %v9910_v20  ;;  %v9997_v17 = vld [vmem:[%s13950_s1 + $0x1344] ss:$16 sps:$4 sm:$0xff]   ;;  %v10000_v20 = vld [vmem:[%s13950_s1 + $0x134c] ss:$16 sps:$4 sm:$0xff]  }
 0x22f   :  { %6719 = vmatpush1.bf16.msra.mxu0 %v9905_v15  ;;  %7407 = vmatpush1.bf16.msra.mxu1 %v9908_v22  ;;  %v9995_v15 = vld [vmem:[%s13950_s1 + $0x1340] ss:$16 sps:$4 sm:$0xff]   ;;  %v9998_v22 = vld [vmem:[%s13950_s1 + $0x1348] ss:$16 sps:$4 sm:$0xff]  }
 0x230   :  { %6720 = vmatprep.subr.bf16.mxu0 %v9913_v23  ;;  %7408 = vmatprep.subr.bf16.mxu1 %v9916_v18  ;;  %v10003_v23 = vld [vmem:[%s13950_s1 + $0x1364] ss:$16 sps:$4 sm:$0xff]   ;;  %v10006_v18 = vld [vmem:[%s13950_s1 + $0x136c] ss:$16 sps:$4 sm:$0xff]  }
 0x233   :  { %6721 = vmatpush1.bf16.msra.mxu0 %v9911_v25  ;;  %7409 = vmatpush1.bf16.msra.mxu1 %v9914_v26  ;;  %v10001_v25 = vld [vmem:[%s13950_s1 + $0x1360] ss:$16 sps:$4 sm:$0xff]   ;;  %v10004_v26 = vld [vmem:[%s13950_s1 + $0x1368] ss:$16 sps:$4 sm:$0xff]  }
 0x234   :  { %6722 = vmatprep.subr.bf16.mxu0 %v9919_v27  ;;  %7410 = vmatprep.subr.bf16.mxu1 %v9922_v28  ;;  %v10009_v27 = vld [vmem:[%s13950_s1 + $0x1384] ss:$16 sps:$4 sm:$0xff]   ;;  %v10012_v28 = vld [vmem:[%s13950_s1 + $0x138c] ss:$16 sps:$4 sm:$0xff]  }
 0x237   :  { %6723 = vmatpush1.bf16.msra.mxu0 %v9917_v29  ;;  %7411 = vmatpush1.bf16.msra.mxu1 %v9920_v30  ;;  %v10007_v29 = vld [vmem:[%s13950_s1 + $0x1380] ss:$16 sps:$4 sm:$0xff]   ;;  %v10010_v30 = vld [vmem:[%s13950_s1 + $0x1388] ss:$16 sps:$4 sm:$0xff]  }
 0x238   :  { %6724 = vmatprep.subr.bf16.mxu0 %v9925_v31  ;;  %7412 = vmatprep.subr.bf16.mxu1 %v9928_v32  ;;  %v10015_v31 = vld [vmem:[%s13950_s1 + $0x13a4] ss:$16 sps:$4 sm:$0xff]   ;;  %v10018_v32 = vld [vmem:[%s13950_s1 + $0x13ac] ss:$16 sps:$4 sm:$0xff]  }
 0x23b   :  { %6725 = vmatpush1.bf16.msra.mxu0 %v9923_v33  ;;  %7413 = vmatpush1.bf16.msra.mxu1 %v9926_v34  ;;  %v10013_v33 = vld [vmem:[%s13950_s1 + $0x13a0] ss:$16 sps:$4 sm:$0xff]   ;;  %v10016_v34 = vld [vmem:[%s13950_s1 + $0x13a8] ss:$16 sps:$4 sm:$0xff]  }
 0x23c   :  { %6726 = vmatprep.subr.bf16.mxu0 %v9931_v35  ;;  %7414 = vmatprep.subr.bf16.mxu1 %v9934_v36  ;;  %v10021_v35 = vld [vmem:[%s13950_s1 + $0x13c4] ss:$16 sps:$4 sm:$0xff]   ;;  %v10024_v36 = vld [vmem:[%s13950_s1 + $0x13cc] ss:$16 sps:$4 sm:$0xff]  }
 0x23f   :  { %6727 = vmatpush1.bf16.msra.mxu0 %v9929_v37  ;;  %7415 = vmatpush1.bf16.msra.mxu1 %v9932_v38  ;;  %v10019_v37 = vld [vmem:[%s13950_s1 + $0x13c0] ss:$16 sps:$4 sm:$0xff]   ;;  %v10022_v38 = vld [vmem:[%s13950_s1 + $0x13c8] ss:$16 sps:$4 sm:$0xff]  }
 0x240   :  { %6739 = vmatprep.subr.bf16.mxu0 %v9937_v39  ;;  %7427 = vmatprep.subr.bf16.mxu1 %v9940_v40  ;;  %v10027_v39 = vld [vmem:[%s13950_s1 + $0x13e4] ss:$16 sps:$4 sm:$0xff]   ;;  %v10030_v40 = vld [vmem:[%s13950_s1 + $0x13ec] ss:$16 sps:$4 sm:$0xff]  }
 0x242   :  { %6729 = vmatmul.mubr.bf16.vlgmr.msra.gmra.mrb[0].mxu0 %v7902_v41  ;;  %7417 = vmatmul.mubr.bf16.vlgmr.msra.gmra.mrb[0].mxu1 %v7902_v41  ;;  %v10025_v41 = vld [vmem:[%s13950_s1 + $0x13e0] ss:$16 sps:$4 sm:$0xff]  }
 0x243   :  { %6740 = vmatpush1.bf16.msra.mxu0 %v9935_v42  ;;  %7428 = vmatpush1.bf16.msra.mxu1 %v9938_v43  ;;  %v10028_v42 = vld [vmem:[%s13950_s1 + $0x13e8] ss:$16 sps:$4 sm:$0xff]   ;;  %v10033_v43 = vld [vmem:[%s13950_s1 + $0x1404] ss:$16 sps:$4 sm:$0xff]  }
 0x244   :  { %6741 = vmatprep.subr.bf16.mxu0 %v9943_v44  ;;  %7429 = vmatprep.subr.bf16.mxu1 %v9946_v14  ;;  %v10036_v44 = vld [vmem:[%s13950_s1 + $0x140c] ss:$16 sps:$4 sm:$0xff]   ;;  %v7904_v14 = vcombine.low %v12486_v19, %v12491_v24  ;;  %v10034_v19 = vld [vmem:[%s13950_s1 + $0x1408] ss:$16 sps:$4 sm:$0xff]   ;;  %v10039_v24 = vld [vmem:[%s13950_s1 + $0x1424] ss:$16 sps:$4 sm:$0xff]  }
 0x245   :  { %6771 = vmatprep.mubr.bf16.mxu0 %v7905_v21  ;;  %7459 = vmatprep.mubr.bf16.mxu1 %v7905_v21  ;;  %v12694_v21 = vld [vmem:[%s13951_s0 + $0x50] sm:$0xff] }
 0x247   :  { %6742 = vmatpush1.bf16.msra.mxu0 %v9941_v45  ;;  %7430 = vmatpush1.bf16.msra.mxu1 %v9944_v46  ;;  %v12699_v45 = vld [vmem:[%s13951_s0 + $0xd0] sm:$0xff] }
 0x248   :  { %6743 = vmatprep.subr.bf16.mxu0 %v9949_v47  ;;  %7431 = vmatprep.subr.bf16.mxu1 %v9952_v48  ;;  %v10031_v46 = vld [vmem:[%s13950_s1 + $0x1400] ss:$16 sps:$4 sm:$0xff]   ;;  %v10042_v47 = vld [vmem:[%s13950_s1 + $0x142c] ss:$16 sps:$4 sm:$0xff]   ;;  %v7907_v48 = vcombine.high %v12694_v21, %v12699_v45 }
 0x24b   :  { %6744 = vmatpush1.bf16.msra.mxu0 %v9947_v49  ;;  %7432 = vmatpush1.bf16.msra.mxu1 %v9950_v50  ;;  %v10037_v49 = vld [vmem:[%s13950_s1 + $0x1420] ss:$16 sps:$4 sm:$0xff]   ;;  %v10040_v50 = vld [vmem:[%s13950_s1 + $0x1428] ss:$16 sps:$4 sm:$0xff]  }
 0x24c   :  { %6745 = vmatprep.subr.bf16.mxu0 %v9955_v51  ;;  %7433 = vmatprep.subr.bf16.mxu1 %v9958_v52  ;;  %v10045_v51 = vld [vmem:[%s13950_s1 + $0x1444] ss:$16 sps:$4 sm:$0xff]   ;;  %v10048_v52 = vld [vmem:[%s13950_s1 + $0x144c] ss:$16 sps:$4 sm:$0xff]  }
 0x24f   :  { %6746 = vmatpush1.bf16.msra.mxu0 %v9953_v53  ;;  %7434 = vmatpush1.bf16.msra.mxu1 %v9956_v54  ;;  %v10043_v53 = vld [vmem:[%s13950_s1 + $0x1440] ss:$16 sps:$4 sm:$0xff]   ;;  %v10046_v54 = vld [vmem:[%s13950_s1 + $0x1448] ss:$16 sps:$4 sm:$0xff]  }
 0x250   :  { %6747 = vmatprep.subr.bf16.mxu0 %v9961_v55  ;;  %7435 = vmatprep.subr.bf16.mxu1 %v9964_v56  ;;  %v10051_v55 = vld [vmem:[%s13950_s1 + $0x1464] ss:$16 sps:$4 sm:$0xff]   ;;  %v10054_v56 = vld [vmem:[%s13950_s1 + $0x146c] ss:$16 sps:$4 sm:$0xff]  }
 0x253   :  { %6748 = vmatpush1.bf16.msra.mxu0 %v9959_v57  ;;  %7436 = vmatpush1.bf16.msra.mxu1 %v9962_v58  ;;  %v10049_v57 = vld [vmem:[%s13950_s1 + $0x1460] ss:$16 sps:$4 sm:$0xff]   ;;  %v10052_v58 = vld [vmem:[%s13950_s1 + $0x1468] ss:$16 sps:$4 sm:$0xff]  }
 0x254   :  { %6749 = vmatprep.subr.bf16.mxu0 %v9967_v59  ;;  %7437 = vmatprep.subr.bf16.mxu1 %v9970_v60  ;;  %v10057_v59 = vld [vmem:[%s13950_s1 + $0x1484] ss:$16 sps:$4 sm:$0xff]   ;;  %v10060_v60 = vld [vmem:[%s13950_s1 + $0x148c] ss:$16 sps:$4 sm:$0xff]  }
 0x257   :  { %6750 = vmatpush1.bf16.msra.mxu0 %v9965_v61  ;;  %7438 = vmatpush1.bf16.msra.mxu1 %v9968_v62  ;;  %v10055_v61 = vld [vmem:[%s13950_s1 + $0x1480] ss:$16 sps:$4 sm:$0xff]   ;;  %v10058_v62 = vld [vmem:[%s13950_s1 + $0x1488] ss:$16 sps:$4 sm:$0xff]  }
 0x258   :  { %6751 = vmatprep.subr.bf16.mxu0 %v9973_v63  ;;  %7439 = vmatprep.subr.bf16.mxu1 %v9976_v0  ;;  %v10063_v63 = vld [vmem:[%s13950_s1 + $0x14a4] ss:$16 sps:$4 sm:$0xff]   ;;  %v10066_v0 = vld [vmem:[%s13950_s1 + $0x14ac] ss:$16 sps:$4 sm:$0xff]  }
 0x25b   :  { %6752 = vmatpush1.bf16.msra.mxu0 %v9971_v1  ;;  %7440 = vmatpush1.bf16.msra.mxu1 %v9974_v2  ;;  %v10061_v1 = vld [vmem:[%s13950_s1 + $0x14a0] ss:$16 sps:$4 sm:$0xff]   ;;  %v10064_v2 = vld [vmem:[%s13950_s1 + $0x14a8] ss:$16 sps:$4 sm:$0xff]  }
 0x25c   :  { %6753 = vmatprep.subr.bf16.mxu0 %v9979_v3  ;;  %7441 = vmatprep.subr.bf16.mxu1 %v9982_v4  ;;  %v10069_v3 = vld [vmem:[%s13950_s1 + $0x14c4] ss:$16 sps:$4 sm:$0xff]   ;;  %v10072_v4 = vld [vmem:[%s13950_s1 + $0x14cc] ss:$16 sps:$4 sm:$0xff]  }
 0x25f   :  { %6754 = vmatpush1.bf16.msra.mxu0 %v9977_v5  ;;  %7442 = vmatpush1.bf16.msra.mxu1 %v9980_v6  ;;  %v10067_v5 = vld [vmem:[%s13950_s1 + $0x14c0] ss:$16 sps:$4 sm:$0xff]   ;;  %v10070_v6 = vld [vmem:[%s13950_s1 + $0x14c8] ss:$16 sps:$4 sm:$0xff]  }
 0x260   :  { %6755 = vmatprep.subr.bf16.mxu0 %v9985_v7  ;;  %7443 = vmatprep.subr.bf16.mxu1 %v9988_v8  ;;  %v10075_v7 = vld [vmem:[%s13950_s1 + $0x14e4] ss:$16 sps:$4 sm:$0xff]   ;;  %v10078_v8 = vld [vmem:[%s13950_s1 + $0x14ec] ss:$16 sps:$4 sm:$0xff]  }
 0x263   :  { %6756 = vmatpush1.bf16.msra.mxu0 %v9983_v9  ;;  %7444 = vmatpush1.bf16.msra.mxu1 %v9986_v10  ;;  %v10073_v9 = vld [vmem:[%s13950_s1 + $0x14e0] ss:$16 sps:$4 sm:$0xff]   ;;  %v10076_v10 = vld [vmem:[%s13950_s1 + $0x14e8] ss:$16 sps:$4 sm:$0xff]  }
 0x264   :  { %6757 = vmatprep.subr.bf16.mxu0 %v9991_v11  ;;  %7445 = vmatprep.subr.bf16.mxu1 %v9994_v12  ;;  %v10081_v11 = vld [vmem:[%s13950_s1 + $0x1504] ss:$16 sps:$4 sm:$0xff]   ;;  %v10084_v12 = vld [vmem:[%s13950_s1 + $0x150c] ss:$16 sps:$4 sm:$0xff]  }
 0x267   :  { %6758 = vmatpush1.bf16.msra.mxu0 %v9989_v13  ;;  %7446 = vmatpush1.bf16.msra.mxu1 %v9992_v16  ;;  %v10079_v13 = vld [vmem:[%s13950_s1 + $0x1500] ss:$16 sps:$4 sm:$0xff]   ;;  %v10082_v16 = vld [vmem:[%s13950_s1 + $0x1508] ss:$16 sps:$4 sm:$0xff]  }
 0x268   :  { %6759 = vmatprep.subr.bf16.mxu0 %v9997_v17  ;;  %7447 = vmatprep.subr.bf16.mxu1 %v10000_v20  ;;  %v10087_v17 = vld [vmem:[%s13950_s1 + $0x1524] ss:$16 sps:$4 sm:$0xff]   ;;  %v10090_v20 = vld [vmem:[%s13950_s1 + $0x152c] ss:$16 sps:$4 sm:$0xff]  }
 0x26b   :  { %6760 = vmatpush1.bf16.msra.mxu0 %v9995_v15  ;;  %7448 = vmatpush1.bf16.msra.mxu1 %v9998_v22  ;;  %v10085_v15 = vld [vmem:[%s13950_s1 + $0x1520] ss:$16 sps:$4 sm:$0xff]   ;;  %v10088_v22 = vld [vmem:[%s13950_s1 + $0x1528] ss:$16 sps:$4 sm:$0xff]  }
 0x26c   :  { %6761 = vmatprep.subr.bf16.mxu0 %v10003_v23  ;;  %7449 = vmatprep.subr.bf16.mxu1 %v10006_v18  ;;  %v10093_v23 = vld [vmem:[%s13950_s1 + $0x1544] ss:$16 sps:$4 sm:$0xff]   ;;  %v10096_v18 = vld [vmem:[%s13950_s1 + $0x154c] ss:$16 sps:$4 sm:$0xff]  }
 0x26f   :  { %6762 = vmatpush1.bf16.msra.mxu0 %v10001_v25  ;;  %7450 = vmatpush1.bf16.msra.mxu1 %v10004_v26  ;;  %v10091_v25 = vld [vmem:[%s13950_s1 + $0x1540] ss:$16 sps:$4 sm:$0xff]   ;;  %v10094_v26 = vld [vmem:[%s13950_s1 + $0x1548] ss:$16 sps:$4 sm:$0xff]  }
 0x270   :  { %6763 = vmatprep.subr.bf16.mxu0 %v10009_v27  ;;  %7451 = vmatprep.subr.bf16.mxu1 %v10012_v28  ;;  %v10099_v27 = vld [vmem:[%s13950_s1 + $0x1564] ss:$16 sps:$4 sm:$0xff]   ;;  %v10102_v28 = vld [vmem:[%s13950_s1 + $0x156c] ss:$16 sps:$4 sm:$0xff]  }
 0x273   :  { %6764 = vmatpush1.bf16.msra.mxu0 %v10007_v29  ;;  %7452 = vmatpush1.bf16.msra.mxu1 %v10010_v30  ;;  %v10097_v29 = vld [vmem:[%s13950_s1 + $0x1560] ss:$16 sps:$4 sm:$0xff]   ;;  %v10100_v30 = vld [vmem:[%s13950_s1 + $0x1568] ss:$16 sps:$4 sm:$0xff]  }
 0x274   :  { %6765 = vmatprep.subr.bf16.mxu0 %v10015_v31  ;;  %7453 = vmatprep.subr.bf16.mxu1 %v10018_v32  ;;  %v10105_v31 = vld [vmem:[%s13950_s1 + $0x1584] ss:$16 sps:$4 sm:$0xff]   ;;  %v10108_v32 = vld [vmem:[%s13950_s1 + $0x158c] ss:$16 sps:$4 sm:$0xff]  }
 0x277   :  { %6766 = vmatpush1.bf16.msra.mxu0 %v10013_v33  ;;  %7454 = vmatpush1.bf16.msra.mxu1 %v10016_v34  ;;  %v10103_v33 = vld [vmem:[%s13950_s1 + $0x1580] ss:$16 sps:$4 sm:$0xff]   ;;  %v10106_v34 = vld [vmem:[%s13950_s1 + $0x1588] ss:$16 sps:$4 sm:$0xff]  }
 0x278   :  { %6767 = vmatprep.subr.bf16.mxu0 %v10021_v35  ;;  %7455 = vmatprep.subr.bf16.mxu1 %v10024_v36  ;;  %v10111_v35 = vld [vmem:[%s13950_s1 + $0x15a4] ss:$16 sps:$4 sm:$0xff]   ;;  %v10114_v36 = vld [vmem:[%s13950_s1 + $0x15ac] ss:$16 sps:$4 sm:$0xff]  }
 0x27b   :  { %6768 = vmatpush1.bf16.msra.mxu0 %v10019_v37  ;;  %7456 = vmatpush1.bf16.msra.mxu1 %v10022_v38  ;;  %v10109_v37 = vld [vmem:[%s13950_s1 + $0x15a0] ss:$16 sps:$4 sm:$0xff]   ;;  %v10112_v38 = vld [vmem:[%s13950_s1 + $0x15a8] ss:$16 sps:$4 sm:$0xff]  }
 0x27c   :  { %6769 = vmatprep.subr.bf16.mxu0 %v10027_v39  ;;  %7457 = vmatprep.subr.bf16.mxu1 %v10030_v40  ;;  %v10117_v39 = vld [vmem:[%s13950_s1 + $0x15c4] ss:$16 sps:$4 sm:$0xff]   ;;  %v10120_v40 = vld [vmem:[%s13950_s1 + $0x15cc] ss:$16 sps:$4 sm:$0xff]  }
 0x27f   :  { %6770 = vmatpush1.bf16.msra.mxu0 %v10025_v41  ;;  %7458 = vmatpush1.bf16.msra.mxu1 %v10028_v42  ;;  %v10115_v41 = vld [vmem:[%s13950_s1 + $0x15c0] ss:$16 sps:$4 sm:$0xff]   ;;  %v10118_v42 = vld [vmem:[%s13950_s1 + $0x15c8] ss:$16 sps:$4 sm:$0xff]  }
 0x280   :  { %6782 = vmatprep.subr.bf16.mxu0 %v10033_v43  ;;  %7470 = vmatprep.subr.bf16.mxu1 %v10036_v44  ;;  %v10123_v43 = vld [vmem:[%s13950_s1 + $0x15e4] ss:$16 sps:$4 sm:$0xff]   ;;  %v10126_v44 = vld [vmem:[%s13950_s1 + $0x15ec] ss:$16 sps:$4 sm:$0xff]  }
 0x282   :  { %6772 = vmatmul.mubr.bf16.vlgmr.msra.gmra.mrb[0].mxu0 %v7904_v14  ;;  %7460 = vmatmul.mubr.bf16.vlgmr.msra.gmra.mrb[0].mxu1 %v7904_v14  ;;  %v10121_v14 = vld [vmem:[%s13950_s1 + $0x15e0] ss:$16 sps:$4 sm:$0xff]  }
 0x283   :  { %6783 = vmatpush1.bf16.msra.mxu0 %v10031_v46  ;;  %7471 = vmatpush1.bf16.msra.mxu1 %v10034_v19  ;;  %v10124_v46 = vld [vmem:[%s13950_s1 + $0x15e8] ss:$16 sps:$4 sm:$0xff]   ;;  %v10129_v19 = vld [vmem:[%s13950_s1 + $0x1604] ss:$16 sps:$4 sm:$0xff]  }
 0x284   :  { %6784 = vmatprep.subr.bf16.mxu0 %v10039_v24  ;;  %7472 = vmatprep.subr.bf16.mxu1 %v10042_v47  ;;  %v10132_v24 = vld [vmem:[%s13950_s1 + $0x160c] ss:$16 sps:$4 sm:$0xff]   ;;  %v7906_v47 = vcombine.low %v12694_v21, %v12699_v45  ;;  %v10130_v21 = vld [vmem:[%s13950_s1 + $0x1608] ss:$16 sps:$4 sm:$0xff]   ;;  %v10135_v45 = vld [vmem:[%s13950_s1 + $0x1624] ss:$16 sps:$4 sm:$0xff]  }
 0x285   :  { %6814 = vmatprep.mubr.bf16.mxu0 %v7907_v48  ;;  %7502 = vmatprep.mubr.bf16.mxu1 %v7907_v48  ;;  %v12900_v48 = vld [vmem:[%s13951_s0 + $0x58] sm:$0xff] }
 0x287   :  { %6785 = vmatpush1.bf16.msra.mxu0 %v10037_v49  ;;  %7473 = vmatpush1.bf16.msra.mxu1 %v10040_v50  ;;  %v12905_v49 = vld [vmem:[%s13951_s0 + $0xd8] sm:$0xff]  ;;  %v10127_v50 = vld [vmem:[%s13950_s1 + $0x1600] ss:$16 sps:$4 sm:$0xff]  }
 0x288   :  { %6786 = vmatprep.subr.bf16.mxu0 %v10045_v51  ;;  %7474 = vmatprep.subr.bf16.mxu1 %v10048_v52  ;;  %v10138_v51 = vld [vmem:[%s13950_s1 + $0x162c] ss:$16 sps:$4 sm:$0xff]   ;;  %v7909_v52 = vcombine.high %v12900_v48, %v12905_v49 }
 0x28b   :  { %6787 = vmatpush1.bf16.msra.mxu0 %v10043_v53  ;;  %7475 = vmatpush1.bf16.msra.mxu1 %v10046_v54  ;;  %v10133_v53 = vld [vmem:[%s13950_s1 + $0x1620] ss:$16 sps:$4 sm:$0xff]   ;;  %v10136_v54 = vld [vmem:[%s13950_s1 + $0x1628] ss:$16 sps:$4 sm:$0xff]  }
 0x28c   :  { %6788 = vmatprep.subr.bf16.mxu0 %v10051_v55  ;;  %7476 = vmatprep.subr.bf16.mxu1 %v10054_v56  ;;  %v10141_v55 = vld [vmem:[%s13950_s1 + $0x1644] ss:$16 sps:$4 sm:$0xff]   ;;  %v10144_v56 = vld [vmem:[%s13950_s1 + $0x164c] ss:$16 sps:$4 sm:$0xff]  }
 0x28f   :  { %6789 = vmatpush1.bf16.msra.mxu0 %v10049_v57  ;;  %7477 = vmatpush1.bf16.msra.mxu1 %v10052_v58  ;;  %v10139_v57 = vld [vmem:[%s13950_s1 + $0x1640] ss:$16 sps:$4 sm:$0xff]   ;;  %v10142_v58 = vld [vmem:[%s13950_s1 + $0x1648] ss:$16 sps:$4 sm:$0xff]  }
 0x290   :  { %6790 = vmatprep.subr.bf16.mxu0 %v10057_v59  ;;  %7478 = vmatprep.subr.bf16.mxu1 %v10060_v60  ;;  %v10147_v59 = vld [vmem:[%s13950_s1 + $0x1664] ss:$16 sps:$4 sm:$0xff]   ;;  %v10150_v60 = vld [vmem:[%s13950_s1 + $0x166c] ss:$16 sps:$4 sm:$0xff]  }
 0x293   :  { %6791 = vmatpush1.bf16.msra.mxu0 %v10055_v61  ;;  %7479 = vmatpush1.bf16.msra.mxu1 %v10058_v62  ;;  %v10145_v61 = vld [vmem:[%s13950_s1 + $0x1660] ss:$16 sps:$4 sm:$0xff]   ;;  %v10148_v62 = vld [vmem:[%s13950_s1 + $0x1668] ss:$16 sps:$4 sm:$0xff]  }
 0x294   :  { %6792 = vmatprep.subr.bf16.mxu0 %v10063_v63  ;;  %7480 = vmatprep.subr.bf16.mxu1 %v10066_v0  ;;  %v10153_v63 = vld [vmem:[%s13950_s1 + $0x1684] ss:$16 sps:$4 sm:$0xff]   ;;  %v10156_v0 = vld [vmem:[%s13950_s1 + $0x168c] ss:$16 sps:$4 sm:$0xff]  }
 0x297   :  { %6793 = vmatpush1.bf16.msra.mxu0 %v10061_v1  ;;  %7481 = vmatpush1.bf16.msra.mxu1 %v10064_v2  ;;  %v10151_v1 = vld [vmem:[%s13950_s1 + $0x1680] ss:$16 sps:$4 sm:$0xff]   ;;  %v10154_v2 = vld [vmem:[%s13950_s1 + $0x1688] ss:$16 sps:$4 sm:$0xff]  }
 0x298   :  { %6794 = vmatprep.subr.bf16.mxu0 %v10069_v3  ;;  %7482 = vmatprep.subr.bf16.mxu1 %v10072_v4  ;;  %v10159_v3 = vld [vmem:[%s13950_s1 + $0x16a4] ss:$16 sps:$4 sm:$0xff]   ;;  %v10162_v4 = vld [vmem:[%s13950_s1 + $0x16ac] ss:$16 sps:$4 sm:$0xff]  }
 0x29b   :  { %6795 = vmatpush1.bf16.msra.mxu0 %v10067_v5  ;;  %7483 = vmatpush1.bf16.msra.mxu1 %v10070_v6  ;;  %v10157_v5 = vld [vmem:[%s13950_s1 + $0x16a0] ss:$16 sps:$4 sm:$0xff]   ;;  %v10160_v6 = vld [vmem:[%s13950_s1 + $0x16a8] ss:$16 sps:$4 sm:$0xff]  }
 0x29c   :  { %6796 = vmatprep.subr.bf16.mxu0 %v10075_v7  ;;  %7484 = vmatprep.subr.bf16.mxu1 %v10078_v8  ;;  %v10165_v7 = vld [vmem:[%s13950_s1 + $0x16c4] ss:$16 sps:$4 sm:$0xff]   ;;  %v10168_v8 = vld [vmem:[%s13950_s1 + $0x16cc] ss:$16 sps:$4 sm:$0xff]  }
 0x29f   :  { %6797 = vmatpush1.bf16.msra.mxu0 %v10073_v9  ;;  %7485 = vmatpush1.bf16.msra.mxu1 %v10076_v10  ;;  %v10163_v9 = vld [vmem:[%s13950_s1 + $0x16c0] ss:$16 sps:$4 sm:$0xff]   ;;  %v10166_v10 = vld [vmem:[%s13950_s1 + $0x16c8] ss:$16 sps:$4 sm:$0xff]  }
 0x2a0   :  { %6798 = vmatprep.subr.bf16.mxu0 %v10081_v11  ;;  %7486 = vmatprep.subr.bf16.mxu1 %v10084_v12  ;;  %v10171_v11 = vld [vmem:[%s13950_s1 + $0x16e4] ss:$16 sps:$4 sm:$0xff]   ;;  %v10174_v12 = vld [vmem:[%s13950_s1 + $0x16ec] ss:$16 sps:$4 sm:$0xff]  }
 0x2a3   :  { %6799 = vmatpush1.bf16.msra.mxu0 %v10079_v13  ;;  %7487 = vmatpush1.bf16.msra.mxu1 %v10082_v16  ;;  %v10169_v13 = vld [vmem:[%s13950_s1 + $0x16e0] ss:$16 sps:$4 sm:$0xff]   ;;  %v10172_v16 = vld [vmem:[%s13950_s1 + $0x16e8] ss:$16 sps:$4 sm:$0xff]  }
 0x2a4   :  { %6800 = vmatprep.subr.bf16.mxu0 %v10087_v17  ;;  %7488 = vmatprep.subr.bf16.mxu1 %v10090_v20  ;;  %v10177_v17 = vld [vmem:[%s13950_s1 + $0x1704] ss:$16 sps:$4 sm:$0xff]   ;;  %v10180_v20 = vld [vmem:[%s13950_s1 + $0x170c] ss:$16 sps:$4 sm:$0xff]  }
 0x2a7   :  { %6801 = vmatpush1.bf16.msra.mxu0 %v10085_v15  ;;  %7489 = vmatpush1.bf16.msra.mxu1 %v10088_v22  ;;  %v10175_v15 = vld [vmem:[%s13950_s1 + $0x1700] ss:$16 sps:$4 sm:$0xff]   ;;  %v10178_v22 = vld [vmem:[%s13950_s1 + $0x1708] ss:$16 sps:$4 sm:$0xff]  }
 0x2a8   :  { %6802 = vmatprep.subr.bf16.mxu0 %v10093_v23  ;;  %7490 = vmatprep.subr.bf16.mxu1 %v10096_v18  ;;  %v10183_v23 = vld [vmem:[%s13950_s1 + $0x1724] ss:$16 sps:$4 sm:$0xff]   ;;  %v10186_v18 = vld [vmem:[%s13950_s1 + $0x172c] ss:$16 sps:$4 sm:$0xff]  }
 0x2ab   :  { %6803 = vmatpush1.bf16.msra.mxu0 %v10091_v25  ;;  %7491 = vmatpush1.bf16.msra.mxu1 %v10094_v26  ;;  %v10181_v25 = vld [vmem:[%s13950_s1 + $0x1720] ss:$16 sps:$4 sm:$0xff]   ;;  %v10184_v26 = vld [vmem:[%s13950_s1 + $0x1728] ss:$16 sps:$4 sm:$0xff]  }
 0x2ac   :  { %6804 = vmatprep.subr.bf16.mxu0 %v10099_v27  ;;  %7492 = vmatprep.subr.bf16.mxu1 %v10102_v28  ;;  %v10189_v27 = vld [vmem:[%s13950_s1 + $0x1744] ss:$16 sps:$4 sm:$0xff]   ;;  %v10192_v28 = vld [vmem:[%s13950_s1 + $0x174c] ss:$16 sps:$4 sm:$0xff]  }
 0x2af   :  { %6805 = vmatpush1.bf16.msra.mxu0 %v10097_v29  ;;  %7493 = vmatpush1.bf16.msra.mxu1 %v10100_v30  ;;  %v10187_v29 = vld [vmem:[%s13950_s1 + $0x1740] ss:$16 sps:$4 sm:$0xff]   ;;  %v10190_v30 = vld [vmem:[%s13950_s1 + $0x1748] ss:$16 sps:$4 sm:$0xff]  }
 0x2b0   :  { %6806 = vmatprep.subr.bf16.mxu0 %v10105_v31  ;;  %7494 = vmatprep.subr.bf16.mxu1 %v10108_v32  ;;  %v10195_v31 = vld [vmem:[%s13950_s1 + $0x1764] ss:$16 sps:$4 sm:$0xff]   ;;  %v10198_v32 = vld [vmem:[%s13950_s1 + $0x176c] ss:$16 sps:$4 sm:$0xff]  }
 0x2b3   :  { %6807 = vmatpush1.bf16.msra.mxu0 %v10103_v33  ;;  %7495 = vmatpush1.bf16.msra.mxu1 %v10106_v34  ;;  %v10193_v33 = vld [vmem:[%s13950_s1 + $0x1760] ss:$16 sps:$4 sm:$0xff]   ;;  %v10196_v34 = vld [vmem:[%s13950_s1 + $0x1768] ss:$16 sps:$4 sm:$0xff]  }
 0x2b4   :  { %6808 = vmatprep.subr.bf16.mxu0 %v10111_v35  ;;  %7496 = vmatprep.subr.bf16.mxu1 %v10114_v36  ;;  %v10201_v35 = vld [vmem:[%s13950_s1 + $0x1784] ss:$16 sps:$4 sm:$0xff]   ;;  %v10204_v36 = vld [vmem:[%s13950_s1 + $0x178c] ss:$16 sps:$4 sm:$0xff]  }
 0x2b7   :  { %6809 = vmatpush1.bf16.msra.mxu0 %v10109_v37  ;;  %7497 = vmatpush1.bf16.msra.mxu1 %v10112_v38  ;;  %v10199_v37 = vld [vmem:[%s13950_s1 + $0x1780] ss:$16 sps:$4 sm:$0xff]   ;;  %v10202_v38 = vld [vmem:[%s13950_s1 + $0x1788] ss:$16 sps:$4 sm:$0xff]  }
 0x2b8   :  { %6810 = vmatprep.subr.bf16.mxu0 %v10117_v39  ;;  %7498 = vmatprep.subr.bf16.mxu1 %v10120_v40  ;;  %v10207_v39 = vld [vmem:[%s13950_s1 + $0x17a4] ss:$16 sps:$4 sm:$0xff]   ;;  %v10210_v40 = vld [vmem:[%s13950_s1 + $0x17ac] ss:$16 sps:$4 sm:$0xff]  }
 0x2bb   :  { %6811 = vmatpush1.bf16.msra.mxu0 %v10115_v41  ;;  %7499 = vmatpush1.bf16.msra.mxu1 %v10118_v42  ;;  %v10205_v41 = vld [vmem:[%s13950_s1 + $0x17a0] ss:$16 sps:$4 sm:$0xff]   ;;  %v10208_v42 = vld [vmem:[%s13950_s1 + $0x17a8] ss:$16 sps:$4 sm:$0xff]  }
 0x2bc   :  { %6812 = vmatprep.subr.bf16.mxu0 %v10123_v43  ;;  %7500 = vmatprep.subr.bf16.mxu1 %v10126_v44  ;;  %v10213_v43 = vld [vmem:[%s13950_s1 + $0x17c4] ss:$16 sps:$4 sm:$0xff]   ;;  %v10216_v44 = vld [vmem:[%s13950_s1 + $0x17cc] ss:$16 sps:$4 sm:$0xff]  }
 0x2bf   :  { %6813 = vmatpush1.bf16.msra.mxu0 %v10121_v14  ;;  %7501 = vmatpush1.bf16.msra.mxu1 %v10124_v46  ;;  %v10211_v14 = vld [vmem:[%s13950_s1 + $0x17c0] ss:$16 sps:$4 sm:$0xff]   ;;  %v10214_v46 = vld [vmem:[%s13950_s1 + $0x17c8] ss:$16 sps:$4 sm:$0xff]  }
 0x2c0   :  { %6825 = vmatprep.subr.bf16.mxu0 %v10129_v19  ;;  %7513 = vmatprep.subr.bf16.mxu1 %v10132_v24  ;;  %v10219_v19 = vld [vmem:[%s13950_s1 + $0x17e4] ss:$16 sps:$4 sm:$0xff]   ;;  %v10222_v24 = vld [vmem:[%s13950_s1 + $0x17ec] ss:$16 sps:$4 sm:$0xff]  }
 0x2c2   :  { %6815 = vmatmul.mubr.bf16.vlgmr.msra.gmra.mrb[0].mxu0 %v7906_v47  ;;  %7503 = vmatmul.mubr.bf16.vlgmr.msra.gmra.mrb[0].mxu1 %v7906_v47  ;;  %v10217_v47 = vld [vmem:[%s13950_s1 + $0x17e0] ss:$16 sps:$4 sm:$0xff]  }
 0x2c3   :  { %6826 = vmatpush1.bf16.msra.mxu0 %v10127_v50  ;;  %7514 = vmatpush1.bf16.msra.mxu1 %v10130_v21  ;;  %v10220_v50 = vld [vmem:[%s13950_s1 + $0x17e8] ss:$16 sps:$4 sm:$0xff]   ;;  %v10225_v21 = vld [vmem:[%s13950_s1 + $0x1804] ss:$16 sps:$4 sm:$0xff]  }
 0x2c4   :  { %6827 = vmatprep.subr.bf16.mxu0 %v10135_v45  ;;  %7515 = vmatprep.subr.bf16.mxu1 %v10138_v51  ;;  %v10228_v45 = vld [vmem:[%s13950_s1 + $0x180c] ss:$16 sps:$4 sm:$0xff]   ;;  %v7908_v51 = vcombine.low %v12900_v48, %v12905_v49  ;;  %v10226_v48 = vld [vmem:[%s13950_s1 + $0x1808] ss:$16 sps:$4 sm:$0xff]   ;;  %v10231_v49 = vld [vmem:[%s13950_s1 + $0x1824] ss:$16 sps:$4 sm:$0xff]  }
 0x2c5   :  { %6857 = vmatprep.mubr.bf16.mxu0 %v7909_v52  ;;  %7545 = vmatprep.mubr.bf16.mxu1 %v7909_v52  ;;  %v13106_v52 = vld [vmem:[%s13951_s0 + $0x60] sm:$0xff] }
 0x2c7   :  { %6828 = vmatpush1.bf16.msra.mxu0 %v10133_v53  ;;  %7516 = vmatpush1.bf16.msra.mxu1 %v10136_v54  ;;  %v13111_v53 = vld [vmem:[%s13951_s0 + $0xe0] sm:$0xff] }
 0x2c8   :  { %6829 = vmatprep.subr.bf16.mxu0 %v10141_v55  ;;  %7517 = vmatprep.subr.bf16.mxu1 %v10144_v56  ;;  %v10223_v54 = vld [vmem:[%s13950_s1 + $0x1800] ss:$16 sps:$4 sm:$0xff]   ;;  %v10234_v55 = vld [vmem:[%s13950_s1 + $0x182c] ss:$16 sps:$4 sm:$0xff]   ;;  %v7911_v56 = vcombine.high %v13106_v52, %v13111_v53 }
 0x2cb   :  { %6830 = vmatpush1.bf16.msra.mxu0 %v10139_v57  ;;  %7518 = vmatpush1.bf16.msra.mxu1 %v10142_v58  ;;  %v10229_v57 = vld [vmem:[%s13950_s1 + $0x1820] ss:$16 sps:$4 sm:$0xff]   ;;  %v10232_v58 = vld [vmem:[%s13950_s1 + $0x1828] ss:$16 sps:$4 sm:$0xff]  }
 0x2cc   :  { %6831 = vmatprep.subr.bf16.mxu0 %v10147_v59  ;;  %7519 = vmatprep.subr.bf16.mxu1 %v10150_v60  ;;  %v10237_v59 = vld [vmem:[%s13950_s1 + $0x1844] ss:$16 sps:$4 sm:$0xff]   ;;  %v10240_v60 = vld [vmem:[%s13950_s1 + $0x184c] ss:$16 sps:$4 sm:$0xff]  }
 0x2cf   :  { %6832 = vmatpush1.bf16.msra.mxu0 %v10145_v61  ;;  %7520 = vmatpush1.bf16.msra.mxu1 %v10148_v62  ;;  %v10235_v61 = vld [vmem:[%s13950_s1 + $0x1840] ss:$16 sps:$4 sm:$0xff]   ;;  %v10238_v62 = vld [vmem:[%s13950_s1 + $0x1848] ss:$16 sps:$4 sm:$0xff]  }
 0x2d0   :  { %6833 = vmatprep.subr.bf16.mxu0 %v10153_v63  ;;  %7521 = vmatprep.subr.bf16.mxu1 %v10156_v0  ;;  %v10243_v63 = vld [vmem:[%s13950_s1 + $0x1864] ss:$16 sps:$4 sm:$0xff]   ;;  %v10246_v0 = vld [vmem:[%s13950_s1 + $0x186c] ss:$16 sps:$4 sm:$0xff]  }
 0x2d3   :  { %6834 = vmatpush1.bf16.msra.mxu0 %v10151_v1  ;;  %7522 = vmatpush1.bf16.msra.mxu1 %v10154_v2  ;;  %v10241_v1 = vld [vmem:[%s13950_s1 + $0x1860] ss:$16 sps:$4 sm:$0xff]   ;;  %v10244_v2 = vld [vmem:[%s13950_s1 + $0x1868] ss:$16 sps:$4 sm:$0xff]  }
 0x2d4   :  { %6835 = vmatprep.subr.bf16.mxu0 %v10159_v3  ;;  %7523 = vmatprep.subr.bf16.mxu1 %v10162_v4  ;;  %v10249_v3 = vld [vmem:[%s13950_s1 + $0x1884] ss:$16 sps:$4 sm:$0xff]   ;;  %v10252_v4 = vld [vmem:[%s13950_s1 + $0x188c] ss:$16 sps:$4 sm:$0xff]  }
 0x2d7   :  { %6836 = vmatpush1.bf16.msra.mxu0 %v10157_v5  ;;  %7524 = vmatpush1.bf16.msra.mxu1 %v10160_v6  ;;  %v10247_v5 = vld [vmem:[%s13950_s1 + $0x1880] ss:$16 sps:$4 sm:$0xff]   ;;  %v10250_v6 = vld [vmem:[%s13950_s1 + $0x1888] ss:$16 sps:$4 sm:$0xff]  }
 0x2d8   :  { %6837 = vmatprep.subr.bf16.mxu0 %v10165_v7  ;;  %7525 = vmatprep.subr.bf16.mxu1 %v10168_v8  ;;  %v10255_v7 = vld [vmem:[%s13950_s1 + $0x18a4] ss:$16 sps:$4 sm:$0xff]   ;;  %v10258_v8 = vld [vmem:[%s13950_s1 + $0x18ac] ss:$16 sps:$4 sm:$0xff]  }
 0x2db   :  { %6838 = vmatpush1.bf16.msra.mxu0 %v10163_v9  ;;  %7526 = vmatpush1.bf16.msra.mxu1 %v10166_v10  ;;  %v10253_v9 = vld [vmem:[%s13950_s1 + $0x18a0] ss:$16 sps:$4 sm:$0xff]   ;;  %v10256_v10 = vld [vmem:[%s13950_s1 + $0x18a8] ss:$16 sps:$4 sm:$0xff]  }
 0x2dc   :  { %6839 = vmatprep.subr.bf16.mxu0 %v10171_v11  ;;  %7527 = vmatprep.subr.bf16.mxu1 %v10174_v12  ;;  %v10261_v11 = vld [vmem:[%s13950_s1 + $0x18c4] ss:$16 sps:$4 sm:$0xff]   ;;  %v10264_v12 = vld [vmem:[%s13950_s1 + $0x18cc] ss:$16 sps:$4 sm:$0xff]  }
 0x2df   :  { %6840 = vmatpush1.bf16.msra.mxu0 %v10169_v13  ;;  %7528 = vmatpush1.bf16.msra.mxu1 %v10172_v16  ;;  %v10259_v13 = vld [vmem:[%s13950_s1 + $0x18c0] ss:$16 sps:$4 sm:$0xff]   ;;  %v10262_v16 = vld [vmem:[%s13950_s1 + $0x18c8] ss:$16 sps:$4 sm:$0xff]  }
 0x2e0   :  { %6841 = vmatprep.subr.bf16.mxu0 %v10177_v17  ;;  %7529 = vmatprep.subr.bf16.mxu1 %v10180_v20  ;;  %v10267_v17 = vld [vmem:[%s13950_s1 + $0x18e4] ss:$16 sps:$4 sm:$0xff]   ;;  %v10270_v20 = vld [vmem:[%s13950_s1 + $0x18ec] ss:$16 sps:$4 sm:$0xff]  }
 0x2e3   :  { %6842 = vmatpush1.bf16.msra.mxu0 %v10175_v15  ;;  %7530 = vmatpush1.bf16.msra.mxu1 %v10178_v22  ;;  %v10265_v15 = vld [vmem:[%s13950_s1 + $0x18e0] ss:$16 sps:$4 sm:$0xff]   ;;  %v10268_v22 = vld [vmem:[%s13950_s1 + $0x18e8] ss:$16 sps:$4 sm:$0xff]  }
 0x2e4   :  { %6843 = vmatprep.subr.bf16.mxu0 %v10183_v23  ;;  %7531 = vmatprep.subr.bf16.mxu1 %v10186_v18  ;;  %v10273_v23 = vld [vmem:[%s13950_s1 + $0x1904] ss:$16 sps:$4 sm:$0xff]   ;;  %v10276_v18 = vld [vmem:[%s13950_s1 + $0x190c] ss:$16 sps:$4 sm:$0xff]  }
 0x2e7   :  { %6844 = vmatpush1.bf16.msra.mxu0 %v10181_v25  ;;  %7532 = vmatpush1.bf16.msra.mxu1 %v10184_v26  ;;  %v10271_v25 = vld [vmem:[%s13950_s1 + $0x1900] ss:$16 sps:$4 sm:$0xff]   ;;  %v10274_v26 = vld [vmem:[%s13950_s1 + $0x1908] ss:$16 sps:$4 sm:$0xff]  }
 0x2e8   :  { %6845 = vmatprep.subr.bf16.mxu0 %v10189_v27  ;;  %7533 = vmatprep.subr.bf16.mxu1 %v10192_v28  ;;  %v10279_v27 = vld [vmem:[%s13950_s1 + $0x1924] ss:$16 sps:$4 sm:$0xff]   ;;  %v10282_v28 = vld [vmem:[%s13950_s1 + $0x192c] ss:$16 sps:$4 sm:$0xff]  }
 0x2eb   :  { %6846 = vmatpush1.bf16.msra.mxu0 %v10187_v29  ;;  %7534 = vmatpush1.bf16.msra.mxu1 %v10190_v30  ;;  %v10277_v29 = vld [vmem:[%s13950_s1 + $0x1920] ss:$16 sps:$4 sm:$0xff]   ;;  %v10280_v30 = vld [vmem:[%s13950_s1 + $0x1928] ss:$16 sps:$4 sm:$0xff]  }
 0x2ec   :  { %6847 = vmatprep.subr.bf16.mxu0 %v10195_v31  ;;  %7535 = vmatprep.subr.bf16.mxu1 %v10198_v32  ;;  %v10285_v31 = vld [vmem:[%s13950_s1 + $0x1944] ss:$16 sps:$4 sm:$0xff]   ;;  %v10288_v32 = vld [vmem:[%s13950_s1 + $0x194c] ss:$16 sps:$4 sm:$0xff]  }
 0x2ef   :  { %6848 = vmatpush1.bf16.msra.mxu0 %v10193_v33  ;;  %7536 = vmatpush1.bf16.msra.mxu1 %v10196_v34  ;;  %v10283_v33 = vld [vmem:[%s13950_s1 + $0x1940] ss:$16 sps:$4 sm:$0xff]   ;;  %v10286_v34 = vld [vmem:[%s13950_s1 + $0x1948] ss:$16 sps:$4 sm:$0xff]  }
 0x2f0   :  { %6849 = vmatprep.subr.bf16.mxu0 %v10201_v35  ;;  %7537 = vmatprep.subr.bf16.mxu1 %v10204_v36  ;;  %v10291_v35 = vld [vmem:[%s13950_s1 + $0x1964] ss:$16 sps:$4 sm:$0xff]   ;;  %v10294_v36 = vld [vmem:[%s13950_s1 + $0x196c] ss:$16 sps:$4 sm:$0xff]  }
 0x2f3   :  { %6850 = vmatpush1.bf16.msra.mxu0 %v10199_v37  ;;  %7538 = vmatpush1.bf16.msra.mxu1 %v10202_v38  ;;  %v10289_v37 = vld [vmem:[%s13950_s1 + $0x1960] ss:$16 sps:$4 sm:$0xff]   ;;  %v10292_v38 = vld [vmem:[%s13950_s1 + $0x1968] ss:$16 sps:$4 sm:$0xff]  }
 0x2f4   :  { %6851 = vmatprep.subr.bf16.mxu0 %v10207_v39  ;;  %7539 = vmatprep.subr.bf16.mxu1 %v10210_v40  ;;  %v10297_v39 = vld [vmem:[%s13950_s1 + $0x1984] ss:$16 sps:$4 sm:$0xff]   ;;  %v10300_v40 = vld [vmem:[%s13950_s1 + $0x198c] ss:$16 sps:$4 sm:$0xff]  }
 0x2f7   :  { %6852 = vmatpush1.bf16.msra.mxu0 %v10205_v41  ;;  %7540 = vmatpush1.bf16.msra.mxu1 %v10208_v42  ;;  %v10295_v41 = vld [vmem:[%s13950_s1 + $0x1980] ss:$16 sps:$4 sm:$0xff]   ;;  %v10298_v42 = vld [vmem:[%s13950_s1 + $0x1988] ss:$16 sps:$4 sm:$0xff]  }
 0x2f8   :  { %6853 = vmatprep.subr.bf16.mxu0 %v10213_v43  ;;  %7541 = vmatprep.subr.bf16.mxu1 %v10216_v44  ;;  %v10303_v43 = vld [vmem:[%s13950_s1 + $0x19a4] ss:$16 sps:$4 sm:$0xff]   ;;  %v10306_v44 = vld [vmem:[%s13950_s1 + $0x19ac] ss:$16 sps:$4 sm:$0xff]  }
 0x2fb   :  { %6854 = vmatpush1.bf16.msra.mxu0 %v10211_v14  ;;  %7542 = vmatpush1.bf16.msra.mxu1 %v10214_v46  ;;  %v10301_v14 = vld [vmem:[%s13950_s1 + $0x19a0] ss:$16 sps:$4 sm:$0xff]   ;;  %v10304_v46 = vld [vmem:[%s13950_s1 + $0x19a8] ss:$16 sps:$4 sm:$0xff]  }
 0x2fc   :  { %6855 = vmatprep.subr.bf16.mxu0 %v10219_v19  ;;  %7543 = vmatprep.subr.bf16.mxu1 %v10222_v24  ;;  %v10309_v19 = vld [vmem:[%s13950_s1 + $0x19c4] ss:$16 sps:$4 sm:$0xff]   ;;  %v10312_v24 = vld [vmem:[%s13950_s1 + $0x19cc] ss:$16 sps:$4 sm:$0xff]  }
 0x2ff   :  { %6856 = vmatpush1.bf16.msra.mxu0 %v10217_v47  ;;  %7544 = vmatpush1.bf16.msra.mxu1 %v10220_v50  ;;  %v10307_v47 = vld [vmem:[%s13950_s1 + $0x19c0] ss:$16 sps:$4 sm:$0xff]   ;;  %v10310_v50 = vld [vmem:[%s13950_s1 + $0x19c8] ss:$16 sps:$4 sm:$0xff]  }
 0x300   :  { %6868 = vmatprep.subr.bf16.mxu0 %v10225_v21  ;;  %7556 = vmatprep.subr.bf16.mxu1 %v10228_v45  ;;  %v10315_v21 = vld [vmem:[%s13950_s1 + $0x19e4] ss:$16 sps:$4 sm:$0xff]   ;;  %v10318_v45 = vld [vmem:[%s13950_s1 + $0x19ec] ss:$16 sps:$4 sm:$0xff]  }
 0x302   :  { %6858 = vmatmul.mubr.bf16.vlgmr.msra.gmra.mrb[0].mxu0 %v7908_v51  ;;  %7546 = vmatmul.mubr.bf16.vlgmr.msra.gmra.mrb[0].mxu1 %v7908_v51  ;;  %v10313_v51 = vld [vmem:[%s13950_s1 + $0x19e0] ss:$16 sps:$4 sm:$0xff]  }
 0x303   :  { %6869 = vmatpush1.bf16.msra.mxu0 %v10223_v54  ;;  %7557 = vmatpush1.bf16.msra.mxu1 %v10226_v48  ;;  %v10316_v54 = vld [vmem:[%s13950_s1 + $0x19e8] ss:$16 sps:$4 sm:$0xff]   ;;  %v10321_v48 = vld [vmem:[%s13950_s1 + $0x1a04] ss:$16 sps:$4 sm:$0xff]  }
 0x304   :  { %6870 = vmatprep.subr.bf16.mxu0 %v10231_v49  ;;  %7558 = vmatprep.subr.bf16.mxu1 %v10234_v55  ;;  %v10324_v49 = vld [vmem:[%s13950_s1 + $0x1a0c] ss:$16 sps:$4 sm:$0xff]   ;;  %v7910_v55 = vcombine.low %v13106_v52, %v13111_v53  ;;  %v10322_v52 = vld [vmem:[%s13950_s1 + $0x1a08] ss:$16 sps:$4 sm:$0xff]   ;;  %v10327_v53 = vld [vmem:[%s13950_s1 + $0x1a24] ss:$16 sps:$4 sm:$0xff]  }
 0x305   :  { %6900 = vmatprep.mubr.bf16.mxu0 %v7911_v56  ;;  %7588 = vmatprep.mubr.bf16.mxu1 %v7911_v56  ;;  %v13312_v56 = vld [vmem:[%s13951_s0 + $0x68] sm:$0xff] }
 0x307   :  { %6871 = vmatpush1.bf16.msra.mxu0 %v10229_v57  ;;  %7559 = vmatpush1.bf16.msra.mxu1 %v10232_v58  ;;  %v13317_v57 = vld [vmem:[%s13951_s0 + $0xe8] sm:$0xff]  ;;  %v10319_v58 = vld [vmem:[%s13950_s1 + $0x1a00] ss:$16 sps:$4 sm:$0xff]  }
 0x308   :  { %6872 = vmatprep.subr.bf16.mxu0 %v10237_v59  ;;  %7560 = vmatprep.subr.bf16.mxu1 %v10240_v60  ;;  %v10330_v59 = vld [vmem:[%s13950_s1 + $0x1a2c] ss:$16 sps:$4 sm:$0xff]   ;;  %v7913_v60 = vcombine.high %v13312_v56, %v13317_v57 }
 0x30b   :  { %6873 = vmatpush1.bf16.msra.mxu0 %v10235_v61  ;;  %7561 = vmatpush1.bf16.msra.mxu1 %v10238_v62  ;;  %v10325_v61 = vld [vmem:[%s13950_s1 + $0x1a20] ss:$16 sps:$4 sm:$0xff]   ;;  %v10328_v62 = vld [vmem:[%s13950_s1 + $0x1a28] ss:$16 sps:$4 sm:$0xff]  }
 0x30c   :  { %6874 = vmatprep.subr.bf16.mxu0 %v10243_v63  ;;  %7562 = vmatprep.subr.bf16.mxu1 %v10246_v0  ;;  %v10333_v63 = vld [vmem:[%s13950_s1 + $0x1a44] ss:$16 sps:$4 sm:$0xff]   ;;  %v10336_v0 = vld [vmem:[%s13950_s1 + $0x1a4c] ss:$16 sps:$4 sm:$0xff]  }
 0x30f   :  { %6875 = vmatpush1.bf16.msra.mxu0 %v10241_v1  ;;  %7563 = vmatpush1.bf16.msra.mxu1 %v10244_v2  ;;  %v10331_v1 = vld [vmem:[%s13950_s1 + $0x1a40] ss:$16 sps:$4 sm:$0xff]   ;;  %v10334_v2 = vld [vmem:[%s13950_s1 + $0x1a48] ss:$16 sps:$4 sm:$0xff]  }
 0x310   :  { %6876 = vmatprep.subr.bf16.mxu0 %v10249_v3  ;;  %7564 = vmatprep.subr.bf16.mxu1 %v10252_v4  ;;  %v10339_v3 = vld [vmem:[%s13950_s1 + $0x1a64] ss:$16 sps:$4 sm:$0xff]   ;;  %v10342_v4 = vld [vmem:[%s13950_s1 + $0x1a6c] ss:$16 sps:$4 sm:$0xff]  }
 0x313   :  { %6877 = vmatpush1.bf16.msra.mxu0 %v10247_v5  ;;  %7565 = vmatpush1.bf16.msra.mxu1 %v10250_v6  ;;  %v10337_v5 = vld [vmem:[%s13950_s1 + $0x1a60] ss:$16 sps:$4 sm:$0xff]   ;;  %v10340_v6 = vld [vmem:[%s13950_s1 + $0x1a68] ss:$16 sps:$4 sm:$0xff]  }
 0x314   :  { %6878 = vmatprep.subr.bf16.mxu0 %v10255_v7  ;;  %7566 = vmatprep.subr.bf16.mxu1 %v10258_v8  ;;  %v10345_v7 = vld [vmem:[%s13950_s1 + $0x1a84] ss:$16 sps:$4 sm:$0xff]   ;;  %v10348_v8 = vld [vmem:[%s13950_s1 + $0x1a8c] ss:$16 sps:$4 sm:$0xff]  }
 0x317   :  { %6879 = vmatpush1.bf16.msra.mxu0 %v10253_v9  ;;  %7567 = vmatpush1.bf16.msra.mxu1 %v10256_v10  ;;  %v10343_v9 = vld [vmem:[%s13950_s1 + $0x1a80] ss:$16 sps:$4 sm:$0xff]   ;;  %v10346_v10 = vld [vmem:[%s13950_s1 + $0x1a88] ss:$16 sps:$4 sm:$0xff]  }
 0x318   :  { %6880 = vmatprep.subr.bf16.mxu0 %v10261_v11  ;;  %7568 = vmatprep.subr.bf16.mxu1 %v10264_v12  ;;  %v10351_v11 = vld [vmem:[%s13950_s1 + $0x1aa4] ss:$16 sps:$4 sm:$0xff]   ;;  %v10354_v12 = vld [vmem:[%s13950_s1 + $0x1aac] ss:$16 sps:$4 sm:$0xff]  }
 0x31b   :  { %6881 = vmatpush1.bf16.msra.mxu0 %v10259_v13  ;;  %7569 = vmatpush1.bf16.msra.mxu1 %v10262_v16  ;;  %v10349_v13 = vld [vmem:[%s13950_s1 + $0x1aa0] ss:$16 sps:$4 sm:$0xff]   ;;  %v10352_v16 = vld [vmem:[%s13950_s1 + $0x1aa8] ss:$16 sps:$4 sm:$0xff]  }
 0x31c   :  { %6882 = vmatprep.subr.bf16.mxu0 %v10267_v17  ;;  %7570 = vmatprep.subr.bf16.mxu1 %v10270_v20  ;;  %v10357_v17 = vld [vmem:[%s13950_s1 + $0x1ac4] ss:$16 sps:$4 sm:$0xff]   ;;  %v10360_v20 = vld [vmem:[%s13950_s1 + $0x1acc] ss:$16 sps:$4 sm:$0xff]  }
 0x31f   :  { %6883 = vmatpush1.bf16.msra.mxu0 %v10265_v15  ;;  %7571 = vmatpush1.bf16.msra.mxu1 %v10268_v22  ;;  %v10355_v15 = vld [vmem:[%s13950_s1 + $0x1ac0] ss:$16 sps:$4 sm:$0xff]   ;;  %v10358_v22 = vld [vmem:[%s13950_s1 + $0x1ac8] ss:$16 sps:$4 sm:$0xff]  }
 0x320   :  { %6884 = vmatprep.subr.bf16.mxu0 %v10273_v23  ;;  %7572 = vmatprep.subr.bf16.mxu1 %v10276_v18  ;;  %v10363_v23 = vld [vmem:[%s13950_s1 + $0x1ae4] ss:$16 sps:$4 sm:$0xff]   ;;  %v10366_v18 = vld [vmem:[%s13950_s1 + $0x1aec] ss:$16 sps:$4 sm:$0xff]  }
 0x323   :  { %6885 = vmatpush1.bf16.msra.mxu0 %v10271_v25  ;;  %7573 = vmatpush1.bf16.msra.mxu1 %v10274_v26  ;;  %v10361_v25 = vld [vmem:[%s13950_s1 + $0x1ae0] ss:$16 sps:$4 sm:$0xff]   ;;  %v10364_v26 = vld [vmem:[%s13950_s1 + $0x1ae8] ss:$16 sps:$4 sm:$0xff]  }
 0x324   :  { %6886 = vmatprep.subr.bf16.mxu0 %v10279_v27  ;;  %7574 = vmatprep.subr.bf16.mxu1 %v10282_v28  ;;  %v10369_v27 = vld [vmem:[%s13950_s1 + $0x1b04] ss:$16 sps:$4 sm:$0xff]   ;;  %v10372_v28 = vld [vmem:[%s13950_s1 + $0x1b0c] ss:$16 sps:$4 sm:$0xff]  }
 0x327   :  { %6887 = vmatpush1.bf16.msra.mxu0 %v10277_v29  ;;  %7575 = vmatpush1.bf16.msra.mxu1 %v10280_v30  ;;  %v10367_v29 = vld [vmem:[%s13950_s1 + $0x1b00] ss:$16 sps:$4 sm:$0xff]   ;;  %v10370_v30 = vld [vmem:[%s13950_s1 + $0x1b08] ss:$16 sps:$4 sm:$0xff]  }
 0x328   :  { %6888 = vmatprep.subr.bf16.mxu0 %v10285_v31  ;;  %7576 = vmatprep.subr.bf16.mxu1 %v10288_v32  ;;  %v10375_v31 = vld [vmem:[%s13950_s1 + $0x1b24] ss:$16 sps:$4 sm:$0xff]   ;;  %v10378_v32 = vld [vmem:[%s13950_s1 + $0x1b2c] ss:$16 sps:$4 sm:$0xff]  }
 0x32b   :  { %6889 = vmatpush1.bf16.msra.mxu0 %v10283_v33  ;;  %7577 = vmatpush1.bf16.msra.mxu1 %v10286_v34  ;;  %v10373_v33 = vld [vmem:[%s13950_s1 + $0x1b20] ss:$16 sps:$4 sm:$0xff]   ;;  %v10376_v34 = vld [vmem:[%s13950_s1 + $0x1b28] ss:$16 sps:$4 sm:$0xff]  }
 0x32c   :  { %6890 = vmatprep.subr.bf16.mxu0 %v10291_v35  ;;  %7578 = vmatprep.subr.bf16.mxu1 %v10294_v36  ;;  %v10381_v35 = vld [vmem:[%s13950_s1 + $0x1b44] ss:$16 sps:$4 sm:$0xff]   ;;  %v10384_v36 = vld [vmem:[%s13950_s1 + $0x1b4c] ss:$16 sps:$4 sm:$0xff]  }
 0x32f   :  { %6891 = vmatpush1.bf16.msra.mxu0 %v10289_v37  ;;  %7579 = vmatpush1.bf16.msra.mxu1 %v10292_v38  ;;  %v10379_v37 = vld [vmem:[%s13950_s1 + $0x1b40] ss:$16 sps:$4 sm:$0xff]   ;;  %v10382_v38 = vld [vmem:[%s13950_s1 + $0x1b48] ss:$16 sps:$4 sm:$0xff]  }
 0x330   :  { %6892 = vmatprep.subr.bf16.mxu0 %v10297_v39  ;;  %7580 = vmatprep.subr.bf16.mxu1 %v10300_v40  ;;  %v10387_v39 = vld [vmem:[%s13950_s1 + $0x1b64] ss:$16 sps:$4 sm:$0xff]   ;;  %v10390_v40 = vld [vmem:[%s13950_s1 + $0x1b6c] ss:$16 sps:$4 sm:$0xff]  }
 0x333   :  { %6893 = vmatpush1.bf16.msra.mxu0 %v10295_v41  ;;  %7581 = vmatpush1.bf16.msra.mxu1 %v10298_v42  ;;  %v10385_v41 = vld [vmem:[%s13950_s1 + $0x1b60] ss:$16 sps:$4 sm:$0xff]   ;;  %v10388_v42 = vld [vmem:[%s13950_s1 + $0x1b68] ss:$16 sps:$4 sm:$0xff]  }
 0x334   :  { %6894 = vmatprep.subr.bf16.mxu0 %v10303_v43  ;;  %7582 = vmatprep.subr.bf16.mxu1 %v10306_v44  ;;  %v10393_v43 = vld [vmem:[%s13950_s1 + $0x1b84] ss:$16 sps:$4 sm:$0xff]   ;;  %v10396_v44 = vld [vmem:[%s13950_s1 + $0x1b8c] ss:$16 sps:$4 sm:$0xff]  }
 0x337   :  { %6895 = vmatpush1.bf16.msra.mxu0 %v10301_v14  ;;  %7583 = vmatpush1.bf16.msra.mxu1 %v10304_v46  ;;  %v10391_v14 = vld [vmem:[%s13950_s1 + $0x1b80] ss:$16 sps:$4 sm:$0xff]   ;;  %v10394_v46 = vld [vmem:[%s13950_s1 + $0x1b88] ss:$16 sps:$4 sm:$0xff]  }
 0x338   :  { %6896 = vmatprep.subr.bf16.mxu0 %v10309_v19  ;;  %7584 = vmatprep.subr.bf16.mxu1 %v10312_v24  ;;  %v10399_v19 = vld [vmem:[%s13950_s1 + $0x1ba4] ss:$16 sps:$4 sm:$0xff]   ;;  %v10402_v24 = vld [vmem:[%s13950_s1 + $0x1bac] ss:$16 sps:$4 sm:$0xff]  }
 0x33b   :  { %6897 = vmatpush1.bf16.msra.mxu0 %v10307_v47  ;;  %7585 = vmatpush1.bf16.msra.mxu1 %v10310_v50  ;;  %v10397_v47 = vld [vmem:[%s13950_s1 + $0x1ba0] ss:$16 sps:$4 sm:$0xff]   ;;  %v10400_v50 = vld [vmem:[%s13950_s1 + $0x1ba8] ss:$16 sps:$4 sm:$0xff]  }
 0x33c   :  { %6898 = vmatprep.subr.bf16.mxu0 %v10315_v21  ;;  %7586 = vmatprep.subr.bf16.mxu1 %v10318_v45  ;;  %v10405_v21 = vld [vmem:[%s13950_s1 + $0x1bc4] ss:$16 sps:$4 sm:$0xff]   ;;  %v10408_v45 = vld [vmem:[%s13950_s1 + $0x1bcc] ss:$16 sps:$4 sm:$0xff]  }
 0x33f   :  { %6899 = vmatpush1.bf16.msra.mxu0 %v10313_v51  ;;  %7587 = vmatpush1.bf16.msra.mxu1 %v10316_v54  ;;  %v10403_v51 = vld [vmem:[%s13950_s1 + $0x1bc0] ss:$16 sps:$4 sm:$0xff]   ;;  %v10406_v54 = vld [vmem:[%s13950_s1 + $0x1bc8] ss:$16 sps:$4 sm:$0xff]  }
 0x340   :  { %6911 = vmatprep.subr.bf16.mxu0 %v10321_v48  ;;  %7599 = vmatprep.subr.bf16.mxu1 %v10324_v49  ;;  %v10411_v48 = vld [vmem:[%s13950_s1 + $0x1be4] ss:$16 sps:$4 sm:$0xff]   ;;  %v10414_v49 = vld [vmem:[%s13950_s1 + $0x1bec] ss:$16 sps:$4 sm:$0xff]  }
 0x342   :  { %6901 = vmatmul.mubr.bf16.vlgmr.msra.gmra.mrb[0].mxu0 %v7910_v55  ;;  %7589 = vmatmul.mubr.bf16.vlgmr.msra.gmra.mrb[0].mxu1 %v7910_v55  ;;  %v10409_v55 = vld [vmem:[%s13950_s1 + $0x1be0] ss:$16 sps:$4 sm:$0xff]  }
 0x343   :  { %6912 = vmatpush1.bf16.msra.mxu0 %v10319_v58  ;;  %7600 = vmatpush1.bf16.msra.mxu1 %v10322_v52  ;;  %v10412_v58 = vld [vmem:[%s13950_s1 + $0x1be8] ss:$16 sps:$4 sm:$0xff]   ;;  %v10417_v52 = vld [vmem:[%s13950_s1 + $0x1c04] ss:$16 sps:$4 sm:$0xff]  }
 0x344   :  { %6913 = vmatprep.subr.bf16.mxu0 %v10327_v53  ;;  %7601 = vmatprep.subr.bf16.mxu1 %v10330_v59  ;;  %v10420_v53 = vld [vmem:[%s13950_s1 + $0x1c0c] ss:$16 sps:$4 sm:$0xff]   ;;  %v7912_v59 = vcombine.low %v13312_v56, %v13317_v57  ;;  %v10418_v56 = vld [vmem:[%s13950_s1 + $0x1c08] ss:$16 sps:$4 sm:$0xff]   ;;  %v10423_v57 = vld [vmem:[%s13950_s1 + $0x1c24] ss:$16 sps:$4 sm:$0xff]  }
 0x345   :  { %6943 = vmatprep.mubr.bf16.mxu0 %v7913_v60  ;;  %7631 = vmatprep.mubr.bf16.mxu1 %v7913_v60  ;;  %v13518_v60 = vld [vmem:[%s13951_s0 + $0x70] sm:$0xff] }
 0x347   :  { %6914 = vmatpush1.bf16.msra.mxu0 %v10325_v61  ;;  %7602 = vmatpush1.bf16.msra.mxu1 %v10328_v62  ;;  %v13523_v61 = vld [vmem:[%s13951_s0 + $0xf0] sm:$0xff] }
 0x348   :  { %6915 = vmatprep.subr.bf16.mxu0 %v10333_v63  ;;  %7603 = vmatprep.subr.bf16.mxu1 %v10336_v0  ;;  %v10415_v62 = vld [vmem:[%s13950_s1 + $0x1c00] ss:$16 sps:$4 sm:$0xff]   ;;  %v10426_v63 = vld [vmem:[%s13950_s1 + $0x1c2c] ss:$16 sps:$4 sm:$0xff]   ;;  %v7915_v0 = vcombine.high %v13518_v60, %v13523_v61 }
 0x34b   :  { %6916 = vmatpush1.bf16.msra.mxu0 %v10331_v1  ;;  %7604 = vmatpush1.bf16.msra.mxu1 %v10334_v2  ;;  %v10421_v1 = vld [vmem:[%s13950_s1 + $0x1c20] ss:$16 sps:$4 sm:$0xff]   ;;  %v10424_v2 = vld [vmem:[%s13950_s1 + $0x1c28] ss:$16 sps:$4 sm:$0xff]  }
 0x34c   :  { %6917 = vmatprep.subr.bf16.mxu0 %v10339_v3  ;;  %7605 = vmatprep.subr.bf16.mxu1 %v10342_v4  ;;  %v10429_v3 = vld [vmem:[%s13950_s1 + $0x1c44] ss:$16 sps:$4 sm:$0xff]   ;;  %v10432_v4 = vld [vmem:[%s13950_s1 + $0x1c4c] ss:$16 sps:$4 sm:$0xff]  }
 0x34f   :  { %6918 = vmatpush1.bf16.msra.mxu0 %v10337_v5  ;;  %7606 = vmatpush1.bf16.msra.mxu1 %v10340_v6  ;;  %v10427_v5 = vld [vmem:[%s13950_s1 + $0x1c40] ss:$16 sps:$4 sm:$0xff]   ;;  %v10430_v6 = vld [vmem:[%s13950_s1 + $0x1c48] ss:$16 sps:$4 sm:$0xff]  }
 0x350   :  { %6919 = vmatprep.subr.bf16.mxu0 %v10345_v7  ;;  %7607 = vmatprep.subr.bf16.mxu1 %v10348_v8  ;;  %v10435_v7 = vld [vmem:[%s13950_s1 + $0x1c64] ss:$16 sps:$4 sm:$0xff]   ;;  %v10438_v8 = vld [vmem:[%s13950_s1 + $0x1c6c] ss:$16 sps:$4 sm:$0xff]  }
 0x353   :  { %6920 = vmatpush1.bf16.msra.mxu0 %v10343_v9  ;;  %7608 = vmatpush1.bf16.msra.mxu1 %v10346_v10  ;;  %v10433_v9 = vld [vmem:[%s13950_s1 + $0x1c60] ss:$16 sps:$4 sm:$0xff]   ;;  %v10436_v10 = vld [vmem:[%s13950_s1 + $0x1c68] ss:$16 sps:$4 sm:$0xff]  }
 0x354   :  { %6921 = vmatprep.subr.bf16.mxu0 %v10351_v11  ;;  %7609 = vmatprep.subr.bf16.mxu1 %v10354_v12  ;;  %v10441_v11 = vld [vmem:[%s13950_s1 + $0x1c84] ss:$16 sps:$4 sm:$0xff]   ;;  %v10444_v12 = vld [vmem:[%s13950_s1 + $0x1c8c] ss:$16 sps:$4 sm:$0xff]  }
 0x357   :  { %6922 = vmatpush1.bf16.msra.mxu0 %v10349_v13  ;;  %7610 = vmatpush1.bf16.msra.mxu1 %v10352_v16  ;;  %v10439_v13 = vld [vmem:[%s13950_s1 + $0x1c80] ss:$16 sps:$4 sm:$0xff]   ;;  %v10442_v16 = vld [vmem:[%s13950_s1 + $0x1c88] ss:$16 sps:$4 sm:$0xff]  }
 0x358   :  { %6923 = vmatprep.subr.bf16.mxu0 %v10357_v17  ;;  %7611 = vmatprep.subr.bf16.mxu1 %v10360_v20  ;;  %v10447_v17 = vld [vmem:[%s13950_s1 + $0x1ca4] ss:$16 sps:$4 sm:$0xff]   ;;  %v10450_v20 = vld [vmem:[%s13950_s1 + $0x1cac] ss:$16 sps:$4 sm:$0xff]  }
 0x35b   :  { %6924 = vmatpush1.bf16.msra.mxu0 %v10355_v15  ;;  %7612 = vmatpush1.bf16.msra.mxu1 %v10358_v22  ;;  %v10445_v15 = vld [vmem:[%s13950_s1 + $0x1ca0] ss:$16 sps:$4 sm:$0xff]   ;;  %v10448_v22 = vld [vmem:[%s13950_s1 + $0x1ca8] ss:$16 sps:$4 sm:$0xff]  }
 0x35c   :  { %6925 = vmatprep.subr.bf16.mxu0 %v10363_v23  ;;  %7613 = vmatprep.subr.bf16.mxu1 %v10366_v18  ;;  %v10453_v23 = vld [vmem:[%s13950_s1 + $0x1cc4] ss:$16 sps:$4 sm:$0xff]   ;;  %v10456_v18 = vld [vmem:[%s13950_s1 + $0x1ccc] ss:$16 sps:$4 sm:$0xff]  }
 0x35f   :  { %6926 = vmatpush1.bf16.msra.mxu0 %v10361_v25  ;;  %7614 = vmatpush1.bf16.msra.mxu1 %v10364_v26  ;;  %v10451_v25 = vld [vmem:[%s13950_s1 + $0x1cc0] ss:$16 sps:$4 sm:$0xff]   ;;  %v10454_v26 = vld [vmem:[%s13950_s1 + $0x1cc8] ss:$16 sps:$4 sm:$0xff]  }
 0x360   :  { %6927 = vmatprep.subr.bf16.mxu0 %v10369_v27  ;;  %7615 = vmatprep.subr.bf16.mxu1 %v10372_v28  ;;  %v10459_v27 = vld [vmem:[%s13950_s1 + $0x1ce4] ss:$16 sps:$4 sm:$0xff]   ;;  %v10462_v28 = vld [vmem:[%s13950_s1 + $0x1cec] ss:$16 sps:$4 sm:$0xff]  }
 0x363   :  { %6928 = vmatpush1.bf16.msra.mxu0 %v10367_v29  ;;  %7616 = vmatpush1.bf16.msra.mxu1 %v10370_v30  ;;  %v10457_v29 = vld [vmem:[%s13950_s1 + $0x1ce0] ss:$16 sps:$4 sm:$0xff]   ;;  %v10460_v30 = vld [vmem:[%s13950_s1 + $0x1ce8] ss:$16 sps:$4 sm:$0xff]  }
 0x364   :  { %6929 = vmatprep.subr.bf16.mxu0 %v10375_v31  ;;  %7617 = vmatprep.subr.bf16.mxu1 %v10378_v32  ;;  %v10465_v31 = vld [vmem:[%s13950_s1 + $0x1d04] ss:$16 sps:$4 sm:$0xff]   ;;  %v10468_v32 = vld [vmem:[%s13950_s1 + $0x1d0c] ss:$16 sps:$4 sm:$0xff]  }
 0x367   :  { %6930 = vmatpush1.bf16.msra.mxu0 %v10373_v33  ;;  %7618 = vmatpush1.bf16.msra.mxu1 %v10376_v34  ;;  %v10463_v33 = vld [vmem:[%s13950_s1 + $0x1d00] ss:$16 sps:$4 sm:$0xff]   ;;  %v10466_v34 = vld [vmem:[%s13950_s1 + $0x1d08] ss:$16 sps:$4 sm:$0xff]  }
 0x368   :  { %6931 = vmatprep.subr.bf16.mxu0 %v10381_v35  ;;  %7619 = vmatprep.subr.bf16.mxu1 %v10384_v36  ;;  %v10471_v35 = vld [vmem:[%s13950_s1 + $0x1d24] ss:$16 sps:$4 sm:$0xff]   ;;  %v10474_v36 = vld [vmem:[%s13950_s1 + $0x1d2c] ss:$16 sps:$4 sm:$0xff]  }
 0x36b   :  { %6932 = vmatpush1.bf16.msra.mxu0 %v10379_v37  ;;  %7620 = vmatpush1.bf16.msra.mxu1 %v10382_v38  ;;  %v10469_v37 = vld [vmem:[%s13950_s1 + $0x1d20] ss:$16 sps:$4 sm:$0xff]   ;;  %v10472_v38 = vld [vmem:[%s13950_s1 + $0x1d28] ss:$16 sps:$4 sm:$0xff]  }
 0x36c   :  { %6933 = vmatprep.subr.bf16.mxu0 %v10387_v39  ;;  %7621 = vmatprep.subr.bf16.mxu1 %v10390_v40  ;;  %v10477_v39 = vld [vmem:[%s13950_s1 + $0x1d44] ss:$16 sps:$4 sm:$0xff]   ;;  %v10480_v40 = vld [vmem:[%s13950_s1 + $0x1d4c] ss:$16 sps:$4 sm:$0xff]  }
 0x36f   :  { %6934 = vmatpush1.bf16.msra.mxu0 %v10385_v41  ;;  %7622 = vmatpush1.bf16.msra.mxu1 %v10388_v42  ;;  %v10475_v41 = vld [vmem:[%s13950_s1 + $0x1d40] ss:$16 sps:$4 sm:$0xff]   ;;  %v10478_v42 = vld [vmem:[%s13950_s1 + $0x1d48] ss:$16 sps:$4 sm:$0xff]  }
 0x370   :  { %6935 = vmatprep.subr.bf16.mxu0 %v10393_v43  ;;  %7623 = vmatprep.subr.bf16.mxu1 %v10396_v44  ;;  %v10483_v43 = vld [vmem:[%s13950_s1 + $0x1d64] ss:$16 sps:$4 sm:$0xff]   ;;  %v10486_v44 = vld [vmem:[%s13950_s1 + $0x1d6c] ss:$16 sps:$4 sm:$0xff]  }
 0x373   :  { %6936 = vmatpush1.bf16.msra.mxu0 %v10391_v14  ;;  %7624 = vmatpush1.bf16.msra.mxu1 %v10394_v46  ;;  %v10481_v14 = vld [vmem:[%s13950_s1 + $0x1d60] ss:$16 sps:$4 sm:$0xff]   ;;  %v10484_v46 = vld [vmem:[%s13950_s1 + $0x1d68] ss:$16 sps:$4 sm:$0xff]  }
 0x374   :  { %6937 = vmatprep.subr.bf16.mxu0 %v10399_v19  ;;  %7625 = vmatprep.subr.bf16.mxu1 %v10402_v24  ;;  %v10489_v19 = vld [vmem:[%s13950_s1 + $0x1d84] ss:$16 sps:$4 sm:$0xff]   ;;  %v10492_v24 = vld [vmem:[%s13950_s1 + $0x1d8c] ss:$16 sps:$4 sm:$0xff]  }
 0x377   :  { %6938 = vmatpush1.bf16.msra.mxu0 %v10397_v47  ;;  %7626 = vmatpush1.bf16.msra.mxu1 %v10400_v50  ;;  %v10487_v47 = vld [vmem:[%s13950_s1 + $0x1d80] ss:$16 sps:$4 sm:$0xff]   ;;  %v10490_v50 = vld [vmem:[%s13950_s1 + $0x1d88] ss:$16 sps:$4 sm:$0xff]  }
 0x378   :  { %6939 = vmatprep.subr.bf16.mxu0 %v10405_v21  ;;  %7627 = vmatprep.subr.bf16.mxu1 %v10408_v45  ;;  %v10495_v21 = vld [vmem:[%s13950_s1 + $0x1da4] ss:$16 sps:$4 sm:$0xff]   ;;  %v10498_v45 = vld [vmem:[%s13950_s1 + $0x1dac] ss:$16 sps:$4 sm:$0xff]  }
 0x37b   :  { %6940 = vmatpush1.bf16.msra.mxu0 %v10403_v51  ;;  %7628 = vmatpush1.bf16.msra.mxu1 %v10406_v54  ;;  %v10493_v51 = vld [vmem:[%s13950_s1 + $0x1da0] ss:$16 sps:$4 sm:$0xff]   ;;  %v10496_v54 = vld [vmem:[%s13950_s1 + $0x1da8] ss:$16 sps:$4 sm:$0xff]  }
 0x37c   :  { %6941 = vmatprep.subr.bf16.mxu0 %v10411_v48  ;;  %7629 = vmatprep.subr.bf16.mxu1 %v10414_v49  ;;  %v10501_v48 = vld [vmem:[%s13950_s1 + $0x1dc4] ss:$16 sps:$4 sm:$0xff]   ;;  %v10504_v49 = vld [vmem:[%s13950_s1 + $0x1dcc] ss:$16 sps:$4 sm:$0xff]  }
 0x37f   :  { %6942 = vmatpush1.bf16.msra.mxu0 %v10409_v55  ;;  %7630 = vmatpush1.bf16.msra.mxu1 %v10412_v58  ;;  %v10499_v55 = vld [vmem:[%s13950_s1 + $0x1dc0] ss:$16 sps:$4 sm:$0xff]   ;;  %v10502_v58 = vld [vmem:[%s13950_s1 + $0x1dc8] ss:$16 sps:$4 sm:$0xff]  }
 0x380   :  { %6954 = vmatprep.subr.bf16.mxu0 %v10417_v52  ;;  %7642 = vmatprep.subr.bf16.mxu1 %v10420_v53  ;;  %v10507_v52 = vld [vmem:[%s13950_s1 + $0x1de4] ss:$16 sps:$4 sm:$0xff]   ;;  %v10510_v53 = vld [vmem:[%s13950_s1 + $0x1dec] ss:$16 sps:$4 sm:$0xff]  }
 0x382   :  { %6944 = vmatmul.mubr.bf16.vlgmr.msra.gmra.mrb[0].mxu0 %v7912_v59  ;;  %7632 = vmatmul.mubr.bf16.vlgmr.msra.gmra.mrb[0].mxu1 %v7912_v59  ;;  %v10505_v59 = vld [vmem:[%s13950_s1 + $0x1de0] ss:$16 sps:$4 sm:$0xff]  }
 0x383   :  { %6955 = vmatpush1.bf16.msra.mxu0 %v10415_v62  ;;  %7643 = vmatpush1.bf16.msra.mxu1 %v10418_v56  ;;  %v10508_v62 = vld [vmem:[%s13950_s1 + $0x1de8] ss:$16 sps:$4 sm:$0xff]   ;;  %v10513_v56 = vld [vmem:[%s13950_s1 + $0x1e04] ss:$16 sps:$4 sm:$0xff]  }
 0x384   :  { %6956 = vmatprep.subr.bf16.mxu0 %v10423_v57  ;;  %7644 = vmatprep.subr.bf16.mxu1 %v10426_v63  ;;  %v10516_v57 = vld [vmem:[%s13950_s1 + $0x1e0c] ss:$16 sps:$4 sm:$0xff]   ;;  %v7914_v63 = vcombine.low %v13518_v60, %v13523_v61  ;;  %v10514_v60 = vld [vmem:[%s13950_s1 + $0x1e08] ss:$16 sps:$4 sm:$0xff]   ;;  %v10519_v61 = vld [vmem:[%s13950_s1 + $0x1e24] ss:$16 sps:$4 sm:$0xff]  }
 0x385   :  { %6986 = vmatprep.mubr.bf16.mxu0 %v7915_v0  ;;  %7674 = vmatprep.mubr.bf16.mxu1 %v7915_v0  ;;  %v13724_v0 = vld [vmem:[%s13951_s0 + $0x78] sm:$0xff] }
 0x387   :  { %6957 = vmatpush1.bf16.msra.mxu0 %v10421_v1  ;;  %7645 = vmatpush1.bf16.msra.mxu1 %v10424_v2  ;;  %v13729_v1 = vld [vmem:[%s13951_s0 + $0xf8] sm:$0xff]  ;;  %v10511_v2 = vld [vmem:[%s13950_s1 + $0x1e00] ss:$16 sps:$4 sm:$0xff]  }
 0x388   :  { %6958 = vmatprep.subr.bf16.mxu0 %v10429_v3  ;;  %7646 = vmatprep.subr.bf16.mxu1 %v10432_v4  ;;  %v10522_v3 = vld [vmem:[%s13950_s1 + $0x1e2c] ss:$16 sps:$4 sm:$0xff]   ;;  %v7917_v4 = vcombine.high %v13724_v0, %v13729_v1 }
 0x38b   :  { %6959 = vmatpush1.bf16.msra.mxu0 %v10427_v5  ;;  %7647 = vmatpush1.bf16.msra.mxu1 %v10430_v6  ;;  %v10517_v5 = vld [vmem:[%s13950_s1 + $0x1e20] ss:$16 sps:$4 sm:$0xff]   ;;  %v10520_v6 = vld [vmem:[%s13950_s1 + $0x1e28] ss:$16 sps:$4 sm:$0xff]  }
 0x38c   :  { %6960 = vmatprep.subr.bf16.mxu0 %v10435_v7  ;;  %7648 = vmatprep.subr.bf16.mxu1 %v10438_v8  ;;  %v10525_v7 = vld [vmem:[%s13950_s1 + $0x1e44] ss:$16 sps:$4 sm:$0xff]   ;;  %v10528_v8 = vld [vmem:[%s13950_s1 + $0x1e4c] ss:$16 sps:$4 sm:$0xff]  }
 0x38f   :  { %6961 = vmatpush1.bf16.msra.mxu0 %v10433_v9  ;;  %7649 = vmatpush1.bf16.msra.mxu1 %v10436_v10  ;;  %v10523_v9 = vld [vmem:[%s13950_s1 + $0x1e40] ss:$16 sps:$4 sm:$0xff]   ;;  %v10526_v10 = vld [vmem:[%s13950_s1 + $0x1e48] ss:$16 sps:$4 sm:$0xff]  }
 0x390   :  { %6962 = vmatprep.subr.bf16.mxu0 %v10441_v11  ;;  %7650 = vmatprep.subr.bf16.mxu1 %v10444_v12  ;;  %v10531_v11 = vld [vmem:[%s13950_s1 + $0x1e64] ss:$16 sps:$4 sm:$0xff]   ;;  %v10534_v12 = vld [vmem:[%s13950_s1 + $0x1e6c] ss:$16 sps:$4 sm:$0xff]  }
 0x393   :  { %6963 = vmatpush1.bf16.msra.mxu0 %v10439_v13  ;;  %7651 = vmatpush1.bf16.msra.mxu1 %v10442_v16  ;;  %v10529_v13 = vld [vmem:[%s13950_s1 + $0x1e60] ss:$16 sps:$4 sm:$0xff]   ;;  %v10532_v16 = vld [vmem:[%s13950_s1 + $0x1e68] ss:$16 sps:$4 sm:$0xff]  }
 0x394   :  { %6964 = vmatprep.subr.bf16.mxu0 %v10447_v17  ;;  %7652 = vmatprep.subr.bf16.mxu1 %v10450_v20  ;;  %v10537_v17 = vld [vmem:[%s13950_s1 + $0x1e84] ss:$16 sps:$4 sm:$0xff]   ;;  %v10540_v20 = vld [vmem:[%s13950_s1 + $0x1e8c] ss:$16 sps:$4 sm:$0xff]  }
 0x397   :  { %6965 = vmatpush1.bf16.msra.mxu0 %v10445_v15  ;;  %7653 = vmatpush1.bf16.msra.mxu1 %v10448_v22  ;;  %v10535_v15 = vld [vmem:[%s13950_s1 + $0x1e80] ss:$16 sps:$4 sm:$0xff]   ;;  %v10538_v22 = vld [vmem:[%s13950_s1 + $0x1e88] ss:$16 sps:$4 sm:$0xff]  }
 0x398   :  { %6966 = vmatprep.subr.bf16.mxu0 %v10453_v23  ;;  %7654 = vmatprep.subr.bf16.mxu1 %v10456_v18  ;;  %v10543_v23 = vld [vmem:[%s13950_s1 + $0x1ea4] ss:$16 sps:$4 sm:$0xff]   ;;  %v10546_v18 = vld [vmem:[%s13950_s1 + $0x1eac] ss:$16 sps:$4 sm:$0xff]  }
 0x39b   :  { %6967 = vmatpush1.bf16.msra.mxu0 %v10451_v25  ;;  %7655 = vmatpush1.bf16.msra.mxu1 %v10454_v26  ;;  %v10541_v25 = vld [vmem:[%s13950_s1 + $0x1ea0] ss:$16 sps:$4 sm:$0xff]   ;;  %v10544_v26 = vld [vmem:[%s13950_s1 + $0x1ea8] ss:$16 sps:$4 sm:$0xff]  }
 0x39c   :  { %6968 = vmatprep.subr.bf16.mxu0 %v10459_v27  ;;  %7656 = vmatprep.subr.bf16.mxu1 %v10462_v28  ;;  %v10549_v27 = vld [vmem:[%s13950_s1 + $0x1ec4] ss:$16 sps:$4 sm:$0xff]   ;;  %v10552_v28 = vld [vmem:[%s13950_s1 + $0x1ecc] ss:$16 sps:$4 sm:$0xff]  }
 0x39f   :  { %6969 = vmatpush1.bf16.msra.mxu0 %v10457_v29  ;;  %7657 = vmatpush1.bf16.msra.mxu1 %v10460_v30  ;;  %v10547_v29 = vld [vmem:[%s13950_s1 + $0x1ec0] ss:$16 sps:$4 sm:$0xff]   ;;  %v10550_v30 = vld [vmem:[%s13950_s1 + $0x1ec8] ss:$16 sps:$4 sm:$0xff]  }
 0x3a0   :  { %6970 = vmatprep.subr.bf16.mxu0 %v10465_v31  ;;  %7658 = vmatprep.subr.bf16.mxu1 %v10468_v32  ;;  %v10555_v31 = vld [vmem:[%s13950_s1 + $0x1ee4] ss:$16 sps:$4 sm:$0xff]   ;;  %v10558_v32 = vld [vmem:[%s13950_s1 + $0x1eec] ss:$16 sps:$4 sm:$0xff]  }
 0x3a3   :  { %6971 = vmatpush1.bf16.msra.mxu0 %v10463_v33  ;;  %7659 = vmatpush1.bf16.msra.mxu1 %v10466_v34  ;;  %v10553_v33 = vld [vmem:[%s13950_s1 + $0x1ee0] ss:$16 sps:$4 sm:$0xff]   ;;  %v10556_v34 = vld [vmem:[%s13950_s1 + $0x1ee8] ss:$16 sps:$4 sm:$0xff]  }
 0x3a4   :  { %6972 = vmatprep.subr.bf16.mxu0 %v10471_v35  ;;  %7660 = vmatprep.subr.bf16.mxu1 %v10474_v36  ;;  %v10561_v35 = vld [vmem:[%s13950_s1 + $0x1f04] ss:$16 sps:$4 sm:$0xff]   ;;  %v10564_v36 = vld [vmem:[%s13950_s1 + $0x1f0c] ss:$16 sps:$4 sm:$0xff]  }
 0x3a7   :  { %6973 = vmatpush1.bf16.msra.mxu0 %v10469_v37  ;;  %7661 = vmatpush1.bf16.msra.mxu1 %v10472_v38  ;;  %v10559_v37 = vld [vmem:[%s13950_s1 + $0x1f00] ss:$16 sps:$4 sm:$0xff]   ;;  %v10562_v38 = vld [vmem:[%s13950_s1 + $0x1f08] ss:$16 sps:$4 sm:$0xff]  }
 0x3a8   :  { %6974 = vmatprep.subr.bf16.mxu0 %v10477_v39  ;;  %7662 = vmatprep.subr.bf16.mxu1 %v10480_v40  ;;  %v10567_v39 = vld [vmem:[%s13950_s1 + $0x1f24] ss:$16 sps:$4 sm:$0xff]   ;;  %v10570_v40 = vld [vmem:[%s13950_s1 + $0x1f2c] ss:$16 sps:$4 sm:$0xff]  }
 0x3ab   :  { %6975 = vmatpush1.bf16.msra.mxu0 %v10475_v41  ;;  %7663 = vmatpush1.bf16.msra.mxu1 %v10478_v42  ;;  %v10565_v41 = vld [vmem:[%s13950_s1 + $0x1f20] ss:$16 sps:$4 sm:$0xff]   ;;  %v10568_v42 = vld [vmem:[%s13950_s1 + $0x1f28] ss:$16 sps:$4 sm:$0xff]  }
 0x3ac   :  { %6976 = vmatprep.subr.bf16.mxu0 %v10483_v43  ;;  %7664 = vmatprep.subr.bf16.mxu1 %v10486_v44  ;;  %v10573_v43 = vld [vmem:[%s13950_s1 + $0x1f44] ss:$16 sps:$4 sm:$0xff]   ;;  %v10576_v44 = vld [vmem:[%s13950_s1 + $0x1f4c] ss:$16 sps:$4 sm:$0xff]  }
 0x3af   :  { %6977 = vmatpush1.bf16.msra.mxu0 %v10481_v14  ;;  %7665 = vmatpush1.bf16.msra.mxu1 %v10484_v46  ;;  %v10571_v14 = vld [vmem:[%s13950_s1 + $0x1f40] ss:$16 sps:$4 sm:$0xff]   ;;  %v10574_v46 = vld [vmem:[%s13950_s1 + $0x1f48] ss:$16 sps:$4 sm:$0xff]  }
 0x3b0   :  { %6978 = vmatprep.subr.bf16.mxu0 %v10489_v19  ;;  %7666 = vmatprep.subr.bf16.mxu1 %v10492_v24  ;;  %v10579_v19 = vld [vmem:[%s13950_s1 + $0x1f64] ss:$16 sps:$4 sm:$0xff]   ;;  %v10582_v24 = vld [vmem:[%s13950_s1 + $0x1f6c] ss:$16 sps:$4 sm:$0xff]  }
 0x3b3   :  { %6979 = vmatpush1.bf16.msra.mxu0 %v10487_v47  ;;  %7667 = vmatpush1.bf16.msra.mxu1 %v10490_v50  ;;  %v10577_v47 = vld [vmem:[%s13950_s1 + $0x1f60] ss:$16 sps:$4 sm:$0xff]   ;;  %v10580_v50 = vld [vmem:[%s13950_s1 + $0x1f68] ss:$16 sps:$4 sm:$0xff]  }
 0x3b4   :  { %6980 = vmatprep.subr.bf16.mxu0 %v10495_v21  ;;  %7668 = vmatprep.subr.bf16.mxu1 %v10498_v45  ;;  %v10585_v21 = vld [vmem:[%s13950_s1 + $0x1f84] ss:$16 sps:$4 sm:$0xff]   ;;  %v10588_v45 = vld [vmem:[%s13950_s1 + $0x1f8c] ss:$16 sps:$4 sm:$0xff]  }
 0x3b7   :  { %6981 = vmatpush1.bf16.msra.mxu0 %v10493_v51  ;;  %7669 = vmatpush1.bf16.msra.mxu1 %v10496_v54  ;;  %v10583_v51 = vld [vmem:[%s13950_s1 + $0x1f80] ss:$16 sps:$4 sm:$0xff]   ;;  %v10586_v54 = vld [vmem:[%s13950_s1 + $0x1f88] ss:$16 sps:$4 sm:$0xff]  }
 0x3b8   :  { %6982 = vmatprep.subr.bf16.mxu0 %v10501_v48  ;;  %7670 = vmatprep.subr.bf16.mxu1 %v10504_v49  ;;  %v10591_v48 = vld [vmem:[%s13950_s1 + $0x1fa4] ss:$16 sps:$4 sm:$0xff]   ;;  %v10594_v49 = vld [vmem:[%s13950_s1 + $0x1fac] ss:$16 sps:$4 sm:$0xff]  }
 0x3bb   :  { %6983 = vmatpush1.bf16.msra.mxu0 %v10499_v55  ;;  %7671 = vmatpush1.bf16.msra.mxu1 %v10502_v58  ;;  %v10589_v55 = vld [vmem:[%s13950_s1 + $0x1fa0] ss:$16 sps:$4 sm:$0xff]   ;;  %v10592_v58 = vld [vmem:[%s13950_s1 + $0x1fa8] ss:$16 sps:$4 sm:$0xff]  }
 0x3bc   :  { %6984 = vmatprep.subr.bf16.mxu0 %v10507_v52  ;;  %7672 = vmatprep.subr.bf16.mxu1 %v10510_v53  ;;  %v10597_v52 = vld [vmem:[%s13950_s1 + $0x1fc4] ss:$16 sps:$4 sm:$0xff]   ;;  %v10600_v53 = vld [vmem:[%s13950_s1 + $0x1fcc] ss:$16 sps:$4 sm:$0xff]  }
 0x3bf   :  { %6985 = vmatpush1.bf16.msra.mxu0 %v10505_v59  ;;  %7673 = vmatpush1.bf16.msra.mxu1 %v10508_v62  ;;  %v10595_v59 = vld [vmem:[%s13950_s1 + $0x1fc0] ss:$16 sps:$4 sm:$0xff]   ;;  %v10598_v62 = vld [vmem:[%s13950_s1 + $0x1fc8] ss:$16 sps:$4 sm:$0xff]  }
 0x3c0   :  { %6997 = vmatprep.subr.bf16.mxu0 %v10513_v56  ;;  %7685 = vmatprep.subr.bf16.mxu1 %v10516_v57  ;;  %v10603_v56 = vld [vmem:[%s13950_s1 + $0x1fe4] ss:$16 sps:$4 sm:$0xff]   ;;  %v10606_v57 = vld [vmem:[%s13950_s1 + $0x1fec] ss:$16 sps:$4 sm:$0xff]  }
 0x3c2   :  { %6987 = vmatmul.mubr.bf16.vlgmr.msra.gmra.mrb[0].mxu0 %v7914_v63  ;;  %7675 = vmatmul.mubr.bf16.vlgmr.msra.gmra.mrb[0].mxu1 %v7914_v63  ;;  %v10601_v63 = vld [vmem:[%s13950_s1 + $0x1fe0] ss:$16 sps:$4 sm:$0xff]  }
 0x3c3   :  { %6998 = vmatpush1.bf16.msra.mxu0 %v10511_v2  ;;  %7686 = vmatpush1.bf16.msra.mxu1 %v10514_v60  ;;  %v10604_v2 = vld [vmem:[%s13950_s1 + $0x1fe8] ss:$16 sps:$4 sm:$0xff]   ;;  %v7916_v60 = vcombine.low %v13724_v0, %v13729_v1 }
 0x3c4   :  { %6999 = vmatprep.subr.bf16.mxu0 %v10519_v61  ;;  %7687 = vmatprep.subr.bf16.mxu1 %v10522_v3  ;;  %v7730_v61 = vlaneseq }
 0x3c5   :  { %7029 = vmatprep.mubr.bf16.mxu0 %v7917_v4  ;;  %7717 = vmatprep.mubr.bf16.mxu1 %v7917_v4 }
 0x3c6   :  { %v13921_v3 = vshrl.u32 %v7730_v61, 7 }
 0x3c7   :  { %7000 = vmatpush1.bf16.msra.mxu0 %v10517_v5  ;;  %7688 = vmatpush1.bf16.msra.mxu1 %v10520_v6  ;;  %v7728_v6 = vld [vmem:[%s13952_s2] sm:$0xf] }
 0x3c8   :  { %7001 = vmatprep.subr.bf16.mxu0 %v10525_v7  ;;  %7689 = vmatprep.subr.bf16.mxu1 %v10528_v8  ;;  %v7732_v4 = vsub.s32 0, %v13921_v3  ;;  %v7740_v5 = vsub.s32 2, %v13921_v3  ;;  %v7736_v7 = vsub.s32 1, %v13921_v3  ;;  %v7744_v8 = vsub.s32 3, %v13921_v3 }
 0x3ca   :  { %v7733_v0 = vrot.slane %v7728_v6, %v7732_v4  ;;  %v7741_v1 = vrot.slane %v7728_v6, %v7740_v5 }
 0x3cb   :  { %7002 = vmatpush1.bf16.msra.mxu0 %v10523_v9  ;;  %7690 = vmatpush1.bf16.msra.mxu1 %v10526_v10  ;;  %v7737_v9 = vrot.slane %v7728_v6, %v7736_v7  ;;  %v7745_v10 = vrot.slane %v7728_v6, %v7744_v8 }
 0x3cc   :  { %7003 = vmatprep.subr.bf16.mxu0 %v10531_v11  ;;  %7691 = vmatprep.subr.bf16.mxu1 %v10534_v12 }
 0x3cf   :  { %7004 = vmatpush1.bf16.msra.mxu0 %v10529_v13  ;;  %7692 = vmatpush1.bf16.msra.mxu1 %v10532_v16 }
 0x3d0   :  { %7005 = vmatprep.subr.bf16.mxu0 %v10537_v17  ;;  %7693 = vmatprep.subr.bf16.mxu1 %v10540_v20 }
 0x3d3   :  { %7006 = vmatpush1.bf16.msra.mxu0 %v10535_v15  ;;  %7694 = vmatpush1.bf16.msra.mxu1 %v10538_v22 }
 0x3d4   :  { %7007 = vmatprep.subr.bf16.mxu0 %v10543_v23  ;;  %7695 = vmatprep.subr.bf16.mxu1 %v10546_v18 }
 0x3d7   :  { %7008 = vmatpush1.bf16.msra.mxu0 %v10541_v25  ;;  %7696 = vmatpush1.bf16.msra.mxu1 %v10544_v26 }
 0x3d8   :  { %7009 = vmatprep.subr.bf16.mxu0 %v10549_v27  ;;  %7697 = vmatprep.subr.bf16.mxu1 %v10552_v28 }
 0x3db   :  { %7010 = vmatpush1.bf16.msra.mxu0 %v10547_v29  ;;  %7698 = vmatpush1.bf16.msra.mxu1 %v10550_v30 }
 0x3dc   :  { %7011 = vmatprep.subr.bf16.mxu0 %v10555_v31  ;;  %7699 = vmatprep.subr.bf16.mxu1 %v10558_v32 }
 0x3df   :  { %7012 = vmatpush1.bf16.msra.mxu0 %v10553_v33  ;;  %7700 = vmatpush1.bf16.msra.mxu1 %v10556_v34 }
 0x3e0   :  { %7013 = vmatprep.subr.bf16.mxu0 %v10561_v35  ;;  %7701 = vmatprep.subr.bf16.mxu1 %v10564_v36 }
 0x3e3   :  { %7014 = vmatpush1.bf16.msra.mxu0 %v10559_v37  ;;  %7702 = vmatpush1.bf16.msra.mxu1 %v10562_v38 }
 0x3e4   :  { %7015 = vmatprep.subr.bf16.mxu0 %v10567_v39  ;;  %7703 = vmatprep.subr.bf16.mxu1 %v10570_v40 }
 0x3e7   :  { %7016 = vmatpush1.bf16.msra.mxu0 %v10565_v41  ;;  %7704 = vmatpush1.bf16.msra.mxu1 %v10568_v42 }
 0x3e8   :  { %7017 = vmatprep.subr.bf16.mxu0 %v10573_v43  ;;  %7705 = vmatprep.subr.bf16.mxu1 %v10576_v44 }
 0x3eb   :  { %7018 = vmatpush1.bf16.msra.mxu0 %v10571_v14  ;;  %7706 = vmatpush1.bf16.msra.mxu1 %v10574_v46 }
 0x3ec   :  { %7019 = vmatprep.subr.bf16.mxu0 %v10579_v19  ;;  %7707 = vmatprep.subr.bf16.mxu1 %v10582_v24 }
 0x3ef   :  { %7020 = vmatpush1.bf16.msra.mxu0 %v10577_v47  ;;  %7708 = vmatpush1.bf16.msra.mxu1 %v10580_v50 }
 0x3f0   :  { %7021 = vmatprep.subr.bf16.mxu0 %v10585_v21  ;;  %7709 = vmatprep.subr.bf16.mxu1 %v10588_v45 }
 0x3f3   :  { %7022 = vmatpush1.bf16.msra.mxu0 %v10583_v51  ;;  %7710 = vmatpush1.bf16.msra.mxu1 %v10586_v54 }
 0x3f4   :  { %7023 = vmatprep.subr.bf16.mxu0 %v10591_v48  ;;  %7711 = vmatprep.subr.bf16.mxu1 %v10594_v49 }
 0x3f7   :  { %7024 = vmatpush1.bf16.msra.mxu0 %v10589_v55  ;;  %7712 = vmatpush1.bf16.msra.mxu1 %v10592_v58 }
 0x3f8   :  { %7025 = vmatprep.subr.bf16.mxu0 %v10597_v52  ;;  %7713 = vmatprep.subr.bf16.mxu1 %v10600_v53 }
 0x3fb   :  { %7026 = vmatpush1.bf16.msra.mxu0 %v10595_v59  ;;  %7714 = vmatpush1.bf16.msra.mxu1 %v10598_v62 }
 0x3fc   :  { %7027 = vmatprep.subr.bf16.mxu0 %v10603_v56  ;;  %7715 = vmatprep.subr.bf16.mxu1 %v10606_v57 }
 0x3ff   :  { %7028 = vmatpush1.bf16.msra.mxu0 %v10601_v63  ;;  %7716 = vmatpush1.bf16.msra.mxu1 %v10604_v2 }
 0x402   :  { %7030 = vmatmul.mubr.bf16.vlgmr.msra.gmra.mrb[0].mxu0 %v7916_v60  ;;  %7718 = vmatmul.mubr.bf16.vlgmr.msra.gmra.mrb[0].mxu1 %v7916_v60 }
 0x4d5   :  { %v7031_v11 = vpop.f32.mrb[0].mxu0  ;;  %v7719_v12 = vpop.f32.mrb[0].mxu1 }
 0x4d6   :  { %v7750_v13 = vadd.f32 %v7733_v0, %v7031_v11  ;;  %v7814_v16 = vmul.f32 %v7031_v11, %v7031_v11  ;;  %v7752_v17 = vadd.f32 %v7741_v1, %v7719_v12  ;;  %v7816_v20 = vmul.f32 %v7719_v12, %v7719_v12  ;;  %v7033_v15 = vpop.f32.mrb[1].mxu0  ;;  %v7721_v22 = vpop.f32.mrb[1].mxu1 }
 0x4d7   :  { %v7751_v23 = vadd.f32 %v7737_v9, %v7033_v15  ;;  %v7815_v18 = vmul.f32 %v7033_v15, %v7033_v15  ;;  %v7753_v25 = vadd.f32 %v7745_v10, %v7721_v22  ;;  %v7817_v26 = vmul.f32 %v7721_v22, %v7721_v22  ;;  %v7035_v27 = vpop.f32.mrb[2].mxu0  ;;  %v7723_v28 = vpop.f32.mrb[2].mxu1 }
 0x4d8   :  { %v7754_v29 = vadd.f32 %v7733_v0, %v7035_v27  ;;  %v7786_v30 = vadd.f32 %v7035_v27, %v7031_v11  ;;  %v7818_v31 = vmul.f32 %v7035_v27, %v7035_v27  ;;  %v7756_v32 = vadd.f32 %v7741_v1, %v7723_v28  ;;  %v7037_v33 = vpop.f32.mrb[3].mxu0  ;;  %v7725_v34 = vpop.f32.mrb[3].mxu1 }
 0x4d9   :  { %v8946_v35 = vpack.c.bf16 %v7751_v23, %v7750_v13  ;;  %v8947_v36 = vpack.c.bf16 %v7753_v25, %v7752_v17  ;;  %v7800_v37 = vadd.f32 %v7723_v28, %v7719_v12  ;;  %v7820_v38 = vmul.f32 %v7723_v28, %v7723_v28 }
 0x4da   :  { %v7787_v39 = vrot.slane %v7786_v30, 4  ;;  %v7822_v40 = vadd.f32 %v7818_v31, %v7814_v16  ;;  %v7755_v41 = vadd.f32 %v7737_v9, %v7037_v33  ;;  %v7793_v42 = vadd.f32 %v7037_v33, %v7033_v15 }
 0x4db   :  { %7782 = vst [vmem:[%s13953_s3] sm:$0xff] %v8946_v35  ;;  %7783 = vst [vmem:[%s13953_s3 + $0x8] sm:$0xff] %v8947_v36  ;;  %v7801_v43 = vrot.slane %v7800_v37, 4  ;;  %v7836_v44 = vadd.f32 %v7820_v38, %v7816_v20  ;;  %v7819_v14 = vmul.f32 %v7037_v33, %v7037_v33  ;;  %v7757_v46 = vadd.f32 %v7745_v10, %v7725_v34 }
 0x4dc   :  { %v7788_v19 = vadd.f32 %v7787_v39, %v7786_v30  ;;  %v7823_v24 = vrot.slane %v7822_v40, 4  ;;  %v8948_v47 = vpack.c.bf16 %v7755_v41, %v7754_v29  ;;  %v7794_v50 = vrot.slane %v7793_v42, 4 }
 0x4dd   :  { %v7802_v21 = vadd.f32 %v7801_v43, %v7800_v37  ;;  %v7837_v45 = vrot.slane %v7836_v44, 4  ;;  %v7829_v51 = vadd.f32 %v7819_v14, %v7815_v18  ;;  %v8949_v54 = vpack.c.bf16 %v7757_v46, %v7756_v32 }
 0x4de   :  { %v7789_v48 = vrot.slane %v7788_v19, 2  ;;  %v7824_v49 = vadd.f32 %v7823_v24, %v7822_v40  ;;  %7784 = vst [vmem:[%s13953_s3 + $0x10] sm:$0xff] %v8948_v47  ;;  %v7795_v55 = vadd.f32 %v7794_v50, %v7793_v42  ;;  %v7807_v58 = vadd.f32 %v7725_v34, %v7721_v22 }
 0x4df   :  { %v7803_v52 = vrot.slane %v7802_v21, 2  ;;  %v7838_v53 = vadd.f32 %v7837_v45, %v7836_v44  ;;  %v7830_v59 = vrot.slane %v7829_v51, 4  ;;  %7785 = vst [vmem:[%s13953_s3 + $0x18] sm:$0xff] %v8949_v54  ;;  %v7821_v62 = vmul.f32 %v7725_v34, %v7725_v34 }
 0x4e0   :  { %v7790_v56 = vadd.f32 %v7789_v48, %v7788_v19  ;;  %v7825_v57 = vrot.slane %v7824_v49, 2  ;;  %v7796_v63 = vrot.slane %v7795_v55, 2  ;;  %v7808_v2 = vrot.slane %v7807_v58, 4 }
 0x4e1   :  { %v7804_v60 = vadd.f32 %v7803_v52, %v7802_v21  ;;  %v7839_v61 = vrot.slane %v7838_v53, 2  ;;  %v7831_v4 = vadd.f32 %v7830_v59, %v7829_v51  ;;  %v7843_v5 = vadd.f32 %v7821_v62, %v7817_v26 }
 0x4e2   :  { %v7791_v6 = vrot.slane %v7790_v56, 1  ;;  %v7826_v7 = vadd.f32 %v7825_v57, %v7824_v49  ;;  %v7797_v8 = vadd.f32 %v7796_v63, %v7795_v55  ;;  %v7809_v0 = vadd.f32 %v7808_v2, %v7807_v58 }
 0x4e3   :  { %v7805_v1 = vrot.slane %v7804_v60, 1  ;;  %v7840_v9 = vadd.f32 %v7839_v61, %v7838_v53  ;;  %v7832_v10 = vrot.slane %v7831_v4, 2  ;;  %v7844_v11 = vrot.slane %v7843_v5, 4 }
 0x4e4   :  { %v7827_v12 = vrot.slane %v7826_v7, 1  ;;  %v7798_v13 = vrot.slane %v7797_v8, 1  ;;  %v10607_v16 = vmov 1983009808   ;;  %v7810_v20 = vrot.slane %v7809_v0, 2 }
 0x4e5   :  { %v7862_v17 = vunpack.c.l.s4 %v10607_v16  ;;  %v7841_v15 = vrot.slane %v7840_v9, 1  ;;  %v7833_v22 = vadd.f32 %v7832_v10, %v7831_v4  ;;  %v7845_v23 = vadd.f32 %v7844_v11, %v7843_v5 }
 0x4e6   :  { %v7792_v18 = vadd.f32 %v7791_v6, %v7790_v56  ;;  %v7828_v25 = vadd.f32 %v7827_v12, %v7826_v7  ;;  %v7811_v26 = vadd.f32 %v7810_v20, %v7809_v0  ;;  %v7806_v27 = vadd.f32 %v7805_v1, %v7804_v60 }
 0x4e7   :  { %v7842_v28 = vadd.f32 %v7841_v15, %v7840_v9  ;;  %v7834_v29 = vrot.slane %v7833_v22, 1  ;;  %v7846_v30 = vrot.slane %v7845_v23, 2  ;;  %v7799_v32 = vadd.f32 %v7798_v13, %v7797_v8 }
 0x4e8   :  { %v7851_v31 = vsel %vm7850_vm0, %v7792_v18, %v7828_v25  ;;  %v7863_v33 = vunpack.c.0.s8 %v7862_v17  ;;  %v7812_v36 = vrot.slane %v7811_v26, 1 }
 0x4e9   :  { %v7853_v34 = vsel %vm7850_vm0, %v7806_v27, %v7842_v28  ;;  %v7835_v35 = vadd.f32 %v7834_v29, %v7833_v22  ;;  %v7847_v37 = vadd.f32 %v7846_v30, %v7845_v23 }
 0x4ea   :  { %v7866_v41 = vsub.s32 %v7863_v33, %v13921_v3  ;;  %v7813_v42 = vadd.f32 %v7812_v36, %v7811_v26 }
 0x4eb   :  { %v7852_v38 = vsel %vm7850_vm0, %v7799_v32, %v7835_v35  ;;  %v7848_v39 = vrot.slane %v7847_v37, 1 }
 0x4ec   :  { %v7859_v40 = vcombine.low %v7851_v31, %v7852_v38 }
 0x4ed   :  { %v7849_v43 = vadd.f32 %v7848_v39, %v7847_v37 }
 0x4ee   :  { %v7867_v14 = vrot.slane %v7859_v40, %v7866_v41 }
 0x4ef   :  { %v7854_v44 = vsel %vm7850_vm0, %v7813_v42, %v7849_v43 }
 0x4f0   :  { %v7860_v46 = vcombine.low %v7853_v34, %v7854_v44 }
 0x4f2   :  { %v7874_v19 = vrot.slane %v7860_v46, %v7866_v41 }
 0x4f4   :  { %v7875_v24 = vcombine.low %v7867_v14, %v7874_v19 }
 0x4f6   :  { %7877 = vst [vmem:[%s13954_s4] sm:$0xff] %v7875_v24 }

</bundles_post_ra>
